<compile_context>
chip_gen: v5e
topology: v5e:2x2
jax: 0.10.0
libtpu: 0.0.40
codegen_flags: <defaults>
</compile_context>

<pallas_src>
import math
import functools

import numpy as np
import jax
import jax.numpy as jnp
from jax import lax
from jax.experimental import pallas as pl
from jax.experimental.pallas import tpu as pltpu


# ----------------------------- "opt" configuration -----------------------------
NFC_D        = 32   # opt.nfc_d
NC_IM        = 3    # opt.nc_im
KER_SIZE     = 3    # opt.ker_size
PADD_SIZE    = 1    # opt.padd_size
NUM_LAYERS_D = 2    # opt.num_layers_d
FEAT_DIM     = 64   # feature_extractor.num_channels (backbone output dim)

LEAKY_SLOPE = 0.02
LEAKY_GAIN  = math.sqrt(2.0 / (1.0 + LEAKY_SLOPE ** 2))

# output_shapes from HyperDiscriminator.__init__ (PyTorch flat hyper layout)
OUTPUT_SHAPES = (
    [NFC_D * NC_IM * KER_SIZE * KER_SIZE, NFC_D]
    + [NFC_D * NFC_D * KER_SIZE * KER_SIZE, NFC_D] * NUM_LAYERS_D
    + [1 * NFC_D * KER_SIZE * KER_SIZE, 1]
)
T_TOTAL = int(sum(OUTPUT_SHAPES))                     # 19681


def _round_up(x, m):
    return ((x + m - 1) // m) * m


# ---------------------- kernel-side hyper weight layout ----------------------
# Per sample, the projection emits a (N_ROWS, ROW_W) matrix:
#   rows 0..NFC_D-1 (one row per output channel):
#     [ head W (27) | head b | body1 W (288) | body1 b | body2 W (288) | body2 b | pad ]
#   row NFC_D (tail row): [ tail W (288) | tail b | pad ]
# W blocks are im2col ordered: column (dy*K+dx)*Cin + c  <->  weight[o, c, dy, dx],
# with norm_weight() scaling already folded in.
KKC       = KER_SIZE * KER_SIZE * NFC_D               # 288
KKC_IM    = KER_SIZE * KER_SIZE * NC_IM               # 27
COL_W0    = 0
COL_B0    = KKC_IM                                    # 27
COL_BODY  = COL_B0 + 1                                # 28
MAIN_COLS = COL_BODY + NUM_LAYERS_D * (KKC + 1)       # 606
TAIL_ROW  = NFC_D                                     # 32
N_ROWS    = NFC_D + 1                                 # 33
ROW_W     = _round_up(max(MAIN_COLS, KKC + 1), 128)   # 640
T_FLAT    = N_ROWS * ROW_W                            # 21120 (multiple of 128)


def _build_perm_scale():
    """Static map: kernel hyper layout <- PyTorch flat hyper layout (with scaling)."""
    perm  = np.zeros((T_FLAT,), np.int32)
    scale = np.zeros((T_FLAT,), np.float32)
    valid = np.zeros((T_FLAT,), bool)
    K = KER_SIZE

    def put(row, col, src, s):
        t = row * ROW_W + col
        perm[t], scale[t], valid[t] = src, s, True

    off = 0
    # head weight (NFC_D, NC_IM, K, K) + bias
    s_w = LEAKY_GAIN / math.sqrt(NC_IM * K * K)
    for o in range(NFC_D):
        for c in range(NC_IM):
            for kh in range(K):
                for kw in range(K):
                    src = off + ((o * NC_IM + c) * K + kh) * K + kw
                    put(o, COL_W0 + (kh * K + kw) * NC_IM + c, src, s_w)
    off += NFC_D * NC_IM * K * K
    for o in range(NFC_D):
        put(o, COL_B0, off + o, 1.0 / math.sqrt(NC_IM))
    off += NFC_D
    # body weights (NFC_D, NFC_D, K, K) + biases
    for i in range(NUM_LAYERS_D):
        base = COL_BODY + i * (KKC + 1)
        s_w = LEAKY_GAIN / math.sqrt(NFC_D * K * K)
        for o in range(NFC_D):
            for c in range(NFC_D):
                for kh in range(K):
                    for kw in range(K):
                        src = off + ((o * NFC_D + c) * K + kh) * K + kw
                        put(o, base + (kh * K + kw) * NFC_D + c, src, s_w)
        off += NFC_D * NFC_D * K * K
        for o in range(NFC_D):
            put(o, base + KKC, off + o, 1.0 / math.sqrt(NFC_D))
        off += NFC_D
    # tail weight (1, NFC_D, K, K) + bias (gain = 1)
    s_w = 1.0 / math.sqrt(NFC_D * K * K)
    for c in range(NFC_D):
        for kh in range(K):
            for kw in range(K):
                src = off + (c * K + kh) * K + kw
                put(TAIL_ROW, (kh * K + kw) * NFC_D + c, src, s_w)
    off += NFC_D * K * K
    put(TAIL_ROW, KKC, off, 1.0 / math.sqrt(NFC_D))
    off += 1
    assert off == T_TOTAL
    return perm, scale, valid


_PERM, _SCALE, _VALID = _build_perm_scale()


def prepare_hyper_params(proj_w, proj_b):
    """One-time (init) preprocessing: fold norm_weight + layout permutation into
    the projection weight columns and cast the weight stream to bf16."""
    perm  = jnp.asarray(_PERM)
    scale = jnp.asarray(_SCALE)
    valid = jnp.asarray(_VALID)
    pw = jnp.where(valid[None, :], proj_w[:, perm] * scale[None, :], 0.0)
    pb = jnp.where(valid, proj_b[perm] * scale, 0.0)
    return pw.astype(jnp.bfloat16), pb.astype(jnp.float32).reshape(1, T_FLAT)


def _vmem_limit(block_bytes, scratch_bytes=0):
    # pipeline double-buffers the blocks; x2 headroom, clamp to [32 MiB, 64 MiB]
    need = 2 * block_bytes + scratch_bytes
    return int(min(max(2 * need, 32 * 1024 * 1024), 64 * 1024 * 1024))


# --------------------- Pallas kernel 1: multi-head projection ---------------------
# TODO(synk): MultiHeadLinearProjection's class body is not provided; assume one
# Linear(in_dim, out_dim) per head (proj_nlayers_d == 1), fused over all heads.
def _proj_kernel(f_ref, w_ref, b_ref, o_ref):
    o_ref[...] = (
        jnp.dot(f_ref[...], w_ref[...], preferred_element_type=jnp.float32)
        + b_ref[...]
    ).astype(jnp.bfloat16)


_MAX_PROJ_TILE = 32768  # columns per grid step (bf16 weight tile <= ~4 MiB)


def _pick_proj_tile(total):
    assert total % 128 == 0
    n = total // 128
    for g in range(1, n + 1):
        if n % g == 0 and (n // g) * 128 <= _MAX_PROJ_TILE:
            return (n // g) * 128
    return 128


def multihead_projection(features, pw, pb):
    """(B, D) @ (D, T_FLAT) + bias, emitted in bf16 (the layout/dtype the conv
    kernel consumes).  The whole bf16 weight fits VMEM, so (typically) 1 tile."""
    B, D = features.shape
    T = pw.shape[1]
    tile = _pick_proj_tile(T)
    block_bytes = B * D * 2 + D * tile * 2 + tile * 4 + B * tile * 2
    return pl.pallas_call(
        _proj_kernel,
        out_shape=jax.ShapeDtypeStruct((B, T), jnp.bfloat16),
        grid_spec=pltpu.PrefetchScalarGridSpec(
            num_scalar_prefetch=0,
            grid=(T // tile,),
            in_specs=[
                pl.BlockSpec((B, D), lambda j: (0, 0)),
                pl.BlockSpec((D, tile), lambda j: (0, j)),
                pl.BlockSpec((1, tile), lambda j: (0, j)),
            ],
            out_specs=pl.BlockSpec((B, tile), lambda j: (0, j)),
        ),
        compiler_params=pltpu.CompilerParams(
            dimension_semantics=("parallel",),
            vmem_limit_bytes=_vmem_limit(block_bytes)),
    )(features.astype(jnp.bfloat16), pw, pb)


# -------------- Pallas kernel 2: fused per-sample DiscriminatorTemplate --------------
def _buf_lanes(H, W):
    off = PADD_SIZE * W + PADD_SIZE
    return _round_up(off, 128) + H * W + off


def _disc_template_kernel(x_ref, hyp_ref, o_ref, act_ref, patch_ref, hpatch_ref,
                          *, H, W, Bblk):
    # x_ref     : (Bblk, NC_IM, H*W)     input images, channels-first, flat spatial
    # hyp_ref   : (Bblk, N_ROWS, ROW_W)  per-sample hyper weights (bf16, kernel layout)
    # o_ref     : (Bblk, 1, H*W)         tail outputs (lane-dense, f32)
    # act_ref   : VMEM (NFC_D, BUF) f32  flat activation buffer with zero margins
    # patch_ref : VMEM (KKC, H*W) bf16   im2col patch for body/tail (MXU bf16 path)
    # hpatch_ref: VMEM (KKC_IM, H*W) f32 im2col patch for the tiny head conv
    HW = H * W
    K = KER_SIZE
    off = PADD_SIZE * W + PADD_SIZE          # max |flat shift| of a conv tap
    buf_off = _round_up(off, 128)            # lane-aligned start of the live image
    taps = [(dy, dx) for dy in range(K) for dx in range(K)]

    # Horizontal-wrap masks only (vertical OOB taps already read the zero margins);
    # the centre-column taps (dx == PADD_SIZE) need no mask at all.
    flat = lax.broadcasted_iota(jnp.int32, (1, HW), 1)
    if W & (W - 1) == 0:
        xs0 = flat & (W - 1)
    else:  # TODO(synk): non-power-of-two widths fall back to vector integer division
        xs0 = flat - (flat // W) * W
    dx_masks = []
    for dx in range(K):
        d = dx - PADD_SIZE
        if d < 0:
            dx_masks.append(xs0 >= -d)
        elif d > 0:
            dx_masks.append(xs0 < W - d)
        else:
            dx_masks.append(None)            # always valid

    # Zero only the margins; the live region is overwritten by every layer.
    # (Kept per grid step on purpose: with the B axis parallel, every core must
    # zero its own scratch margins.)
    act_ref[:, 0:buf_off] = jnp.zeros((NFC_D, buf_off), jnp.float32)
    act_ref[:, buf_off + HW:buf_off + HW + off] = jnp.zeros((NFC_D, off), jnp.float32)

    def gather(cin, dest_ref):
        # im2col from the zero-margined flat buffer (zero padding is implicit:
        # vertical OOB taps read the margins; horizontal wrap is masked out).
        for t, (dy, dx) in enumerate(taps):
            start = buf_off + (dy - PADD_SIZE) * W + (dx - PADD_SIZE)
            p = act_ref[0:cin, start:start + HW]
            if dx_masks[dx] is not None:
                p = jnp.where(dx_masks[dx], p, jnp.zeros_like(p))
            dest_ref[t * cin:(t + 1) * cin, :] = p.astype(dest_ref.dtype)

    def lrelu(v):
        return jnp.where(v >= 0.0, v, v * LEAKY_SLOPE)

    for s in range(Bblk):
        hv = hyp_ref.at[s]                   # (N_ROWS, ROW_W) bf16 view (no load)
        # place the image in the centre of the padded buffer
        act_ref[0:NC_IM, buf_off:buf_off + HW] = x_ref[s]

        # head: tiny 27-wide contraction kept in f32 (~3% of the MACs; avoids
        # packed-sublane bf16 stores for the 3-channel patch rows)
        gather(NC_IM, hpatch_ref)
        w = hv[0:NFC_D, COL_W0:COL_W0 + KKC_IM].astype(jnp.float32)
        b = hv[0:NFC_D, COL_B0:COL_B0 + 1]
        a = lrelu(jnp.dot(w, hpatch_ref[...],
                          preferred_element_type=jnp.float32) + b)
        act_ref[0:NFC_D, buf_off:buf_off + HW] = a

        # body: bf16 weights @ bf16 patch -> f32 accumulation on the MXU
        for i in range(NUM_LAYERS_D):
            c0 = COL_BODY + i * (KKC + 1)
            gather(NFC_D, patch_ref)
            w = hv[0:NFC_D, c0:c0 + KKC]
            b = hv[0:NFC_D, c0 + KKC:c0 + KKC + 1]
            a = lrelu(jnp.dot(w, patch_ref[...],
                              preferred_element_type=jnp.float32) + b)
            act_ref[0:NFC_D, buf_off:buf_off + HW] = a

        # tail (gain = 1, no activation)
        gather(NFC_D, patch_ref)
        w = hv[TAIL_ROW:TAIL_ROW + 1, 0:KKC]
        b = hv[TAIL_ROW:TAIL_ROW + 1, KKC:KKC + 1]
        o_ref[s] = jnp.dot(w, patch_ref[...],
                           preferred_element_type=jnp.float32) + b


def _pick_block_b(B):
    # Amortize per-grid-step overhead with up to 4 samples per step, but keep
    # >= 2 grid steps when possible so megacore (v7x) can split the batch axis.
    cands = [d for d in range(1, min(B, 4) + 1) if B % d == 0]
    multi = [d for d in cands if B // d >= 2]
    return max(multi) if multi else max(cands)


def disc_template(x_flat, hyper, *, H, W):
    B = x_flat.shape[0]
    HW = H * W
    Bblk = _pick_block_b(B)
    buf = _buf_lanes(H, W)
    kernel = functools.partial(_disc_template_kernel, H=H, W=W, Bblk=Bblk)
    block_bytes = Bblk * (NC_IM * HW * 4 + N_ROWS * ROW_W * 2 + HW * 4)
    scratch_bytes = NFC_D * buf * 4 + KKC * HW * 2 + KKC_IM * HW * 4
    # TODO(synk): add a spatial (H*W) tile grid axis for SinGAN-scale images so
    # the 288*HW bf16 patch stays within v7x's 64 MiB VMEM.
    return pl.pallas_call(
        kernel,
        out_shape=jax.ShapeDtypeStruct((B, 1, HW), jnp.float32),
        grid_spec=pltpu.PrefetchScalarGridSpec(
            num_scalar_prefetch=0,
            grid=(B // Bblk,),
            in_specs=[
                pl.BlockSpec((Bblk, NC_IM, HW), lambda b: (b, 0, 0)),
                pl.BlockSpec((Bblk, N_ROWS, ROW_W), lambda b: (b, 0, 0)),
            ],
            out_specs=pl.BlockSpec((Bblk, 1, HW), lambda b: (b, 0, 0)),
            scratch_shapes=[
                pltpu.VMEM((NFC_D, buf), jnp.float32),     # padded activations
                pltpu.VMEM((KKC, HW), jnp.bfloat16),       # body/tail im2col patch
                pltpu.VMEM((KKC_IM, HW), jnp.float32),     # head im2col patch
            ],
        ),
        compiler_params=pltpu.CompilerParams(
            dimension_semantics=("parallel",),
            vmem_limit_bytes=_vmem_limit(block_bytes, scratch_bytes)),
    )(x_flat, hyper)


# ----------------------------- HyperDiscriminator forward -----------------------------
def hyper_discriminator_forward(x_nchw, features, pw_prepped, pb_prepped):
    # TODO(synk): the Backbone feature extractor is a pretrained CNN not defined in
    # the reference code; we use the `features=...` input path of the module.
    B, _, H, W = x_nchw.shape
    proj_out = multihead_projection(features, pw_prepped, pb_prepped)  # (B, T_FLAT) bf16
    hyper = proj_out.reshape(B, N_ROWS, ROW_W)                         # free reshape
    x_flat = x_nchw.reshape(B, NC_IM, H * W)                           # free reshape
    out = disc_template(x_flat, hyper, H=H, W=W)                       # (B, 1, H*W)
    return out.reshape(B, 1, H, W)


# ----------------------------- pure-JAX reference -----------------------------
def reference_forward(x, features, proj_w, proj_b):
    B = x.shape[0]
    proj_out = features @ proj_w + proj_b[None, :]
    split_points = [int(s) for s in np.cumsum(OUTPUT_SHAPES)[:-1]]
    hyper = jnp.split(proj_out, split_points, axis=1)

    out = x.reshape(1, -1, x.shape[2], x.shape[3])

    def norm(w, bias, gain):
        out_c, in_c, k1, k2 = w.shape
        return w / math.sqrt(in_c * k1 * k2) * gain, bias / math.sqrt(in_c)

    def conv(o, w, bias):
        y = jax.lax.conv_general_dilated(
            o, w, window_strides=(1, 1),
            padding=[(PADD_SIZE, PADD_SIZE), (PADD_SIZE, PADD_SIZE)],
            dimension_numbers=("NCHW", "OIHW", "NCHW"),
            feature_group_count=B)
        return y + bias[None, :, None, None]

    def lrelu(o):
        return jnp.where(o >= 0, o, o * LEAKY_SLOPE)

    w = hyper[0].reshape(B * NFC_D, NC_IM, KER_SIZE, KER_SIZE)
    bvec = hyper[1].reshape(-1)
    w, bvec = norm(w, bvec, LEAKY_GAIN)
    out = lrelu(conv(out, w, bvec))
    for i in range(1, NUM_LAYERS_D + 1):
        w = hyper[2 * i].reshape(B * NFC_D, NFC_D, KER_SIZE, KER_SIZE)
        bvec = hyper[2 * i + 1].reshape(-1)
        w, bvec = norm(w, bvec, LEAKY_GAIN)
        out = lrelu(conv(out, w, bvec))
    w = hyper[-2].reshape(B * 1, NFC_D, KER_SIZE, KER_SIZE)
    bvec = hyper[-1].reshape(-1)
    w, bvec = norm(w, bvec, 1.0)
    out = conv(out, w, bvec)
    return out.reshape(B, 1, out.shape[2], out.shape[3])


if __name__ == "__main__":
    key = jax.random.PRNGKey(0)
    k1, k2, k3, k4 = jax.random.split(key, 4)

    B, H, W = 2, 16, 16
    x = jax.random.normal(k1, (B, NC_IM, H, W), jnp.float32)       # NCHW input image
    features = jax.random.normal(k2, (B, FEAT_DIM), jnp.float32)   # backbone features

    proj_w = jax.random.normal(k3, (FEAT_DIM, T_TOTAL), jnp.float32) / math.sqrt(FEAT_DIM)
    proj_b = jax.random.normal(k4, (T_TOTAL,), jnp.float32) * 0.01

    # one-time (init) static preprocessing of the projection parameters
    pw_prepped, pb_prepped = prepare_hyper_params(proj_w, proj_b)

    fwd = jax.jit(hyper_discriminator_forward)
    out = jax.block_until_ready(fwd(x, features, pw_prepped, pb_prepped))
    ref = jax.block_until_ready(reference_forward(x, features, proj_w, proj_b))

    assert out.shape == (B, 1, H, W), out.shape
    max_err = float(np.max(np.abs(np.asarray(out) - np.asarray(ref))))
    assert np.allclose(np.asarray(out), np.asarray(ref), rtol=5e-2, atol=5e-2), max_err

    print("KERNEL_OK")
</pallas_src>

<mosaic_0001>
module attributes {stable_mosaic.version = 11 : i64} {
  func.func @_proj_kernel(%arg0: i32, %arg1: memref<2x64xbf16, #tpu.memory_space<vmem>>, %arg2: memref<64x21120xbf16, #tpu.memory_space<vmem>>, %arg3: memref<1x21120xf32, #tpu.memory_space<vmem>>, %arg4: memref<2x21120xbf16, #tpu.memory_space<vmem>>) attributes {dimension_semantics = [#tpu.dimension_semantics<parallel>], iteration_bounds = array<i64: 1>, scalar_prefetch = 0 : i64, scratch_operands = 0 : i64, tpu.core_type = #tpu.core_type<tc>, window_params = [{pipeline_mode = #tpu.pipeline_mode<synchronous>, transform_indices = @transform_0, window_bounds = array<i64: 2, 64>}, {transform_indices = @transform_1, window_bounds = array<i64: 64, 21120>}, {transform_indices = @transform_2, window_bounds = array<i64: 1, 21120>}, {transform_indices = @transform_3, window_bounds = array<i64: 2, 21120>}]} {
    %c0 = arith.constant 0 : index
    %c0_0 = arith.constant 0 : index
    %0 = vector.load %arg1[%c0, %c0_0] : memref<2x64xbf16, #tpu.memory_space<vmem>>, vector<2x64xbf16>
    %c0_1 = arith.constant 0 : index
    %c0_2 = arith.constant 0 : index
    %1 = vector.load %arg2[%c0_1, %c0_2] : memref<64x21120xbf16, #tpu.memory_space<vmem>>, vector<64x21120xbf16>
    %cst = arith.constant dense<0.000000e+00> : vector<2x21120xf32>
    %2 = tpu.matmul %0, %1, %cst {dimension_numbers = #tpu.dot_dimension_numbers<[1], [0], [0], [1], [0, 0, 1, 1], [], []>} : vector<2x64xbf16>, vector<64x21120xbf16>, vector<2x21120xf32> -> vector<2x21120xf32>
    %c0_3 = arith.constant 0 : index
    %c0_4 = arith.constant 0 : index
    %3 = vector.load %arg3[%c0_3, %c0_4] : memref<1x21120xf32, #tpu.memory_space<vmem>>, vector<1x21120xf32>
    %4 = vector.broadcast %3 : vector<1x21120xf32> to vector<2x21120xf32>
    %5 = arith.addf %2, %4 : vector<2x21120xf32>
    %6 = arith.truncf %5 : vector<2x21120xf32> to vector<2x21120xbf16>
    %c0_5 = arith.constant 0 : index
    %c0_6 = arith.constant 0 : index
    %7 = vector.load %arg4[%c0_5, %c0_6] : memref<2x21120xbf16, #tpu.memory_space<vmem>>, vector<2x21120xbf16>
    tpu.vector_store %arg4[%c0_5, %c0_6], %6 {strides = array<i32>} : memref<2x21120xbf16, #tpu.memory_space<vmem>>, vector<2x21120xbf16>,
    return
  }
  func.func @transform_0(%arg0: i32) -> (i32, i32) {
    %c0_i32 = arith.constant 0 : i32
    %c0_i32_0 = arith.constant 0 : i32
    %c0_i32_1 = arith.constant 0 : i32
    return %c0_i32, %c0_i32_0 : i32, i32
  }
  func.func @transform_1(%arg0: i32) -> (i32, i32) {
    %c0_i32 = arith.constant 0 : i32
    %c0_i32_0 = arith.constant 0 : i32
    return %c0_i32, %arg0 : i32, i32
  }
  func.func @transform_2(%arg0: i32) -> (i32, i32) {
    %c0_i32 = arith.constant 0 : i32
    %c0_i32_0 = arith.constant 0 : i32
    return %c0_i32, %arg0 : i32, i32
  }
  func.func @transform_3(%arg0: i32) -> (i32, i32) {
    %c0_i32 = arith.constant 0 : i32
    %c0_i32_0 = arith.constant 0 : i32
    return %c0_i32, %arg0 : i32, i32
  }
}

module attributes {stable_mosaic.version = 11 : i64} {
  func.func @_disc_template_kernel(%arg0: i32, %arg1: memref<1x3x256xf32, #tpu.memory_space<vmem>>, %arg2: memref<1x33x640xbf16, #tpu.memory_space<vmem>>, %arg3: memref<1x1x256xf32, #tpu.memory_space<vmem>>, %arg4: memref<32x401xf32, #tpu.memory_space<vmem>>, %arg5: memref<288x256xbf16, #tpu.memory_space<vmem>>, %arg6: memref<27x256xf32, #tpu.memory_space<vmem>>) attributes {dimension_semantics = [#tpu.dimension_semantics<parallel>], iteration_bounds = array<i64: 2>, scalar_prefetch = 0 : i64, scratch_operands = 3 : i64, tpu.core_type = #tpu.core_type<tc>, window_params = [{transform_indices = @transform_0, window_bounds = array<i64: 1, 3, 256>}, {transform_indices = @transform_1, window_bounds = array<i64: 1, 33, 640>}, {transform_indices = @transform_2, window_bounds = array<i64: 1, 1, 256>}]} {
    %0 = tpu.iota {dimensions = array<i32: 1>} : vector<1x256xi32>
    %c15_i32 = arith.constant 15 : i32
    %1 = vector.broadcast %c15_i32 : i32 to vector<1x256xi32>
    %2 = arith.andi %0, %1 : vector<1x256xi32>
    %c1_i32 = arith.constant 1 : i32
    %3 = vector.broadcast %c1_i32 : i32 to vector<1x256xi32>
    %4 = arith.cmpi sge, %2, %3 : vector<1x256xi32>
    %c15_i32_0 = arith.constant 15 : i32
    %5 = vector.broadcast %c15_i32_0 : i32 to vector<1x256xi32>
    %6 = arith.cmpi slt, %2, %5 : vector<1x256xi32>
    %cst = arith.constant 0.000000e+00 : f32
    %7 = vector.broadcast %cst : f32 to vector<32x128xf32>
    %c0 = arith.constant 0 : index
    %c0_1 = arith.constant 0 : index
    %8 = vector.load %arg4[%c0, %c0_1] : memref<32x401xf32, #tpu.memory_space<vmem>>, vector<32x128xf32>
    tpu.vector_store %arg4[%c0, %c0_1], %7 {strides = array<i32>} : memref<32x401xf32, #tpu.memory_space<vmem>>, vector<32x128xf32>,
    %cst_2 = arith.constant 0.000000e+00 : f32
    %9 = vector.broadcast %cst_2 : f32 to vector<32x17xf32>
    %c0_3 = arith.constant 0 : index
    %c384 = arith.constant 384 : index
    %10 = vector.load %arg4[%c0_3, %c384] : memref<32x401xf32, #tpu.memory_space<vmem>>, vector<32x17xf32>
    tpu.vector_store %arg4[%c0_3, %c384], %9 {strides = array<i32>} : memref<32x401xf32, #tpu.memory_space<vmem>>, vector<32x17xf32>,
    %c0_4 = arith.constant 0 : index
    %c0_5 = arith.constant 0 : index
    %c0_6 = arith.constant 0 : index
    %11 = vector.load %arg1[%c0_4, %c0_5, %c0_6] : memref<1x3x256xf32, #tpu.memory_space<vmem>>, vector<1x3x256xf32>
    %12 = vector.shape_cast %11 : vector<1x3x256xf32> to vector<3x256xf32>
    %c0_7 = arith.constant 0 : index
    %c128 = arith.constant 128 : index
    %13 = vector.load %arg4[%c0_7, %c128] : memref<32x401xf32, #tpu.memory_space<vmem>>, vector<3x256xf32>
    tpu.vector_store %arg4[%c0_7, %c128], %12 {strides = array<i32>} : memref<32x401xf32, #tpu.memory_space<vmem>>, vector<3x256xf32>,
    %c0_8 = arith.constant 0 : index
    %c111 = arith.constant 111 : index
    %14 = vector.load %arg4[%c0_8, %c111] : memref<32x401xf32, #tpu.memory_space<vmem>>, vector<3x256xf32>
    %cst_9 = arith.constant 0.000000e+00 : f32
    %15 = vector.broadcast %cst_9 : f32 to vector<3x256xf32>
    %16 = vector.shape_cast %4 : vector<1x256xi1> to vector<1x256xi1>
    %17 = vector.broadcast %16 : vector<1x256xi1> to vector<3x256xi1>
    %18 = arith.select %17, %14, %15 : vector<3x256xi1>, vector<3x256xf32>
    %c0_10 = arith.constant 0 : index
    %c0_11 = arith.constant 0 : index
    %19 = vector.load %arg6[%c0_10, %c0_11] : memref<27x256xf32, #tpu.memory_space<vmem>>, vector<3x256xf32>
    tpu.vector_store %arg6[%c0_10, %c0_11], %18 {strides = array<i32>} : memref<27x256xf32, #tpu.memory_space<vmem>>, vector<3x256xf32>,
    %c0_12 = arith.constant 0 : index
    %c112 = arith.constant 112 : index
    %20 = vector.load %arg4[%c0_12, %c112] : memref<32x401xf32, #tpu.memory_space<vmem>>, vector<3x256xf32>
    %c3 = arith.constant 3 : index
    %c0_13 = arith.constant 0 : index
    %21 = vector.load %arg6[%c3, %c0_13] : memref<27x256xf32, #tpu.memory_space<vmem>>, vector<3x256xf32>
    tpu.vector_store %arg6[%c3, %c0_13], %20 {strides = array<i32>} : memref<27x256xf32, #tpu.memory_space<vmem>>, vector<3x256xf32>,
    %c0_14 = arith.constant 0 : index
    %c113 = arith.constant 113 : index
    %22 = vector.load %arg4[%c0_14, %c113] : memref<32x401xf32, #tpu.memory_space<vmem>>, vector<3x256xf32>
    %cst_15 = arith.constant 0.000000e+00 : f32
    %23 = vector.broadcast %cst_15 : f32 to vector<3x256xf32>
    %24 = vector.shape_cast %6 : vector<1x256xi1> to vector<1x256xi1>
    %25 = vector.broadcast %24 : vector<1x256xi1> to vector<3x256xi1>
    %26 = arith.select %25, %22, %23 : vector<3x256xi1>, vector<3x256xf32>
    %c6 = arith.constant 6 : index
    %c0_16 = arith.constant 0 : index
    %27 = vector.load %arg6[%c6, %c0_16] : memref<27x256xf32, #tpu.memory_space<vmem>>, vector<3x256xf32>
    tpu.vector_store %arg6[%c6, %c0_16], %26 {strides = array<i32>} : memref<27x256xf32, #tpu.memory_space<vmem>>, vector<3x256xf32>,
    %c0_17 = arith.constant 0 : index
    %c127 = arith.constant 127 : index
    %28 = vector.load %arg4[%c0_17, %c127] : memref<32x401xf32, #tpu.memory_space<vmem>>, vector<3x256xf32>
    %cst_18 = arith.constant 0.000000e+00 : f32
    %29 = vector.broadcast %cst_18 : f32 to vector<3x256xf32>
    %30 = vector.shape_cast %4 : vector<1x256xi1> to vector<1x256xi1>
    %31 = vector.broadcast %30 : vector<1x256xi1> to vector<3x256xi1>
    %32 = arith.select %31, %28, %29 : vector<3x256xi1>, vector<3x256xf32>
    %c9 = arith.constant 9 : index
    %c0_19 = arith.constant 0 : index
    %33 = vector.load %arg6[%c9, %c0_19] : memref<27x256xf32, #tpu.memory_space<vmem>>, vector<3x256xf32>
    tpu.vector_store %arg6[%c9, %c0_19], %32 {strides = array<i32>} : memref<27x256xf32, #tpu.memory_space<vmem>>, vector<3x256xf32>,
    %c0_20 = arith.constant 0 : index
    %c128_21 = arith.constant 128 : index
    %34 = vector.load %arg4[%c0_20, %c128_21] : memref<32x401xf32, #tpu.memory_space<vmem>>, vector<3x256xf32>
    %c12 = arith.constant 12 : index
    %c0_22 = arith.constant 0 : index
    %35 = vector.load %arg6[%c12, %c0_22] : memref<27x256xf32, #tpu.memory_space<vmem>>, vector<3x256xf32>
    tpu.vector_store %arg6[%c12, %c0_22], %34 {strides = array<i32>} : memref<27x256xf32, #tpu.memory_space<vmem>>, vector<3x256xf32>,
    %c0_23 = arith.constant 0 : index
    %c129 = arith.constant 129 : index
    %36 = vector.load %arg4[%c0_23, %c129] : memref<32x401xf32, #tpu.memory_space<vmem>>, vector<3x256xf32>
    %cst_24 = arith.constant 0.000000e+00 : f32
    %37 = vector.broadcast %cst_24 : f32 to vector<3x256xf32>
    %38 = vector.shape_cast %6 : vector<1x256xi1> to vector<1x256xi1>
    %39 = vector.broadcast %38 : vector<1x256xi1> to vector<3x256xi1>
    %40 = arith.select %39, %36, %37 : vector<3x256xi1>, vector<3x256xf32>
    %c15 = arith.constant 15 : index
    %c0_25 = arith.constant 0 : index
    %41 = vector.load %arg6[%c15, %c0_25] : memref<27x256xf32, #tpu.memory_space<vmem>>, vector<3x256xf32>
    tpu.vector_store %arg6[%c15, %c0_25], %40 {strides = array<i32>} : memref<27x256xf32, #tpu.memory_space<vmem>>, vector<3x256xf32>,
    %c0_26 = arith.constant 0 : index
    %c143 = arith.constant 143 : index
    %42 = vector.load %arg4[%c0_26, %c143] : memref<32x401xf32, #tpu.memory_space<vmem>>, vector<3x256xf32>
    %cst_27 = arith.constant 0.000000e+00 : f32
    %43 = vector.broadcast %cst_27 : f32 to vector<3x256xf32>
    %44 = vector.shape_cast %4 : vector<1x256xi1> to vector<1x256xi1>
    %45 = vector.broadcast %44 : vector<1x256xi1> to vector<3x256xi1>
    %46 = arith.select %45, %42, %43 : vector<3x256xi1>, vector<3x256xf32>
    %c18 = arith.constant 18 : index
    %c0_28 = arith.constant 0 : index
    %47 = vector.load %arg6[%c18, %c0_28] : memref<27x256xf32, #tpu.memory_space<vmem>>, vector<3x256xf32>
    tpu.vector_store %arg6[%c18, %c0_28], %46 {strides = array<i32>} : memref<27x256xf32, #tpu.memory_space<vmem>>, vector<3x256xf32>,
    %c0_29 = arith.constant 0 : index
    %c144 = arith.constant 144 : index
    %48 = vector.load %arg4[%c0_29, %c144] : memref<32x401xf32, #tpu.memory_space<vmem>>, vector<3x256xf32>
    %c21 = arith.constant 21 : index
    %c0_30 = arith.constant 0 : index
    %49 = vector.load %arg6[%c21, %c0_30] : memref<27x256xf32, #tpu.memory_space<vmem>>, vector<3x256xf32>
    tpu.vector_store %arg6[%c21, %c0_30], %48 {strides = array<i32>} : memref<27x256xf32, #tpu.memory_space<vmem>>, vector<3x256xf32>,
    %c0_31 = arith.constant 0 : index
    %c145 = arith.constant 145 : index
    %50 = vector.load %arg4[%c0_31, %c145] : memref<32x401xf32, #tpu.memory_space<vmem>>, vector<3x256xf32>
    %cst_32 = arith.constant 0.000000e+00 : f32
    %51 = vector.broadcast %cst_32 : f32 to vector<3x256xf32>
    %52 = vector.shape_cast %6 : vector<1x256xi1> to vector<1x256xi1>
    %53 = vector.broadcast %52 : vector<1x256xi1> to vector<3x256xi1>
    %54 = arith.select %53, %50, %51 : vector<3x256xi1>, vector<3x256xf32>
    %c24 = arith.constant 24 : index
    %c0_33 = arith.constant 0 : index
    %55 = vector.load %arg6[%c24, %c0_33] : memref<27x256xf32, #tpu.memory_space<vmem>>, vector<3x256xf32>
    tpu.vector_store %arg6[%c24, %c0_33], %54 {strides = array<i32>} : memref<27x256xf32, #tpu.memory_space<vmem>>, vector<3x256xf32>,
    %c0_i32 = arith.constant 0 : i32
    %c0_i32_34 = arith.constant 0 : i32
    %c0_i32_35 = arith.constant 0 : i32
    %56 = tpu.memref_slice %arg2[%c0_i32, %c0_i32_34, %c0_i32_35] : memref<1x33x640xbf16, #tpu.memory_space<vmem>> -> memref<1x33x640xbf16, #tpu.memory_space<vmem>>
    %57 = tpu.memref_squeeze %56 : memref<1x33x640xbf16, #tpu.memory_space<vmem>> -> memref<33x640xbf16, #tpu.memory_space<vmem>>
    %c0_36 = arith.constant 0 : index
    %c0_37 = arith.constant 0 : index
    %58 = vector.load %57[%c0_36, %c0_37] : memref<33x640xbf16, #tpu.memory_space<vmem>>, vector<32x27xbf16>
    %59 = arith.extf %58 : vector<32x27xbf16> to vector<32x27xf32>
    %c0_i32_38 = arith.constant 0 : i32
    %c0_i32_39 = arith.constant 0 : i32
    %c0_i32_40 = arith.constant 0 : i32
    %60 = tpu.memref_slice %arg2[%c0_i32_38, %c0_i32_39, %c0_i32_40] : memref<1x33x640xbf16, #tpu.memory_space<vmem>> -> memref<1x33x640xbf16, #tpu.memory_space<vmem>>
    %61 = tpu.memref_squeeze %60 : memref<1x33x640xbf16, #tpu.memory_space<vmem>> -> memref<33x640xbf16, #tpu.memory_space<vmem>>
    %c0_41 = arith.constant 0 : index
    %c27 = arith.constant 27 : index
    %62 = vector.load %61[%c0_41, %c27] : memref<33x640xbf16, #tpu.memory_space<vmem>>, vector<32x1xbf16>
    %c0_42 = arith.constant 0 : index
    %c0_43 = arith.constant 0 : index
    %63 = vector.load %arg6[%c0_42, %c0_43] : memref<27x256xf32, #tpu.memory_space<vmem>>, vector<27x256xf32>
    %cst_44 = arith.constant dense<0.000000e+00> : vector<32x256xf32>
    %64 = tpu.matmul %59, %63, %cst_44 {dimension_numbers = #tpu.dot_dimension_numbers<[1], [0], [0], [1], [0, 0, 1, 1], [], []>} : vector<32x27xf32>, vector<27x256xf32>, vector<32x256xf32> -> vector<32x256xf32>
    %65 = arith.extf %62 : vector<32x1xbf16> to vector<32x1xf32>
    %66 = vector.broadcast %65 : vector<32x1xf32> to vector<32x256xf32>
    %67 = arith.addf %64, %66 : vector<32x256xf32>
    %cst_45 = arith.constant 0.000000e+00 : f32
    %68 = vector.broadcast %cst_45 : f32 to vector<32x256xf32>
    %69 = arith.cmpf oge, %67, %68 : vector<32x256xf32>
    %cst_46 = arith.constant 2.000000e-02 : f32
    %70 = vector.broadcast %cst_46 : f32 to vector<32x256xf32>
    %71 = arith.mulf %67, %70 : vector<32x256xf32>
    %72 = arith.select %69, %67, %71 : vector<32x256xi1>, vector<32x256xf32>
    %c0_47 = arith.constant 0 : index
    %c128_48 = arith.constant 128 : index
    %73 = vector.load %arg4[%c0_47, %c128_48] : memref<32x401xf32, #tpu.memory_space<vmem>>, vector<32x256xf32>
    tpu.vector_store %arg4[%c0_47, %c128_48], %72 {strides = array<i32>} : memref<32x401xf32, #tpu.memory_space<vmem>>, vector<32x256xf32>,
    %c0_49 = arith.constant 0 : index
    %c111_50 = arith.constant 111 : index
    %74 = vector.load %arg4[%c0_49, %c111_50] : memref<32x401xf32, #tpu.memory_space<vmem>>, vector<32x256xf32>
    %cst_51 = arith.constant 0.000000e+00 : f32
    %75 = vector.broadcast %cst_51 : f32 to vector<32x256xf32>
    %76 = vector.shape_cast %4 : vector<1x256xi1> to vector<1x256xi1>
    %77 = vector.broadcast %76 : vector<1x256xi1> to vector<32x256xi1>
    %78 = arith.select %77, %74, %75 : vector<32x256xi1>, vector<32x256xf32>
    %79 = arith.truncf %78 : vector<32x256xf32> to vector<32x256xbf16>
    %c0_52 = arith.constant 0 : index
    %c0_53 = arith.constant 0 : index
    %80 = vector.load %arg5[%c0_52, %c0_53] : memref<288x256xbf16, #tpu.memory_space<vmem>>, vector<32x256xbf16>
    tpu.vector_store %arg5[%c0_52, %c0_53], %79 {strides = array<i32>} : memref<288x256xbf16, #tpu.memory_space<vmem>>, vector<32x256xbf16>,
    %c0_54 = arith.constant 0 : index
    %c112_55 = arith.constant 112 : index
    %81 = vector.load %arg4[%c0_54, %c112_55] : memref<32x401xf32, #tpu.memory_space<vmem>>, vector<32x256xf32>
    %82 = arith.truncf %81 : vector<32x256xf32> to vector<32x256xbf16>
    %c32 = arith.constant 32 : index
    %c0_56 = arith.constant 0 : index
    %83 = vector.load %arg5[%c32, %c0_56] : memref<288x256xbf16, #tpu.memory_space<vmem>>, vector<32x256xbf16>
    tpu.vector_store %arg5[%c32, %c0_56], %82 {strides = array<i32>} : memref<288x256xbf16, #tpu.memory_space<vmem>>, vector<32x256xbf16>,
    %c0_57 = arith.constant 0 : index
    %c113_58 = arith.constant 113 : index
    %84 = vector.load %arg4[%c0_57, %c113_58] : memref<32x401xf32, #tpu.memory_space<vmem>>, vector<32x256xf32>
    %cst_59 = arith.constant 0.000000e+00 : f32
    %85 = vector.broadcast %cst_59 : f32 to vector<32x256xf32>
    %86 = vector.shape_cast %6 : vector<1x256xi1> to vector<1x256xi1>
    %87 = vector.broadcast %86 : vector<1x256xi1> to vector<32x256xi1>
    %88 = arith.select %87, %84, %85 : vector<32x256xi1>, vector<32x256xf32>
    %89 = arith.truncf %88 : vector<32x256xf32> to vector<32x256xbf16>
    %c64 = arith.constant 64 : index
    %c0_60 = arith.constant 0 : index
    %90 = vector.load %arg5[%c64, %c0_60] : memref<288x256xbf16, #tpu.memory_space<vmem>>, vector<32x256xbf16>
    tpu.vector_store %arg5[%c64, %c0_60], %89 {strides = array<i32>} : memref<288x256xbf16, #tpu.memory_space<vmem>>, vector<32x256xbf16>,
    %c0_61 = arith.constant 0 : index
    %c127_62 = arith.constant 127 : index
    %91 = vector.load %arg4[%c0_61, %c127_62] : memref<32x401xf32, #tpu.memory_space<vmem>>, vector<32x256xf32>
    %cst_63 = arith.constant 0.000000e+00 : f32
    %92 = vector.broadcast %cst_63 : f32 to vector<32x256xf32>
    %93 = vector.shape_cast %4 : vector<1x256xi1> to vector<1x256xi1>
    %94 = vector.broadcast %93 : vector<1x256xi1> to vector<32x256xi1>
    %95 = arith.select %94, %91, %92 : vector<32x256xi1>, vector<32x256xf32>
    %96 = arith.truncf %95 : vector<32x256xf32> to vector<32x256xbf16>
    %c96 = arith.constant 96 : index
    %c0_64 = arith.constant 0 : index
    %97 = vector.load %arg5[%c96, %c0_64] : memref<288x256xbf16, #tpu.memory_space<vmem>>, vector<32x256xbf16>
    tpu.vector_store %arg5[%c96, %c0_64], %96 {strides = array<i32>} : memref<288x256xbf16, #tpu.memory_space<vmem>>, vector<32x256xbf16>,
    %c0_65 = arith.constant 0 : index
    %c128_66 = arith.constant 128 : index
    %98 = vector.load %arg4[%c0_65, %c128_66] : memref<32x401xf32, #tpu.memory_space<vmem>>, vector<32x256xf32>
    %99 = arith.truncf %98 : vector<32x256xf32> to vector<32x256xbf16>
    %c128_67 = arith.constant 128 : index
    %c0_68 = arith.constant 0 : index
    %100 = vector.load %arg5[%c128_67, %c0_68] : memref<288x256xbf16, #tpu.memory_space<vmem>>, vector<32x256xbf16>
    tpu.vector_store %arg5[%c128_67, %c0_68], %99 {strides = array<i32>} : memref<288x256xbf16, #tpu.memory_space<vmem>>, vector<32x256xbf16>,
    %c0_69 = arith.constant 0 : index
    %c129_70 = arith.constant 129 : index
    %101 = vector.load %arg4[%c0_69, %c129_70] : memref<32x401xf32, #tpu.memory_space<vmem>>, vector<32x256xf32>
    %cst_71 = arith.constant 0.000000e+00 : f32
    %102 = vector.broadcast %cst_71 : f32 to vector<32x256xf32>
    %103 = vector.shape_cast %6 : vector<1x256xi1> to vector<1x256xi1>
    %104 = vector.broadcast %103 : vector<1x256xi1> to vector<32x256xi1>
    %105 = arith.select %104, %101, %102 : vector<32x256xi1>, vector<32x256xf32>
    %106 = arith.truncf %105 : vector<32x256xf32> to vector<32x256xbf16>
    %c160 = arith.constant 160 : index
    %c0_72 = arith.constant 0 : index
    %107 = vector.load %arg5[%c160, %c0_72] : memref<288x256xbf16, #tpu.memory_space<vmem>>, vector<32x256xbf16>
    tpu.vector_store %arg5[%c160, %c0_72], %106 {strides = array<i32>} : memref<288x256xbf16, #tpu.memory_space<vmem>>, vector<32x256xbf16>,
    %c0_73 = arith.constant 0 : index
    %c143_74 = arith.constant 143 : index
    %108 = vector.load %arg4[%c0_73, %c143_74] : memref<32x401xf32, #tpu.memory_space<vmem>>, vector<32x256xf32>
    %cst_75 = arith.constant 0.000000e+00 : f32
    %109 = vector.broadcast %cst_75 : f32 to vector<32x256xf32>
    %110 = vector.shape_cast %4 : vector<1x256xi1> to vector<1x256xi1>
    %111 = vector.broadcast %110 : vector<1x256xi1> to vector<32x256xi1>
    %112 = arith.select %111, %108, %109 : vector<32x256xi1>, vector<32x256xf32>
    %113 = arith.truncf %112 : vector<32x256xf32> to vector<32x256xbf16>
    %c192 = arith.constant 192 : index
    %c0_76 = arith.constant 0 : index
    %114 = vector.load %arg5[%c192, %c0_76] : memref<288x256xbf16, #tpu.memory_space<vmem>>, vector<32x256xbf16>
    tpu.vector_store %arg5[%c192, %c0_76], %113 {strides = array<i32>} : memref<288x256xbf16, #tpu.memory_space<vmem>>, vector<32x256xbf16>,
    %c0_77 = arith.constant 0 : index
    %c144_78 = arith.constant 144 : index
    %115 = vector.load %arg4[%c0_77, %c144_78] : memref<32x401xf32, #tpu.memory_space<vmem>>, vector<32x256xf32>
    %116 = arith.truncf %115 : vector<32x256xf32> to vector<32x256xbf16>
    %c224 = arith.constant 224 : index
    %c0_79 = arith.constant 0 : index
    %117 = vector.load %arg5[%c224, %c0_79] : memref<288x256xbf16, #tpu.memory_space<vmem>>, vector<32x256xbf16>
    tpu.vector_store %arg5[%c224, %c0_79], %116 {strides = array<i32>} : memref<288x256xbf16, #tpu.memory_space<vmem>>, vector<32x256xbf16>,
    %c0_80 = arith.constant 0 : index
    %c145_81 = arith.constant 145 : index
    %118 = vector.load %arg4[%c0_80, %c145_81] : memref<32x401xf32, #tpu.memory_space<vmem>>, vector<32x256xf32>
    %cst_82 = arith.constant 0.000000e+00 : f32
    %119 = vector.broadcast %cst_82 : f32 to vector<32x256xf32>
    %120 = vector.shape_cast %6 : vector<1x256xi1> to vector<1x256xi1>
    %121 = vector.broadcast %120 : vector<1x256xi1> to vector<32x256xi1>
    %122 = arith.select %121, %118, %119 : vector<32x256xi1>, vector<32x256xf32>
    %123 = arith.truncf %122 : vector<32x256xf32> to vector<32x256xbf16>
    %c256 = arith.constant 256 : index
    %c0_83 = arith.constant 0 : index
    %124 = vector.load %arg5[%c256, %c0_83] : memref<288x256xbf16, #tpu.memory_space<vmem>>, vector<32x256xbf16>
    tpu.vector_store %arg5[%c256, %c0_83], %123 {strides = array<i32>} : memref<288x256xbf16, #tpu.memory_space<vmem>>, vector<32x256xbf16>,
    %c0_i32_84 = arith.constant 0 : i32
    %c0_i32_85 = arith.constant 0 : i32
    %c0_i32_86 = arith.constant 0 : i32
    %125 = tpu.memref_slice %arg2[%c0_i32_84, %c0_i32_85, %c0_i32_86] : memref<1x33x640xbf16, #tpu.memory_space<vmem>> -> memref<1x33x640xbf16, #tpu.memory_space<vmem>>
    %126 = tpu.memref_squeeze %125 : memref<1x33x640xbf16, #tpu.memory_space<vmem>> -> memref<33x640xbf16, #tpu.memory_space<vmem>>
    %c0_87 = arith.constant 0 : index
    %c28 = arith.constant 28 : index
    %127 = vector.load %126[%c0_87, %c28] : memref<33x640xbf16, #tpu.memory_space<vmem>>, vector<32x288xbf16>
    %c0_i32_88 = arith.constant 0 : i32
    %c0_i32_89 = arith.constant 0 : i32
    %c0_i32_90 = arith.constant 0 : i32
    %128 = tpu.memref_slice %arg2[%c0_i32_88, %c0_i32_89, %c0_i32_90] : memref<1x33x640xbf16, #tpu.memory_space<vmem>> -> memref<1x33x640xbf16, #tpu.memory_space<vmem>>
    %129 = tpu.memref_squeeze %128 : memref<1x33x640xbf16, #tpu.memory_space<vmem>> -> memref<33x640xbf16, #tpu.memory_space<vmem>>
    %c0_91 = arith.constant 0 : index
    %c316 = arith.constant 316 : index
    %130 = vector.load %129[%c0_91, %c316] : memref<33x640xbf16, #tpu.memory_space<vmem>>, vector<32x1xbf16>
    %c0_92 = arith.constant 0 : index
    %c0_93 = arith.constant 0 : index
    %131 = vector.load %arg5[%c0_92, %c0_93] : memref<288x256xbf16, #tpu.memory_space<vmem>>, vector<288x256xbf16>
    %cst_94 = arith.constant dense<0.000000e+00> : vector<32x256xf32>
    %132 = tpu.matmul %127, %131, %cst_94 {dimension_numbers = #tpu.dot_dimension_numbers<[1], [0], [0], [1], [0, 0, 1, 1], [], []>} : vector<32x288xbf16>, vector<288x256xbf16>, vector<32x256xf32> -> vector<32x256xf32>
    %133 = arith.extf %130 : vector<32x1xbf16> to vector<32x1xf32>
    %134 = vector.broadcast %133 : vector<32x1xf32> to vector<32x256xf32>
    %135 = arith.addf %132, %134 : vector<32x256xf32>
    %cst_95 = arith.constant 0.000000e+00 : f32
    %136 = vector.broadcast %cst_95 : f32 to vector<32x256xf32>
    %137 = arith.cmpf oge, %135, %136 : vector<32x256xf32>
    %cst_96 = arith.constant 2.000000e-02 : f32
    %138 = vector.broadcast %cst_96 : f32 to vector<32x256xf32>
    %139 = arith.mulf %135, %138 : vector<32x256xf32>
    %140 = arith.select %137, %135, %139 : vector<32x256xi1>, vector<32x256xf32>
    %c0_97 = arith.constant 0 : index
    %c128_98 = arith.constant 128 : index
    %141 = vector.load %arg4[%c0_97, %c128_98] : memref<32x401xf32, #tpu.memory_space<vmem>>, vector<32x256xf32>
    tpu.vector_store %arg4[%c0_97, %c128_98], %140 {strides = array<i32>} : memref<32x401xf32, #tpu.memory_space<vmem>>, vector<32x256xf32>,
    %c0_99 = arith.constant 0 : index
    %c111_100 = arith.constant 111 : index
    %142 = vector.load %arg4[%c0_99, %c111_100] : memref<32x401xf32, #tpu.memory_space<vmem>>, vector<32x256xf32>
    %cst_101 = arith.constant 0.000000e+00 : f32
    %143 = vector.broadcast %cst_101 : f32 to vector<32x256xf32>
    %144 = vector.shape_cast %4 : vector<1x256xi1> to vector<1x256xi1>
    %145 = vector.broadcast %144 : vector<1x256xi1> to vector<32x256xi1>
    %146 = arith.select %145, %142, %143 : vector<32x256xi1>, vector<32x256xf32>
    %147 = arith.truncf %146 : vector<32x256xf32> to vector<32x256xbf16>
    %c0_102 = arith.constant 0 : index
    %c0_103 = arith.constant 0 : index
    %148 = vector.load %arg5[%c0_102, %c0_103] : memref<288x256xbf16, #tpu.memory_space<vmem>>, vector<32x256xbf16>
    tpu.vector_store %arg5[%c0_102, %c0_103], %147 {strides = array<i32>} : memref<288x256xbf16, #tpu.memory_space<vmem>>, vector<32x256xbf16>,
    %c0_104 = arith.constant 0 : index
    %c112_105 = arith.constant 112 : index
    %149 = vector.load %arg4[%c0_104, %c112_105] : memref<32x401xf32, #tpu.memory_space<vmem>>, vector<32x256xf32>
    %150 = arith.truncf %149 : vector<32x256xf32> to vector<32x256xbf16>
    %c32_106 = arith.constant 32 : index
    %c0_107 = arith.constant 0 : index
    %151 = vector.load %arg5[%c32_106, %c0_107] : memref<288x256xbf16, #tpu.memory_space<vmem>>, vector<32x256xbf16>
    tpu.vector_store %arg5[%c32_106, %c0_107], %150 {strides = array<i32>} : memref<288x256xbf16, #tpu.memory_space<vmem>>, vector<32x256xbf16>,
    %c0_108 = arith.constant 0 : index
    %c113_109 = arith.constant 113 : index
    %152 = vector.load %arg4[%c0_108, %c113_109] : memref<32x401xf32, #tpu.memory_space<vmem>>, vector<32x256xf32>
    %cst_110 = arith.constant 0.000000e+00 : f32
    %153 = vector.broadcast %cst_110 : f32 to vector<32x256xf32>
    %154 = vector.shape_cast %6 : vector<1x256xi1> to vector<1x256xi1>
    %155 = vector.broadcast %154 : vector<1x256xi1> to vector<32x256xi1>
    %156 = arith.select %155, %152, %153 : vector<32x256xi1>, vector<32x256xf32>
    %157 = arith.truncf %156 : vector<32x256xf32> to vector<32x256xbf16>
    %c64_111 = arith.constant 64 : index
    %c0_112 = arith.constant 0 : index
    %158 = vector.load %arg5[%c64_111, %c0_112] : memref<288x256xbf16, #tpu.memory_space<vmem>>, vector<32x256xbf16>
    tpu.vector_store %arg5[%c64_111, %c0_112], %157 {strides = array<i32>} : memref<288x256xbf16, #tpu.memory_space<vmem>>, vector<32x256xbf16>,
    %c0_113 = arith.constant 0 : index
    %c127_114 = arith.constant 127 : index
    %159 = vector.load %arg4[%c0_113, %c127_114] : memref<32x401xf32, #tpu.memory_space<vmem>>, vector<32x256xf32>
    %cst_115 = arith.constant 0.000000e+00 : f32
    %160 = vector.broadcast %cst_115 : f32 to vector<32x256xf32>
    %161 = vector.shape_cast %4 : vector<1x256xi1> to vector<1x256xi1>
    %162 = vector.broadcast %161 : vector<1x256xi1> to vector<32x256xi1>
    %163 = arith.select %162, %159, %160 : vector<32x256xi1>, vector<32x256xf32>
    %164 = arith.truncf %163 : vector<32x256xf32> to vector<32x256xbf16>
    %c96_116 = arith.constant 96 : index
    %c0_117 = arith.constant 0 : index
    %165 = vector.load %arg5[%c96_116, %c0_117] : memref<288x256xbf16, #tpu.memory_space<vmem>>, vector<32x256xbf16>
    tpu.vector_store %arg5[%c96_116, %c0_117], %164 {strides = array<i32>} : memref<288x256xbf16, #tpu.memory_space<vmem>>, vector<32x256xbf16>,
    %c0_118 = arith.constant 0 : index
    %c128_119 = arith.constant 128 : index
    %166 = vector.load %arg4[%c0_118, %c128_119] : memref<32x401xf32, #tpu.memory_space<vmem>>, vector<32x256xf32>
    %167 = arith.truncf %166 : vector<32x256xf32> to vector<32x256xbf16>
    %c128_120 = arith.constant 128 : index
    %c0_121 = arith.constant 0 : index
    %168 = vector.load %arg5[%c128_120, %c0_121] : memref<288x256xbf16, #tpu.memory_space<vmem>>, vector<32x256xbf16>
    tpu.vector_store %arg5[%c128_120, %c0_121], %167 {strides = array<i32>} : memref<288x256xbf16, #tpu.memory_space<vmem>>, vector<32x256xbf16>,
    %c0_122 = arith.constant 0 : index
    %c129_123 = arith.constant 129 : index
    %169 = vector.load %arg4[%c0_122, %c129_123] : memref<32x401xf32, #tpu.memory_space<vmem>>, vector<32x256xf32>
    %cst_124 = arith.constant 0.000000e+00 : f32
    %170 = vector.broadcast %cst_124 : f32 to vector<32x256xf32>
    %171 = vector.shape_cast %6 : vector<1x256xi1> to vector<1x256xi1>
    %172 = vector.broadcast %171 : vector<1x256xi1> to vector<32x256xi1>
    %173 = arith.select %172, %169, %170 : vector<32x256xi1>, vector<32x256xf32>
    %174 = arith.truncf %173 : vector<32x256xf32> to vector<32x256xbf16>
    %c160_125 = arith.constant 160 : index
    %c0_126 = arith.constant 0 : index
    %175 = vector.load %arg5[%c160_125, %c0_126] : memref<288x256xbf16, #tpu.memory_space<vmem>>, vector<32x256xbf16>
    tpu.vector_store %arg5[%c160_125, %c0_126], %174 {strides = array<i32>} : memref<288x256xbf16, #tpu.memory_space<vmem>>, vector<32x256xbf16>,
    %c0_127 = arith.constant 0 : index
    %c143_128 = arith.constant 143 : index
    %176 = vector.load %arg4[%c0_127, %c143_128] : memref<32x401xf32, #tpu.memory_space<vmem>>, vector<32x256xf32>
    %cst_129 = arith.constant 0.000000e+00 : f32
    %177 = vector.broadcast %cst_129 : f32 to vector<32x256xf32>
    %178 = vector.shape_cast %4 : vector<1x256xi1> to vector<1x256xi1>
    %179 = vector.broadcast %178 : vector<1x256xi1> to vector<32x256xi1>
    %180 = arith.select %179, %176, %177 : vector<32x256xi1>, vector<32x256xf32>
    %181 = arith.truncf %180 : vector<32x256xf32> to vector<32x256xbf16>
    %c192_130 = arith.constant 192 : index
    %c0_131 = arith.constant 0 : index
    %182 = vector.load %arg5[%c192_130, %c0_131] : memref<288x256xbf16, #tpu.memory_space<vmem>>, vector<32x256xbf16>
    tpu.vector_store %arg5[%c192_130, %c0_131], %181 {strides = array<i32>} : memref<288x256xbf16, #tpu.memory_space<vmem>>, vector<32x256xbf16>,
    %c0_132 = arith.constant 0 : index
    %c144_133 = arith.constant 144 : index
    %183 = vector.load %arg4[%c0_132, %c144_133] : memref<32x401xf32, #tpu.memory_space<vmem>>, vector<32x256xf32>
    %184 = arith.truncf %183 : vector<32x256xf32> to vector<32x256xbf16>
    %c224_134 = arith.constant 224 : index
    %c0_135 = arith.constant 0 : index
    %185 = vector.load %arg5[%c224_134, %c0_135] : memref<288x256xbf16, #tpu.memory_space<vmem>>, vector<32x256xbf16>
    tpu.vector_store %arg5[%c224_134, %c0_135], %184 {strides = array<i32>} : memref<288x256xbf16, #tpu.memory_space<vmem>>, vector<32x256xbf16>,
    %c0_136 = arith.constant 0 : index
    %c145_137 = arith.constant 145 : index
    %186 = vector.load %arg4[%c0_136, %c145_137] : memref<32x401xf32, #tpu.memory_space<vmem>>, vector<32x256xf32>
    %cst_138 = arith.constant 0.000000e+00 : f32
    %187 = vector.broadcast %cst_138 : f32 to vector<32x256xf32>
    %188 = vector.shape_cast %6 : vector<1x256xi1> to vector<1x256xi1>
    %189 = vector.broadcast %188 : vector<1x256xi1> to vector<32x256xi1>
    %190 = arith.select %189, %186, %187 : vector<32x256xi1>, vector<32x256xf32>
    %191 = arith.truncf %190 : vector<32x256xf32> to vector<32x256xbf16>
    %c256_139 = arith.constant 256 : index
    %c0_140 = arith.constant 0 : index
    %192 = vector.load %arg5[%c256_139, %c0_140] : memref<288x256xbf16, #tpu.memory_space<vmem>>, vector<32x256xbf16>
    tpu.vector_store %arg5[%c256_139, %c0_140], %191 {strides = array<i32>} : memref<288x256xbf16, #tpu.memory_space<vmem>>, vector<32x256xbf16>,
    %c0_i32_141 = arith.constant 0 : i32
    %c0_i32_142 = arith.constant 0 : i32
    %c0_i32_143 = arith.constant 0 : i32
    %193 = tpu.memref_slice %arg2[%c0_i32_141, %c0_i32_142, %c0_i32_143] : memref<1x33x640xbf16, #tpu.memory_space<vmem>> -> memref<1x33x640xbf16, #tpu.memory_space<vmem>>
    %194 = tpu.memref_squeeze %193 : memref<1x33x640xbf16, #tpu.memory_space<vmem>> -> memref<33x640xbf16, #tpu.memory_space<vmem>>
    %c0_144 = arith.constant 0 : index
    %c317 = arith.constant 317 : index
    %195 = vector.load %194[%c0_144, %c317] : memref<33x640xbf16, #tpu.memory_space<vmem>>, vector<32x288xbf16>
    %c0_i32_145 = arith.constant 0 : i32
    %c0_i32_146 = arith.constant 0 : i32
    %c0_i32_147 = arith.constant 0 : i32
    %196 = tpu.memref_slice %arg2[%c0_i32_145, %c0_i32_146, %c0_i32_147] : memref<1x33x640xbf16, #tpu.memory_space<vmem>> -> memref<1x33x640xbf16, #tpu.memory_space<vmem>>
    %197 = tpu.memref_squeeze %196 : memref<1x33x640xbf16, #tpu.memory_space<vmem>> -> memref<33x640xbf16, #tpu.memory_space<vmem>>
    %c0_148 = arith.constant 0 : index
    %c605 = arith.constant 605 : index
    %198 = vector.load %197[%c0_148, %c605] : memref<33x640xbf16, #tpu.memory_space<vmem>>, vector<32x1xbf16>
    %c0_149 = arith.constant 0 : index
    %c0_150 = arith.constant 0 : index
    %199 = vector.load %arg5[%c0_149, %c0_150] : memref<288x256xbf16, #tpu.memory_space<vmem>>, vector<288x256xbf16>
    %cst_151 = arith.constant dense<0.000000e+00> : vector<32x256xf32>
    %200 = tpu.matmul %195, %199, %cst_151 {dimension_numbers = #tpu.dot_dimension_numbers<[1], [0], [0], [1], [0, 0, 1, 1], [], []>} : vector<32x288xbf16>, vector<288x256xbf16>, vector<32x256xf32> -> vector<32x256xf32>
    %201 = arith.extf %198 : vector<32x1xbf16> to vector<32x1xf32>
    %202 = vector.broadcast %201 : vector<32x1xf32> to vector<32x256xf32>
    %203 = arith.addf %200, %202 : vector<32x256xf32>
    %cst_152 = arith.constant 0.000000e+00 : f32
    %204 = vector.broadcast %cst_152 : f32 to vector<32x256xf32>
    %205 = arith.cmpf oge, %203, %204 : vector<32x256xf32>
    %cst_153 = arith.constant 2.000000e-02 : f32
    %206 = vector.broadcast %cst_153 : f32 to vector<32x256xf32>
    %207 = arith.mulf %203, %206 : vector<32x256xf32>
    %208 = arith.select %205, %203, %207 : vector<32x256xi1>, vector<32x256xf32>
    %c0_154 = arith.constant 0 : index
    %c128_155 = arith.constant 128 : index
    %209 = vector.load %arg4[%c0_154, %c128_155] : memref<32x401xf32, #tpu.memory_space<vmem>>, vector<32x256xf32>
    tpu.vector_store %arg4[%c0_154, %c128_155], %208 {strides = array<i32>} : memref<32x401xf32, #tpu.memory_space<vmem>>, vector<32x256xf32>,
    %c0_156 = arith.constant 0 : index
    %c111_157 = arith.constant 111 : index
    %210 = vector.load %arg4[%c0_156, %c111_157] : memref<32x401xf32, #tpu.memory_space<vmem>>, vector<32x256xf32>
    %cst_158 = arith.constant 0.000000e+00 : f32
    %211 = vector.broadcast %cst_158 : f32 to vector<32x256xf32>
    %212 = vector.shape_cast %4 : vector<1x256xi1> to vector<1x256xi1>
    %213 = vector.broadcast %212 : vector<1x256xi1> to vector<32x256xi1>
    %214 = arith.select %213, %210, %211 : vector<32x256xi1>, vector<32x256xf32>
    %215 = arith.truncf %214 : vector<32x256xf32> to vector<32x256xbf16>
    %c0_159 = arith.constant 0 : index
    %c0_160 = arith.constant 0 : index
    %216 = vector.load %arg5[%c0_159, %c0_160] : memref<288x256xbf16, #tpu.memory_space<vmem>>, vector<32x256xbf16>
    tpu.vector_store %arg5[%c0_159, %c0_160], %215 {strides = array<i32>} : memref<288x256xbf16, #tpu.memory_space<vmem>>, vector<32x256xbf16>,
    %c0_161 = arith.constant 0 : index
    %c112_162 = arith.constant 112 : index
    %217 = vector.load %arg4[%c0_161, %c112_162] : memref<32x401xf32, #tpu.memory_space<vmem>>, vector<32x256xf32>
    %218 = arith.truncf %217 : vector<32x256xf32> to vector<32x256xbf16>
    %c32_163 = arith.constant 32 : index
    %c0_164 = arith.constant 0 : index
    %219 = vector.load %arg5[%c32_163, %c0_164] : memref<288x256xbf16, #tpu.memory_space<vmem>>, vector<32x256xbf16>
    tpu.vector_store %arg5[%c32_163, %c0_164], %218 {strides = array<i32>} : memref<288x256xbf16, #tpu.memory_space<vmem>>, vector<32x256xbf16>,
    %c0_165 = arith.constant 0 : index
    %c113_166 = arith.constant 113 : index
    %220 = vector.load %arg4[%c0_165, %c113_166] : memref<32x401xf32, #tpu.memory_space<vmem>>, vector<32x256xf32>
    %cst_167 = arith.constant 0.000000e+00 : f32
    %221 = vector.broadcast %cst_167 : f32 to vector<32x256xf32>
    %222 = vector.shape_cast %6 : vector<1x256xi1> to vector<1x256xi1>
    %223 = vector.broadcast %222 : vector<1x256xi1> to vector<32x256xi1>
    %224 = arith.select %223, %220, %221 : vector<32x256xi1>, vector<32x256xf32>
    %225 = arith.truncf %224 : vector<32x256xf32> to vector<32x256xbf16>
    %c64_168 = arith.constant 64 : index
    %c0_169 = arith.constant 0 : index
    %226 = vector.load %arg5[%c64_168, %c0_169] : memref<288x256xbf16, #tpu.memory_space<vmem>>, vector<32x256xbf16>
    tpu.vector_store %arg5[%c64_168, %c0_169], %225 {strides = array<i32>} : memref<288x256xbf16, #tpu.memory_space<vmem>>, vector<32x256xbf16>,
    %c0_170 = arith.constant 0 : index
    %c127_171 = arith.constant 127 : index
    %227 = vector.load %arg4[%c0_170, %c127_171] : memref<32x401xf32, #tpu.memory_space<vmem>>, vector<32x256xf32>
    %cst_172 = arith.constant 0.000000e+00 : f32
    %228 = vector.broadcast %cst_172 : f32 to vector<32x256xf32>
    %229 = vector.shape_cast %4 : vector<1x256xi1> to vector<1x256xi1>
    %230 = vector.broadcast %229 : vector<1x256xi1> to vector<32x256xi1>
    %231 = arith.select %230, %227, %228 : vector<32x256xi1>, vector<32x256xf32>
    %232 = arith.truncf %231 : vector<32x256xf32> to vector<32x256xbf16>
    %c96_173 = arith.constant 96 : index
    %c0_174 = arith.constant 0 : index
    %233 = vector.load %arg5[%c96_173, %c0_174] : memref<288x256xbf16, #tpu.memory_space<vmem>>, vector<32x256xbf16>
    tpu.vector_store %arg5[%c96_173, %c0_174], %232 {strides = array<i32>} : memref<288x256xbf16, #tpu.memory_space<vmem>>, vector<32x256xbf16>,
    %c0_175 = arith.constant 0 : index
    %c128_176 = arith.constant 128 : index
    %234 = vector.load %arg4[%c0_175, %c128_176] : memref<32x401xf32, #tpu.memory_space<vmem>>, vector<32x256xf32>
    %235 = arith.truncf %234 : vector<32x256xf32> to vector<32x256xbf16>
    %c128_177 = arith.constant 128 : index
    %c0_178 = arith.constant 0 : index
    %236 = vector.load %arg5[%c128_177, %c0_178] : memref<288x256xbf16, #tpu.memory_space<vmem>>, vector<32x256xbf16>
    tpu.vector_store %arg5[%c128_177, %c0_178], %235 {strides = array<i32>} : memref<288x256xbf16, #tpu.memory_space<vmem>>, vector<32x256xbf16>,
    %c0_179 = arith.constant 0 : index
    %c129_180 = arith.constant 129 : index
    %237 = vector.load %arg4[%c0_179, %c129_180] : memref<32x401xf32, #tpu.memory_space<vmem>>, vector<32x256xf32>
    %cst_181 = arith.constant 0.000000e+00 : f32
    %238 = vector.broadcast %cst_181 : f32 to vector<32x256xf32>
    %239 = vector.shape_cast %6 : vector<1x256xi1> to vector<1x256xi1>
    %240 = vector.broadcast %239 : vector<1x256xi1> to vector<32x256xi1>
    %241 = arith.select %240, %237, %238 : vector<32x256xi1>, vector<32x256xf32>
    %242 = arith.truncf %241 : vector<32x256xf32> to vector<32x256xbf16>
    %c160_182 = arith.constant 160 : index
    %c0_183 = arith.constant 0 : index
    %243 = vector.load %arg5[%c160_182, %c0_183] : memref<288x256xbf16, #tpu.memory_space<vmem>>, vector<32x256xbf16>
    tpu.vector_store %arg5[%c160_182, %c0_183], %242 {strides = array<i32>} : memref<288x256xbf16, #tpu.memory_space<vmem>>, vector<32x256xbf16>,
    %c0_184 = arith.constant 0 : index
    %c143_185 = arith.constant 143 : index
    %244 = vector.load %arg4[%c0_184, %c143_185] : memref<32x401xf32, #tpu.memory_space<vmem>>, vector<32x256xf32>
    %cst_186 = arith.constant 0.000000e+00 : f32
    %245 = vector.broadcast %cst_186 : f32 to vector<32x256xf32>
    %246 = vector.shape_cast %4 : vector<1x256xi1> to vector<1x256xi1>
    %247 = vector.broadcast %246 : vector<1x256xi1> to vector<32x256xi1>
    %248 = arith.select %247, %244, %245 : vector<32x256xi1>, vector<32x256xf32>
    %249 = arith.truncf %248 : vector<32x256xf32> to vector<32x256xbf16>
    %c192_187 = arith.constant 192 : index
    %c0_188 = arith.constant 0 : index
    %250 = vector.load %arg5[%c192_187, %c0_188] : memref<288x256xbf16, #tpu.memory_space<vmem>>, vector<32x256xbf16>
    tpu.vector_store %arg5[%c192_187, %c0_188], %249 {strides = array<i32>} : memref<288x256xbf16, #tpu.memory_space<vmem>>, vector<32x256xbf16>,
    %c0_189 = arith.constant 0 : index
    %c144_190 = arith.constant 144 : index
    %251 = vector.load %arg4[%c0_189, %c144_190] : memref<32x401xf32, #tpu.memory_space<vmem>>, vector<32x256xf32>
    %252 = arith.truncf %251 : vector<32x256xf32> to vector<32x256xbf16>
    %c224_191 = arith.constant 224 : index
    %c0_192 = arith.constant 0 : index
    %253 = vector.load %arg5[%c224_191, %c0_192] : memref<288x256xbf16, #tpu.memory_space<vmem>>, vector<32x256xbf16>
    tpu.vector_store %arg5[%c224_191, %c0_192], %252 {strides = array<i32>} : memref<288x256xbf16, #tpu.memory_space<vmem>>, vector<32x256xbf16>,
    %c0_193 = arith.constant 0 : index
    %c145_194 = arith.constant 145 : index
    %254 = vector.load %arg4[%c0_193, %c145_194] : memref<32x401xf32, #tpu.memory_space<vmem>>, vector<32x256xf32>
    %cst_195 = arith.constant 0.000000e+00 : f32
    %255 = vector.broadcast %cst_195 : f32 to vector<32x256xf32>
    %256 = vector.shape_cast %6 : vector<1x256xi1> to vector<1x256xi1>
    %257 = vector.broadcast %256 : vector<1x256xi1> to vector<32x256xi1>
    %258 = arith.select %257, %254, %255 : vector<32x256xi1>, vector<32x256xf32>
    %259 = arith.truncf %258 : vector<32x256xf32> to vector<32x256xbf16>
    %c256_196 = arith.constant 256 : index
    %c0_197 = arith.constant 0 : index
    %260 = vector.load %arg5[%c256_196, %c0_197] : memref<288x256xbf16, #tpu.memory_space<vmem>>, vector<32x256xbf16>
    tpu.vector_store %arg5[%c256_196, %c0_197], %259 {strides = array<i32>} : memref<288x256xbf16, #tpu.memory_space<vmem>>, vector<32x256xbf16>,
    %c0_i32_198 = arith.constant 0 : i32
    %c0_i32_199 = arith.constant 0 : i32
    %c0_i32_200 = arith.constant 0 : i32
    %261 = tpu.memref_slice %arg2[%c0_i32_198, %c0_i32_199, %c0_i32_200] : memref<1x33x640xbf16, #tpu.memory_space<vmem>> -> memref<1x33x640xbf16, #tpu.memory_space<vmem>>
    %262 = tpu.memref_squeeze %261 : memref<1x33x640xbf16, #tpu.memory_space<vmem>> -> memref<33x640xbf16, #tpu.memory_space<vmem>>
    %c32_201 = arith.constant 32 : index
    %c0_202 = arith.constant 0 : index
    %263 = vector.load %262[%c32_201, %c0_202] : memref<33x640xbf16, #tpu.memory_space<vmem>>, vector<1x288xbf16>
    %c0_i32_203 = arith.constant 0 : i32
    %c0_i32_204 = arith.constant 0 : i32
    %c0_i32_205 = arith.constant 0 : i32
    %264 = tpu.memref_slice %arg2[%c0_i32_203, %c0_i32_204, %c0_i32_205] : memref<1x33x640xbf16, #tpu.memory_space<vmem>> -> memref<1x33x640xbf16, #tpu.memory_space<vmem>>
    %265 = tpu.memref_squeeze %264 : memref<1x33x640xbf16, #tpu.memory_space<vmem>> -> memref<33x640xbf16, #tpu.memory_space<vmem>>
    %c32_206 = arith.constant 32 : index
    %c288 = arith.constant 288 : index
    %266 = vector.load %265[%c32_206, %c288] : memref<33x640xbf16, #tpu.memory_space<vmem>>, vector<1x1xbf16>
    %c0_207 = arith.constant 0 : index
    %c0_208 = arith.constant 0 : index
    %267 = vector.load %arg5[%c0_207, %c0_208] : memref<288x256xbf16, #tpu.memory_space<vmem>>, vector<288x256xbf16>
    %cst_209 = arith.constant dense<0.000000e+00> : vector<1x256xf32>
    %268 = tpu.matmul %263, %267, %cst_209 {dimension_numbers = #tpu.dot_dimension_numbers<[1], [0], [0], [1], [0, 0, 1, 1], [], []>} : vector<1x288xbf16>, vector<288x256xbf16>, vector<1x256xf32> -> vector<1x256xf32>
    %269 = arith.extf %266 : vector<1x1xbf16> to vector<1x1xf32>
    %270 = vector.broadcast %269 : vector<1x1xf32> to vector<1x256xf32>
    %271 = arith.addf %268, %270 : vector<1x256xf32>
    %c0_210 = arith.constant 0 : index
    %c0_211 = arith.constant 0 : index
    %c0_212 = arith.constant 0 : index
    %272 = vector.load %arg3[%c0_210, %c0_211, %c0_212] : memref<1x1x256xf32, #tpu.memory_space<vmem>>, vector<1x1x256xf32>
    %273 = vector.shape_cast %272 : vector<1x1x256xf32> to vector<1x256xf32>
    %274 = vector.shape_cast %271 : vector<1x256xf32> to vector<1x1x256xf32>
    tpu.vector_store %arg3[%c0_210, %c0_211, %c0_212], %274 {strides = array<i32>} : memref<1x1x256xf32, #tpu.memory_space<vmem>>, vector<1x1x256xf32>,
    return
  }
  func.func @transform_0(%arg0: i32) -> (i32, i32, i32) {
    %c0_i32 = arith.constant 0 : i32
    %c0_i32_0 = arith.constant 0 : i32
    %c0_i32_1 = arith.constant 0 : i32
    return %arg0, %c0_i32, %c0_i32_0 : i32, i32, i32
  }
  func.func @transform_1(%arg0: i32) -> (i32, i32, i32) {
    %c0_i32 = arith.constant 0 : i32
    %c0_i32_0 = arith.constant 0 : i32
    %c0_i32_1 = arith.constant 0 : i32
    return %arg0, %c0_i32, %c0_i32_0 : i32, i32, i32
  }
  func.func @transform_2(%arg0: i32) -> (i32, i32, i32) {
    %c0_i32 = arith.constant 0 : i32
    %c0_i32_0 = arith.constant 0 : i32
    %c0_i32_1 = arith.constant 0 : i32
    return %arg0, %c0_i32, %c0_i32_0 : i32, i32, i32
  }
}

</mosaic_0001>

<bundles_post_ra>
// kernel: hyper_discriminator_forward.3
= control target key start
LH: loop header
LB: loop body
LE: loop exit
PB: predicated region body
PF: predicated region fallthrough
CT: control target
= control target key end

     0   :  { %s5006_s9 = smov 0   ;;  %s6380_s0 = inlined_call_operand.vmem [shape: f32[2,3,256], index: 0, kind: input, shape index: {}]   ;;  %s6381_s1 = inlined_call_operand.vmem [shape: bf16[2,33,640], index: 1, kind: input, shape index: {}]   ;;  %s6382_s2 = inlined_call_operand.vmem [shape: f32[2,1,256], index: 2, kind: output, shape index: {}]  }
   0x1 LB: > { %s3732_s10 = sadd.s32 4294967295, %s4974_s9   ;;  %p3736_p0 = scmp.ge.s32.totalorder %s4974_s9, 1  ;;  %s4974_s9 = sphi %s5006_s9, %s12_s9  }
   0x2   : > { %p122_p1 = scmp.lt.s32.totalorder %s4974_s9, 3 }
   0x4   : > { %p123_p2 = pnand %p3736_p0, %p122_p1 }
   0x5   : > { %p148_p3 = scmp.lt.s32.totalorder (!%p123_p2), %s3732_s10, 1  ;;  %s4977_s15 = smov (!%p123_p2), 15  }
   0x6   : > { %126 = sbr.rel (%p123_p2) target bundleno = 1565 (0x61d), region = 28  ;;  %s4978_s16 = smov (!%p123_p2), 1  }
   0x7   : > { %s4979_s17 = smov (!%p123_p2), 113   ;;  %s4980_s18 = smov (!%p123_p2), 127  }
   0x8   : > { %s4981_s19 = smov (!%p123_p2), 111   ;;  %s4982_s20 = smov (!%p123_p2), 112  }
   0x9   : > { %s4983_s21 = smov (!%p123_p2), 17   ;;  %s4984_s22 = smov (!%p123_p2), 16  }
   0xa   : > { %s4986_s27 = smov (!%p123_p2), 100   ;;  %s4988_s28 = smov (!%p123_p2), 67  }
   0xb   : > { %v4976_v0 = vmov 0.0   ;;  %s6392_s10 = smov (!%p148_p3, %s3732_s10), 1  ;;  %vm176_vm0 = vcmask 138240   ;;  %v163_v36 = vlaneseq  ;;  %vm396_vm1 = vcmask 908288  }
   0xc   : > { %172 = vst [vmem:[#allocation2] sm:$0xff] %v4976_v0  ;;  %s4243_s11 = sshll.u32 %s6392_s10, 3  ;;  %vm450_vm3 = vcmask 1042432   ;;  %vm347_vm4 = vcmask 924672   ;;  %vm318_vm5 = vcmask 1039360   ;;  %vm281_vm8 = vcmask 7168  }
   0xd   : > { %s152_s14 = scalar_lea.vmem %s6380_s0, %s4243_s11  ;;  %177 = vst.msk [vmem:[#allocation2 + $0x18] sm:$0xff] %vm176_vm0, %v4976_v0  ;;  %v164_v37 = vand.u32 127, %v163_v36  ;;  %vm252_vm9 = vcmask 121856   ;;  %vm377_vm11 = vcmask 916480   ;;  %s4364_s23 = smul.u32 100, %s6392_s10  ;;  %vm229_vm12 = vcmask 130048  }
   0xe   : > { %v181_v1 = vld [vmem:[%s152_s14] sm:$0x77]  ;;  %178 = vst.msk [vmem:[#allocation2 + $0x38] sm:$0xff] %vm176_vm0, %v4976_v0  ;;  %vm441_vm13 = vcmask 220160   ;;  %s3740_s29 = sshll.u32 %s6392_s10, 1 }
   0xf   : > { %183 = vst [vmem:[#allocation1] ss:$2 sm:$0xff] %v181_v1  ;;  %v166_v39 = vand.u32 15, %v164_v37  ;;  %v165_v49 = vadd.s32 128, %v164_v37  ;;  %s5110_s26 = scalar_lea.vmem %s6381_s1, %s4364_s23  ;;  %s161_s4 = scalar_lea.vmem %s6382_s2, %s3740_s29 }
  0x10   : > { %179 = vst.msk [vmem:[#allocation2 + $0x58] sm:$0xff] %vm176_vm0, %v4976_v0 }
  0x11   : > { %180 = vst.msk [vmem:[#allocation2 + $0x78] sm:$0xff] %vm176_vm0, %v4976_v0  ;;  %vm5054_vm2 = vcmp.lt.s32.totalorder %v166_v39, 15  ;;  %v167_v53 = vand.u32 15, %v165_v49  ;;  %vm5067_vm6 = vcmp.ge.s32.totalorder %v166_v39, 1  ;;  %v4985_v39 = vmov 27  }
  0x12   : > { %4393 = vset.pattern.permute.xlu0 %v4985_v39  ;;  %4399 = vset.pattern.permute.xlu1 %v4985_v39 }
  0x13   : > { %v236_v2 = vld [vmem:[#allocation2] sm:$0x7]  ;;  %vm5071_vm7 = vcmp.lt.s32.totalorder %v167_v53, 15  ;;  %vm5088_vm10 = vcmp.ge.s32.totalorder %v167_v53, 1 }
  0x14   : > { %v269_v3 = vld [vmem:[#allocation2] sm:$0x7]  ;;  %246 = vrot.lane.b32.xlu0 %v236_v2, %s4977_s15  ;;  %v308_v20 = vld [vmem:[#allocation2 + $0x18] sm:$0x7] }
  0x15   : > { %275 = vrot.lane.b32.xlu2 %v269_v3, %s4978_s16  ;;  %v190_v16 = vld [vmem:[#allocation2] sm:$0x7]  ;;  %v337_v22 = vld [vmem:[#allocation2 + $0x18] sm:$0x7] }
  0x16   : > { %v184_v4 = vld.sshfl [vmem:[#allocation1] sm:$0xff pattern:$0x75316420]  ;;  %v185_v5 = vld.sshfl [vmem:[#allocation1 + $0x8] sm:$0xff pattern:$0x75316420] }
  0x17   : > { %188 = vst [vmem:[#allocation2 + $0x8] sm:$0x7] %v184_v4  ;;  %v4388_v18 = vpack.i.bf16 0.0, %v190_v16  ;;  %v214_v21 = vld [vmem:[#allocation2] sm:$0x7] }
  0x18   : > { %189 = vst [vmem:[#allocation2 + $0x10] sm:$0x7] %v185_v5  ;;  %v220_v24 = vrot.slane %v214_v21, 5  ;;  %v386_v27 = vld [vmem:[#allocation2 + $0x18] sm:$0x7] }
  0x19   : > { %v364_v29 = vld [vmem:[#allocation2 + $0x18] sm:$0x7] }
  0x1a   : > { %v370_v31 = vrot.slane %v364_v29, 3 }
  0x1e   : > { %v335_v6 = vld [vmem:[#allocation2 + $0x8] sm:$0x7] }
  0x1f   : > { %v306_v7 = vld [vmem:[#allocation2 + $0x8] sm:$0x7]  ;;  %341 = vrot.lane.b32.xlu1 %v335_v6, %s4979_s17  ;;  %v336_v9 = vld [vmem:[#allocation2 + $0x10] sm:$0x7] }
  0x20   : > { %v384_v8 = vld [vmem:[#allocation2 + $0x8] sm:$0x7]  ;;  %312 = vrot.lane.b32.xlu0 %v306_v7, %s4980_s18  ;;  %v307_v10 = vld [vmem:[#allocation2 + $0x10] sm:$0x7] }
  0x21   : > { %390 = vrot.lane.b32.xlu2 %v384_v8, %s4981_s19  ;;  %v385_v11 = vld [vmem:[#allocation2 + $0x10] sm:$0x7]  ;;  %v270_v13 = vld [vmem:[#allocation2 + $0x8] sm:$0x7] }
  0x22   : > { %v363_v12 = vld [vmem:[#allocation2 + $0x10] sm:$0x7]  ;;  %v237_v14 = vld [vmem:[#allocation2 + $0x8] sm:$0x7] }
  0x23   : > { %v369_v15 = vrot.slane %v363_v12, 3  ;;  %v362_v17 = vld [vmem:[#allocation2 + $0x8] sm:$0x7]  ;;  %v271_v28 = vld [vmem:[#allocation2 + $0x10] sm:$0x7] }
  0x24   : > { %v368_v19 = vrot.slane %v362_v17, 3  ;;  %v191_v23 = vld [vmem:[#allocation2 + $0x8] sm:$0x7]  ;;  %v216_v30 = vld [vmem:[#allocation2 + $0x10] sm:$0x7] }
  0x25   : > { %v215_v25 = vld [vmem:[#allocation2 + $0x8] sm:$0x7]  ;;  %v238_v32 = vld [vmem:[#allocation2 + $0x10] sm:$0x7]  ;;  %v222_v33 = vrot.slane %v216_v30, 5 }
  0x26   : > { %v221_v26 = vrot.slane %v215_v25, 5  ;;  %v192_v34 = vld [vmem:[#allocation2 + $0x10] sm:$0x7]  ;;  %v296_v44 = vld [vmem:[#allocation2 + $0x8] sm:$0x7] }
  0x27   : > { %343 = vrot.lane.b32.xlu1 %v336_v9, %s4979_s17  ;;  %v300_v46 = vrot.slane %v296_v44, 4  ;;  %v406_v25 = vld [vmem:[%s5110_s26 + $0x14] sm:$0xf] }
  0x28   : > { %314 = vrot.lane.b32.xlu0 %v307_v10, %s4980_s18 }
  0x29   : > { %392 = vrot.lane.b32.xlu2 %v385_v11, %s4981_s19  ;;  %304 = vst [vmem:[#allocation4 + $0x18] sm:$0x70] %v300_v46 }
  0x2f   : > { %248 = vrot.lane.b32.xlu1 %v237_v14, %s4977_s15 }
  0x30   : > { %277 = vrot.lane.b32.xlu0 %v270_v13, %s4978_s16 }
  0x31   : > { %373 = vrot.lane.b32.xlu2 %v369_v15, %s4982_s20 }
  0x37   : > { %371 = vrot.lane.b32.xlu1 %v368_v19, %s4982_s20 }
  0x38   : > { %4389 = vrot.lane.b32.xlu0 %v4388_v18, %s4983_s21  ;;  %v297_v18 = vld [vmem:[#allocation2 + $0x10] sm:$0x7] }
  0x39   : > { %316 = vrot.lane.b32.xlu2 %v308_v20, %s4980_s18  ;;  %v301_v19 = vrot.slane %v297_v18, 4 }
  0x3b   : > { %305 = vst [vmem:[#allocation4 + $0x10] sm:$0x70] %v301_v19 }
  0x3f   : > { %202 = vrot.lane.b32.xlu1 %v191_v23, %s4983_s21 }
  0x40   : > { %345 = vrot.lane.b32.xlu0 %v337_v22, %s4979_s17 }
  0x41   : > { %223 = vrot.lane.b32.xlu2 %v220_v24, %s4984_s22  ;;  %v405_v24 = vld [vmem:[%s5110_s26] sm:$0xf] }
  0x47   : > { %394 = vrot.lane.b32.xlu1 %v386_v27, %s4981_s19 }
  0x48   : > { %225 = vrot.lane.b32.xlu0 %v221_v26, %s4984_s22 }
  0x49   : > { %279 = vrot.lane.b32.xlu2 %v271_v28, %s4978_s16 }
  0x4f   : > { %250 = vrot.lane.b32.xlu1 %v238_v32, %s4977_s15 }
  0x50   : > { %375 = vrot.lane.b32.xlu0 %v370_v31, %s4982_s20 }
  0x51   : > { %227 = vrot.lane.b32.xlu2 %v222_v33, %s4984_s22  ;;  %v409_v33 = vunpack.c.l.bf16 %v405_v24 }
  0x57   : > { %204 = vrot.lane.b32.xlu1 %v192_v34, %s4983_s21  ;;  %v410_v34 = vunpack.c.l.bf16 %v406_v25 }
  0x6f   : > { %v276_v35 = vpop.permute.xlu2 %275 }
  0x7b   : > { %v391_v38 = vpop.permute.xlu2 %390 }
  0x83   : > { %v5058_v41 = vpop.permute.xlu2 %392 }
  0x84   : > { %v397_v42 = vsel %vm396_vm1, %v391_v38, %v5058_v41  ;;  %v4394_v38 = vpack.i.bf16 %v410_v34, %v409_v33 }
  0x85   : > { %v401_v43 = vsel %vm5054_vm2, %v397_v42, 0.0 }
  0x86   : > { %403 = vst [vmem:[#allocation4 + $0x28] sm:$0x7] %v401_v43  ;;  %v247_v45 = vpop.permute.xlu0 %246  ;;  %4395 = vperm.xlu0 %4393, %v4394_v38  }
  0x8b   : > { %v5064_v47 = vpop.permute.xlu2 %373 }
  0x8d   : > { %v419_v48 = vld [vmem:[#allocation4 + $0x28] sm:$0x7] }
  0x8e   : > { %3741 = vmatpush.msk.msra.mxu2 %vm450_vm3, %v419_v48 }
  0x91   : > { %v342_v50 = vpop.permute.xlu1 %341 }
  0x92   : > { %v313_v51 = vpop.permute.xlu0 %312 }
  0x93   : > { %v317_v52 = vpop.permute.xlu2 %316 }
  0x99   : > { %v344_v56 = vpop.permute.xlu1 %343 }
  0x9a   : > { %v315_v57 = vpop.permute.xlu0 %314  ;;  %v348_v58 = vsel %vm347_vm4, %v342_v50, %v344_v56 }
  0x9b   : > { %v319_v59 = vsel %vm318_vm5, %v313_v51, %v315_v57  ;;  %v320_v60 = vsel %vm318_vm5, %v315_v57, %v317_v52  ;;  %v5078_v61 = vpop.permute.xlu2 %223  ;;  %v352_v62 = vsel %vm5067_vm6, %v348_v58, 0.0 }
  0x9c   : > { %v323_v63 = vsel %vm5054_vm2, %v319_v59, 0.0  ;;  %v324_v1 = vsel %vm5071_vm7, %v320_v60, 0.0  ;;  %v356_v2 = vrot.slane %v352_v62, 6  ;;  %v407_v59 = vld [vmem:[%s5110_s26 + $0x28] sm:$0xf] }
  0x9d   : > { %v327_v3 = vrot.slane %v323_v63, 1  ;;  %v328_v4 = vrot.slane %v324_v1, 1  ;;  %v408_v60 = vld [vmem:[%s5110_s26 + $0x3c] sm:$0xf]  ;;  %v411_v1 = vunpack.c.l.bf16 %v407_v59 }
  0x9e   : > { %360 = vst [vmem:[#allocation4 + $0x8] sm:$0x1c] %v356_v2  ;;  %v412_v2 = vunpack.c.l.bf16 %v408_v60 }
  0x9f   : > { %331 = vst [vmem:[#allocation4 + $0x18] sm:$0x80] %v327_v3 }
  0xa0   : > { %332 = vst [vmem:[#allocation4 + $0x10] sm:$0x80] %v328_v4 }
  0xa1   : > { %333 = vst [vmem:[#allocation4 + $0x8] sm:$0x3] %v327_v3  ;;  %v5086_v6 = vpop.permute.xlu1 %248  ;;  %v4400_v3 = vpack.i.bf16 %v412_v2, %v411_v1 }
  0xa2   : > { %v278_v5 = vpop.permute.xlu0 %277  ;;  %334 = vst [vmem:[#allocation4 + $0x20] sm:$0x3] %v328_v4  ;;  %v253_v9 = vsel %vm252_vm9, %v247_v45, %v5086_v6 }
  0xa3   : > { %v282_v8 = vsel %vm281_vm8, %v276_v35, %v278_v5  ;;  %v280_v10 = vpop.permute.xlu2 %279  ;;  %v257_v12 = vsel %vm5054_vm2, %v253_v9, 0.0  ;;  %4401 = vperm.xlu1 %4399, %v4400_v3   ;;  %v5153_v9 = vld [vmem:[#allocation2 + $0x78] sm:$0xff] }
  0xa4   : > { %v286_v11 = vsel %vm5067_vm6, %v282_v8, 0.0  ;;  %v283_v13 = vsel %vm281_vm8, %v278_v5, %v280_v10  ;;  %v261_v15 = vrot.slane %v257_v12, 2  ;;  %v1052_v10 = vpack.c.bf16 %v5153_v9, %v5153_v9  ;;  %v1038_v12 = vld [vmem:[#allocation2 + $0x38] sm:$0xff] }
  0xa5   : > { %v290_v14 = vrot.slane %v286_v11, 7  ;;  %v287_v16 = vsel %vm5088_vm10, %v283_v13, 0.0  ;;  %v1035_v11 = vld [vmem:[#allocation2 + $0x18] sm:$0xff] }
  0xa6   : > { %v291_v17 = vrot.slane %v287_v16, 7  ;;  %265 = vst [vmem:[#allocation4 + $0x30] sm:$0xc0] %v261_v15  ;;  %1075 = vrot.lane.b32.xlu0 %v1052_v10, %s4982_s20  ;;  %v1046_v13 = vpack.c.bf16 %v1035_v11, %v1035_v11 }
  0xa7   : > { %294 = vst [vmem:[#allocation4 + $0x18] sm:$0xe] %v290_v14  ;;  %v1048_v14 = vpack.c.bf16 %v1038_v12, %v1038_v12 }
  0xa8   : > { %267 = vst [vmem:[#allocation4 + $0x18] sm:$0x1] %v261_v15  ;;  %1063 = vrot.lane.b32.xlu2 %v1046_v13, %s4982_s20 }
  0xa9   : > { %295 = vst [vmem:[#allocation4 + $0x10] sm:$0xe] %v291_v17  ;;  %v372_v21 = vpop.permute.xlu1 %371 }
  0xaa   : > { %v5103_v20 = vpop.permute.xlu0 %4389  ;;  %v378_v22 = vsel %vm377_vm11, %v372_v21, %v5064_v47 }
  0xab   : > { %382 = vst [vmem:[#allocation4 + $0x8] sm:$0xe0] %v378_v22  ;;  %v4391_v23 = vunpack.i.l.bf16 %v5103_v20  ;;  %v228_v42 = vpop.permute.xlu2 %227 }
  0xaf   : > { %v415_v37 = vld [vmem:[#allocation4 + $0x18] sm:$0xff] }
  0xb1   : > { %v203_v27 = vpop.permute.xlu1 %202 }
  0xb2   : > { %v346_v26 = vpop.permute.xlu0 %345  ;;  %v206_v29 = vsel %vm176_vm0, %v4391_v23, %v203_v27  ;;  %v417_v30 = vld [vmem:[#allocation4 + $0x8] sm:$0xff] }
  0xb3   : > { %v349_v28 = vsel %vm347_vm4, %v344_v56, %v346_v26  ;;  %v210_v32 = vsel %vm5067_vm6, %v206_v29, 0.0  ;;  %470 = vmatpush.msra.mxu2 %v417_v30 }
  0xb4   : > { %v353_v31 = vsel %vm5088_vm10, %v349_v28, 0.0  ;;  %212 = vst [vmem:[#allocation4 + $0x30] sm:$0x7] %v210_v32 }
  0xb5   : > { %v357_v35 = vrot.slane %v353_v31, 6  ;;  %471 = vmatpush.msra.mxu2 %v415_v37 }
  0xb7   : > { %361 = vst [vmem:[#allocation4 + $0x20] sm:$0x1c] %v357_v35 }
  0xb9   : > { %v395_v44 = vpop.permute.xlu1 %394 }
  0xba   : > { %v226_v43 = vpop.permute.xlu0 %225  ;;  %v398_v46 = vsel %vm396_vm1, %v5058_v41, %v395_v44 }
  0xbb   : > { %v230_v45 = vsel %vm229_vm12, %v5078_v61, %v226_v43  ;;  %v231_v48 = vsel %vm229_vm12, %v226_v43, %v228_v42  ;;  %v402_v49 = vsel %vm5071_vm7, %v398_v46, 0.0 }
  0xbc   : > { %234 = vst [vmem:[#allocation4 + $0x30] sm:$0x38] %v230_v45 }
  0xbd   : > { %404 = vst [vmem:[#allocation4 + $0x38] sm:$0x7] %v402_v49 }
  0xbe   : > { %235 = vst [vmem:[#allocation4] sm:$0x38] %v231_v48 }
  0xc1   : > { %v251_v51 = vpop.permute.xlu1 %250 }
  0xc2   : > { %v376_v50 = vpop.permute.xlu0 %375  ;;  %v254_v53 = vsel %vm252_vm9, %v5086_v6, %v251_v51  ;;  %v5148_v6 = vld [vmem:[#allocation2 + $0x58] sm:$0xff] }
  0xc3   : > { %v379_v52 = vsel %vm377_vm11, %v5064_v47, %v376_v50  ;;  %v413_v41 = vld [vmem:[#allocation4 + $0x30] sm:$0xff]  ;;  %v258_v56 = vsel %vm5071_vm7, %v254_v53, 0.0  ;;  %v1050_v8 = vpack.c.bf16 %v5148_v6, %v5148_v6 }
  0xc4   : > { %383 = vst [vmem:[#allocation4 + $0x20] sm:$0xe0] %v379_v52  ;;  %472 = vmatpush.msra.mxu2 %v413_v41  ;;  %v420_v57 = vld [vmem:[#allocation4 + $0x38] sm:$0x7]  ;;  %v262_v58 = vrot.slane %v258_v56, 2 }
  0xc5   : > { %3746 = vmatpush.msk.msra.mxu1 %vm450_vm3, %v420_v57  ;;  %3742 = vmatmul.msk.f32.vlgmr.msra.gmra.mxu2 %vm441_vm13, %v409_v33 }
  0xc6   : > { %266 = vst [vmem:[#allocation4] sm:$0xc0] %v262_v58  ;;  %1071 = vrot.lane.b32.xlu1 %v1050_v8, %s4982_s20 }
  0xc7   : > { %268 = vst [vmem:[#allocation4 + $0x10] sm:$0x1] %v262_v58 }
  0xc9   : > { %v205_v47 = vpop.permute.xlu1 %204 }
  0xca   : > { %v207_v61 = vsel %vm176_vm0, %v203_v27, %v205_v47 }
  0xcb   : > { %v418_v62 = vld [vmem:[#allocation4 + $0x20] sm:$0xff]  ;;  %v211_v63 = vsel %vm5088_vm10, %v207_v61, 0.0 }
  0xcc   : > { %499 = vmatpush.msra.mxu1 %v418_v62  ;;  %213 = vst [vmem:[#allocation4] sm:$0x7] %v211_v63 }
  0xcd   : > { %3743 = vmatmul.msk.f32.gmra.mxu2 %vm441_vm13, %v410_v34 }
  0xce   : > { %v416_v4 = vld [vmem:[#allocation4 + $0x10] sm:$0xff]  ;;  %1067 = vrot.lane.b32.xlu1 %v1048_v14, %s4982_s20 }
  0xcf   : > { %500 = vmatpush.msra.mxu1 %v416_v4 }
  0xd3   : > { %v414_v5 = vld [vmem:[#allocation4] sm:$0xff] }
  0xd4   : > { %501 = vmatpush.msra.mxu1 %v414_v5 }
  0xd5   : > { %3744 = vmatmul.msk.f32.gmra.mxu2 %vm441_vm13, %v411_v1  ;;  %3747 = vmatmul.msk.f32.vlgmr.msra.gmra.mxu1 %vm441_vm13, %v409_v33 }
  0xdd   : > { %3745 = vmatmul.msk.f32.gmra.mxu2 %vm441_vm13, %v412_v2  ;;  %3748 = vmatmul.msk.f32.gmra.mxu1 %vm441_vm13, %v410_v34 }
  0xe5   : > { %3749 = vmatmul.msk.f32.gmra.mxu1 %vm441_vm13, %v411_v1 }
  0xed   : > { %3750 = vmatmul.msk.f32.gmra.mxu1 %vm441_vm13, %v412_v2 }
  0xf8   : > { %v4396_v15 = vpop.permute.xlu0 %4395 }
  0xf9   : > { %v4397_v16 = vunpack.i.l.bf16 %v4396_v15  ;;  %v4398_v21 = vunpack.i.h.bf16 %v4396_v15 }
 0x115   : > { %v4402_v26 = vpop.permute.xlu1 %4401 }
 0x116   : > { %v4403_v31 = vunpack.i.l.bf16 %v4402_v26  ;;  %v4404_v46 = vunpack.i.h.bf16 %v4402_v26 }
 0x148   : > { %v474_v17 = vpop.f32.mrf.mxu2 }
 0x149   : > { %v475_v18 = vadd.f32 %v4397_v16, %v474_v17 }
 0x14b   : > { %vm515_vm14 = vcmp.ge.f32.partialorder %v475_v18, 0.0  ;;  %v523_v19 = vmul.f32 0.02, %v475_v18 }
 0x14d   : > { %v5160_v22 = vsel %vm515_vm14, %v475_v18, %v523_v19 }
 0x14e   : > { %539 = vst [vmem:[#allocation2 + $0x8] sm:$0xff] %v5160_v22  ;;  %v639_v23 = vpack.c.bf16 %v5160_v22, %v4976_v0  ;;  %v4425_v41 = vpack.i.bf16 %v5160_v22, %v4976_v0 }
 0x150   : > { %v477_v24 = vpop.f32.mrf.mxu2  ;;  %655 = vrot.lane.b32.xlu0 %v639_v23, %s4984_s22 }
 0x151   : > { %v478_v25 = vadd.f32 %v4398_v21, %v477_v24 }
 0x152   : > { %v503_v28 = vpop.f32.mrf.mxu1 }
 0x153   : > { %vm517_vm15 = vcmp.ge.f32.partialorder %v478_v25, 0.0  ;;  %v525_v27 = vmul.f32 0.02, %v478_v25  ;;  %v504_v29 = vadd.f32 %v4397_v16, %v503_v28 }
 0x155   : > { %v5166_v30 = vsel %vm517_vm15, %v478_v25, %v525_v27  ;;  %vm516_vm3 = vcmp.ge.f32.partialorder %v504_v29, 0.0  ;;  %v524_v32 = vmul.f32 0.02, %v504_v29  ;;  %v857_v57 = vld [vmem:[#allocation2 + $0x8] sm:$0xff] }
 0x156   : > { %541 = vst [vmem:[#allocation2 + $0x28] sm:$0xff] %v5166_v30  ;;  %v5170_v33 = vpack.i.bf16 %v5166_v30, %v1035_v11  ;;  %v4440_v25 = vpack.i.bf16 %v5166_v30, %v4976_v0 }
 0x157   : > { %v5172_v34 = vsel %vm516_vm3, %v504_v29, %v524_v32 }
 0x158   : > { %v480_v35 = vpop.f32.mrf.mxu2  ;;  %540 = vst [vmem:[#allocation2 + $0x10] sm:$0xff] %v5172_v34  ;;  %v4405_v37 = vpack.i.bf16 0.0, %v5172_v34  ;;  %v640_v38 = vpack.c.bf16 %v5172_v34, %v5172_v34  ;;  %v5196_v3 = vpack.i.bf16 %v5172_v34, %v5160_v22  ;;  %v1045_v16 = vpack.c.bf16 %v5172_v34, %v5160_v22 }
 0x159   : > { %v481_v39 = vadd.f32 %v4403_v31, %v480_v35  ;;  %v641_v22 = vpack.c.bf16 %v5166_v30, %v4976_v0 }
 0x15a   : > { %v506_v42 = vpop.f32.mrf.mxu1  ;;  %4406 = vrot.lane.b32.xlu2 %v4405_v37, %s4978_s16  ;;  %657 = vrot.lane.b32.xlu1 %v640_v38, %s4984_s22 }
 0x15b   : > { %vm519_vm13 = vcmp.ge.f32.partialorder %v481_v39, 0.0  ;;  %v527_v43 = vmul.f32 0.02, %v481_v39  ;;  %v507_v44 = vadd.f32 %v4398_v21, %v506_v42 }
 0x15d   : > { %v5180_v45 = vsel %vm519_vm13, %v481_v39, %v527_v43  ;;  %vm518_vm14 = vcmp.ge.f32.partialorder %v507_v44, 0.0  ;;  %v526_v48 = vmul.f32 0.02, %v507_v44  ;;  %v859_v4 = vld [vmem:[#allocation2 + $0x28] sm:$0xff]  ;;  %v3753_v43 = vld [vmem:[%s5110_s26] sm:$0xf] }
 0x15e   : > { %543 = vst [vmem:[#allocation2 + $0x48] sm:$0xff] %v5180_v45  ;;  %v643_v29 = vpack.c.bf16 %v5180_v45, %v4976_v0 }
 0x15f   : > { %v534_v49 = vsel %vm518_vm14, %v507_v44, %v526_v48  ;;  %v858_v51 = vld [vmem:[#allocation2 + $0x10] sm:$0xff]  ;;  %v4245_v44 = vld [vmem:[%s5110_s26 + $0x10] sm:$0xf0]  ;;  %vm679_vm14 = vcmask 1043456  }
 0x160   : > { %v483_v50 = vpop.f32.mrf.mxu2  ;;  %542 = vst [vmem:[#allocation2 + $0x30] sm:$0xff] %v534_v49  ;;  %v642_v52 = vpack.c.bf16 %v534_v49, %v534_v49  ;;  %v5185_v56 = vpack.i.bf16 %v1038_v12, %v534_v49  ;;  %v865_v60 = vpack.c.bf16 %v858_v51, %v857_v57  ;;  %v4445_v2 = vpack.i.bf16 %v534_v49, %v5166_v30 }
 0x161   : > { %v484_v53 = vadd.f32 %v4404_v46, %v483_v50  ;;  %v1047_v21 = vpack.c.bf16 %v534_v49, %v5166_v30  ;;  %v4435_v23 = vpack.i.bf16 0.0, %v534_v49  ;;  %v4475_v30 = vpack.i.bf16 %v5180_v45, %v4976_v0  ;;  %v3761_v49 = vld [vmem:[%s5110_s26 + $0x8] sm:$0xf]  ;;  %v4246_v50 = vld [vmem:[%s5110_s26 + $0x18] sm:$0xf0] }
 0x162   : > { %661 = vrot.lane.b32.xlu0 %v642_v52, %s4984_s22  ;;  %4411 = vrot.lane.b32.xlu2 %v4405_v37, %s4977_s15  ;;  %v509_v58 = vpop.f32.mrf.mxu1  ;;  %869 = vst [vmem:[#allocation3 + $0x80] sm:$0xff] %v865_v60  ;;  %v4392_v52 = vunpack.i.h.bf16 %v5103_v20  ;;  %v3762_v57 = vor.u32 %v4246_v50, %v3761_v49  ;;  %v4244_v20 = vld [vmem:[%s5110_s26 + $0x4] sm:$0xf] }
 0x163   : > { %vm521_vm15 = vcmp.ge.f32.partialorder %v484_v53, 0.0  ;;  %v529_v59 = vmul.f32 0.02, %v484_v53  ;;  %4426 = vrot.lane.b32.xlu1 %v4425_v41, %s4978_s16  ;;  %v510_v47 = vadd.f32 %v4403_v31, %v509_v58 }
 0x165   : > { %v5190_v61 = vsel %vm521_vm15, %v484_v53, %v529_v59  ;;  %vm520_vm3 = vcmp.ge.f32.partialorder %v510_v47, 0.0  ;;  %v528_v62 = vmul.f32 0.02, %v510_v47  ;;  %v861_v12 = vld [vmem:[#allocation2 + $0x48] sm:$0xff]  ;;  %vm1288_vm15 = vcmask 818176  }
 0x166   : > { %545 = vst [vmem:[#allocation2 + $0x68] sm:$0xff] %v5190_v61  ;;  %v4490_v35 = vpack.i.bf16 %v5190_v61, %v4976_v0  ;;  %v645_v38 = vpack.c.bf16 %v5190_v61, %v4976_v0  ;;  %v5263_v0 = vpop.permute.xlu1 %1071 }
 0x167   : > { %v536_v63 = vsel %vm520_vm3, %v510_v47, %v528_v62  ;;  %v860_v1 = vld [vmem:[#allocation2 + $0x30] sm:$0xff]  ;;  %vm1477_vm3 = vcmask 261120  }
 0x168   : > { %544 = vst [vmem:[#allocation2 + $0x50] sm:$0xff] %v536_v63  ;;  %v866_v5 = vpack.c.bf16 %v860_v1, %v859_v4  ;;  %v4455_v26 = vpack.i.bf16 0.0, %v536_v63  ;;  %v644_v27 = vpack.c.bf16 %v536_v63, %v536_v63  ;;  %v4465_v28 = vpack.i.bf16 %v536_v63, %v5180_v45 }
 0x169   : > { %v1049_v32 = vpack.c.bf16 %v536_v63, %v5180_v45  ;;  %v3754_v45 = vor.u32 %v4245_v44, %v3753_v43  ;;  %v3755_v63 = vld [vmem:[%s5110_s26 + $0x14] sm:$0xf0]  ;;  %v3773_v43 = vld [vmem:[%s5110_s26 + $0x30] sm:$0xf]  ;;  %v4249_v44 = vld [vmem:[%s5110_s26 + $0x40] sm:$0xf0] }
 0x16a   : > { %4446 = vrot.lane.b32.xlu0 %v4445_v2, %s4978_s16  ;;  %4416 = vrot.lane.b32.xlu2 %v5196_v3, %s4983_s21  ;;  %v512_v8 = vpop.f32.mrf.mxu1  ;;  %870 = vst [vmem:[#allocation3 + $0x88] sm:$0xff] %v866_v5  ;;  %v3765_v5 = vld [vmem:[%s5110_s26 + $0x28] sm:$0xf] }
 0x16b   : > { %4431 = vrot.lane.b32.xlu1 %v5196_v3, %s4979_s17  ;;  %v513_v10 = vadd.f32 %v4404_v46, %v512_v8  ;;  %v5275_v46 = vpop.permute.xlu0 %1075  ;;  %v4248_v8 = vld [vmem:[%s5110_s26 + $0x38] sm:$0xf0] }
 0x16d   : > { %vm522_vm13 = vcmp.ge.f32.partialorder %v513_v10, 0.0  ;;  %v530_v11 = vmul.f32 0.02, %v513_v10  ;;  %v863_v18 = vld [vmem:[#allocation2 + $0x68] sm:$0xff] }
 0x16e   : > { %v5281_v48 = vpop.permute.xlu1 %1067 }
 0x16f   : > { %v538_v13 = vsel %vm522_vm13, %v513_v10, %v530_v11  ;;  %v862_v14 = vld [vmem:[#allocation2 + $0x50] sm:$0xff] }
 0x170   : > { %546 = vst [vmem:[#allocation2 + $0x70] sm:$0xff] %v538_v13  ;;  %v1051_v15 = vpack.c.bf16 %v538_v13, %v5190_v61  ;;  %v867_v17 = vpack.c.bf16 %v862_v14, %v861_v12  ;;  %v5229_v31 = vpack.i.bf16 %v5153_v9, %v538_v13  ;;  %v646_v34 = vpack.c.bf16 %v538_v13, %v538_v13 }
 0x171   : > { %v5241_v9 = vpack.i.bf16 %v5190_v61, %v5148_v6  ;;  %v4495_v37 = vpack.i.bf16 %v538_v13, %v5190_v61  ;;  %v5254_v6 = vpop.permute.xlu2 %1063  ;;  %v3758_v14 = vor.u32 %v4244_v20, %v3755_v63 }
 0x172   : > { %4451 = vrot.lane.b32.xlu0 %v4445_v2, %s4977_s15  ;;  %4421 = vrot.lane.b32.xlu2 %v4425_v41, %s4977_s15  ;;  %871 = vst [vmem:[#allocation3 + $0x90] sm:$0xff] %v867_v17 }
 0x173   : > { %1061 = vrot.lane.b32.xlu1 %v1045_v16, %s4982_s20 }
 0x177   : > { %v864_v19 = vld [vmem:[#allocation2 + $0x70] sm:$0xff] }
 0x178   : > { %v868_v24 = vpack.c.bf16 %v864_v19, %v863_v18  ;;  %v3766_v18 = vor.u32 %v4248_v8, %v3765_v5  ;;  %v1078_v5 = vrot.slane %v5254_v6, 4 }
 0x17a   : > { %1065 = vrot.lane.b32.xlu0 %v1047_v21, %s4982_s20  ;;  %4436 = vrot.lane.b32.xlu2 %v4435_v23, %s4983_s21  ;;  %872 = vst [vmem:[#allocation3 + $0x98] sm:$0xff] %v868_v24 }
 0x17b   : > { %4441 = vrot.lane.b32.xlu1 %v4440_v25, %s4983_s21 }
 0x182   : > { %659 = vrot.lane.b32.xlu2 %v641_v22, %s4984_s22  ;;  %4461 = vrot.lane.b32.xlu0 %v4455_v26, %s4977_s15 }
 0x183   : > { %4456 = vrot.lane.b32.xlu1 %v4455_v26, %s4978_s16 }
 0x18a   : > { %665 = vrot.lane.b32.xlu2 %v644_v27, %s4984_s22  ;;  %4466 = vrot.lane.b32.xlu0 %v4465_v28, %s4983_s21 }
 0x18b   : > { %663 = vrot.lane.b32.xlu1 %v643_v29, %s4984_s22 }
 0x192   : > { %4476 = vrot.lane.b32.xlu2 %v4475_v30, %s4977_s15  ;;  %4471 = vrot.lane.b32.xlu0 %v4475_v30, %s4978_s16 }
 0x193   : > { %4486 = vrot.lane.b32.xlu1 %v5229_v31, %s4979_s17 }
 0x19a   : > { %4481 = vrot.lane.b32.xlu2 %v4465_v28, %s4979_s17  ;;  %1069 = vrot.lane.b32.xlu0 %v1049_v32, %s4982_s20 }
 0x19b   : > { %669 = vrot.lane.b32.xlu1 %v646_v34, %s4984_s22 }
 0x1a2   : > { %593 = vrot.lane.b32.xlu2 %v538_v13, %s4983_s21  ;;  %4506 = vrot.lane.b32.xlu0 %v5241_v9, %s4979_s17 }
 0x1a3   : > { %4491 = vrot.lane.b32.xlu1 %v4490_v35, %s4983_s21 }
 0x1aa   : > { %4496 = vrot.lane.b32.xlu2 %v4495_v37, %s4978_s16  ;;  %667 = vrot.lane.b32.xlu0 %v645_v38, %s4984_s22  ;;  %v3767_v38 = vld [vmem:[%s5110_s26 + $0x3c] sm:$0xf0] }
 0x1ab   : > { %4501 = vrot.lane.b32.xlu1 %v4495_v37, %s4977_s15  ;;  %v4247_v37 = vld [vmem:[%s5110_s26 + $0x2c] sm:$0xf] }
 0x1b2   : > { %1073 = vrot.lane.b32.xlu2 %v1051_v15, %s4982_s20  ;;  %4516 = vrot.lane.b32.xlu0 %v5185_v56, %s4979_s17 }
 0x1b3   : > { %4521 = vrot.lane.b32.xlu1 %v4465_v28, %s4980_s18 }
 0x1b4   : > { %v5261_v39 = vpop.permute.xlu2 %4406 }
 0x1b5   : > { %v4408_v27 = vunpack.i.l.bf16 %v5261_v39 }
 0x1ba   : > { %4511 = vrot.lane.b32.xlu2 %v5170_v33, %s4979_s17  ;;  %4531 = vrot.lane.b32.xlu0 %v5229_v31, %s4980_s18 }
 0x1bb   : > { %4536 = vrot.lane.b32.xlu1 %v5196_v3, %s4980_s18 }
 0x1bc   : > { %v5271_v42 = vpop.permute.xlu2 %4411 }
 0x1bd   : > { %v4413_v1 = vunpack.i.l.bf16 %v5271_v42  ;;  %v4414_v63 = vunpack.i.h.bf16 %v5271_v42 }
 0x1c2   : > { %4526 = vrot.lane.b32.xlu2 %v5241_v9, %s4980_s18  ;;  %4546 = vrot.lane.b32.xlu0 %v5185_v56, %s4980_s18  ;;  %v656_v62 = vpop.permute.xlu0 %655 }
 0x1c3   : > { %1276 = vrot.lane.b32.xlu1 %v3754_v45, %s4986_s27  ;;  %v671_v10 = vrot.slane %v656_v62, 4  ;;  %v4409_v45 = vunpack.i.h.bf16 %v5261_v39 }
 0x1c4   : > { %v4417_v51 = vpop.permute.xlu2 %4416 }
 0x1c5   : > { %v4419_v53 = vunpack.i.h.bf16 %v4417_v51  ;;  %v4418_v41 = vunpack.i.l.bf16 %v4417_v51 }
 0x1c7   : > { %v595_v58 = vsel %vm176_vm0, %v4392_v52, %v4418_v41  ;;  %v596_v59 = vsel %vm176_vm0, %v4418_v41, %v4419_v53 }
 0x1c8   : > { %v611_v60 = vsel %vm5067_vm6, %v595_v58, 0.0  ;;  %v612_v47 = vsel %vm5088_vm10, %v596_v59, 0.0 }
 0x1c9   : > { %v619_v61 = vpack.c.bf16 %v612_v47, %v611_v60 }
 0x1ca   : > { %4541 = vrot.lane.b32.xlu2 %v5170_v33, %s4980_s18  ;;  %1280 = vrot.lane.b32.xlu0 %v3762_v57, %s4986_s27  ;;  %v3770_v57 = vor.u32 %v4247_v37, %v3767_v38 }
 0x1cb   : > { %623 = vst [vmem:[#allocation3] sm:$0xff] %v619_v61  ;;  %4551 = vrot.lane.b32.xlu1 %v4465_v28, %s4981_s19 }
 0x1cc   : > { %v4422_v2 = vpop.permute.xlu2 %4421  ;;  %v658_v4 = vpop.permute.xlu1 %657 }
 0x1cd   : > { %v4424_v11 = vunpack.i.h.bf16 %v4422_v2  ;;  %v4423_v12 = vunpack.i.l.bf16 %v4422_v2  ;;  %v672_v13 = vrot.slane %v658_v4, 4 }
 0x1cf   : > { %v746_v15 = vsel %vm252_vm9, %v4424_v11, %v4413_v1  ;;  %v745_v16 = vsel %vm252_vm9, %v4423_v12, %v4424_v11  ;;  %v680_v17 = vsel %vm679_vm14, %v671_v10, %v672_v13 }
 0x1d0   : > { %v762_v19 = vsel %vm5071_vm7, %v746_v15, 0.0  ;;  %v761_v21 = vsel %vm5054_vm2, %v745_v16, 0.0  ;;  %v682_v23 = vsel %vm229_vm12, %v656_v62, %v680_v17  ;;  %v1080_v17 = vrot.slane %v5281_v48, 4 }
 0x1d1   : > { %v769_v24 = vpack.c.bf16 %v762_v19, %v761_v21  ;;  %693 = vst [vmem:[#allocation3 + $0x20] sm:$0xff] %v682_v23 }
 0x1d2   : > { %1278 = vrot.lane.b32.xlu2 %v3758_v14, %s4986_s27  ;;  %4561 = vrot.lane.b32.xlu0 %v5229_v31, %s4981_s19 }
 0x1d3   : > { %773 = vst [vmem:[#allocation3 + $0x40] sm:$0xff] %v769_v24  ;;  %1282 = vrot.lane.b32.xlu1 %v3766_v18, %s4986_s27 }
 0x1d4   : > { %v662_v25 = vpop.permute.xlu0 %661  ;;  %v5314_v22 = vpop.permute.xlu2 %4436 }
 0x1d5   : > { %v4427_v26 = vpop.permute.xlu1 %4426  ;;  %v674_v51 = vrot.slane %v662_v25, 4  ;;  %v4438_v21 = vunpack.i.l.bf16 %v5314_v22 }
 0x1d6   : > { %v4429_v28 = vunpack.i.h.bf16 %v4427_v26  ;;  %v4428_v29 = vunpack.i.l.bf16 %v4427_v26 }
 0x1d8   : > { %v826_v30 = vsel %vm281_vm8, %v4429_v28, %v4408_v27  ;;  %v825_v32 = vsel %vm281_vm8, %v4428_v29, %v4429_v28 }
 0x1d9   : > { %v842_v31 = vsel %vm5088_vm10, %v826_v30, 0.0  ;;  %v841_v34 = vsel %vm5067_vm6, %v825_v32, 0.0 }
 0x1da   : > { %v849_v35 = vpack.c.bf16 %v842_v31, %v841_v34  ;;  %4556 = vrot.lane.b32.xlu2 %v5241_v9, %s4981_s19  ;;  %4566 = vrot.lane.b32.xlu0 %v5196_v3, %s4981_s19  ;;  %v3774_v3 = vor.u32 %v4249_v44, %v3773_v43 }
 0x1db   : > { %4571 = vrot.lane.b32.xlu1 %v5170_v33, %s4981_s19 }
 0x1dc   : > { %853 = vst [vmem:[#allocation3 + $0x60] sm:$0xff] %v849_v35  ;;  %v4447_v49 = vpop.permute.xlu0 %4446  ;;  %v660_v50 = vpop.permute.xlu2 %659 }
 0x1dd   : > { %v4449_v52 = vunpack.i.h.bf16 %v4447_v49  ;;  %v4448_v53 = vunpack.i.l.bf16 %v4447_v49  ;;  %v673_v41 = vrot.slane %v660_v50, 4  ;;  %v5334_v9 = vpop.permute.xlu1 %4431 }
 0x1df   : > { %v827_v58 = vsel %vm281_vm8, %v4409_v45, %v4448_v53  ;;  %v828_v33 = vsel %vm281_vm8, %v4448_v53, %v4449_v52  ;;  %v683_v59 = vsel %vm679_vm14, %v673_v41, %v674_v51  ;;  %v4439_v52 = vunpack.i.h.bf16 %v5314_v22 }
 0x1e0   : > { %v843_v39 = vsel %vm5067_vm6, %v827_v58, 0.0  ;;  %v844_v60 = vsel %vm5088_vm10, %v828_v33, 0.0  ;;  %v684_v47 = vsel %vm229_vm12, %v660_v50, %v683_v59 }
 0x1e1   : > { %v850_v61 = vpack.c.bf16 %v844_v60, %v843_v39  ;;  %694 = vst [vmem:[#allocation3 + $0x28] sm:$0xff] %v684_v47 }
 0x1e2   : > { %1284 = vrot.lane.b32.xlu2 %v3770_v57, %s4986_s27  ;;  %1286 = vrot.lane.b32.xlu0 %v3774_v3, %s4986_s27 }
 0x1e3   : > { %854 = vst [vmem:[#allocation3 + $0x68] sm:$0xff] %v850_v61 }
 0x1e4   : > { %v4452_v62 = vpop.permute.xlu0 %4451  ;;  %v666_v20 = vpop.permute.xlu2 %665 }
 0x1e5   : > { %v4454_v1 = vunpack.i.h.bf16 %v4452_v62  ;;  %v4453_v2 = vunpack.i.l.bf16 %v4452_v62  ;;  %v1062_v4 = vpop.permute.xlu1 %1061  ;;  %v676_v3 = vrot.slane %v666_v20, 4 }
 0x1e6   : > { %v1077_v8 = vrot.slane %v1062_v4, 4 }
 0x1e7   : > { %v747_v10 = vsel %vm252_vm9, %v4414_v63, %v4453_v2  ;;  %v748_v11 = vsel %vm252_vm9, %v4453_v2, %v4454_v1 }
 0x1e8   : > { %v763_v12 = vsel %vm5054_vm2, %v747_v10, 0.0  ;;  %v764_v13 = vsel %vm5071_vm7, %v748_v11, 0.0  ;;  %v1085_v14 = vsel %vm679_vm14, %v1077_v8, %v1078_v5 }
 0x1e9   : > { %v770_v15 = vpack.c.bf16 %v764_v13, %v763_v12  ;;  %v1087_v42 = vsel %vm377_vm11, %v1062_v4, %v1085_v14 }
 0x1ea   : > { %1098 = vst [vmem:[#allocation3 + $0xe0] sm:$0xff] %v1087_v42  ;;  %4576 = vrot.lane.b32.xlu2 %v5185_v56, %s4981_s19 }
 0x1eb   : > { %774 = vst [vmem:[#allocation3 + $0x48] sm:$0xff] %v770_v15 }
 0x1ec   : > { %v1066_v6 = vpop.permute.xlu0 %1065  ;;  %v4477_v16 = vpop.permute.xlu2 %4476 }
 0x1ed   : > { %v1079_v18 = vrot.slane %v1066_v6, 4  ;;  %v4442_v19 = vpop.permute.xlu1 %4441  ;;  %v4479_v29 = vunpack.i.h.bf16 %v4477_v16  ;;  %v4478_v30 = vunpack.i.l.bf16 %v4477_v16 }
 0x1ee   : > { %v4444_v23 = vunpack.i.h.bf16 %v4442_v19  ;;  %v4443_v24 = vunpack.i.l.bf16 %v4442_v19  ;;  %v1082_v19 = vrot.slane %v5263_v0, 4 }
 0x1ef   : > { %v1088_v25 = vsel %vm679_vm14, %v1079_v18, %v1080_v17  ;;  %v749_v35 = vsel %vm252_vm9, %v4478_v30, %v4479_v29 }
 0x1f0   : > { %v1089_v26 = vsel %vm377_vm11, %v1066_v6, %v1088_v25  ;;  %v598_v27 = vsel %vm176_vm0, %v4444_v23, %v4438_v21  ;;  %v597_v28 = vsel %vm176_vm0, %v4443_v24, %v4444_v23  ;;  %v765_v44 = vsel %vm5054_vm2, %v749_v35, 0.0 }
 0x1f1   : > { %1099 = vst [vmem:[#allocation3 + $0xe8] sm:$0xff] %v1089_v26  ;;  %v614_v56 = vsel %vm5088_vm10, %v598_v27, 0.0  ;;  %v613_v48 = vsel %vm5067_vm6, %v597_v28, 0.0  ;;  %v1084_v21 = vrot.slane %v5275_v46, 4  ;;  %v4434_v25 = vunpack.i.h.bf16 %v5334_v9 }
 0x1f2   : > { %v620_v32 = vpack.c.bf16 %v614_v56, %v613_v48  ;;  %v4433_v26 = vunpack.i.l.bf16 %v5334_v9  ;;  %v4263_v9 = vld [vmem:[#allocation3 + $0x64] sm:$0xf0] }
 0x1f4   : > { %624 = vst [vmem:[#allocation3 + $0x8] sm:$0xff] %v620_v32  ;;  %v5368_v31 = vpop.permute.xlu0 %4461  ;;  %v5370_v34 = vpop.permute.xlu2 %4481  ;;  %v1001_v35 = vsel %vm347_vm4, %v4433_v26, %v4434_v25 }
 0x1f5   : > { %v4457_v37 = vpop.permute.xlu1 %4456  ;;  %v4463_v38 = vunpack.i.l.bf16 %v5368_v31 }
 0x1f6   : > { %v4459_v62 = vunpack.i.h.bf16 %v4457_v37  ;;  %v4458_v20 = vunpack.i.l.bf16 %v4457_v37  ;;  %v4484_v37 = vunpack.i.h.bf16 %v5370_v34 }
 0x1f7   : > { %v750_v43 = vsel %vm252_vm9, %v4479_v29, %v4463_v38  ;;  %v4483_v38 = vunpack.i.l.bf16 %v5370_v34 }
 0x1f8   : > { %v766_v45 = vsel %vm5071_vm7, %v750_v43, 0.0 }
 0x1f9   : > { %v771_v49 = vpack.c.bf16 %v766_v45, %v765_v44 }
 0x1fb   : > { %775 = vst [vmem:[#allocation3 + $0x50] sm:$0xff] %v771_v49 }
 0x1fc   : > { %v5379_v50 = vpop.permute.xlu2 %593  ;;  %v4467_v51 = vpop.permute.xlu0 %4466 }
 0x1fd   : > { %v664_v53 = vpop.permute.xlu1 %663  ;;  %v4469_v41 = vunpack.i.h.bf16 %v4467_v51  ;;  %v4468_v57 = vunpack.i.l.bf16 %v4467_v51  ;;  %v3827_v51 = vld [vmem:[#allocation3 + $0x68] sm:$0xf0] }
 0x1fe   : > { %v675_v58 = vrot.slane %v664_v53, 4 }
 0x1ff   : > { %v599_v33 = vsel %vm176_vm0, %v4439_v52, %v4468_v57  ;;  %v600_v59 = vsel %vm176_vm0, %v4468_v57, %v4469_v41  ;;  %v1017_v52 = vsel %vm5067_vm6, %v1001_v35, 0.0 }
 0x200   : > { %v685_v39 = vsel %vm679_vm14, %v675_v58, %v676_v3  ;;  %v615_v60 = vsel %vm5067_vm6, %v599_v33, 0.0  ;;  %v616_v47 = vsel %vm5088_vm10, %v600_v59, 0.0  ;;  %v3825_v33 = vld [vmem:[#allocation3 + $0x60] sm:$0xf] }
 0x201   : > { %v686_v61 = vsel %vm229_vm12, %v664_v53, %v685_v39  ;;  %v621_v22 = vpack.c.bf16 %v616_v47, %v615_v60  ;;  %v3826_v47 = vor.u32 %v4263_v9, %v3825_v33 }
 0x202   : > { %695 = vst [vmem:[#allocation3 + $0x30] sm:$0xff] %v686_v61  ;;  %v4262_v61 = vld [vmem:[#allocation3 + $0x64] sm:$0xf] }
 0x203   : > { %625 = vst [vmem:[#allocation3 + $0x10] sm:$0xff] %v621_v22  ;;  %v1005_v22 = vsel %vm347_vm4, %v4483_v38, %v4484_v37 }
 0x204   : > { %v4497_v63 = vpop.permute.xlu2 %4496  ;;  %v4472_v1 = vpop.permute.xlu0 %4471 }
 0x205   : > { %v4499_v2 = vunpack.i.h.bf16 %v4497_v63  ;;  %v4498_v4 = vunpack.i.l.bf16 %v4497_v63  ;;  %v5390_v5 = vpop.permute.xlu1 %4486  ;;  %v4474_v8 = vunpack.i.h.bf16 %v4472_v1  ;;  %v4473_v10 = vunpack.i.l.bf16 %v4472_v1 }
 0x206   : > { %v4489_v30 = vunpack.i.h.bf16 %v5390_v5  ;;  %v4488_v0 = vunpack.i.l.bf16 %v5390_v5  ;;  %v3830_v63 = vor.u32 %v4262_v61, %v3827_v51 }
 0x207   : > { %v831_v11 = vsel %vm281_vm8, %v4459_v62, %v4498_v4  ;;  %v832_v12 = vsel %vm281_vm8, %v4498_v4, %v4499_v2  ;;  %v830_v13 = vsel %vm281_vm8, %v4474_v8, %v4458_v20  ;;  %v829_v14 = vsel %vm281_vm8, %v4473_v10, %v4474_v8 }
 0x208   : > { %v847_v15 = vsel %vm5067_vm6, %v831_v11, 0.0  ;;  %v848_v42 = vsel %vm5088_vm10, %v832_v12, 0.0  ;;  %v846_v6 = vsel %vm5088_vm10, %v830_v13, 0.0  ;;  %v845_v17 = vsel %vm5067_vm6, %v829_v14, 0.0 }
 0x209   : > { %v852_v16 = vpack.c.bf16 %v848_v42, %v847_v15  ;;  %v851_v18 = vpack.c.bf16 %v846_v6, %v845_v17  ;;  %v1008_v53 = vsel %vm347_vm4, %v4488_v0, %v4489_v30  ;;  %v1021_v17 = vsel %vm5067_vm6, %v1005_v22, 0.0 }
 0x20a   : > { %v1024_v1 = vsel %vm5088_vm10, %v1008_v53, 0.0 }
 0x20b   : > { %856 = vst [vmem:[#allocation3 + $0x78] sm:$0xff] %v852_v16 }
 0x20c   : > { %855 = vst [vmem:[#allocation3 + $0x70] sm:$0xff] %v851_v18  ;;  %v1074_v23 = vpop.permute.xlu2 %1073  ;;  %v1070_v24 = vpop.permute.xlu0 %1069 }
 0x20d   : > { %v1083_v27 = vrot.slane %v1074_v23, 4  ;;  %v5408_v28 = vpop.permute.xlu1 %669  ;;  %v1081_v56 = vrot.slane %v1070_v24, 4 }
 0x20e   : > { %v678_v26 = vrot.slane %v5408_v28, 4 }
 0x20f   : > { %v1092_v48 = vsel %vm679_vm14, %v1083_v27, %v1084_v21  ;;  %v1090_v29 = vsel %vm679_vm14, %v1081_v56, %v1082_v19 }
 0x210   : > { %v1093_v46 = vsel %vm377_vm11, %v1074_v23, %v1092_v48  ;;  %v1091_v32 = vsel %vm377_vm11, %v1070_v24, %v1090_v29  ;;  %v4279_v23 = vld [vmem:[#allocation3 + $0xe4] sm:$0xf0]  ;;  %v3889_v48 = vld [vmem:[#allocation3 + $0xe0] sm:$0xf]  ;;  %v4464_v29 = vunpack.i.h.bf16 %v5368_v31 }
 0x211   : > { %1101 = vst [vmem:[#allocation3 + $0xf8] sm:$0xff] %v1093_v46  ;;  %v3890_v46 = vor.u32 %v4279_v23, %v3889_v48 }
 0x212   : > { %1100 = vst [vmem:[#allocation3 + $0xf0] sm:$0xff] %v1091_v32  ;;  %v4265_v43 = vld [vmem:[#allocation3 + $0x74] sm:$0xf0]  ;;  %v3835_v44 = vld [vmem:[#allocation3 + $0x78] sm:$0xf0] }
 0x213   : > { %v3833_v45 = vld [vmem:[#allocation3 + $0x70] sm:$0xf]  ;;  %v4264_v49 = vld [vmem:[#allocation3 + $0x74] sm:$0xf] }
 0x214   : > { %v5422_v41 = vpop.permute.xlu2 %4511  ;;  %v4507_v57 = vpop.permute.xlu0 %4506  ;;  %v3834_v3 = vor.u32 %v4265_v43, %v3833_v45  ;;  %v3838_v58 = vor.u32 %v4264_v49, %v3835_v44 }
 0x215   : > { %v4513_v59 = vunpack.i.l.bf16 %v5422_v41  ;;  %v4492_v34 = vpop.permute.xlu1 %4491  ;;  %v4509_v39 = vunpack.i.h.bf16 %v4507_v57  ;;  %v4508_v60 = vunpack.i.l.bf16 %v4507_v57  ;;  %v4514_v49 = vunpack.i.h.bf16 %v5422_v41 }
 0x216   : > { %v4494_v62 = vunpack.i.h.bf16 %v4492_v34  ;;  %v4493_v20 = vunpack.i.l.bf16 %v4492_v34  ;;  %1484 = vmatpush.bf16.msrb.mxu2 %v3834_v3  ;;  %1541 = vmatpush.bf16.msrb.mxu1 %v3838_v58 }
 0x217   : > { %v1002_v2 = vsel %vm347_vm4, %v4434_v25, %v4513_v59  ;;  %v1007_v4 = vsel %vm347_vm4, %v4509_v39, %v4488_v0  ;;  %v1006_v5 = vsel %vm347_vm4, %v4484_v37, %v4508_v60 }
 0x218   : > { %v1018_v8 = vsel %vm5088_vm10, %v1002_v2, 0.0  ;;  %v602_v10 = vsel %vm176_vm0, %v4494_v62, %v5379_v50  ;;  %v601_v11 = vsel %vm176_vm0, %v4493_v20, %v4494_v62  ;;  %v1023_v12 = vsel %vm5067_vm6, %v1007_v4, 0.0  ;;  %v4281_v13 = vld [vmem:[#allocation3 + $0xf4] sm:$0xf0]  ;;  %v3817_v2 = vld [vmem:[#allocation3 + $0x50] sm:$0xf] }
 0x219   : > { %v1025_v14 = vpack.c.bf16 %v1018_v8, %v1017_v52  ;;  %v618_v15 = vsel %vm5088_vm10, %v602_v10, 0.0  ;;  %v617_v42 = vsel %vm5067_vm6, %v601_v11, 0.0  ;;  %v1028_v6 = vpack.c.bf16 %v1024_v1, %v1023_v12  ;;  %v3897_v16 = vld [vmem:[#allocation3 + $0xf0] sm:$0xf]  ;;  %v4260_v4 = vld [vmem:[#allocation3 + $0x54] sm:$0xf] }
 0x21a   : > { %v622_v18 = vpack.c.bf16 %v618_v15, %v617_v42  ;;  %v1022_v50 = vsel %vm5088_vm10, %v1006_v5, 0.0  ;;  %1485 = vmatpush.bf16.msrb.mxu2 %v3826_v47  ;;  %1542 = vmatpush.bf16.msrb.mxu1 %v3830_v63  ;;  %v3898_v19 = vor.u32 %v4281_v13, %v3897_v16  ;;  %v4259_v63 = vld [vmem:[#allocation3 + $0x44] sm:$0xf0]  ;;  %v3811_v5 = vld [vmem:[#allocation3 + $0x48] sm:$0xf0]  ;;  %v4987_v42 = vmov 60  }
 0x21b   : > { %1029 = vst [vmem:[#allocation3 + $0xc0] sm:$0xff] %v1025_v14  ;;  %v1027_v21 = vpack.c.bf16 %v1022_v50, %v1021_v17  ;;  %4580 = vset.pattern.permute.xlu1 %v4987_v42  ;;  %v1185_v16 = vld [vmem:[%s5110_s26 + $0x1c] sm:$0xf]  ;;  %4586 = vset.pattern.permute.xlu2 %v4987_v42 }
 0x21c   : > { %626 = vst [vmem:[#allocation3 + $0x18] sm:$0xff] %v622_v18  ;;  %1503 = vmatpush.bf16.msra.mxu3 %v3898_v19  ;;  %v5446_v24 = vpop.permute.xlu2 %4526  ;;  %v668_v25 = vpop.permute.xlu0 %667  ;;  %v3809_v19 = vld [vmem:[#allocation3 + $0x40] sm:$0xf]  ;;  %v1227_v23 = vunpack.c.l.bf16 %v1185_v16  ;;  %v4252_v42 = vld [vmem:[#allocation3 + $0x14] sm:$0xf] }
 0x21d   : > { %1032 = vst [vmem:[#allocation3 + $0xd8] sm:$0xff] %v1028_v6  ;;  %v4502_v27 = vpop.permute.xlu1 %4501  ;;  %v677_v56 = vrot.slane %v668_v25, 4  ;;  %v4528_v3 = vunpack.i.l.bf16 %v5446_v24  ;;  %v4529_v11 = vunpack.i.h.bf16 %v5446_v24  ;;  %v1183_v6 = vld [vmem:[%s5110_s26 + $0x8] sm:$0xf] }
 0x21e   : > { %1031 = vst [vmem:[#allocation3 + $0xd0] sm:$0xff] %v1027_v21  ;;  %v4504_v30 = vunpack.i.h.bf16 %v4502_v27  ;;  %v4503_v0 = vunpack.i.l.bf16 %v4502_v27  ;;  %v1226_v21 = vunpack.c.l.bf16 %v1183_v6  ;;  %v3810_v27 = vor.u32 %v4259_v63, %v3809_v19  ;;  %v4254_v63 = vld [vmem:[#allocation3 + $0x24] sm:$0xf]  ;;  %v4251_v19 = vld [vmem:[#allocation3 + $0x4] sm:$0xf0] }
 0x21f   : > { %v687_v32 = vsel %vm679_vm14, %v677_v56, %v678_v26  ;;  %v4258_v56 = vld [vmem:[#allocation3 + $0x44] sm:$0xf] }
 0x220   : > { %v751_v35 = vsel %vm252_vm9, %v4464_v29, %v4503_v0  ;;  %v752_v9 = vsel %vm252_vm9, %v4503_v0, %v4504_v30  ;;  %v688_v37 = vsel %vm229_vm12, %v668_v25, %v687_v32  ;;  %1504 = vmatpush.bf16.msra.mxu3 %v3890_v46  ;;  %v3814_v30 = vor.u32 %v4258_v56, %v3811_v5  ;;  %v3777_v56 = vld [vmem:[#allocation3] sm:$0xf] }
 0x221   : > { %v767_v28 = vsel %vm5054_vm2, %v751_v35, 0.0  ;;  %v768_v38 = vsel %vm5071_vm7, %v752_v9, 0.0  ;;  %696 = vst [vmem:[#allocation3 + $0x38] sm:$0xff] %v688_v37  ;;  %v4581_v0 = vpack.i.bf16 %v1227_v23, %v1226_v21  ;;  %v3779_v21 = vld [vmem:[#allocation3 + $0x8] sm:$0xf0] }
 0x222   : > { %v772_v31 = vpack.c.bf16 %v768_v38, %v767_v28 }
 0x223   : > { %4582 = vperm.xlu1 %4580, %v4581_v0   ;;  %v3778_v0 = vor.u32 %v4251_v19, %v3777_v56 }
 0x224   : > { %776 = vst [vmem:[#allocation3 + $0x58] sm:$0xff] %v772_v31  ;;  %v5458_v43 = vpop.permute.xlu2 %4541  ;;  %v4517_v44 = vpop.permute.xlu0 %4516  ;;  %v4277_v45 = vld [vmem:[#allocation3 + $0xd4] sm:$0xf0] }
 0x225   : > { %v4522_v51 = vpop.permute.xlu1 %4521  ;;  %v4519_v52 = vunpack.i.h.bf16 %v4517_v44  ;;  %v4518_v53 = vunpack.i.l.bf16 %v4517_v44  ;;  %v3881_v57 = vld [vmem:[#allocation3 + $0xd0] sm:$0xf]  ;;  %v4543_v25 = vunpack.i.l.bf16 %v5458_v43 }
 0x226   : > { %v4524_v58 = vunpack.i.h.bf16 %v4522_v51  ;;  %v4523_v33 = vunpack.i.l.bf16 %v4522_v51  ;;  %v3882_v59 = vor.u32 %v4277_v45, %v3881_v57  ;;  %v4256_v57 = vld [vmem:[#allocation3 + $0x34] sm:$0xf] }
 0x227   : > { %v1003_v34 = vsel %vm347_vm4, %v4514_v49, %v4518_v53  ;;  %v1004_v39 = vsel %vm347_vm4, %v4518_v53, %v4519_v52  ;;  %v3873_v49 = vld [vmem:[#allocation3 + $0xc0] sm:$0xf]  ;;  %v3801_v52 = vld [vmem:[#allocation3 + $0x30] sm:$0xf] }
 0x228   : > { %v926_v60 = vsel %vm318_vm5, %v4524_v58, %v4528_v3  ;;  %v925_v47 = vsel %vm318_vm5, %v4523_v33, %v4524_v58  ;;  %v1019_v41 = vsel %vm5067_vm6, %v1003_v34, 0.0  ;;  %v1020_v61 = vsel %vm5088_vm10, %v1004_v39, 0.0  ;;  %1505 = vmatpush.bf16.msra.mxu3 %v3882_v59  ;;  %v4257_v31 = vld [vmem:[#allocation3 + $0x34] sm:$0xf0]  ;;  %v3803_v44 = vld [vmem:[#allocation3 + $0x38] sm:$0xf0] }
 0x229   : > { %v942_v22 = vsel %vm5071_vm7, %v926_v60, 0.0  ;;  %v941_v62 = vsel %vm5054_vm2, %v925_v47, 0.0  ;;  %v1026_v20 = vpack.c.bf16 %v1020_v61, %v1019_v41  ;;  %v3802_v33 = vor.u32 %v4257_v31, %v3801_v52  ;;  %v4255_v41 = vld [vmem:[#allocation3 + $0x24] sm:$0xf0]  ;;  %v3795_v61 = vld [vmem:[#allocation3 + $0x28] sm:$0xf0] }
 0x22a   : > { %v947_v1 = vpack.c.bf16 %v942_v22, %v941_v62  ;;  %v3806_v59 = vor.u32 %v4256_v57, %v3803_v44  ;;  %v4544_v34 = vunpack.i.h.bf16 %v5458_v43  ;;  %v3891_v31 = vld [vmem:[#allocation3 + $0xe8] sm:$0xf0] }
 0x22b   : > { %1030 = vst [vmem:[#allocation3 + $0xc8] sm:$0xff] %v1026_v20  ;;  %v4261_v8 = vld [vmem:[#allocation3 + $0x54] sm:$0xf0]  ;;  %v3819_v10 = vld [vmem:[#allocation3 + $0x58] sm:$0xf0] }
 0x22c   : > { %951 = vst [vmem:[#allocation3 + $0xb0] sm:$0xff] %v947_v1  ;;  %v5475_v12 = vpop.permute.xlu2 %1278  ;;  %v4532_v13 = vpop.permute.xlu0 %4531  ;;  %v3818_v14 = vor.u32 %v4261_v8, %v3817_v2  ;;  %v3822_v15 = vor.u32 %v4260_v4, %v3819_v10  ;;  %v3793_v20 = vld [vmem:[#allocation3 + $0x20] sm:$0xf]  ;;  %v3798_v4 = vor.u32 %v4254_v63, %v3795_v61  ;;  %v4253_v8 = vld [vmem:[#allocation3 + $0x14] sm:$0xf0] }
 0x22d   : > { %v4537_v17 = vpop.permute.xlu1 %4536  ;;  %v4534_v18 = vunpack.i.h.bf16 %v4532_v13  ;;  %v4533_v50 = vunpack.i.l.bf16 %v4532_v13  ;;  %v3794_v2 = vor.u32 %v4255_v41, %v3793_v20  ;;  %v3787_v10 = vld [vmem:[#allocation3 + $0x18] sm:$0xf0] }
 0x22e   : > { %v4539_v24 = vunpack.i.h.bf16 %v4537_v17  ;;  %v4538_v26 = vunpack.i.l.bf16 %v4537_v17  ;;  %1486 = vmatpush.bf16.msrb.mxu2 %v3818_v14  ;;  %1543 = vmatpush.bf16.msrb.mxu1 %v3822_v15  ;;  %v3785_v14 = vld [vmem:[#allocation3 + $0x10] sm:$0xf]  ;;  %v3790_v17 = vor.u32 %v4252_v42, %v3787_v10 }
 0x22f   : > { %v927_v48 = vsel %vm318_vm5, %v4529_v11, %v4533_v50  ;;  %v928_v29 = vsel %vm318_vm5, %v4533_v50, %v4534_v18  ;;  %v3786_v16 = vor.u32 %v4253_v8, %v3785_v14 }
 0x230   : > { %v922_v46 = vsel %vm318_vm5, %v4539_v24, %v4543_v25  ;;  %v921_v32 = vsel %vm318_vm5, %v4538_v26, %v4539_v24  ;;  %v943_v35 = vsel %vm5054_vm2, %v927_v48, 0.0  ;;  %v944_v9 = vsel %vm5071_vm7, %v928_v29, 0.0  ;;  %v4280_v26 = vld [vmem:[#allocation3 + $0xf4] sm:$0xf]  ;;  %v4250_v48 = vld [vmem:[#allocation3 + $0x4] sm:$0xf] }
 0x231   : > { %v938_v37 = vsel %vm5071_vm7, %v922_v46, 0.0  ;;  %v937_v28 = vsel %vm5054_vm2, %v921_v32, 0.0  ;;  %v948_v38 = vpack.c.bf16 %v944_v9, %v943_v35  ;;  %v3782_v46 = vor.u32 %v4250_v48, %v3779_v21 }
 0x232   : > { %v945_v45 = vpack.c.bf16 %v938_v37, %v937_v28  ;;  %1487 = vmatpush.bf16.msrb.mxu2 %v3810_v27  ;;  %1544 = vmatpush.bf16.msrb.mxu1 %v3814_v30  ;;  %v4275_v51 = vld [vmem:[#allocation3 + $0xc4] sm:$0xf0]  ;;  %v3899_v27 = vld [vmem:[#allocation3 + $0xf8] sm:$0xf0] }
 0x233   : > { %952 = vst [vmem:[#allocation3 + $0xb8] sm:$0xff] %v948_v38  ;;  %v3874_v53 = vor.u32 %v4275_v51, %v3873_v49  ;;  %v3865_v11 = vld [vmem:[#allocation3 + $0xb0] sm:$0xf]  ;;  %v3902_v9 = vor.u32 %v4280_v26, %v3899_v27  ;;  %v4278_v51 = vld [vmem:[#allocation3 + $0xe4] sm:$0xf] }
 0x234   : > { %949 = vst [vmem:[#allocation3 + $0xa0] sm:$0xff] %v945_v45  ;;  %v5492_v3 = vpop.permute.xlu2 %4556  ;;  %v4547_v58 = vpop.permute.xlu0 %4546  ;;  %v4272_v27 = vld [vmem:[#allocation3 + $0xb4] sm:$0xf] }
 0x235   : > { %v5495_v39 = vpop.permute.xlu1 %1276  ;;  %v4549_v60 = vunpack.i.h.bf16 %v4547_v58  ;;  %v4548_v47 = vunpack.i.l.bf16 %v4547_v58  ;;  %1506 = vmatpush.bf16.msra.mxu3 %v3874_v53  ;;  %v4558_v23 = vunpack.i.l.bf16 %v5492_v3  ;;  %v4559_v52 = vunpack.i.h.bf16 %v5492_v3 }
 0x236   : > { %1488 = vmatpush.bf16.msrb.mxu2 %v3802_v33  ;;  %1545 = vmatpush.bf16.msrb.mxu1 %v3806_v59  ;;  %v1289_v49 = vsel %vm1288_vm15, %v5495_v39, %v5475_v12  ;;  %v3894_v33 = vor.u32 %v4278_v51, %v3891_v31  ;;  %v3849_v59 = vld [vmem:[#allocation3 + $0x90] sm:$0xf]  ;;  %v1187_v31 = vld [vmem:[%s5110_s26 + $0x30] sm:$0xf] }
 0x237   : > { %v923_v22 = vsel %vm318_vm5, %v4544_v34, %v4548_v47  ;;  %v924_v62 = vsel %vm318_vm5, %v4548_v47, %v4549_v60  ;;  %v4269_v34 = vld [vmem:[#allocation3 + $0x94] sm:$0xf0]  ;;  %v4276_v60 = vld [vmem:[#allocation3 + $0xd4] sm:$0xf]  ;;  %v3883_v47 = vld [vmem:[#allocation3 + $0xd8] sm:$0xf0]  ;;  %v1228_v51 = vunpack.c.l.bf16 %v1187_v31 }
 0x238   : > { %v939_v1 = vsel %vm5054_vm2, %v923_v22, 0.0  ;;  %v940_v43 = vsel %vm5071_vm7, %v924_v62, 0.0  ;;  %v3850_v62 = vor.u32 %v4269_v34, %v3849_v59  ;;  %v3886_v63 = vor.u32 %v4276_v60, %v3883_v47 }
 0x239   : > { %v946_v5 = vpack.c.bf16 %v940_v43, %v939_v1  ;;  %v4267_v1 = vld [vmem:[#allocation3 + $0x84] sm:$0xf0] }
 0x23a   : > { %1489 = vmatpush.bf16.msrb.mxu2 %v3794_v2  ;;  %1546 = vmatpush.bf16.msrb.mxu1 %v3798_v4  ;;  %v4273_v13 = vld [vmem:[#allocation3 + $0xb4] sm:$0xf0]  ;;  %v3875_v4 = vld [vmem:[#allocation3 + $0xc8] sm:$0xf0]  ;;  %v3867_v19 = vld [vmem:[#allocation3 + $0xb8] sm:$0xf0] }
 0x23b   : > { %950 = vst [vmem:[#allocation3 + $0xa8] sm:$0xff] %v946_v5  ;;  %v3866_v15 = vor.u32 %v4273_v13, %v3865_v11  ;;  %v3857_v28 = vld [vmem:[#allocation3 + $0xa0] sm:$0xf]  ;;  %v4274_v11 = vld [vmem:[#allocation3 + $0xc4] sm:$0xf] }
 0x23c   : > { %v5503_v6 = vpop.permute.xlu0 %1280  ;;  %v5505_v18 = vpop.permute.xlu2 %1284  ;;  %v3841_v5 = vld [vmem:[#allocation3 + $0x80] sm:$0xf]  ;;  %v3878_v42 = vor.u32 %v4274_v11, %v3875_v4 }
 0x23d   : > { %v4552_v50 = vpop.permute.xlu1 %4551  ;;  %1507 = vmatpush.bf16.msra.mxu3 %v3866_v15  ;;  %v3842_v10 = vor.u32 %v4267_v1, %v3841_v5  ;;  %v1290_v26 = vsel %vm1288_vm15, %v5475_v12, %v5503_v6  ;;  %v5554_v1 = vld [vmem:[#allocation2 + $0x58] sm:$0xff] }
 0x23e   : > { %v4554_v25 = vunpack.i.h.bf16 %v4552_v50  ;;  %v4553_v24 = vunpack.i.l.bf16 %v4552_v50  ;;  %1490 = vmatpush.bf16.msrb.mxu2 %v3786_v16  ;;  %1547 = vmatpush.bf16.msrb.mxu1 %v3790_v17 }
 0x240   : > { %v1155_v29 = vsel %vm396_vm1, %v4554_v25, %v4558_v23  ;;  %v1154_v30 = vsel %vm396_vm1, %v4553_v24, %v4554_v25 }
 0x241   : > { %v1171_v32 = vsel %vm5071_vm7, %v1155_v29, 0.0  ;;  %v1170_v35 = vsel %vm5054_vm2, %v1154_v30, 0.0 }
 0x242   : > { %v1176_v37 = vpack.c.bf16 %v1171_v32, %v1170_v35  ;;  %1491 = vmatpush.bf16.msrb.mxu2 %v3778_v0  ;;  %1548 = vmatpush.bf16.msrb.mxu1 %v3782_v46  ;;  %v4271_v38 = vld [vmem:[#allocation3 + $0xa4] sm:$0xf0]  ;;  %v3859_v56 = vld [vmem:[#allocation3 + $0xa8] sm:$0xf0]  ;;  %v3870_v0 = vor.u32 %v4272_v27, %v3867_v19 }
 0x243   : > { %v3858_v44 = vor.u32 %v4271_v38, %v3857_v28 }
 0x244   : > { %1180 = vst [vmem:[#allocation3 + $0x110] sm:$0xff] %v1176_v37  ;;  %v4562_v45 = vpop.permute.xlu0 %4561  ;;  %v4577_v41 = vpop.permute.xlu2 %4576 }
 0x245   : > { %v5518_v53 = vpop.permute.xlu1 %1282  ;;  %v4564_v57 = vunpack.i.h.bf16 %v4562_v45  ;;  %v4563_v58 = vunpack.i.l.bf16 %v4562_v45  ;;  %1492 = vmatmul.bf16.vlgmr.msrb.gmra.mxu2 %v1289_v49  ;;  %1549 = vmatmul.bf16.vlgmr.msrb.gmra.mxu1 %v1289_v49  ;;  %v4579_v43 = vunpack.i.h.bf16 %v4577_v41  ;;  %v4578_v2 = vunpack.i.l.bf16 %v4577_v41  ;;  %v4270_v49 = vld [vmem:[#allocation3 + $0xa4] sm:$0xf]  ;;  %v3843_v41 = vld [vmem:[#allocation3 + $0x88] sm:$0xf0] }
 0x246   : > { %1560 = vmatpush.bf16.msra.mxu2 %v3902_v9  ;;  %1508 = vmatpush.bf16.msra.mxu3 %v3858_v44  ;;  %v1189_v44 = vld [vmem:[%s5110_s26 + $0x44] sm:$0xf]  ;;  %v1291_v45 = vsel %vm1288_vm15, %v5518_v53, %v5505_v18 }
 0x247   : > { %v1156_v61 = vsel %vm396_vm1, %v4559_v52, %v4563_v58  ;;  %v1157_v39 = vsel %vm396_vm1, %v4563_v58, %v4564_v57  ;;  %v1153_v16 = vsel %vm396_vm1, %v4578_v2, %v4579_v43  ;;  %v1229_v52 = vunpack.c.l.bf16 %v1189_v44  ;;  %v4268_v58 = vld [vmem:[#allocation3 + $0x94] sm:$0xf] }
 0x248   : > { %v1172_v3 = vsel %vm5054_vm2, %v1156_v61, 0.0  ;;  %v1173_v22 = vsel %vm5071_vm7, %v1157_v39, 0.0  ;;  %v1169_v48 = vsel %vm5071_vm7, %v1153_v16, 0.0  ;;  %v3862_v57 = vor.u32 %v4270_v49, %v3859_v56 }
 0x249   : > { %v1177_v20 = vpack.c.bf16 %v1173_v22, %v1172_v3  ;;  %v4587_v59 = vpack.i.bf16 %v1229_v52, %v1228_v51  ;;  %v2131_v43 = vpack.c.bf16 %v5554_v1, %v5554_v1 }
 0x24a   : > { %1561 = vmatpush.bf16.msra.mxu2 %v3894_v33  ;;  %1509 = vmatpush.bf16.msra.mxu3 %v3850_v62  ;;  %v3851_v33 = vld [vmem:[#allocation3 + $0x98] sm:$0xf0]  ;;  %v4266_v62 = vld [vmem:[#allocation3 + $0x84] sm:$0xf] }
 0x24b   : > { %1181 = vst [vmem:[#allocation3 + $0x118] sm:$0xff] %v1177_v20  ;;  %v3913_v46 = vld [vmem:[#allocation3 + $0x110] sm:$0xf]  ;;  %v4284_v12 = vld [vmem:[#allocation3 + $0x114] sm:$0xf]  ;;  %4588 = vperm.xlu2 %4586, %v4587_v59   ;;  %v3854_v34 = vor.u32 %v4268_v58, %v3851_v33  ;;  %v3846_v20 = vor.u32 %v4266_v62, %v3843_v41 }
 0x24c   : > { %v4567_v8 = vpop.permute.xlu0 %4566 }
 0x24d   : > { %v4572_v13 = vpop.permute.xlu1 %4571  ;;  %v4569_v14 = vunpack.i.h.bf16 %v4567_v8  ;;  %v4568_v15 = vunpack.i.l.bf16 %v4567_v8 }
 0x24e   : > { %1562 = vmatpush.bf16.msra.mxu2 %v3886_v63  ;;  %v4574_v17 = vunpack.i.h.bf16 %v4572_v13  ;;  %v4573_v50 = vunpack.i.l.bf16 %v4572_v13  ;;  %1510 = vmatpush.bf16.msra.mxu3 %v3842_v10 }
 0x24f   : > { %v1150_v21 = vsel %vm396_vm1, %v4568_v15, %v4569_v14 }
 0x250   : > { %v1152_v23 = vsel %vm396_vm1, %v4574_v17, %v4578_v2  ;;  %v1151_v25 = vsel %vm396_vm1, %v4569_v14, %v4573_v50  ;;  %v1166_v24 = vsel %vm5054_vm2, %v1150_v21, 0.0  ;;  %v2116_v2 = vld [vmem:[#allocation2 + $0x18] sm:$0xff] }
 0x251   : > { %v1168_v29 = vsel %vm5054_vm2, %v1152_v23, 0.0  ;;  %v1167_v30 = vsel %vm5071_vm7, %v1151_v25, 0.0  ;;  %1511 = vmatmul.bf16.vlgmr.msra.gmra.mxu3 %v1290_v26  ;;  %v2127_v5 = vpack.c.bf16 %v2116_v2, %v2116_v2 }
 0x252   : > { %1563 = vmatpush.bf16.msra.mxu2 %v3878_v42  ;;  %v1175_v32 = vpack.c.bf16 %v1169_v48, %v1168_v29  ;;  %v1174_v35 = vpack.c.bf16 %v1167_v30, %v1166_v24  ;;  %v4285_v9 = vld [vmem:[#allocation3 + $0x114] sm:$0xf0]  ;;  %v3915_v37 = vld [vmem:[#allocation3 + $0x118] sm:$0xf0]  ;;  %v5577_v48 = vld [vmem:[#allocation2] sm:$0xff] }
 0x253   : > { %v3914_v28 = vor.u32 %v4285_v9, %v3913_v46  ;;  %v3918_v38 = vor.u32 %v4284_v12, %v3915_v37  ;;  %2152 = vrot.lane.b32.xlu2 %v2131_v43, %s4982_s20  ;;  %2144 = vrot.lane.b32.xlu0 %v2127_v5, %s4982_s20 }
 0x254   : > { %1179 = vst [vmem:[#allocation3 + $0x108] sm:$0xff] %v1175_v32  ;;  %v1287_v39 = vpop.permute.xlu0 %1286 }
 0x255   : > { %1178 = vst [vmem:[#allocation3 + $0x100] sm:$0xff] %v1174_v35  ;;  %1497 = vmatmul.bf16.gmra.mxu2 %v1291_v45  ;;  %1554 = vmatmul.bf16.gmra.mxu1 %v1291_v45  ;;  %v1292_v63 = vsel %vm1288_vm15, %v5505_v18, %v1287_v39  ;;  %v5559_v18 = vld [vmem:[#allocation2 + $0x38] sm:$0xff] }
 0x256   : > { %1564 = vmatpush.bf16.msra.mxu2 %v3870_v0  ;;  %1528 = vmatpush.bf16.msra.mxu0 %v3914_v28  ;;  %v2129_v4 = vpack.c.bf16 %v5559_v18, %v5559_v18 }
 0x257   : > { %1585 = vmatpush.bf16.msrb.mxu3 %v3918_v38 }
 0x25a   : > { %1565 = vmatpush.bf16.msra.mxu2 %v3862_v57 }
 0x25b   : > { %v4283_v60 = vld [vmem:[#allocation3 + $0x104] sm:$0xf0]  ;;  %v3907_v47 = vld [vmem:[#allocation3 + $0x108] sm:$0xf0]  ;;  %2148 = vrot.lane.b32.xlu2 %v2129_v4, %s4982_s20 }
 0x25c   : > { %v3905_v53 = vld [vmem:[#allocation3 + $0x100] sm:$0xf]  ;;  %v4282_v61 = vld [vmem:[#allocation3 + $0x104] sm:$0xf] }
 0x25d   : > { %v3906_v3 = vor.u32 %v4283_v60, %v3905_v53  ;;  %v3910_v22 = vor.u32 %v4282_v61, %v3907_v47 }
 0x25e   : > { %1566 = vmatpush.bf16.msra.mxu2 %v3854_v34 }
 0x25f   : > { %1529 = vmatpush.bf16.msra.mxu0 %v3906_v3  ;;  %1586 = vmatpush.bf16.msrb.mxu3 %v3910_v22 }
 0x261   : > { %1516 = vmatmul.bf16.gmra.mxu3 %v1292_v63 }
 0x262   : > { %1567 = vmatpush.bf16.msra.mxu2 %v3846_v20  ;;  %3919 = vmatmul.msk.bf16.vlgmr.msra.gmra.mxu0 %vm1477_vm3, %v5503_v6 }
 0x265   : > { %1568 = vmatmul.bf16.vlgmr.msra.gmra.mxu2 %v1290_v26 }
 0x271   : > { %3921 = vmatmul.msk.bf16.vlgmr.msrb.gmra.mxu3 %vm1477_vm3, %v5503_v6  ;;  %v5565_v6 = vld [vmem:[#allocation2 + $0x78] sm:$0xff] }
 0x272   : > { %3920 = vmatmul.msk.bf16.gmra.mxu0 %vm1477_vm3, %v1287_v39  ;;  %v2133_v8 = vpack.c.bf16 %v5565_v6, %v5565_v6 }
 0x274   : > { %2156 = vrot.lane.b32.xlu1 %v2133_v8, %s4982_s20 }
 0x275   : > { %1573 = vmatmul.bf16.gmra.mxu2 %v1292_v63 }
 0x281   : > { %3922 = vmatmul.msk.bf16.gmra.mxu3 %vm1477_vm3, %v1287_v39 }
 0x295   : > { %v5570_v14 = vpop.permute.xlu1 %4582 }
 0x296   : > { %v4584_v42 = vunpack.i.l.bf16 %v5570_v14  ;;  %v4585_v25 = vunpack.i.h.bf16 %v5570_v14 }
 0x2a5   : > { %v5581_v0 = vpop.permute.xlu2 %4588 }
 0x2a6   : > { %v4590_v9 = vunpack.i.l.bf16 %v5581_v0  ;;  %v4591_v33 = vunpack.i.h.bf16 %v5581_v0 }
 0x2c2   : > { %v1550_v32 = vpop.f32.mrf.mxu1 }
 0x2c3   : > { %v1551_v57 = vadd.f32 %v4584_v42, %v1550_v32 }
 0x2c8   : > { %v1493_v10 = vpop.f32.mrf.mxu2 }
 0x2c9   : > { %v1494_v16 = vadd.f32 %v4584_v42, %v1493_v10 }
 0x2ca   : > { %v1552_v58 = vpop.f32.mrf.mxu1 }
 0x2cb   : > { %v1553_v43 = vadd.f32 %v4585_v25, %v1552_v58 }
 0x2d0   : > { %v1495_v11 = vpop.f32.mrf.mxu2 }
 0x2d1   : > { %v1496_v26 = vadd.f32 %v4585_v25, %v1495_v11 }
 0x2d2   : > { %v1555_v8 = vpop.f32.mrf.mxu1 }
 0x2d4   : > { %v1512_v13 = vpop.f32.mrf.mxu3 }
 0x2d5   : > { %v1513_v50 = vadd.f32 %v1512_v13, %v1494_v16 }
 0x2d8   : > { %v1498_v15 = vpop.f32.mrf.mxu2 }
 0x2d9   : > { %v1499_v28 = vadd.f32 %v4590_v9, %v1498_v15 }
 0x2dc   : > { %v1514_v17 = vpop.f32.mrf.mxu3 }
 0x2dd   : > { %v1515_v30 = vadd.f32 %v1514_v17, %v1496_v26  ;;  %v1556_v17 = vadd.f32 %v4590_v9, %v1555_v8 }
 0x2df   : > { %v1531_v19 = vpop.f32.mrf.mxu0 }
 0x2e0   : > { %v1532_v21 = vadd.f32 %v1531_v19, %v1513_v50  ;;  %v1500_v23 = vpop.f32.mrf.mxu2 }
 0x2e1   : > { %v1501_v60 = vadd.f32 %v4591_v33, %v1500_v23 }
 0x2e2   : > { %vm1598_vm13 = vcmp.ge.f32.partialorder %v1532_v21, 0.0  ;;  %v1606_v24 = vmul.f32 0.02, %v1532_v21 }
 0x2e4   : > { %v5574_v27 = vsel %vm1598_vm13, %v1532_v21, %v1606_v24  ;;  %v1517_v56 = vpop.f32.mrf.mxu3 }
 0x2e5   : > { %1622 = vst [vmem:[#allocation2 + $0x8] sm:$0xff] %v5574_v27  ;;  %v4597_v29 = vpack.i.bf16 %v5574_v27, %v5577_v48  ;;  %v1518_v49 = vadd.f32 %v1517_v56, %v1499_v28  ;;  %v1722_v22 = vpack.c.bf16 %v5574_v27, %v5577_v48 }
 0x2e7   : > { %v1533_v46 = vpop.f32.mrf.mxu0  ;;  %4598 = vrot.lane.b32.xlu2 %v4597_v29, %s4978_s16  ;;  %4593 = vrot.lane.b32.xlu0 %v4597_v29, %s4983_s21 }
 0x2e8   : > { %v1534_v35 = vadd.f32 %v1533_v46, %v1515_v30  ;;  %v1569_v37 = vpop.f32.mrf.mxu2 }
 0x2e9   : > { %v1570_v34 = vadd.f32 %v1569_v37, %v1551_v57 }
 0x2ea   : > { %vm1600_vm15 = vcmp.ge.f32.partialorder %v1534_v35, 0.0  ;;  %v1608_v12 = vmul.f32 0.02, %v1534_v35 }
 0x2ec   : > { %v5586_v38 = vsel %vm1600_vm15, %v1534_v35, %v1608_v12  ;;  %v1519_v31 = vpop.f32.mrf.mxu3  ;;  %v1938_v21 = vld [vmem:[#allocation2 + $0x8] sm:$0xff] }
 0x2ed   : > { %1624 = vst [vmem:[#allocation2 + $0x28] sm:$0xff] %v5586_v38  ;;  %v5590_v44 = vpack.i.bf16 %v5586_v38, %v2116_v2  ;;  %v1724_v45 = vpack.c.bf16 %v5586_v38, %v5577_v48  ;;  %v1520_v3 = vadd.f32 %v1519_v31, %v1501_v60 }
 0x2ef   : > { %v1536_v51 = vpop.f32.mrf.mxu0  ;;  %4608 = vrot.lane.b32.xlu1 %v5590_v44, %s4979_s17  ;;  %1742 = vrot.lane.b32.xlu2 %v1724_v45, %s4984_s22 }
 0x2f0   : > { %v1537_v52 = vadd.f32 %v1536_v51, %v1518_v49  ;;  %4603 = vrot.lane.b32.xlu0 %v4597_v29, %s4977_s15  ;;  %v1571_v41 = vpop.f32.mrf.mxu2  ;;  %v1557_v29 = vpop.f32.mrf.mxu1 }
 0x2f1   : > { %v1572_v5 = vadd.f32 %v1571_v41, %v1553_v43  ;;  %v1558_v46 = vadd.f32 %v4591_v33, %v1557_v29 }
 0x2f2   : > { %vm1602_vm13 = vcmp.ge.f32.partialorder %v1537_v52, 0.0  ;;  %v1610_v59 = vmul.f32 0.02, %v1537_v52 }
 0x2f4   : > { %v5599_v47 = vsel %vm1602_vm13, %v1537_v52, %v1610_v59  ;;  %v1588_v53 = vpop.f32.mrf.mxu3  ;;  %v1940_v9 = vld [vmem:[#allocation2 + $0x28] sm:$0xff] }
 0x2f5   : > { %1626 = vst [vmem:[#allocation2 + $0x48] sm:$0xff] %v5599_v47  ;;  %v1589_v61 = vadd.f32 %v1588_v53, %v1570_v34  ;;  %v4617_v39 = vpack.i.bf16 %v5599_v47, %v5577_v48  ;;  %v1726_v49 = vpack.c.bf16 %v5599_v47, %v5577_v48 }
 0x2f7   : > { %vm1599_vm15 = vcmp.ge.f32.partialorder %v1589_v61, 0.0  ;;  %v1607_v62 = vmul.f32 0.02, %v1589_v61  ;;  %v1538_v20 = vpop.f32.mrf.mxu0  ;;  %4618 = vrot.lane.b32.xlu1 %v4617_v39, %s4978_s16 }
 0x2f8   : > { %v1539_v63 = vadd.f32 %v1538_v20, %v1520_v3  ;;  %1738 = vrot.lane.b32.xlu0 %v1722_v22, %s4984_s22  ;;  %v1574_v42 = vpop.f32.mrf.mxu2 }
 0x2f9   : > { %v5608_v2 = vsel %vm1599_vm15, %v1589_v61, %v1607_v62 }
 0x2fa   : > { %1623 = vst [vmem:[#allocation2 + $0x10] sm:$0xff] %v5608_v2  ;;  %vm1604_vm13 = vcmp.ge.f32.partialorder %v1539_v63, 0.0  ;;  %v1612_v4 = vmul.f32 0.02, %v1539_v63  ;;  %v2126_v26 = vpack.c.bf16 %v5608_v2, %v5574_v27  ;;  %v4632_v56 = vpack.i.bf16 %v5577_v48, %v5608_v2 }
 0x2fb   : > { %v1723_v59 = vpack.c.bf16 %v5608_v2, %v5608_v2  ;;  %v5650_v61 = vpack.i.bf16 %v5608_v2, %v5574_v27  ;;  %v2145_v2 = vpop.permute.xlu0 %2144 }
 0x2fc   : > { %v5611_v10 = vsel %vm1604_vm13, %v1539_v63, %v1612_v4  ;;  %v1590_v11 = vpop.f32.mrf.mxu3  ;;  %v1942_v58 = vld [vmem:[#allocation2 + $0x48] sm:$0xff]  ;;  %v4286_v4 = vld [vmem:[%s5110_s26 + $0xc] sm:$0xf] }
 0x2fd   : > { %1628 = vst [vmem:[#allocation2 + $0x68] sm:$0xff] %v5611_v10  ;;  %v1591_v13 = vadd.f32 %v1590_v11, %v1572_v5  ;;  %v5616_v14 = vpack.i.bf16 %v5611_v10, %v5554_v1  ;;  %v1728_v15 = vpack.c.bf16 %v5611_v10, %v5577_v48  ;;  %v1575_v1 = vadd.f32 %v1574_v42, %v1556_v17  ;;  %v3927_v5 = vld [vmem:[%s5110_s26 + $0x1c] sm:$0xf0]  ;;  %v5702_v11 = vpop.permute.xlu1 %2156  ;;  %v3933_v17 = vld [vmem:[%s5110_s26 + $0x10] sm:$0xf] }
 0x2ff   : > { %vm1601_vm15 = vcmp.ge.f32.partialorder %v1591_v13, 0.0  ;;  %v1609_v16 = vmul.f32 0.02, %v1591_v13  ;;  %4628 = vrot.lane.b32.xlu1 %v5616_v14, %s4979_s17  ;;  %1750 = vrot.lane.b32.xlu2 %v1728_v15, %s4984_s22  ;;  %v4287_v15 = vld [vmem:[%s5110_s26 + $0x18] sm:$0xf0] }
 0x300   : > { %4613 = vrot.lane.b32.xlu0 %v4617_v39, %s4983_s21  ;;  %v1576_v0 = vpop.f32.mrf.mxu2 }
 0x301   : > { %v1617_v50 = vsel %vm1601_vm15, %v1591_v13, %v1609_v16  ;;  %v1939_v19 = vld [vmem:[#allocation2 + $0x10] sm:$0xff]  ;;  %v1577_v12 = vadd.f32 %v1576_v0, %v1558_v46  ;;  %v3925_v13 = vld [vmem:[%s5110_s26 + $0x8] sm:$0xf]  ;;  %v3937_v46 = vld [vmem:[%s5110_s26 + $0x30] sm:$0xf] }
 0x302   : > { %1625 = vst [vmem:[#allocation2 + $0x30] sm:$0xff] %v1617_v50  ;;  %v1946_v23 = vpack.c.bf16 %v1939_v19, %v1938_v21  ;;  %v4652_v45 = vpack.i.bf16 %v1617_v50, %v5586_v38  ;;  %v5646_v53 = vpack.i.bf16 %v5559_v18, %v1617_v50  ;;  %v2128_v3 = vpack.c.bf16 %v1617_v50, %v5586_v38 }
 0x303   : > { %v1725_v22 = vpack.c.bf16 %v1617_v50, %v1617_v50  ;;  %v4288_v50 = vld [vmem:[%s5110_s26 + $0x20] sm:$0xf0]  ;;  %v3926_v19 = vor.u32 %v4287_v15, %v3925_v13 }
 0x304   : > { %v1593_v25 = vpop.f32.mrf.mxu3  ;;  %1950 = vst [vmem:[#allocation3 + $0x80] sm:$0xff] %v1946_v23  ;;  %v1944_v34 = vld [vmem:[#allocation2 + $0x68] sm:$0xff]  ;;  %v3934_v21 = vor.u32 %v4288_v50, %v3933_v17 }
 0x305   : > { %v1594_v24 = vadd.f32 %v1593_v25, %v1575_v1  ;;  %v2159_v25 = vrot.slane %v2145_v2, 4 }
 0x307   : > { %vm1603_vm13 = vcmp.ge.f32.partialorder %v1594_v24, 0.0  ;;  %v1611_v30 = vmul.f32 0.02, %v1594_v24  ;;  %2142 = vrot.lane.b32.xlu2 %v2126_v26, %s4982_s20  ;;  %4633 = vrot.lane.b32.xlu1 %v4632_v56, %s4983_s21 }
 0x308   : > { %4623 = vrot.lane.b32.xlu0 %v4617_v39, %s4977_s15 }
 0x309   : > { %v5631_v32 = vsel %vm1603_vm13, %v1594_v24, %v1611_v30  ;;  %v1941_v35 = vld [vmem:[#allocation2 + $0x30] sm:$0xff]  ;;  %vm2368_vm13 = vcmask 547840  }
 0x30a   : > { %1627 = vst [vmem:[#allocation2 + $0x50] sm:$0xff] %v5631_v32  ;;  %v1947_v37 = vpack.c.bf16 %v1941_v35, %v1940_v9  ;;  %v4677_v39 = vpack.i.bf16 %v5577_v48, %v5631_v32  ;;  %v4687_v27 = vpack.i.bf16 %v5631_v32, %v5599_v47  ;;  %v5669_v48 = vpop.permute.xlu2 %2152  ;;  %v2130_v20 = vpack.c.bf16 %v5631_v32, %v5599_v47  ;;  %v3945_v9 = vld [vmem:[%s5110_s26 + $0x38] sm:$0xf] }
 0x30c   : > { %v1595_v28 = vpop.f32.mrf.mxu3  ;;  %1951 = vst [vmem:[#allocation3 + $0x88] sm:$0xff] %v1947_v37 }
 0x30d   : > { %v1596_v31 = vadd.f32 %v1595_v28, %v1577_v12  ;;  %v4291_v12 = vld [vmem:[%s5110_s26 + $0x48] sm:$0xf0] }
 0x30f   : > { %vm1605_vm15 = vcmp.ge.f32.partialorder %v1596_v31, 0.0  ;;  %v1613_v51 = vmul.f32 0.02, %v1596_v31  ;;  %4653 = vrot.lane.b32.xlu2 %v4652_v45, %s4983_s21  ;;  %4643 = vrot.lane.b32.xlu1 %v4632_v56, %s4977_s15 }
 0x310   : > { %1746 = vrot.lane.b32.xlu0 %v1726_v49, %s4984_s22  ;;  %v3939_v49 = vld [vmem:[%s5110_s26 + $0x44] sm:$0xf0] }
 0x311   : > { %v1621_v52 = vsel %vm1605_vm15, %v1596_v31, %v1613_v51  ;;  %v1943_v57 = vld [vmem:[#allocation2 + $0x50] sm:$0xff] }
 0x312   : > { %1629 = vst [vmem:[#allocation2 + $0x70] sm:$0xff] %v1621_v52  ;;  %v1948_v33 = vpack.c.bf16 %v1943_v57, %v1942_v58  ;;  %v4697_v18 = vpack.i.bf16 %v1621_v52, %v5611_v10  ;;  %v5674_v38 = vpop.permute.xlu2 %2148  ;;  %v4712_v62 = vpack.i.bf16 %v5565_v6, %v1621_v52  ;;  %v2132_v63 = vpack.c.bf16 %v1621_v52, %v5611_v10 }
 0x313   : > { %v1727_v6 = vpack.c.bf16 %v5631_v32, %v5631_v32  ;;  %v1729_v47 = vpack.c.bf16 %v1621_v52, %v1621_v52  ;;  %v3930_v10 = vor.u32 %v4286_v4, %v3927_v5  ;;  %v4290_v32 = vld [vmem:[%s5110_s26 + $0x40] sm:$0xf0] }
 0x314   : > { %1952 = vst [vmem:[#allocation3 + $0x90] sm:$0xff] %v1948_v33  ;;  %v3938_v51 = vor.u32 %v4290_v32, %v3937_v46  ;;  %v3946_v33 = vor.u32 %v4291_v12, %v3945_v9 }
 0x317   : > { %4663 = vrot.lane.b32.xlu2 %v4652_v45, %s4977_s15  ;;  %1740 = vrot.lane.b32.xlu1 %v1723_v59, %s4984_s22 }
 0x318   : > { %4638 = vrot.lane.b32.xlu0 %v4632_v56, %s4978_s16 }
 0x319   : > { %v1945_v60 = vld [vmem:[#allocation2 + $0x70] sm:$0xff] }
 0x31a   : > { %v1949_v41 = vpack.c.bf16 %v1945_v60, %v1944_v34 }
 0x31c   : > { %1953 = vst [vmem:[#allocation3 + $0x98] sm:$0xff] %v1949_v41 }
 0x31f   : > { %4668 = vrot.lane.b32.xlu2 %v5646_v53, %s4979_s17  ;;  %4658 = vrot.lane.b32.xlu1 %v4652_v45, %s4978_s16  ;;  %v4289_v45 = vld [vmem:[%s5110_s26 + $0x34] sm:$0xf] }
 0x320   : > { %4648 = vrot.lane.b32.xlu0 %v5650_v61, %s4979_s17  ;;  %v3942_v52 = vor.u32 %v4289_v45, %v3939_v49 }
 0x327   : > { %4678 = vrot.lane.b32.xlu2 %v4677_v39, %s4978_s16  ;;  %2146 = vrot.lane.b32.xlu1 %v2128_v3, %s4982_s20 }
 0x328   : > { %1744 = vrot.lane.b32.xlu0 %v1725_v22, %s4984_s22 }
 0x32f   : > { %4698 = vrot.lane.b32.xlu2 %v4697_v18, %s4983_s21  ;;  %4673 = vrot.lane.b32.xlu1 %v4677_v39, %s4983_s21 }
 0x330   : > { %4688 = vrot.lane.b32.xlu0 %v4687_v27, %s4979_s17 }
 0x337   : > { %4708 = vrot.lane.b32.xlu2 %v4697_v18, %s4977_s15  ;;  %4683 = vrot.lane.b32.xlu1 %v4677_v39, %s4977_s15 }
 0x338   : > { %4703 = vrot.lane.b32.xlu0 %v4697_v18, %s4978_s16 }
 0x33f   : > { %4713 = vrot.lane.b32.xlu2 %v4712_v62, %s4979_s17  ;;  %2150 = vrot.lane.b32.xlu1 %v2130_v20, %s4982_s20 }
 0x340   : > { %2154 = vrot.lane.b32.xlu0 %v2132_v63, %s4982_s20 }
 0x341   : > { %v5683_v43 = vpop.permute.xlu2 %4598 }
 0x347   : > { %4718 = vrot.lane.b32.xlu2 %v5616_v14, %s4980_s18  ;;  %4693 = vrot.lane.b32.xlu1 %v4687_v27, %s4980_s18 }
 0x348   : > { %4723 = vrot.lane.b32.xlu0 %v4712_v62, %s4980_s18 }
 0x349   : > { %v5697_v8 = vpop.permute.xlu2 %1742 }
 0x34f   : > { %4733 = vrot.lane.b32.xlu2 %v5590_v44, %s4980_s18  ;;  %1748 = vrot.lane.b32.xlu1 %v1727_v6, %s4984_s22 }
 0x350   : > { %1752 = vrot.lane.b32.xlu0 %v1729_v47, %s4984_s22 }
 0x357   : > { %2358 = vrot.lane.b32.xlu2 %v3930_v10, %s4988_s28  ;;  %4728 = vrot.lane.b32.xlu1 %v5650_v61, %s4980_s18 }
 0x358   : > { %4738 = vrot.lane.b32.xlu0 %v5646_v53, %s4980_s18 }
 0x359   : > { %v5708_v42 = vpop.permute.xlu2 %1750  ;;  %v5710_v16 = vpop.permute.xlu0 %4593 }
 0x35a   : > { %v4596_v37 = vunpack.i.h.bf16 %v5710_v16  ;;  %v4595_v28 = vunpack.i.l.bf16 %v5710_v16 }
 0x35c   : > { %v1678_v59 = vsel %vm176_vm0, %v4595_v28, %v4596_v37 }
 0x35d   : > { %v1694_v60 = vsel %vm5067_vm6, %v1678_v59, 0.0 }
 0x35f   : > { %4748 = vrot.lane.b32.xlu2 %v5616_v14, %s4981_s19  ;;  %2356 = vrot.lane.b32.xlu1 %v3926_v19, %s4988_s28 }
 0x360   : > { %2360 = vrot.lane.b32.xlu0 %v3934_v21, %s4988_s28 }
 0x361   : > { %v5718_v1 = vpop.permute.xlu1 %4608  ;;  %v2143_v23 = vpop.permute.xlu2 %2142 }
 0x362   : > { %v5720_v24 = vpop.permute.xlu0 %4603  ;;  %v2158_v26 = vrot.slane %v2143_v23, 4  ;;  %v4611_v41 = vunpack.i.h.bf16 %v5718_v1 }
 0x363   : > { %v4605_v20 = vunpack.i.l.bf16 %v5720_v24 }
 0x364   : > { %v2166_v56 = vsel %vm679_vm14, %v2158_v26, %v2159_v25 }
 0x365   : > { %v2167_v29 = vsel %vm377_vm11, %v2143_v23, %v2166_v56 }
 0x366   : > { %2178 = vst [vmem:[#allocation3 + $0xe0] sm:$0xff] %v2167_v29 }
 0x367   : > { %4763 = vrot.lane.b32.xlu2 %v5590_v44, %s4981_s19  ;;  %4743 = vrot.lane.b32.xlu1 %v4687_v27, %s4981_s19 }
 0x368   : > { %4753 = vrot.lane.b32.xlu0 %v4712_v62, %s4981_s19 }
 0x369   : > { %v5728_v14 = vpop.permute.xlu1 %4618  ;;  %v4654_v30 = vpop.permute.xlu2 %4653 }
 0x36a   : > { %v5730_v0 = vpop.permute.xlu0 %1738  ;;  %v4656_v57 = vunpack.i.h.bf16 %v4654_v30  ;;  %v4655_v58 = vunpack.i.l.bf16 %v4654_v30  ;;  %v4621_v63 = vunpack.i.h.bf16 %v5728_v14  ;;  %v4620_v6 = vunpack.i.l.bf16 %v5728_v14 }
 0x36c   : > { %v1681_v34 = vsel %vm176_vm0, %v4655_v58, %v4656_v57  ;;  %v1910_v26 = vsel %vm281_vm8, %v4620_v6, %v4621_v63 }
 0x36d   : > { %v1697_v47 = vsel %vm5088_vm10, %v1681_v34, 0.0  ;;  %v1926_v12 = vsel %vm5067_vm6, %v1910_v26, 0.0  ;;  %v4601_v34 = vunpack.i.h.bf16 %v5683_v43 }
 0x36f   : > { %4758 = vrot.lane.b32.xlu1 %v5650_v61, %s4981_s19  ;;  %2364 = vrot.lane.b32.xlu2 %v3942_v52, %s4988_s28 }
 0x370   : > { %4768 = vrot.lane.b32.xlu0 %v5646_v53, %s4981_s19  ;;  %v4606_v53 = vunpack.i.h.bf16 %v5720_v24 }
 0x371   : > { %v5738_v44 = vpop.permute.xlu1 %4628  ;;  %v4664_v35 = vpop.permute.xlu2 %4663 }
 0x372   : > { %v5744_v31 = vpop.permute.xlu0 %4613  ;;  %v4666_v13 = vunpack.i.h.bf16 %v4664_v35  ;;  %v4665_v50 = vunpack.i.l.bf16 %v4664_v35  ;;  %v1826_v24 = vsel %vm252_vm9, %v4605_v20, %v4606_v53 }
 0x373   : > { %v1842_v9 = vsel %vm5054_vm2, %v1826_v24, 0.0 }
 0x374   : > { %v1829_v14 = vsel %vm252_vm9, %v4665_v50, %v4666_v13 }
 0x375   : > { %v1845_v49 = vsel %vm5071_vm7, %v1829_v14, 0.0 }
 0x377   : > { %2362 = vrot.lane.b32.xlu1 %v3938_v51, %s4988_s28 }
 0x378   : > { %2366 = vrot.lane.b32.xlu0 %v3946_v33, %s4988_s28 }
 0x379   : > { %v4669_v61 = vpop.permute.xlu2 %4668  ;;  %v4634_v39 = vpop.permute.xlu1 %4633 }
 0x37a   : > { %v5757_v3 = vpop.permute.xlu0 %4623  ;;  %v4671_v22 = vunpack.i.h.bf16 %v4669_v61  ;;  %v4670_v18 = vunpack.i.l.bf16 %v4669_v61  ;;  %v4636_v27 = vunpack.i.h.bf16 %v4634_v39  ;;  %v4635_v62 = vunpack.i.l.bf16 %v4634_v39 }
 0x37b   : > { %v1754_v61 = vrot.slane %v5730_v0, 4 }
 0x37c   : > { %v2084_v2 = vsel %vm347_vm4, %v4611_v41, %v4670_v18  ;;  %v2085_v4 = vsel %vm347_vm4, %v4670_v18, %v4671_v22  ;;  %v1680_v5 = vsel %vm176_vm0, %v4636_v27, %v4655_v58  ;;  %v1679_v10 = vsel %vm176_vm0, %v4596_v37, %v4635_v62 }
 0x37d   : > { %v2100_v15 = vsel %vm5067_vm6, %v2084_v2, 0.0  ;;  %v2101_v16 = vsel %vm5088_vm10, %v2085_v4, 0.0  ;;  %v1696_v17 = vsel %vm5067_vm6, %v1680_v5, 0.0  ;;  %v1695_v23 = vsel %vm5088_vm10, %v1679_v10, 0.0 }
 0x37e   : > { %v2107_v19 = vpack.c.bf16 %v2101_v16, %v2100_v15  ;;  %v1703_v21 = vpack.c.bf16 %v1697_v47, %v1696_v17  ;;  %v1702_v25 = vpack.c.bf16 %v1695_v23, %v1694_v60  ;;  %v4600_v60 = vunpack.i.l.bf16 %v5683_v43 }
 0x37f   : > { %v4610_v16 = vunpack.i.l.bf16 %v5718_v1 }
 0x380   : > { %2111 = vst [vmem:[#allocation3 + $0xc8] sm:$0xff] %v2107_v19  ;;  %v1906_v18 = vsel %vm281_vm8, %v4600_v60, %v4601_v34 }
 0x381   : > { %1707 = vst [vmem:[#allocation3 + $0x8] sm:$0xff] %v1703_v21  ;;  %v5778_v56 = vpop.permute.xlu2 %4678  ;;  %v4644_v29 = vpop.permute.xlu1 %4643 }
 0x382   : > { %1706 = vst [vmem:[#allocation3] sm:$0xff] %v1702_v25  ;;  %v5781_v30 = vpop.permute.xlu0 %1746  ;;  %v4680_v46 = vunpack.i.l.bf16 %v5778_v56  ;;  %v4646_v32 = vunpack.i.h.bf16 %v4644_v29  ;;  %v4645_v35 = vunpack.i.l.bf16 %v4644_v29 }
 0x384   : > { %v1911_v37 = vsel %vm281_vm8, %v4621_v63, %v4680_v46  ;;  %v1828_v28 = vsel %vm252_vm9, %v4646_v32, %v4665_v50  ;;  %v1827_v45 = vsel %vm252_vm9, %v4606_v53, %v4645_v35  ;;  %v1922_v63 = vsel %vm5067_vm6, %v1906_v18, 0.0 }
 0x385   : > { %v1927_v51 = vsel %vm5088_vm10, %v1911_v37, 0.0  ;;  %v1844_v52 = vsel %vm5054_vm2, %v1828_v28, 0.0  ;;  %v1843_v57 = vsel %vm5071_vm7, %v1827_v45, 0.0  ;;  %v2161_v46 = vrot.slane %v5674_v38, 4 }
 0x386   : > { %v1932_v58 = vpack.c.bf16 %v1927_v51, %v1926_v12  ;;  %v1851_v33 = vpack.c.bf16 %v1845_v49, %v1844_v52  ;;  %v1850_v59 = vpack.c.bf16 %v1843_v57, %v1842_v9  ;;  %v1756_v32 = vrot.slane %v5697_v8, 4 }
 0x387   : > { %v4631_v12 = vunpack.i.h.bf16 %v5738_v44  ;;  %v4616_v51 = vunpack.i.h.bf16 %v5744_v31  ;;  %v4615_v52 = vunpack.i.l.bf16 %v5744_v31 }
 0x388   : > { %1936 = vst [vmem:[#allocation3 + $0x70] sm:$0xff] %v1932_v58 }
 0x389   : > { %1855 = vst [vmem:[#allocation3 + $0x48] sm:$0xff] %v1851_v33  ;;  %v5801_v41 = vpop.permute.xlu2 %4698  ;;  %v1741_v53 = vpop.permute.xlu1 %1740 }
 0x38a   : > { %1854 = vst [vmem:[#allocation3 + $0x40] sm:$0xff] %v1850_v59  ;;  %v4639_v39 = vpop.permute.xlu0 %4638  ;;  %v1755_v22 = vrot.slane %v1741_v53, 4  ;;  %v4701_v57 = vunpack.i.h.bf16 %v5801_v41  ;;  %v4700_v38 = vunpack.i.l.bf16 %v5801_v41 }
 0x38b   : > { %v4640_v27 = vunpack.i.l.bf16 %v4639_v39  ;;  %v4641_v5 = vunpack.i.h.bf16 %v4639_v39 }
 0x38c   : > { %v1762_v62 = vsel %vm679_vm14, %v1754_v61, %v1755_v22  ;;  %v1682_v22 = vsel %vm176_vm0, %v4615_v52, %v4616_v51  ;;  %v1685_v18 = vsel %vm176_vm0, %v4700_v38, %v4701_v57 }
 0x38d   : > { %v1907_v20 = vsel %vm281_vm8, %v4601_v34, %v4640_v27  ;;  %v1763_v43 = vsel %vm229_vm12, %v5730_v0, %v1762_v62  ;;  %v4630_v27 = vunpack.i.l.bf16 %v5738_v44 }
 0x38e   : > { %v1923_v6 = vsel %vm5088_vm10, %v1907_v20, 0.0  ;;  %1774 = vst [vmem:[#allocation3 + $0x20] sm:$0xff] %v1763_v43  ;;  %v1698_v20 = vsel %vm5067_vm6, %v1682_v22, 0.0  ;;  %v4626_v43 = vunpack.i.h.bf16 %v5757_v3 }
 0x38f   : > { %v1930_v47 = vpack.c.bf16 %v1923_v6, %v1922_v63 }
 0x391   : > { %1934 = vst [vmem:[#allocation3 + $0x60] sm:$0xff] %v1930_v47  ;;  %v5813_v2 = vpop.permute.xlu2 %4708  ;;  %v4659_v4 = vpop.permute.xlu1 %4658 }
 0x392   : > { %v4649_v10 = vpop.permute.xlu0 %4648  ;;  %v4661_v13 = vunpack.i.h.bf16 %v4659_v4  ;;  %v4660_v15 = vunpack.i.l.bf16 %v4659_v4  ;;  %v1701_v4 = vsel %vm5088_vm10, %v1685_v18, 0.0  ;;  %v4710_v44 = vunpack.i.l.bf16 %v5813_v2 }
 0x393   : > { %v4651_v17 = vunpack.i.h.bf16 %v4649_v10  ;;  %v4650_v0 = vunpack.i.l.bf16 %v4649_v10 }
 0x394   : > { %v1908_v50 = vsel %vm281_vm8, %v4641_v5, %v4660_v15  ;;  %v1909_v19 = vsel %vm281_vm8, %v4660_v15, %v4661_v13  ;;  %v4711_v13 = vunpack.i.h.bf16 %v5813_v2 }
 0x395   : > { %v2083_v21 = vsel %vm347_vm4, %v4651_v17, %v4610_v16  ;;  %v2082_v23 = vsel %vm347_vm4, %v4650_v0, %v4651_v17  ;;  %v1924_v25 = vsel %vm5067_vm6, %v1908_v50, 0.0  ;;  %v1925_v1 = vsel %vm5088_vm10, %v1909_v19, 0.0 }
 0x396   : > { %v2099_v24 = vsel %vm5088_vm10, %v2083_v21, 0.0  ;;  %v2098_v26 = vsel %vm5067_vm6, %v2082_v23, 0.0  ;;  %v1931_v14 = vpack.c.bf16 %v1925_v1, %v1924_v25 }
 0x397   : > { %v2106_v29 = vpack.c.bf16 %v2099_v24, %v2098_v26  ;;  %v1833_v26 = vsel %vm252_vm9, %v4710_v44, %v4711_v13 }
 0x398   : > { %1935 = vst [vmem:[#allocation3 + $0x68] sm:$0xff] %v1931_v14 }
 0x399   : > { %2110 = vst [vmem:[#allocation3 + $0xc0] sm:$0xff] %v2106_v29  ;;  %v4714_v35 = vpop.permute.xlu2 %4713  ;;  %v2147_v9 = vpop.permute.xlu1 %2146 }
 0x39a   : > { %v4716_v37 = vunpack.i.h.bf16 %v4714_v35  ;;  %v4715_v28 = vunpack.i.l.bf16 %v4714_v35  ;;  %v1745_v45 = vpop.permute.xlu0 %1744  ;;  %v2160_v49 = vrot.slane %v2147_v9, 4 }
 0x39b   : > { %v1757_v58 = vrot.slane %v1745_v45, 4 }
 0x39c   : > { %v2088_v33 = vsel %vm347_vm4, %v4631_v12, %v4715_v28  ;;  %v2089_v59 = vsel %vm347_vm4, %v4715_v28, %v4716_v37  ;;  %v2168_v34 = vsel %vm679_vm14, %v2160_v49, %v2161_v46  ;;  %v1849_v37 = vsel %vm5071_vm7, %v1833_v26, 0.0 }
 0x39d   : > { %v2104_v60 = vsel %vm5067_vm6, %v2088_v33, 0.0  ;;  %v2105_v53 = vsel %vm5088_vm10, %v2089_v59, 0.0  ;;  %v1764_v61 = vsel %vm679_vm14, %v1756_v32, %v1757_v58  ;;  %v2169_v31 = vsel %vm377_vm11, %v2147_v9, %v2168_v34 }
 0x39e   : > { %v2109_v39 = vpack.c.bf16 %v2105_v53, %v2104_v60  ;;  %v1765_v41 = vsel %vm229_vm12, %v5697_v8, %v1764_v61  ;;  %2179 = vst [vmem:[#allocation3 + $0xe8] sm:$0xff] %v2169_v31  ;;  %v4625_v8 = vunpack.i.l.bf16 %v5757_v3  ;;  %v4681_v32 = vunpack.i.h.bf16 %v5778_v56 }
 0x39f   : > { %1775 = vst [vmem:[#allocation3 + $0x28] sm:$0xff] %v1765_v41  ;;  %v2163_v60 = vrot.slane %v5669_v48, 4  ;;  %v2165_v31 = vrot.slane %v5702_v11, 4  ;;  %v4306_v48 = vld [vmem:[#allocation3 + $0x74] sm:$0xf] }
 0x3a0   : > { %2113 = vst [vmem:[#allocation3 + $0xd8] sm:$0xff] %v2109_v39  ;;  %v1830_v24 = vsel %vm252_vm9, %v4625_v8, %v4626_v43  ;;  %v4305_v11 = vld [vmem:[#allocation3 + $0x64] sm:$0xf0] }
 0x3a1   : > { %v4674_v62 = vpop.permute.xlu1 %4673  ;;  %v1846_v12 = vsel %vm5054_vm2, %v1830_v24, 0.0 }
 0x3a2   : > { %v4689_v63 = vpop.permute.xlu0 %4688  ;;  %v4676_v6 = vunpack.i.h.bf16 %v4674_v62  ;;  %v4675_v47 = vunpack.i.l.bf16 %v4674_v62  ;;  %v4719_v62 = vpop.permute.xlu2 %4718 }
 0x3a3   : > { %v4691_v5 = vunpack.i.h.bf16 %v4689_v63  ;;  %v4690_v10 = vunpack.i.l.bf16 %v4689_v63 }
 0x3a4   : > { %v1684_v15 = vsel %vm176_vm0, %v4676_v6, %v4700_v38  ;;  %v1683_v16 = vsel %vm176_vm0, %v4616_v51, %v4675_v47 }
 0x3a5   : > { %v2087_v17 = vsel %vm347_vm4, %v4691_v5, %v4630_v27  ;;  %v2086_v0 = vsel %vm347_vm4, %v4690_v10, %v4691_v5  ;;  %v1700_v3 = vsel %vm5067_vm6, %v1684_v15, 0.0  ;;  %v1699_v50 = vsel %vm5088_vm10, %v1683_v16, 0.0 }
 0x3a6   : > { %v2103_v19 = vsel %vm5088_vm10, %v2087_v17, 0.0  ;;  %v2102_v2 = vsel %vm5067_vm6, %v2086_v0, 0.0  ;;  %v1705_v21 = vpack.c.bf16 %v1701_v4, %v1700_v3  ;;  %v1704_v23 = vpack.c.bf16 %v1699_v50, %v1698_v20  ;;  %v4005_v20 = vld [vmem:[#allocation3 + $0x70] sm:$0xf]  ;;  %v3999_v4 = vld [vmem:[#allocation3 + $0x68] sm:$0xf0] }
 0x3a7   : > { %v2108_v25 = vpack.c.bf16 %v2103_v19, %v2102_v2  ;;  %v4720_v5 = vunpack.i.l.bf16 %v4719_v62  ;;  %v4721_v15 = vunpack.i.h.bf16 %v4719_v62  ;;  %v3997_v0 = vld [vmem:[#allocation3 + $0x60] sm:$0xf]  ;;  %v4304_v3 = vld [vmem:[#allocation3 + $0x64] sm:$0xf] }
 0x3a8   : > { %1709 = vst [vmem:[#allocation3 + $0x18] sm:$0xff] %v1705_v21  ;;  %v3998_v2 = vor.u32 %v4305_v11, %v3997_v0  ;;  %v4002_v21 = vor.u32 %v4304_v3, %v3999_v4 }
 0x3a9   : > { %2112 = vst [vmem:[#allocation3 + $0xd0] sm:$0xff] %v2108_v25  ;;  %v4684_v1 = vpop.permute.xlu1 %4683 }
 0x3aa   : > { %1708 = vst [vmem:[#allocation3 + $0x10] sm:$0xff] %v1704_v23  ;;  %v4704_v29 = vpop.permute.xlu0 %4703  ;;  %v4686_v14 = vunpack.i.h.bf16 %v4684_v1  ;;  %v4685_v46 = vunpack.i.l.bf16 %v4684_v1 }
 0x3ab   : > { %v4706_v35 = vunpack.i.h.bf16 %v4704_v29  ;;  %v4705_v9 = vunpack.i.l.bf16 %v4704_v29 }
 0x3ac   : > { %v1832_v28 = vsel %vm252_vm9, %v4686_v14, %v4710_v44  ;;  %v1831_v45 = vsel %vm252_vm9, %v4626_v43, %v4685_v46 }
 0x3ad   : > { %v1912_v49 = vsel %vm281_vm8, %v4681_v32, %v4705_v9  ;;  %v1913_v51 = vsel %vm281_vm8, %v4705_v9, %v4706_v35  ;;  %v1848_v52 = vsel %vm5054_vm2, %v1832_v28, 0.0  ;;  %v1847_v56 = vsel %vm5071_vm7, %v1831_v45, 0.0 }
 0x3ae   : > { %v1928_v57 = vsel %vm5067_vm6, %v1912_v49, 0.0  ;;  %v1929_v58 = vsel %vm5088_vm10, %v1913_v51, 0.0  ;;  %v1853_v38 = vpack.c.bf16 %v1849_v37, %v1848_v52  ;;  %v1852_v33 = vpack.c.bf16 %v1847_v56, %v1846_v12  ;;  %v4061_v49 = vld [vmem:[#allocation3 + $0xe0] sm:$0xf]  ;;  %v4321_v51 = vld [vmem:[#allocation3 + $0xe4] sm:$0xf0]  ;;  %v4734_v52 = vpop.permute.xlu2 %4733 }
 0x3af   : > { %v1933_v59 = vpack.c.bf16 %v1929_v58, %v1928_v57  ;;  %v4735_v11 = vunpack.i.l.bf16 %v4734_v52 }
 0x3b0   : > { %1857 = vst [vmem:[#allocation3 + $0x58] sm:$0xff] %v1853_v38  ;;  %v4301_v38 = vld [vmem:[#allocation3 + $0x44] sm:$0xf0] }
 0x3b1   : > { %1937 = vst [vmem:[#allocation3 + $0x78] sm:$0xff] %v1933_v59  ;;  %v2151_v34 = vpop.permute.xlu1 %2150  ;;  %v1758_v59 = vrot.slane %v5781_v30, 4 }
 0x3b2   : > { %1856 = vst [vmem:[#allocation3 + $0x50] sm:$0xff] %v1852_v33  ;;  %v2155_v53 = vpop.permute.xlu0 %2154  ;;  %v2162_v61 = vrot.slane %v2151_v34, 4  ;;  %v3983_v33 = vld [vmem:[#allocation3 + $0x48] sm:$0xf0] }
 0x3b3   : > { %v2164_v39 = vrot.slane %v2155_v53, 4 }
 0x3b4   : > { %v2170_v41 = vsel %vm679_vm14, %v2162_v61, %v2163_v60  ;;  %v4300_v61 = vld [vmem:[#allocation3 + $0x44] sm:$0xf] }
 0x3b5   : > { %v2172_v22 = vsel %vm679_vm14, %v2164_v39, %v2165_v31  ;;  %v2171_v18 = vsel %vm377_vm11, %v2151_v34, %v2170_v41  ;;  %v1760_v31 = vrot.slane %v5708_v42, 4  ;;  %v4062_v41 = vor.u32 %v4321_v51, %v4061_v49  ;;  %v3965_v51 = vld [vmem:[#allocation3 + $0x20] sm:$0xf] }
 0x3b6   : > { %v2173_v27 = vsel %vm377_vm11, %v2155_v53, %v2172_v22  ;;  %2180 = vst [vmem:[#allocation3 + $0xf0] sm:$0xff] %v2171_v18  ;;  %v3981_v53 = vld [vmem:[#allocation3 + $0x40] sm:$0xf]  ;;  %v4053_v18 = vld [vmem:[#allocation3 + $0xd0] sm:$0xf] }
 0x3b7   : > { %2181 = vst [vmem:[#allocation3 + $0xf8] sm:$0xff] %v2173_v27  ;;  %v4303_v23 = vld [vmem:[#allocation3 + $0x54] sm:$0xf0]  ;;  %v3991_v25 = vld [vmem:[#allocation3 + $0x58] sm:$0xf0] }
 0x3b8   : > { %v4307_v43 = vld [vmem:[#allocation3 + $0x74] sm:$0xf0]  ;;  %v4007_v63 = vld [vmem:[#allocation3 + $0x78] sm:$0xf0] }
 0x3b9   : > { %v4694_v6 = vpop.permute.xlu1 %4693  ;;  %v4006_v47 = vor.u32 %v4307_v43, %v4005_v20  ;;  %v4010_v8 = vor.u32 %v4306_v48, %v4007_v63  ;;  %v3989_v46 = vld [vmem:[#allocation3 + $0x50] sm:$0xf]  ;;  %v4302_v37 = vld [vmem:[#allocation3 + $0x54] sm:$0xf]  ;;  %v3982_v20 = vor.u32 %v4301_v38, %v3981_v53  ;;  %v3986_v43 = vor.u32 %v4300_v61, %v3983_v33  ;;  %v4319_v63 = vld [vmem:[#allocation3 + $0xd4] sm:$0xf0] }
 0x3ba   : > { %v4724_v10 = vpop.permute.xlu0 %4723  ;;  %v4696_v13 = vunpack.i.h.bf16 %v4694_v6  ;;  %v4695_v44 = vunpack.i.l.bf16 %v4694_v6  ;;  %v3990_v57 = vor.u32 %v4303_v23, %v3989_v46  ;;  %v3994_v58 = vor.u32 %v4302_v37, %v3991_v25  ;;  %v4297_v37 = vld [vmem:[#allocation3 + $0x24] sm:$0xf0]  ;;  %v4295_v38 = vld [vmem:[#allocation3 + $0x14] sm:$0xf0] }
 0x3bb   : > { %v4726_v16 = vunpack.i.h.bf16 %v4724_v10  ;;  %v4725_v17 = vunpack.i.l.bf16 %v4724_v10  ;;  %2563 = vmatpush.bf16.msrb.mxu0 %v4006_v47  ;;  %2620 = vmatpush.bf16.msra.mxu3 %v4010_v8  ;;  %v4054_v6 = vor.u32 %v4319_v63, %v4053_v18  ;;  %v4045_v47 = vld [vmem:[#allocation3 + $0xc0] sm:$0xf]  ;;  %v4293_v53 = vld [vmem:[#allocation3 + $0x4] sm:$0xf0]  ;;  %v4311_v61 = vld [vmem:[#allocation3 + $0x94] sm:$0xf0] }
 0x3bc   : > { %v2007_v50 = vsel %vm318_vm5, %v4696_v13, %v4720_v5  ;;  %v2006_v19 = vsel %vm318_vm5, %v4695_v44, %v4696_v13  ;;  %v4736_v13 = vunpack.i.h.bf16 %v4734_v52  ;;  %v5914_v44 = vpop.permute.xlu2 %2358  ;;  %v3966_v52 = vor.u32 %v4297_v37, %v3965_v51 }
 0x3bd   : > { %v2008_v24 = vsel %vm318_vm5, %v4721_v15, %v4725_v17  ;;  %v2009_v26 = vsel %vm318_vm5, %v4725_v17, %v4726_v16  ;;  %v2023_v1 = vsel %vm5071_vm7, %v2007_v50, 0.0  ;;  %v2022_v29 = vsel %vm5054_vm2, %v2006_v19, 0.0  ;;  %v4069_v14 = vld [vmem:[#allocation3 + $0xf0] sm:$0xf]  ;;  %v4322_v63 = vld [vmem:[#allocation3 + $0xf4] sm:$0xf] }
 0x3be   : > { %v2024_v32 = vsel %vm5054_vm2, %v2008_v24, 0.0  ;;  %v2025_v35 = vsel %vm5071_vm7, %v2009_v26, 0.0  ;;  %v2028_v9 = vpack.c.bf16 %v2023_v1, %v2022_v29  ;;  %v4323_v12 = vld [vmem:[#allocation3 + $0xf4] sm:$0xf0] }
 0x3bf   : > { %v2029_v28 = vpack.c.bf16 %v2025_v35, %v2024_v32  ;;  %2564 = vmatpush.bf16.msrb.mxu0 %v3998_v2  ;;  %2621 = vmatpush.bf16.msra.mxu3 %v4002_v21  ;;  %v4070_v45 = vor.u32 %v4323_v12, %v4069_v14 }
 0x3c0   : > { %2032 = vst [vmem:[#allocation3 + $0xb0] sm:$0xff] %v2028_v9 }
 0x3c1   : > { %2033 = vst [vmem:[#allocation3 + $0xb8] sm:$0xff] %v2029_v28  ;;  %2582 = vmatpush.bf16.msra.mxu1 %v4070_v45  ;;  %v1749_v56 = vpop.permute.xlu1 %1748  ;;  %v3967_v45 = vld [vmem:[#allocation3 + $0x28] sm:$0xf0] }
 0x3c2   : > { %v1753_v34 = vpop.permute.xlu0 %1752  ;;  %v1759_v60 = vrot.slane %v1749_v56, 4  ;;  %v4296_v56 = vld [vmem:[#allocation3 + $0x24] sm:$0xf] }
 0x3c3   : > { %v1761_v39 = vrot.slane %v1753_v34, 4  ;;  %2565 = vmatpush.bf16.msrb.mxu0 %v3990_v57  ;;  %2622 = vmatpush.bf16.msra.mxu3 %v3994_v58  ;;  %v3970_v57 = vor.u32 %v4296_v56, %v3967_v45  ;;  %v3957_v58 = vld [vmem:[#allocation3 + $0x10] sm:$0xf]  ;;  %v3959_v34 = vld [vmem:[#allocation3 + $0x18] sm:$0xf0] }
 0x3c4   : > { %v1766_v22 = vsel %vm679_vm14, %v1758_v59, %v1759_v60  ;;  %v4749_v33 = vpop.permute.xlu2 %4748  ;;  %v4294_v59 = vld [vmem:[#allocation3 + $0x14] sm:$0xf]  ;;  %v3949_v60 = vld [vmem:[#allocation3] sm:$0xf] }
 0x3c5   : > { %v1768_v27 = vsel %vm679_vm14, %v1760_v31, %v1761_v39  ;;  %v1767_v62 = vsel %vm229_vm12, %v5781_v30, %v1766_v22  ;;  %2583 = vmatpush.bf16.msra.mxu1 %v4062_v41  ;;  %v4317_v30 = vld [vmem:[#allocation3 + $0xc4] sm:$0xf0]  ;;  %v3958_v31 = vor.u32 %v4295_v38, %v3957_v58  ;;  %v4292_v41 = vld [vmem:[#allocation3 + $0x4] sm:$0xf]  ;;  %v3951_v22 = vld [vmem:[#allocation3 + $0x8] sm:$0xf0]  ;;  %v3962_v18 = vor.u32 %v4294_v59, %v3959_v34 }
 0x3c6   : > { %v1769_v48 = vsel %vm229_vm12, %v5708_v42, %v1768_v27  ;;  %1776 = vst [vmem:[#allocation3 + $0x30] sm:$0xff] %v1767_v62  ;;  %v4046_v42 = vor.u32 %v4317_v30, %v4045_v47  ;;  %v4021_v62 = vld [vmem:[#allocation3 + $0x90] sm:$0xf]  ;;  %v4751_v30 = vunpack.i.h.bf16 %v4749_v33  ;;  %v4013_v45 = vld [vmem:[#allocation3 + $0x80] sm:$0xf] }
 0x3c7   : > { %1777 = vst [vmem:[#allocation3 + $0x38] sm:$0xff] %v1769_v48  ;;  %2566 = vmatpush.bf16.msrb.mxu0 %v3982_v20  ;;  %2623 = vmatpush.bf16.msra.mxu3 %v3986_v43  ;;  %v4037_v3 = vld [vmem:[#allocation3 + $0xb0] sm:$0xf]  ;;  %v3950_v48 = vor.u32 %v4293_v53, %v3949_v60  ;;  %v4022_v47 = vor.u32 %v4311_v61, %v4021_v62  ;;  %v4318_v56 = vld [vmem:[#allocation3 + $0xd4] sm:$0xf] }
 0x3c8   : > { %v4315_v50 = vld [vmem:[#allocation3 + $0xb4] sm:$0xf0]  ;;  %v4055_v53 = vld [vmem:[#allocation3 + $0xd8] sm:$0xf0] }
 0x3c9   : > { %2584 = vmatpush.bf16.msra.mxu1 %v4054_v6  ;;  %v4729_v8 = vpop.permute.xlu1 %4728  ;;  %v4038_v9 = vor.u32 %v4315_v50, %v4037_v3  ;;  %v4071_v6 = vld [vmem:[#allocation3 + $0xf8] sm:$0xf0] }
 0x3ca   : > { %v4739_v4 = vpop.permute.xlu0 %4738  ;;  %v4731_v5 = vunpack.i.h.bf16 %v4729_v8  ;;  %v4730_v10 = vunpack.i.l.bf16 %v4729_v8  ;;  %v4750_v8 = vunpack.i.l.bf16 %v4749_v33 }
 0x3cb   : > { %v4741_v15 = vunpack.i.h.bf16 %v4739_v4  ;;  %v4740_v16 = vunpack.i.l.bf16 %v4739_v4 }
 0x3cc   : > { %v2003_v17 = vsel %vm318_vm5, %v4731_v5, %v4735_v11  ;;  %v2002_v0 = vsel %vm318_vm5, %v4730_v10, %v4731_v5  ;;  %v3954_v10 = vor.u32 %v4292_v41, %v3951_v22  ;;  %v4058_v41 = vor.u32 %v4318_v56, %v4055_v53 }
 0x3cd   : > { %v2004_v19 = vsel %vm318_vm5, %v4736_v13, %v4740_v16  ;;  %v2005_v2 = vsel %vm318_vm5, %v4740_v16, %v4741_v15  ;;  %v2019_v21 = vsel %vm5071_vm7, %v2003_v17, 0.0  ;;  %v2018_v23 = vsel %vm5054_vm2, %v2002_v0, 0.0  ;;  %2585 = vmatpush.bf16.msra.mxu1 %v4046_v42  ;;  %v3973_v25 = vld [vmem:[#allocation3 + $0x30] sm:$0xf]  ;;  %v4298_v24 = vld [vmem:[#allocation3 + $0x34] sm:$0xf] }
 0x3ce   : > { %v2020_v26 = vsel %vm5054_vm2, %v2004_v19, 0.0  ;;  %v2021_v1 = vsel %vm5071_vm7, %v2005_v2, 0.0  ;;  %v2026_v29 = vpack.c.bf16 %v2019_v21, %v2018_v23  ;;  %v4299_v14 = vld [vmem:[#allocation3 + $0x34] sm:$0xf0]  ;;  %v3975_v46 = vld [vmem:[#allocation3 + $0x38] sm:$0xf0]  ;;  %v4074_v17 = vor.u32 %v4322_v63, %v4071_v6 }
 0x3cf   : > { %v2027_v32 = vpack.c.bf16 %v2021_v1, %v2020_v26  ;;  %v3974_v35 = vor.u32 %v4299_v14, %v3973_v25  ;;  %v3978_v12 = vor.u32 %v4298_v24, %v3975_v46  ;;  %v4989_v0 = vmov 93   ;;  %v4063_v21 = vld [vmem:[#allocation3 + $0xe8] sm:$0xf0]  ;;  %v4309_v23 = vld [vmem:[#allocation3 + $0x84] sm:$0xf0]  ;;  %v4764_v14 = vpop.permute.xlu2 %4763 }
 0x3d0   : > { %2030 = vst [vmem:[#allocation3 + $0xa0] sm:$0xff] %v2026_v29  ;;  %4778 = vset.pattern.permute.xlu2 %v4989_v0  ;;  %4772 = vset.pattern.permute.xlu1 %v4989_v0  ;;  %v2263_v1 = vld [vmem:[%s5110_s26 + $0x10] sm:$0xf]  ;;  %v2265_v29 = vld [vmem:[%s5110_s26 + $0x24] sm:$0xf]  ;;  %v4765_v58 = vunpack.i.l.bf16 %v4764_v14  ;;  %v4766_v34 = vunpack.i.h.bf16 %v4764_v14 }
 0x3d1   : > { %2031 = vst [vmem:[#allocation3 + $0xa8] sm:$0xff] %v2027_v32  ;;  %2567 = vmatpush.bf16.msrb.mxu0 %v3974_v35  ;;  %2586 = vmatpush.bf16.msra.mxu1 %v4038_v9  ;;  %v5928_v28 = vpop.permute.xlu1 %2356  ;;  %v4320_v35 = vld [vmem:[#allocation3 + $0xe4] sm:$0xf]  ;;  %v2306_v9 = vunpack.c.l.bf16 %v2263_v1  ;;  %v2267_v63 = vld [vmem:[%s5110_s26 + $0x38] sm:$0xf] }
 0x3d2   : > { %2624 = vmatpush.bf16.msra.mxu3 %v3978_v12  ;;  %v5930_v49 = vpop.permute.xlu0 %2360  ;;  %v2369_v32 = vsel %vm2368_vm13, %v5928_v28, %v5914_v44  ;;  %v2307_v12 = vunpack.c.l.bf16 %v2265_v29  ;;  %v4066_v37 = vor.u32 %v4320_v35, %v4063_v21  ;;  %v2269_v6 = vld [vmem:[%s5110_s26 + $0x4c] sm:$0xf]  ;;  %v4039_v0 = vld [vmem:[#allocation3 + $0xb8] sm:$0xf0] }
 0x3d5   : > { %2568 = vmatpush.bf16.msrb.mxu0 %v3966_v52  ;;  %v4014_v52 = vor.u32 %v4309_v23, %v4013_v45 }
 0x3d6   : > { %2625 = vmatpush.bf16.msra.mxu3 %v3970_v57  ;;  %v4779_v57 = vpack.i.bf16 %v2307_v12, %v2306_v9  ;;  %v4023_v9 = vld [vmem:[#allocation3 + $0x98] sm:$0xf0] }
 0x3d7   : > { %v4029_v39 = vld [vmem:[#allocation3 + $0xa0] sm:$0xf]  ;;  %v4312_v23 = vld [vmem:[#allocation3 + $0xa4] sm:$0xf] }
 0x3d8   : > { %v4313_v27 = vld [vmem:[#allocation3 + $0xa4] sm:$0xf0]  ;;  %4780 = vperm.xlu2 %4778, %v4779_v57   ;;  %v5978_v57 = vld [vmem:[#allocation2 + $0x58] sm:$0xff] }
 0x3d9   : > { %2569 = vmatpush.bf16.msrb.mxu0 %v3958_v31  ;;  %v4744_v20 = vpop.permute.xlu1 %4743  ;;  %v4030_v43 = vor.u32 %v4313_v27, %v4029_v39  ;;  %v5954_v39 = vsel %vm2368_vm13, %v5914_v44, %v5930_v49 }
 0x3da   : > { %2626 = vmatpush.bf16.msra.mxu3 %v3962_v18  ;;  %v4754_v11 = vpop.permute.xlu0 %4753  ;;  %v4746_v4 = vunpack.i.h.bf16 %v4744_v20  ;;  %v4745_v5 = vunpack.i.l.bf16 %v4744_v20  ;;  %v4316_v20 = vld [vmem:[#allocation3 + $0xc4] sm:$0xf] }
 0x3db   : > { %v4756_v13 = vunpack.i.h.bf16 %v4754_v11  ;;  %v4755_v15 = vunpack.i.l.bf16 %v4754_v11  ;;  %2587 = vmatpush.bf16.msra.mxu1 %v4030_v43 }
 0x3dc   : > { %v2235_v16 = vsel %vm396_vm1, %v4746_v4, %v4750_v8  ;;  %v2234_v42 = vsel %vm396_vm1, %v4745_v5, %v4746_v4  ;;  %v4047_v8 = vld [vmem:[#allocation3 + $0xc8] sm:$0xf0]  ;;  %v2308_v5 = vunpack.c.l.bf16 %v2267_v63 }
 0x3dd   : > { %v2236_v3 = vsel %vm396_vm1, %v4751_v30, %v4755_v15  ;;  %v2237_v50 = vsel %vm396_vm1, %v4755_v15, %v4756_v13  ;;  %v2251_v19 = vsel %vm5071_vm7, %v2235_v16, 0.0  ;;  %v2250_v2 = vsel %vm5054_vm2, %v2234_v42, 0.0  ;;  %2570 = vmatpush.bf16.msrb.mxu0 %v3950_v48 }
 0x3de   : > { %v2252_v25 = vsel %vm5054_vm2, %v2236_v3, 0.0  ;;  %v2253_v24 = vsel %vm5071_vm7, %v2237_v50, 0.0  ;;  %v2256_v26 = vpack.c.bf16 %v2251_v19, %v2250_v2  ;;  %2627 = vmatpush.bf16.msra.mxu3 %v3954_v10  ;;  %v2309_v10 = vunpack.c.l.bf16 %v2269_v6  ;;  %v2365_v50 = vpop.permute.xlu2 %2364 }
 0x3df   : > { %v2257_v46 = vpack.c.bf16 %v2253_v24, %v2252_v25  ;;  %2588 = vmatpush.bf16.msra.mxu1 %v4022_v47  ;;  %v4050_v30 = vor.u32 %v4316_v20, %v4047_v8  ;;  %v4031_v25 = vld [vmem:[#allocation3 + $0xa8] sm:$0xf0] }
 0x3e0   : > { %2260 = vst [vmem:[#allocation3 + $0x110] sm:$0xff] %v2256_v26  ;;  %2571 = vmatmul.bf16.vlgmr.msrb.gmra.mxu0 %v2369_v32  ;;  %v4773_v3 = vpack.i.bf16 %v2309_v10, %v2308_v5  ;;  %v4034_v1 = vor.u32 %v4312_v23, %v4031_v25  ;;  %v5999_v10 = vld [vmem:[#allocation2] sm:$0xff] }
 0x3e1   : > { %2639 = vmatpush.bf16.msra.mxu0 %v4074_v17  ;;  %2261 = vst [vmem:[#allocation3 + $0x118] sm:$0xff] %v2257_v46  ;;  %2628 = vmatmul.bf16.vlgmr.msra.gmra.mxu3 %v2369_v32  ;;  %v4759_v51 = vpop.permute.xlu1 %4758  ;;  %v4314_v17 = vld [vmem:[#allocation3 + $0xb4] sm:$0xf] }
 0x3e2   : > { %v4769_v38 = vpop.permute.xlu0 %4768  ;;  %v4761_v33 = vunpack.i.h.bf16 %v4759_v51  ;;  %v4760_v59 = vunpack.i.l.bf16 %v4759_v51  ;;  %v4042_v2 = vor.u32 %v4314_v17, %v4039_v0  ;;  %4774 = vperm.xlu1 %4772, %v4773_v3   ;;  %v4015_v51 = vld [vmem:[#allocation3 + $0x88] sm:$0xf0] }
 0x3e3   : > { %v4771_v28 = vunpack.i.h.bf16 %v4769_v38  ;;  %v4770_v60 = vunpack.i.l.bf16 %v4769_v38  ;;  %2589 = vmatpush.bf16.msra.mxu1 %v4014_v52  ;;  %v4308_v52 = vld [vmem:[#allocation3 + $0x84] sm:$0xf]  ;;  %v5983_v38 = vld [vmem:[#allocation2 + $0x78] sm:$0xff] }
 0x3e4   : > { %v2231_v61 = vsel %vm396_vm1, %v4761_v33, %v4765_v58  ;;  %v2230_v31 = vsel %vm396_vm1, %v4760_v59, %v4761_v33  ;;  %v4018_v56 = vor.u32 %v4308_v52, %v4015_v51  ;;  %v3210_v58 = vpack.c.bf16 %v5978_v57, %v5978_v57  ;;  %v5985_v33 = vld [vmem:[#allocation2 + $0x38] sm:$0xff] }
 0x3e5   : > { %2640 = vmatpush.bf16.msra.mxu0 %v4066_v37  ;;  %v2232_v22 = vsel %vm396_vm1, %v4766_v34, %v4770_v60  ;;  %v2233_v18 = vsel %vm396_vm1, %v4770_v60, %v4771_v28  ;;  %v2247_v27 = vsel %vm5071_vm7, %v2231_v61, 0.0  ;;  %v2246_v62 = vsel %vm5054_vm2, %v2230_v31, 0.0  ;;  %v4310_v37 = vld [vmem:[#allocation3 + $0x94] sm:$0xf]  ;;  %v3195_v59 = vld [vmem:[#allocation2 + $0x18] sm:$0xff] }
 0x3e6   : > { %v2248_v43 = vsel %vm5054_vm2, %v2232_v22, 0.0  ;;  %v2249_v48 = vsel %vm5071_vm7, %v2233_v18, 0.0  ;;  %v2254_v44 = vpack.c.bf16 %v2247_v27, %v2246_v62  ;;  %2590 = vmatmul.bf16.vlgmr.msra.gmra.mxu1 %v5954_v39  ;;  %v4026_v45 = vor.u32 %v4310_v37, %v4023_v9  ;;  %3231 = vrot.lane.b32.xlu0 %v3210_v58, %s4982_s20 }
 0x3e7   : > { %v2255_v47 = vpack.c.bf16 %v2249_v48, %v2248_v43  ;;  %v4085_v11 = vld [vmem:[#allocation3 + $0x110] sm:$0xf]  ;;  %v4326_v4 = vld [vmem:[#allocation3 + $0x114] sm:$0xf]  ;;  %v3212_v34 = vpack.c.bf16 %v5983_v38, %v5983_v38  ;;  %v3206_v28 = vpack.c.bf16 %v3195_v59, %v3195_v59 }
 0x3e8   : > { %2258 = vst [vmem:[#allocation3 + $0x100] sm:$0xff] %v2254_v44  ;;  %v4327_v13 = vld [vmem:[#allocation3 + $0x114] sm:$0xf0]  ;;  %v4087_v15 = vld [vmem:[#allocation3 + $0x118] sm:$0xf0] }
 0x3e9   : > { %2641 = vmatpush.bf16.msra.mxu0 %v4058_v41  ;;  %2259 = vst [vmem:[#allocation3 + $0x108] sm:$0xff] %v2255_v47  ;;  %v4086_v16 = vor.u32 %v4327_v13, %v4085_v11  ;;  %v4090_v42 = vor.u32 %v4326_v4, %v4087_v15  ;;  %v2363_v19 = vpop.permute.xlu1 %2362  ;;  %3235 = vrot.lane.b32.xlu2 %v3212_v34, %s4982_s20 }
 0x3ea   : > { %v2371_v21 = vsel %vm2368_vm13, %v2363_v19, %v2365_v50  ;;  %v2367_v46 = vpop.permute.xlu0 %2366  ;;  %3223 = vrot.lane.b32.xlu1 %v3206_v28, %s4982_s20 }
 0x3eb   : > { %2607 = vmatpush.bf16.msrb.mxu2 %v4086_v16  ;;  %2664 = vmatpush.bf16.msrb.mxu1 %v4090_v42  ;;  %v2372_v12 = vsel %vm2368_vm13, %v2365_v50, %v2367_v46 }
 0x3ed   : > { %2642 = vmatpush.bf16.msra.mxu0 %v4050_v30 }
 0x3ef   : > { %v4077_v24 = vld [vmem:[#allocation3 + $0x100] sm:$0xf]  ;;  %v4324_v26 = vld [vmem:[#allocation3 + $0x104] sm:$0xf] }
 0x3f0   : > { %2576 = vmatmul.bf16.gmra.mxu0 %v2371_v21  ;;  %v4325_v29 = vld [vmem:[#allocation3 + $0x104] sm:$0xf0]  ;;  %v4079_v14 = vld [vmem:[#allocation3 + $0x108] sm:$0xf0] }
 0x3f1   : > { %2643 = vmatpush.bf16.msra.mxu0 %v4042_v2  ;;  %v4078_v32 = vor.u32 %v4325_v29, %v4077_v24  ;;  %v4082_v35 = vor.u32 %v4324_v26, %v4079_v14  ;;  %2633 = vmatmul.bf16.gmra.mxu3 %v2371_v21 }
 0x3f3   : > { %2608 = vmatpush.bf16.msrb.mxu2 %v4078_v32  ;;  %2665 = vmatpush.bf16.msrb.mxu1 %v4082_v35 }
 0x3f5   : > { %2644 = vmatpush.bf16.msra.mxu0 %v4034_v1 }
 0x3f6   : > { %2595 = vmatmul.bf16.gmra.mxu1 %v2372_v12  ;;  %4091 = vmatmul.msk.bf16.vlgmr.msrb.gmra.mxu2 %vm1477_vm3, %v5930_v49 }
 0x3f9   : > { %2645 = vmatpush.bf16.msra.mxu0 %v4026_v45 }
 0x3fd   : > { %2646 = vmatpush.bf16.msra.mxu0 %v4018_v56 }
 0x400   : > { %2647 = vmatmul.bf16.vlgmr.msra.gmra.mxu0 %v5954_v39 }
 0x406   : > { %4092 = vmatmul.msk.bf16.gmra.mxu2 %vm1477_vm3, %v2367_v46  ;;  %4093 = vmatmul.msk.bf16.vlgmr.msrb.gmra.mxu1 %vm1477_vm3, %v5930_v49  ;;  %v3208_v49 = vpack.c.bf16 %v5985_v33, %v5985_v33 }
 0x408   : > { %3227 = vrot.lane.b32.xlu0 %v3208_v49, %s4982_s20 }
 0x410   : > { %2652 = vmatmul.bf16.gmra.mxu0 %v2372_v12 }
 0x416   : > { %4094 = vmatmul.msk.bf16.gmra.mxu1 %vm1477_vm3, %v2367_v46 }
 0x432   : > { %v4781_v41 = vpop.permute.xlu2 %4780 }
 0x433   : > { %v4782_v22 = vunpack.i.l.bf16 %v4781_v41  ;;  %v4783_v44 = vunpack.i.h.bf16 %v4781_v41 }
 0x454   : > { %v5994_v11 = vpop.permute.xlu1 %4774 }
 0x455   : > { %v4776_v42 = vunpack.i.l.bf16 %v5994_v11  ;;  %v4777_v14 = vunpack.i.h.bf16 %v5994_v11 }
 0x45d   : > { %v2572_v60 = vpop.f32.mrf.mxu0 }
 0x45e   : > { %v2573_v62 = vadd.f32 %v4782_v22, %v2572_v60 }
 0x463   : > { %v2591_v53 = vpop.f32.mrf.mxu1 }
 0x464   : > { %v2592_v20 = vadd.f32 %v2591_v53, %v2573_v62  ;;  %v2629_v43 = vpop.f32.mrf.mxu3 }
 0x465   : > { %v2574_v61 = vpop.f32.mrf.mxu0  ;;  %v2630_v15 = vadd.f32 %v4782_v22, %v2629_v43 }
 0x466   : > { %v2575_v4 = vadd.f32 %v4783_v44, %v2574_v61 }
 0x46b   : > { %v2593_v31 = vpop.f32.mrf.mxu1 }
 0x46c   : > { %v2594_v16 = vadd.f32 %v2593_v31, %v2575_v4  ;;  %v2631_v50 = vpop.f32.mrf.mxu3 }
 0x46d   : > { %v2577_v39 = vpop.f32.mrf.mxu0  ;;  %v2632_v29 = vadd.f32 %v4783_v44, %v2631_v50 }
 0x46e   : > { %v2578_v21 = vadd.f32 %v4776_v42, %v2577_v39 }
 0x473   : > { %v2596_v18 = vpop.f32.mrf.mxu1 }
 0x474   : > { %v2597_v32 = vadd.f32 %v2596_v18, %v2578_v21  ;;  %v2634_v45 = vpop.f32.mrf.mxu3 }
 0x475   : > { %v2579_v27 = vpop.f32.mrf.mxu0  ;;  %v2635_v53 = vadd.f32 %v4776_v42, %v2634_v45 }
 0x476   : > { %v2580_v51 = vadd.f32 %v4777_v14, %v2579_v27 }
 0x479   : > { %v2610_v48 = vpop.f32.mrf.mxu2 }
 0x47a   : > { %v2611_v63 = vadd.f32 %v2610_v48, %v2592_v20 }
 0x47b   : > { %v2598_v6 = vpop.f32.mrf.mxu1 }
 0x47c   : > { %vm2677_vm15 = vcmp.ge.f32.partialorder %v2611_v63, 0.0  ;;  %v2685_v47 = vmul.f32 0.02, %v2611_v63  ;;  %v2599_v61 = vadd.f32 %v2598_v6, %v2580_v51  ;;  %v2636_v48 = vpop.f32.mrf.mxu3  ;;  %v6097_v51 = vpop.permute.xlu2 %3235 }
 0x47d   : > { %v2648_v8 = vpop.f32.mrf.mxu0  ;;  %v2637_v4 = vadd.f32 %v4777_v14, %v2636_v48 }
 0x47e   : > { %v5996_v5 = vsel %vm2677_vm15, %v2611_v63, %v2685_v47  ;;  %v2649_v0 = vadd.f32 %v2648_v8, %v2630_v15 }
 0x47f   : > { %2701 = vst [vmem:[#allocation2 + $0x8] sm:$0xff] %v5996_v5  ;;  %v4789_v30 = vpack.i.bf16 %v5996_v5, %v5999_v10  ;;  %v2801_v13 = vpack.c.bf16 %v5996_v5, %v5999_v10 }
 0x481   : > { %v2612_v17 = vpop.f32.mrf.mxu2  ;;  %4790 = vrot.lane.b32.xlu1 %v4789_v30, %s4978_s16  ;;  %2817 = vrot.lane.b32.xlu2 %v2801_v13, %s4984_s22 }
 0x482   : > { %v2613_v3 = vadd.f32 %v2612_v17, %v2594_v16  ;;  %4785 = vrot.lane.b32.xlu0 %v4789_v30, %s4983_s21 }
 0x483   : > { %v2667_v19 = vpop.f32.mrf.mxu1 }
 0x484   : > { %vm2679_vm13 = vcmp.ge.f32.partialorder %v2613_v3, 0.0  ;;  %v2687_v2 = vmul.f32 0.02, %v2613_v3  ;;  %v2668_v23 = vadd.f32 %v2667_v19, %v2649_v0 }
 0x485   : > { %v2650_v25 = vpop.f32.mrf.mxu0 }
 0x486   : > { %v6009_v24 = vsel %vm2679_vm13, %v2613_v3, %v2687_v2  ;;  %vm2678_vm15 = vcmp.ge.f32.partialorder %v2668_v23, 0.0  ;;  %v2686_v26 = vmul.f32 0.02, %v2668_v23  ;;  %v2651_v9 = vadd.f32 %v2650_v25, %v2632_v29  ;;  %v3017_v41 = vld [vmem:[#allocation2 + $0x8] sm:$0xff] }
 0x487   : > { %2703 = vst [vmem:[#allocation2 + $0x28] sm:$0xff] %v6009_v24  ;;  %v6013_v1 = vpack.i.bf16 %v6009_v24, %v3195_v59  ;;  %v2803_v49 = vpack.c.bf16 %v6009_v24, %v5999_v10 }
 0x488   : > { %v6016_v46 = vsel %vm2678_vm15, %v2668_v23, %v2686_v26 }
 0x489   : > { %2702 = vst [vmem:[#allocation2 + $0x10] sm:$0xff] %v6016_v46  ;;  %v2615_v35 = vpop.f32.mrf.mxu2  ;;  %4795 = vrot.lane.b32.xlu1 %v4789_v30, %s4977_s15  ;;  %4800 = vrot.lane.b32.xlu2 %v6013_v1, %s4979_s17  ;;  %v2802_v50 = vpack.c.bf16 %v6016_v46, %v6016_v46  ;;  %v4834_v25 = vpack.i.bf16 %v5999_v10, %v6016_v46 }
 0x48a   : > { %v2616_v12 = vadd.f32 %v2615_v35, %v2597_v32  ;;  %v3205_v26 = vpack.c.bf16 %v6016_v46, %v5996_v5 }
 0x48b   : > { %v2669_v37 = vpop.f32.mrf.mxu1 }
 0x48c   : > { %vm2681_vm13 = vcmp.ge.f32.partialorder %v2616_v12, 0.0  ;;  %v2689_v52 = vmul.f32 0.02, %v2616_v12  ;;  %v2670_v56 = vadd.f32 %v2669_v37, %v2651_v9  ;;  %v4844_v9 = vpack.i.bf16 %v6016_v46, %v5996_v5 }
 0x48d   : > { %v2653_v58 = vpop.f32.mrf.mxu0 }
 0x48e   : > { %v6022_v59 = vsel %vm2681_vm13, %v2616_v12, %v2689_v52  ;;  %vm2680_vm15 = vcmp.ge.f32.partialorder %v2670_v56, 0.0  ;;  %v2688_v34 = vmul.f32 0.02, %v2670_v56  ;;  %v2654_v22 = vadd.f32 %v2653_v58, %v2635_v53  ;;  %v3019_v13 = vld [vmem:[#allocation2 + $0x28] sm:$0xff] }
 0x48f   : > { %2705 = vst [vmem:[#allocation2 + $0x48] sm:$0xff] %v6022_v59  ;;  %v4804_v28 = vpack.i.bf16 %v6022_v59, %v5999_v10  ;;  %v2805_v23 = vpack.c.bf16 %v6022_v59, %v5999_v10 }
 0x490   : > { %v6029_v60 = vsel %vm2680_vm15, %v2670_v56, %v2688_v34  ;;  %v3018_v31 = vld [vmem:[#allocation2 + $0x10] sm:$0xff]  ;;  %v3224_v34 = vpop.permute.xlu1 %3223 }
 0x491   : > { %2704 = vst [vmem:[#allocation2 + $0x30] sm:$0xff] %v6029_v60  ;;  %v2617_v39 = vpop.f32.mrf.mxu2  ;;  %2821 = vrot.lane.b32.xlu1 %v2803_v49, %s4984_s22  ;;  %4805 = vrot.lane.b32.xlu0 %v4804_v28, %s4983_s21  ;;  %v3025_v27 = vpack.c.bf16 %v3018_v31, %v3017_v41  ;;  %v4854_v35 = vpack.i.bf16 %v6029_v60, %v6009_v24 }
 0x492   : > { %v2618_v18 = vadd.f32 %v2617_v39, %v2599_v61  ;;  %v2804_v12 = vpack.c.bf16 %v6029_v60, %v6029_v60  ;;  %v4864_v45 = vpack.i.bf16 %v5985_v33, %v6029_v60  ;;  %v3207_v5 = vpack.c.bf16 %v6029_v60, %v6009_v24 }
 0x493   : > { %v2672_v62 = vpop.f32.mrf.mxu1  ;;  %3029 = vst [vmem:[#allocation3 + $0x80] sm:$0xff] %v3025_v27 }
 0x494   : > { %vm2683_vm13 = vcmp.ge.f32.partialorder %v2618_v18, 0.0  ;;  %v2691_v20 = vmul.f32 0.02, %v2618_v18  ;;  %v2673_v43 = vadd.f32 %v2672_v62, %v2654_v22 }
 0x495   : > { %v2655_v6 = vpop.f32.mrf.mxu0 }
 0x496   : > { %v6034_v44 = vsel %vm2683_vm13, %v2618_v18, %v2691_v20  ;;  %vm2682_vm15 = vcmp.ge.f32.partialorder %v2673_v43, 0.0  ;;  %v2690_v63 = vmul.f32 0.02, %v2673_v43  ;;  %v2656_v15 = vadd.f32 %v2655_v6, %v2637_v4  ;;  %v3021_v2 = vld [vmem:[#allocation2 + $0x48] sm:$0xff] }
 0x497   : > { %2707 = vst [vmem:[#allocation2 + $0x68] sm:$0xff] %v6034_v44  ;;  %v6039_v47 = vpack.i.bf16 %v6034_v44, %v5978_v57  ;;  %v2807_v8 = vpack.c.bf16 %v6034_v44, %v5999_v10 }
 0x498   : > { %v6043_v11 = vsel %vm2682_vm15, %v2673_v43, %v2690_v63  ;;  %v3020_v30 = vld [vmem:[#allocation2 + $0x30] sm:$0xff] }
 0x499   : > { %2706 = vst [vmem:[#allocation2 + $0x50] sm:$0xff] %v6043_v11  ;;  %4810 = vrot.lane.b32.xlu1 %v4804_v28, %s4978_s16  ;;  %4820 = vrot.lane.b32.xlu2 %v6039_v47, %s4979_s17  ;;  %v3209_v57 = vpack.c.bf16 %v6043_v11, %v6022_v59  ;;  %v3026_v16 = vpack.c.bf16 %v3020_v30, %v3019_v13 }
 0x49a   : > { %2829 = vrot.lane.b32.xlu0 %v2807_v8, %s4984_s22  ;;  %v4884_v37 = vpack.i.bf16 %v6043_v11, %v6022_v59  ;;  %v4879_v46 = vpack.i.bf16 %v5999_v10, %v6043_v11  ;;  %v2806_v10 = vpack.c.bf16 %v6043_v11, %v6043_v11  ;;  %v6109_v59 = vpop.permute.xlu0 %3231 }
 0x49b   : > { %v2674_v42 = vpop.f32.mrf.mxu1  ;;  %3030 = vst [vmem:[#allocation3 + $0x88] sm:$0xff] %v3026_v16 }
 0x49c   : > { %v2675_v17 = vadd.f32 %v2674_v42, %v2656_v15 }
 0x49e   : > { %vm2684_vm13 = vcmp.ge.f32.partialorder %v2675_v17, 0.0  ;;  %v2692_v0 = vmul.f32 0.02, %v2675_v17  ;;  %v3023_v29 = vld [vmem:[#allocation2 + $0x68] sm:$0xff] }
 0x4a0   : > { %v2700_v3 = vsel %vm2684_vm13, %v2675_v17, %v2692_v0  ;;  %v3022_v19 = vld [vmem:[#allocation2 + $0x50] sm:$0xff] }
 0x4a1   : > { %2708 = vst [vmem:[#allocation2 + $0x70] sm:$0xff] %v2700_v3  ;;  %4815 = vrot.lane.b32.xlu1 %v4804_v28, %s4977_s15  ;;  %4825 = vrot.lane.b32.xlu2 %v6039_v47, %s4981_s19  ;;  %v3027_v21 = vpack.c.bf16 %v3022_v19, %v3021_v2  ;;  %v4894_v33 = vpack.i.bf16 %v2700_v3, %v6034_v44 }
 0x4a2   : > { %2819 = vrot.lane.b32.xlu0 %v2802_v50, %s4984_s22  ;;  %v2808_v24 = vpack.c.bf16 %v2700_v3, %v2700_v3  ;;  %v3211_v52 = vpack.c.bf16 %v2700_v3, %v6034_v44  ;;  %v4909_v56 = vpack.i.bf16 %v5983_v38, %v2700_v3  ;;  %v6116_v28 = vpop.permute.xlu0 %3227 }
 0x4a3   : > { %3031 = vst [vmem:[#allocation3 + $0x90] sm:$0xff] %v3027_v21 }
 0x4a8   : > { %v3024_v14 = vld [vmem:[#allocation2 + $0x70] sm:$0xff] }
 0x4a9   : > { %2825 = vrot.lane.b32.xlu1 %v2805_v23, %s4984_s22  ;;  %4835 = vrot.lane.b32.xlu2 %v4834_v25, %s4978_s16  ;;  %v3028_v32 = vpack.c.bf16 %v3024_v14, %v3023_v29 }
 0x4aa   : > { %3221 = vrot.lane.b32.xlu0 %v3205_v26, %s4982_s20  ;;  %v3238_v26 = vrot.slane %v3224_v34, 4 }
 0x4ab   : > { %3032 = vst [vmem:[#allocation3 + $0x98] sm:$0xff] %v3028_v32 }
 0x4b1   : > { %4840 = vrot.lane.b32.xlu2 %v4834_v25, %s4977_s15  ;;  %4830 = vrot.lane.b32.xlu1 %v4834_v25, %s4983_s21 }
 0x4b2   : > { %4855 = vrot.lane.b32.xlu0 %v4854_v35, %s4978_s16 }
 0x4b9   : > { %4850 = vrot.lane.b32.xlu2 %v4854_v35, %s4983_s21  ;;  %4845 = vrot.lane.b32.xlu1 %v4844_v9, %s4979_s17 }
 0x4ba   : > { %4860 = vrot.lane.b32.xlu0 %v4854_v35, %s4977_s15 }
 0x4c1   : > { %2823 = vrot.lane.b32.xlu2 %v2804_v12, %s4984_s22  ;;  %4885 = vrot.lane.b32.xlu1 %v4884_v37, %s4979_s17 }
 0x4c2   : > { %4865 = vrot.lane.b32.xlu0 %v4864_v45, %s4979_s17 }
 0x4c9   : > { %3225 = vrot.lane.b32.xlu2 %v3207_v5, %s4982_s20  ;;  %4890 = vrot.lane.b32.xlu1 %v4884_v37, %s4981_s19 }
 0x4ca   : > { %4880 = vrot.lane.b32.xlu0 %v4879_v46, %s4983_s21 }
 0x4d1   : > { %4870 = vrot.lane.b32.xlu2 %v4879_v46, %s4978_s16  ;;  %4905 = vrot.lane.b32.xlu1 %v4894_v33, %s4983_s21 }
 0x4d2   : > { %4895 = vrot.lane.b32.xlu0 %v4894_v33, %s4978_s16 }
 0x4d9   : > { %4875 = vrot.lane.b32.xlu2 %v4879_v46, %s4977_s15  ;;  %2831 = vrot.lane.b32.xlu1 %v2808_v24, %s4984_s22  ;;  %v3240_v24 = vrot.slane %v6116_v28, 4 }
 0x4da   : > { %4900 = vrot.lane.b32.xlu0 %v4894_v33, %s4977_s15 }
 0x4db   : > { %v2818_v58 = vpop.permute.xlu2 %2817 }
 0x4dc   : > { %v2833_v3 = vrot.slane %v2818_v58, 4 }
 0x4e1   : > { %2827 = vrot.lane.b32.xlu2 %v2806_v10, %s4984_s22  ;;  %3233 = vrot.lane.b32.xlu1 %v3211_v52, %s4982_s20 }
 0x4e2   : > { %4910 = vrot.lane.b32.xlu0 %v4909_v56, %s4979_s17 }
 0x4e3   : > { %v6114_v49 = vpop.permute.xlu2 %4800 }
 0x4e9   : > { %3229 = vrot.lane.b32.xlu2 %v3209_v57, %s4982_s20  ;;  %4920 = vrot.lane.b32.xlu1 %v4884_v37, %s4980_s18 }
 0x4ea   : > { %4915 = vrot.lane.b32.xlu0 %v4909_v56, %s4981_s19 }
 0x4f1   : > { %4925 = vrot.lane.b32.xlu2 %v6039_v47, %s4980_s18  ;;  %4935 = vrot.lane.b32.xlu1 %v4844_v9, %s4981_s19 }
 0x4f2   : > { %4930 = vrot.lane.b32.xlu0 %v4909_v56, %s4980_s18 }
 0x4f3   : > { %v4791_v38 = vpop.permute.xlu1 %4790  ;;  %v6122_v60 = vpop.permute.xlu2 %4820 }
 0x4f4   : > { %v6127_v53 = vpop.permute.xlu0 %4785  ;;  %v4793_v39 = vunpack.i.h.bf16 %v4791_v38  ;;  %v4792_v41 = vunpack.i.l.bf16 %v4791_v38 }
 0x4f5   : > { %v4787_v5 = vunpack.i.l.bf16 %v6127_v53 }
 0x4f6   : > { %v2985_v62 = vsel %vm281_vm8, %v4792_v41, %v4793_v39 }
 0x4f7   : > { %v3001_v48 = vsel %vm5067_vm6, %v2985_v62, 0.0 }
 0x4f9   : > { %4940 = vrot.lane.b32.xlu2 %v6013_v1, %s4981_s19  ;;  %4950 = vrot.lane.b32.xlu1 %v4844_v9, %s4980_s18 }
 0x4fa   : > { %4945 = vrot.lane.b32.xlu0 %v4864_v45, %s4981_s19 }
 0x4fb   : > { %v4796_v61 = vpop.permute.xlu1 %4795  ;;  %v6130_v31 = vpop.permute.xlu2 %4825 }
 0x4fc   : > { %v4797_v63 = vunpack.i.l.bf16 %v4796_v61 }
 0x501   : > { %4955 = vrot.lane.b32.xlu2 %v6013_v1, %s4980_s18  ;;  %v4798_v1 = vunpack.i.h.bf16 %v4796_v61 }
 0x502   : > { %4960 = vrot.lane.b32.xlu0 %v4864_v45, %s4980_s18  ;;  %v4788_v45 = vunpack.i.h.bf16 %v6127_v53 }
 0x503   : > { %v2822_v22 = vpop.permute.xlu1 %2821  ;;  %v6135_v18 = vpop.permute.xlu0 %4805  ;;  %v2905_v4 = vsel %vm252_vm9, %v4797_v63, %v4798_v1 }
 0x504   : > { %v6137_v27 = vpop.permute.xlu2 %4835  ;;  %v2921_v15 = vsel %vm5054_vm2, %v2905_v4, 0.0  ;;  %v2835_v29 = vrot.slane %v2822_v22, 4  ;;  %v2757_v56 = vsel %vm176_vm0, %v4787_v5, %v4788_v45 }
 0x505   : > { %v4837_v20 = vunpack.i.l.bf16 %v6137_v27 }
 0x507   : > { %v2986_v43 = vsel %vm281_vm8, %v4793_v39, %v4837_v20 }
 0x508   : > { %v3002_v44 = vsel %vm5088_vm10, %v2986_v43, 0.0 }
 0x509   : > { %v3009_v6 = vpack.c.bf16 %v3002_v44, %v3001_v48 }
 0x50b   : > { %3013 = vst [vmem:[#allocation3 + $0x60] sm:$0xff] %v3009_v6  ;;  %v6146_v47 = vpop.permute.xlu1 %4810 }
 0x50c   : > { %v6148_v8 = vpop.permute.xlu0 %2829  ;;  %v6150_v11 = vpop.permute.xlu2 %4840  ;;  %v4813_v53 = vunpack.i.h.bf16 %v6146_v47  ;;  %v4812_v20 = vunpack.i.l.bf16 %v6146_v47 }
 0x50d   : > { %v4842_v30 = vunpack.i.l.bf16 %v6150_v11 }
 0x50f   : > { %v2906_v13 = vsel %vm252_vm9, %v4798_v1, %v4842_v30 }
 0x510   : > { %v2922_v57 = vsel %vm5071_vm7, %v2906_v13, 0.0  ;;  %v2773_v13 = vsel %vm5067_vm6, %v2757_v56, 0.0 }
 0x511   : > { %v2929_v16 = vpack.c.bf16 %v2922_v57, %v2921_v15 }
 0x513   : > { %2933 = vst [vmem:[#allocation3 + $0x40] sm:$0xff] %v2929_v16  ;;  %v6159_v42 = vpop.permute.xlu1 %4815  ;;  %v2989_v16 = vsel %vm281_vm8, %v4812_v20, %v4813_v53 }
 0x514   : > { %v4851_v17 = vpop.permute.xlu2 %4850  ;;  %v2820_v0 = vpop.permute.xlu0 %2819 }
 0x515   : > { %v2834_v50 = vrot.slane %v2820_v0, 4  ;;  %v4853_v35 = vunpack.i.h.bf16 %v4851_v17  ;;  %v4852_v9 = vunpack.i.l.bf16 %v4851_v17 }
 0x517   : > { %v2841_v19 = vsel %vm679_vm14, %v2833_v3, %v2834_v50  ;;  %v2760_v10 = vsel %vm176_vm0, %v4852_v9, %v4853_v35  ;;  %v4802_v3 = vunpack.i.l.bf16 %v6114_v49  ;;  %v4843_v50 = vunpack.i.h.bf16 %v6150_v11 }
 0x518   : > { %v2842_v2 = vsel %vm229_vm12, %v2818_v58, %v2841_v19  ;;  %v4838_v58 = vunpack.i.h.bf16 %v6137_v27  ;;  %v2776_v28 = vsel %vm5088_vm10, %v2760_v10, 0.0  ;;  %v4818_v35 = vunpack.i.h.bf16 %v6159_v42 }
 0x519   : > { %2853 = vst [vmem:[#allocation3 + $0x20] sm:$0xff] %v2842_v2 }
 0x51b   : > { %v6163_v21 = vpop.permute.xlu1 %2825 }
 0x51c   : > { %v2824_v23 = vpop.permute.xlu2 %2823  ;;  %v3222_v25 = vpop.permute.xlu0 %3221 }
 0x51d   : > { %v2836_v14 = vrot.slane %v2824_v23, 4  ;;  %v3237_v32 = vrot.slane %v3222_v25, 4 }
 0x51f   : > { %v2843_v12 = vsel %vm679_vm14, %v2835_v29, %v2836_v14  ;;  %v3245_v37 = vsel %vm679_vm14, %v3237_v32, %v3238_v26  ;;  %v3005_v26 = vsel %vm5067_vm6, %v2989_v16, 0.0 }
 0x520   : > { %v2844_v46 = vsel %vm229_vm12, %v2822_v22, %v2843_v12  ;;  %v3246_v33 = vsel %vm377_vm11, %v3222_v25, %v3245_v37 }
 0x521   : > { %2854 = vst [vmem:[#allocation3 + $0x28] sm:$0xff] %v2844_v46 }
 0x522   : > { %3257 = vst [vmem:[#allocation3 + $0xe0] sm:$0xff] %v3246_v33 }
 0x523   : > { %v4831_v52 = vpop.permute.xlu1 %4830 }
 0x524   : > { %v3226_v34 = vpop.permute.xlu2 %3225  ;;  %v4856_v38 = vpop.permute.xlu0 %4855  ;;  %v4833_v61 = vunpack.i.h.bf16 %v4831_v52  ;;  %v4832_v39 = vunpack.i.l.bf16 %v4831_v52 }
 0x525   : > { %v3239_v41 = vrot.slane %v3226_v34, 4  ;;  %v4858_v22 = vunpack.i.h.bf16 %v4856_v38  ;;  %v4857_v62 = vunpack.i.l.bf16 %v4856_v38 }
 0x526   : > { %v2759_v43 = vsel %vm176_vm0, %v4833_v61, %v4852_v9  ;;  %v2758_v48 = vsel %vm176_vm0, %v4788_v45, %v4832_v39  ;;  %v4817_v9 = vunpack.i.l.bf16 %v6159_v42  ;;  %v4822_v61 = vunpack.i.l.bf16 %v6122_v60 }
 0x527   : > { %v3247_v27 = vsel %vm679_vm14, %v3239_v41, %v3240_v24  ;;  %v2987_v44 = vsel %vm281_vm8, %v4838_v58, %v4857_v62  ;;  %v2988_v1 = vsel %vm281_vm8, %v4857_v62, %v4858_v22  ;;  %v2775_v63 = vsel %vm5067_vm6, %v2759_v43, 0.0 }
 0x528   : > { %v3248_v6 = vsel %vm377_vm11, %v3226_v34, %v3247_v27  ;;  %v3003_v47 = vsel %vm5067_vm6, %v2987_v44, 0.0  ;;  %v3004_v4 = vsel %vm5088_vm10, %v2988_v1, 0.0  ;;  %v2782_v30 = vpack.c.bf16 %v2776_v28, %v2775_v63 }
 0x529   : > { %3258 = vst [vmem:[#allocation3 + $0xe8] sm:$0xff] %v3248_v6  ;;  %v3010_v15 = vpack.c.bf16 %v3004_v4, %v3003_v47  ;;  %v2774_v57 = vsel %vm5088_vm10, %v2758_v48, 0.0  ;;  %v2909_v34 = vsel %vm252_vm9, %v4817_v9, %v4818_v35  ;;  %v4803_v62 = vunpack.i.h.bf16 %v6114_v49 }
 0x52a   : > { %2786 = vst [vmem:[#allocation3 + $0x8] sm:$0xff] %v2782_v30  ;;  %v2781_v17 = vpack.c.bf16 %v2774_v57, %v2773_v13  ;;  %v4808_v48 = vunpack.i.h.bf16 %v6135_v18  ;;  %v2925_v27 = vsel %vm5054_vm2, %v2909_v34, 0.0  ;;  %v4807_v57 = vunpack.i.l.bf16 %v6135_v18 }
 0x52b   : > { %3014 = vst [vmem:[#allocation3 + $0x68] sm:$0xff] %v3010_v15  ;;  %v4846_v0 = vpop.permute.xlu1 %4845 }
 0x52c   : > { %2785 = vst [vmem:[#allocation3] sm:$0xff] %v2781_v17  ;;  %v6198_v19 = vpop.permute.xlu2 %4870  ;;  %v4861_v2 = vpop.permute.xlu0 %4860  ;;  %v4848_v23 = vunpack.i.h.bf16 %v4846_v0  ;;  %v4847_v25 = vunpack.i.l.bf16 %v4846_v0 }
 0x52d   : > { %v4872_v29 = vunpack.i.l.bf16 %v6198_v19  ;;  %v4863_v14 = vunpack.i.h.bf16 %v4861_v2  ;;  %v4862_v32 = vunpack.i.l.bf16 %v4861_v2 }
 0x52e   : > { %v3162_v12 = vsel %vm347_vm4, %v4848_v23, %v4802_v3  ;;  %v3161_v11 = vsel %vm347_vm4, %v4847_v25, %v4848_v23 }
 0x52f   : > { %v2990_v37 = vsel %vm281_vm8, %v4813_v53, %v4872_v29  ;;  %v2907_v45 = vsel %vm252_vm9, %v4843_v50, %v4862_v32  ;;  %v2908_v5 = vsel %vm252_vm9, %v4862_v32, %v4863_v14  ;;  %v3178_v46 = vsel %vm5088_vm10, %v3162_v12, 0.0 }
 0x530   : > { %v3006_v33 = vsel %vm5088_vm10, %v2990_v37, 0.0  ;;  %v2923_v24 = vsel %vm5054_vm2, %v2907_v45, 0.0  ;;  %v2924_v42 = vsel %vm5071_vm7, %v2908_v5, 0.0  ;;  %v3177_v10 = vsel %vm5067_vm6, %v3161_v11, 0.0 }
 0x531   : > { %v3011_v52 = vpack.c.bf16 %v3006_v33, %v3005_v26  ;;  %v2930_v56 = vpack.c.bf16 %v2924_v42, %v2923_v24  ;;  %v3185_v58 = vpack.c.bf16 %v3178_v46, %v3177_v10  ;;  %v4827_v50 = vunpack.i.l.bf16 %v6130_v31 }
 0x532   : > { %v2761_v29 = vsel %vm176_vm0, %v4807_v57, %v4808_v48  ;;  %v2837_v14 = vrot.slane %v6163_v21, 4 }
 0x533   : > { %3015 = vst [vmem:[#allocation3 + $0x70] sm:$0xff] %v3011_v52  ;;  %v4886_v38 = vpop.permute.xlu1 %4885  ;;  %v2777_v5 = vsel %vm5067_vm6, %v2761_v29, 0.0  ;;  %v3242_v52 = vrot.slane %v6109_v59, 4 }
 0x534   : > { %2934 = vst [vmem:[#allocation3 + $0x48] sm:$0xff] %v2930_v56  ;;  %v6222_v39 = vpop.permute.xlu2 %4875  ;;  %v4866_v53 = vpop.permute.xlu0 %4865  ;;  %v4888_v41 = vunpack.i.h.bf16 %v4886_v38  ;;  %v4887_v22 = vunpack.i.l.bf16 %v4886_v38 }
 0x535   : > { %3189 = vst [vmem:[#allocation3 + $0xc0] sm:$0xff] %v3185_v58  ;;  %v4877_v20 = vunpack.i.l.bf16 %v6222_v39  ;;  %v4868_v28 = vunpack.i.h.bf16 %v4866_v53  ;;  %v4867_v43 = vunpack.i.l.bf16 %v4866_v53  ;;  %v4873_v53 = vunpack.i.h.bf16 %v6198_v19 }
 0x536   : > { %v3166_v44 = vsel %vm347_vm4, %v4888_v41, %v4822_v61  ;;  %v3165_v1 = vsel %vm347_vm4, %v4887_v22, %v4888_v41 }
 0x537   : > { %v2910_v63 = vsel %vm252_vm9, %v4818_v35, %v4877_v20  ;;  %v3163_v6 = vsel %vm347_vm4, %v4803_v62, %v4867_v43  ;;  %v3164_v49 = vsel %vm347_vm4, %v4867_v43, %v4868_v28  ;;  %v3182_v47 = vsel %vm5088_vm10, %v3166_v44, 0.0 }
 0x538   : > { %v2926_v4 = vsel %vm5071_vm7, %v2910_v63, 0.0  ;;  %v3179_v30 = vsel %vm5067_vm6, %v3163_v6, 0.0  ;;  %v3180_v13 = vsel %vm5088_vm10, %v3164_v49, 0.0  ;;  %v3181_v15 = vsel %vm5067_vm6, %v3165_v1, 0.0 }
 0x539   : > { %v2931_v16 = vpack.c.bf16 %v2926_v4, %v2925_v27  ;;  %v3186_v17 = vpack.c.bf16 %v3180_v13, %v3179_v30  ;;  %v3187_v0 = vpack.c.bf16 %v3182_v47, %v3181_v15  ;;  %v2839_v47 = vrot.slane %v6148_v8, 4 }
 0x53a   : > { %v4878_v13 = vunpack.i.h.bf16 %v6222_v39  ;;  %v4153_v39 = vld [vmem:[#allocation3 + $0x70] sm:$0xf] }
 0x53b   : > { %2935 = vst [vmem:[#allocation3 + $0x50] sm:$0xff] %v2931_v16  ;;  %v4891_v3 = vpop.permute.xlu1 %4890 }
 0x53c   : > { %3190 = vst [vmem:[#allocation3 + $0xc8] sm:$0xff] %v3186_v17  ;;  %v2828_v2 = vpop.permute.xlu2 %2827  ;;  %v4881_v23 = vpop.permute.xlu0 %4880  ;;  %v4893_v25 = vunpack.i.h.bf16 %v4891_v3  ;;  %v4892_v26 = vunpack.i.l.bf16 %v4891_v3 }
 0x53d   : > { %3191 = vst [vmem:[#allocation3 + $0xd0] sm:$0xff] %v3187_v0  ;;  %v2838_v32 = vrot.slane %v2828_v2, 4  ;;  %v4882_v35 = vunpack.i.l.bf16 %v4881_v23  ;;  %v4883_v56 = vunpack.i.h.bf16 %v4881_v23 }
 0x53e   : > { %v3314_v18 = vsel %vm396_vm1, %v4893_v25, %v4827_v50  ;;  %v3313_v9 = vsel %vm396_vm1, %v4892_v26, %v4893_v25  ;;  %v4342_v26 = vld [vmem:[#allocation3 + $0x74] sm:$0xf] }
 0x53f   : > { %v2845_v12 = vsel %vm679_vm14, %v2837_v14, %v2838_v32  ;;  %v2762_v11 = vsel %vm176_vm0, %v4808_v48, %v4882_v35  ;;  %v3330_v37 = vsel %vm5071_vm7, %v3314_v18, 0.0  ;;  %v3329_v45 = vsel %vm5054_vm2, %v3313_v9, 0.0  ;;  %v4341_v18 = vld [vmem:[#allocation3 + $0x64] sm:$0xf0] }
 0x540   : > { %v2846_v46 = vsel %vm229_vm12, %v6163_v21, %v2845_v12  ;;  %v2778_v33 = vsel %vm5088_vm10, %v2762_v11, 0.0  ;;  %v3335_v24 = vpack.c.bf16 %v3330_v37, %v3329_v45  ;;  %v3244_v9 = vrot.slane %v6097_v51, 4  ;;  %v4147_v11 = vld [vmem:[#allocation3 + $0x68] sm:$0xf0] }
 0x541   : > { %2855 = vst [vmem:[#allocation3 + $0x30] sm:$0xff] %v2846_v46  ;;  %v2783_v42 = vpack.c.bf16 %v2778_v33, %v2777_v5  ;;  %v4823_v37 = vunpack.i.h.bf16 %v6122_v60  ;;  %v4145_v33 = vld [vmem:[#allocation3 + $0x60] sm:$0xf] }
 0x542   : > { %3339 = vst [vmem:[#allocation3 + $0x110] sm:$0xff] %v3335_v24 }
 0x543   : > { %2787 = vst [vmem:[#allocation3 + $0x10] sm:$0xff] %v2783_v42  ;;  %v4906_v10 = vpop.permute.xlu1 %4905  ;;  %v4146_v42 = vor.u32 %v4341_v18, %v4145_v33  ;;  %v4211_v18 = vld [vmem:[#allocation3 + $0xe8] sm:$0xf0] }
 0x544   : > { %v3230_v58 = vpop.permute.xlu2 %3229  ;;  %v4896_v34 = vpop.permute.xlu0 %4895  ;;  %v4908_v38 = vunpack.i.h.bf16 %v4906_v10  ;;  %v4907_v61 = vunpack.i.l.bf16 %v4906_v10  ;;  %v4340_v10 = vld [vmem:[#allocation3 + $0x64] sm:$0xf] }
 0x545   : > { %v3241_v41 = vrot.slane %v3230_v58, 4  ;;  %v4898_v21 = vunpack.i.h.bf16 %v4896_v34  ;;  %v4897_v22 = vunpack.i.l.bf16 %v4896_v34 }
 0x546   : > { %v2763_v62 = vsel %vm176_vm0, %v4883_v56, %v4907_v61  ;;  %v2764_v20 = vsel %vm176_vm0, %v4907_v61, %v4908_v38  ;;  %v4137_v61 = vld [vmem:[#allocation3 + $0x50] sm:$0xf]  ;;  %vm3659_vm0 = vcmask 1040384  }
 0x547   : > { %v3249_v28 = vsel %vm679_vm14, %v3241_v41, %v3242_v52  ;;  %v2991_v43 = vsel %vm281_vm8, %v4873_v53, %v4897_v22  ;;  %v2992_v59 = vsel %vm281_vm8, %v4897_v22, %v4898_v21  ;;  %v2779_v48 = vsel %vm5067_vm6, %v2763_v62, 0.0  ;;  %v4338_v41 = vld [vmem:[#allocation3 + $0x54] sm:$0xf] }
 0x548   : > { %v3250_v27 = vsel %vm377_vm11, %v3230_v58, %v3249_v28  ;;  %v3007_v19 = vsel %vm5067_vm6, %v2991_v43, 0.0  ;;  %v3008_v44 = vsel %vm5088_vm10, %v2992_v59, 0.0  ;;  %v2780_v1 = vsel %vm5088_vm10, %v2764_v20, 0.0  ;;  %v4337_v28 = vld [vmem:[#allocation3 + $0x44] sm:$0xf0] }
 0x549   : > { %3259 = vst [vmem:[#allocation3 + $0xf0] sm:$0xff] %v3250_v27  ;;  %v3012_v63 = vpack.c.bf16 %v3008_v44, %v3007_v19  ;;  %v2784_v6 = vpack.c.bf16 %v2780_v1, %v2779_v48  ;;  %v4150_v58 = vor.u32 %v4340_v10, %v4147_v11  ;;  %v4131_v43 = vld [vmem:[#allocation3 + $0x48] sm:$0xf0]  ;;  %v4828_v27 = vunpack.i.h.bf16 %v6130_v31  ;;  %v4129_v1 = vld [vmem:[#allocation3 + $0x40] sm:$0xf] }
 0x54a   : > { %v4334_v11 = vld [vmem:[#allocation3 + $0x34] sm:$0xf] }
 0x54b   : > { %3016 = vst [vmem:[#allocation3 + $0x78] sm:$0xff] %v3012_v63  ;;  %v2832_v49 = vpop.permute.xlu1 %2831  ;;  %v4336_v63 = vld [vmem:[#allocation3 + $0x44] sm:$0xf] }
 0x54c   : > { %2788 = vst [vmem:[#allocation3 + $0x18] sm:$0xff] %v2784_v6  ;;  %v4901_v4 = vpop.permute.xlu0 %4900  ;;  %v2840_v30 = vrot.slane %v2832_v49, 4  ;;  %v6291_v45 = vpop.permute.xlu2 %4925 }
 0x54d   : > { %v4903_v15 = vunpack.i.h.bf16 %v4901_v4  ;;  %v4902_v57 = vunpack.i.l.bf16 %v4901_v4  ;;  %v4927_v54 = vunpack.i.l.bf16 %v6291_v45  ;;  %v4134_v4 = vor.u32 %v4336_v63, %v4131_v43  ;;  %v6336_v63 = vld [vmem:[%s5110_s26 + $0x50] sm:$0x11] }
 0x54e   : > { %v2847_v16 = vsel %vm679_vm14, %v2839_v47, %v2840_v30  ;;  %v4130_v47 = vor.u32 %v4337_v28, %v4129_v1  ;;  %v4354_v1 = vld [vmem:[#allocation3 + $0xd4] sm:$0xf] }
 0x54f   : > { %v2911_v17 = vsel %vm252_vm9, %v4878_v13, %v4902_v57  ;;  %v2912_v0 = vsel %vm252_vm9, %v4902_v57, %v4903_v15  ;;  %v2848_v3 = vsel %vm229_vm12, %v6148_v8, %v2847_v16 }
 0x550   : > { %v2927_v50 = vsel %vm5054_vm2, %v2911_v17, 0.0  ;;  %v2928_v2 = vsel %vm5071_vm7, %v2912_v0, 0.0  ;;  %2856 = vst [vmem:[#allocation3 + $0x38] sm:$0xff] %v2848_v3  ;;  %v4217_v30 = vld [vmem:[#allocation3 + $0xf0] sm:$0xf] }
 0x551   : > { %v2932_v23 = vpack.c.bf16 %v2928_v2, %v2927_v50  ;;  %v4358_v13 = vld [vmem:[#allocation3 + $0xf4] sm:$0xf] }
 0x552   : > { %v4343_v25 = vld [vmem:[#allocation3 + $0x74] sm:$0xf0]  ;;  %v4155_v29 = vld [vmem:[#allocation3 + $0x78] sm:$0xf0] }
 0x553   : > { %2936 = vst [vmem:[#allocation3 + $0x58] sm:$0xff] %v2932_v23  ;;  %v3234_v14 = vpop.permute.xlu1 %3233  ;;  %v4154_v32 = vor.u32 %v4343_v25, %v4153_v39  ;;  %v4158_v35 = vor.u32 %v4342_v26, %v4155_v29  ;;  %v6318_v29 = vld [vmem:[%s5110_s26 + $0x58] sm:$0x1] }
 0x554   : > { %v4911_v8 = vpop.permute.xlu0 %4910  ;;  %v3243_v12 = vrot.slane %v3234_v14, 4  ;;  %v6305_v57 = vpop.permute.xlu2 %4940 }
 0x555   : > { %v4913_v5 = vunpack.i.h.bf16 %v4911_v8  ;;  %v4912_v46 = vunpack.i.l.bf16 %v4911_v8  ;;  %3578 = vmatpush.bf16.msrb.mxu0 %v4154_v32  ;;  %3617 = vmatpush.bf16.msra.mxu1 %v4158_v35  ;;  %v4357_v35 = vld [vmem:[#allocation3 + $0xe4] sm:$0xf0]  ;;  %v3379_v8 = vunpack.c.l.bf16 %v6318_v29  ;;  %v4942_v10 = vunpack.i.l.bf16 %v6305_v57 }
 0x556   : > { %v3251_v24 = vsel %vm679_vm14, %v3243_v12, %v3244_v9  ;;  %v4333_v9 = vld [vmem:[#allocation3 + $0x24] sm:$0xf0]  ;;  %v4121_v12 = vld [vmem:[#allocation3 + $0x30] sm:$0xf] }
 0x557   : > { %v3167_v52 = vsel %vm347_vm4, %v4823_v37, %v4912_v46  ;;  %v3168_v51 = vsel %vm347_vm4, %v4912_v46, %v4913_v5  ;;  %v3252_v56 = vsel %vm377_vm11, %v3234_v14, %v3251_v24  ;;  %v4335_v15 = vld [vmem:[#allocation3 + $0x34] sm:$0xf0]  ;;  %v4123_v26 = vld [vmem:[#allocation3 + $0x38] sm:$0xf0]  ;;  %v4990_v37 = vmov 32  }
 0x558   : > { %v3183_v60 = vsel %vm5067_vm6, %v3167_v52, 0.0  ;;  %v3184_v34 = vsel %vm5088_vm10, %v3168_v51, 0.0  ;;  %3260 = vst [vmem:[#allocation3 + $0xf8] sm:$0xff] %v3252_v56  ;;  %4964 = vset.pattern.permute.xlu1 %v4990_v37  ;;  %v4122_v46 = vor.u32 %v4335_v15, %v4121_v12  ;;  %v4126_v33 = vor.u32 %v4334_v11, %v4123_v26  ;;  %v4209_v24 = vld [vmem:[#allocation3 + $0xe0] sm:$0xf]  ;;  %4965 = vset.pattern.permute.xlu0 %v4990_v37 }
 0x559   : > { %v3188_v38 = vpack.c.bf16 %v3184_v34, %v3183_v60  ;;  %3579 = vmatpush.bf16.msrb.mxu0 %v4146_v42  ;;  %3618 = vmatpush.bf16.msra.mxu1 %v4150_v58  ;;  %v4115_v42 = vld [vmem:[#allocation3 + $0x28] sm:$0xf0]  ;;  %v4210_v58 = vor.u32 %v4357_v35, %v4209_v24  ;;  %v4356_v60 = vld [vmem:[#allocation3 + $0xe4] sm:$0xf]  ;;  %v4928_v34 = vunpack.i.h.bf16 %v6291_v45  ;;  %v6327_v45 = vld [vmem:[#allocation3 + $0x4] sm:$0xf0] }
 0x55a   : > { %v4339_v53 = vld [vmem:[#allocation3 + $0x54] sm:$0xf0]  ;;  %v4139_v21 = vld [vmem:[#allocation3 + $0x58] sm:$0xf0]  ;;  %3382 = vperm.xlu1 %4964, %v3379_v8   ;;  %v4328_v35 = vld [vmem:[#allocation3 + $0x4] sm:$0xf] }
 0x55b   : > { %3192 = vst [vmem:[#allocation3 + $0xd8] sm:$0xff] %v3188_v38  ;;  %v4921_v22 = vpop.permute.xlu1 %4920  ;;  %v4138_v62 = vor.u32 %v4339_v53, %v4137_v61  ;;  %v4142_v20 = vor.u32 %v4338_v41, %v4139_v21  ;;  %v4214_v53 = vor.u32 %v4356_v60, %v4211_v18  ;;  %v4113_v41 = vld [vmem:[#allocation3 + $0x20] sm:$0xf]  ;;  %v4332_v21 = vld [vmem:[#allocation3 + $0x24] sm:$0xf] }
 0x55c   : > { %v4916_v59 = vpop.permute.xlu0 %4915  ;;  %v4923_v48 = vunpack.i.h.bf16 %v4921_v22  ;;  %v4922_v7 = vunpack.i.l.bf16 %v4921_v22  ;;  %v4114_v28 = vor.u32 %v4333_v9, %v4113_v41  ;;  %v4118_v43 = vor.u32 %v4332_v21, %v4115_v42  ;;  %v6342_v15 = vpop.permute.xlu2 %4955  ;;  %v4352_v37 = vld [vmem:[#allocation3 + $0xc4] sm:$0xf] }
 0x55d   : > { %v4918_v19 = vunpack.i.h.bf16 %v4916_v59  ;;  %v4917_v44 = vunpack.i.l.bf16 %v4916_v59  ;;  %3580 = vmatpush.bf16.msrb.mxu0 %v4138_v62  ;;  %3619 = vmatpush.bf16.msra.mxu1 %v4142_v20  ;;  %v4957_v18 = vunpack.i.l.bf16 %v6342_v15 }
 0x55e   : > { %v3086_v6 = vsel %vm318_vm5, %v4923_v48, %v4927_v54  ;;  %v3085_v49 = vsel %vm318_vm5, %v4922_v7, %v4923_v48  ;;  %v4201_v54 = vld [vmem:[#allocation3 + $0xd0] sm:$0xf]  ;;  %v6325_v48 = vld [vmem:[#allocation3] sm:$0xf] }
 0x55f   : > { %v3315_v31 = vsel %vm396_vm1, %v4828_v27, %v4917_v44  ;;  %v3316_v16 = vsel %vm396_vm1, %v4917_v44, %v4918_v19  ;;  %v3102_v17 = vsel %vm5071_vm7, %v3086_v6, 0.0  ;;  %v3101_v0 = vsel %vm5054_vm2, %v3085_v49, 0.0  ;;  %v4359_v3 = vld [vmem:[#allocation3 + $0xf4] sm:$0xf0]  ;;  %v4219_v50 = vld [vmem:[#allocation3 + $0xf8] sm:$0xf0] }
 0x560   : > { %v3331_v2 = vsel %vm5054_vm2, %v3315_v31, 0.0  ;;  %v3332_v23 = vsel %vm5071_vm7, %v3316_v16, 0.0  ;;  %v3107_v39 = vpack.c.bf16 %v3102_v17, %v3101_v0  ;;  %v4218_v25 = vor.u32 %v4359_v3, %v4217_v30  ;;  %v4331_v30 = vld [vmem:[#allocation3 + $0x14] sm:$0xf0]  ;;  %v4353_v17 = vld [vmem:[#allocation3 + $0xc4] sm:$0xf0] }
 0x561   : > { %v3336_v14 = vpack.c.bf16 %v3332_v23, %v3331_v2  ;;  %3581 = vmatpush.bf16.msrb.mxu0 %v4130_v47  ;;  %3620 = vmatpush.bf16.msra.mxu1 %v4134_v4  ;;  %v4222_v32 = vor.u32 %v4358_v13, %v4219_v50  ;;  %v4107_v13 = vld [vmem:[#allocation3 + $0x18] sm:$0xf0]  ;;  %v4195_v0 = vld [vmem:[#allocation3 + $0xc8] sm:$0xf0]  ;;  %v4105_v50 = vld [vmem:[#allocation3 + $0x10] sm:$0xf]  ;;  %v3387_v23 = vunpack.c.l.b16 %v6336_v63 }
 0x562   : > { %3111 = vst [vmem:[#allocation3 + $0xb0] sm:$0xff] %v3107_v39  ;;  %3591 = vmatpush.bf16.msrb.mxu3 %v4218_v25  ;;  %v4355_v22 = vld [vmem:[#allocation3 + $0xd4] sm:$0xf0]  ;;  %v4203_v59 = vld [vmem:[#allocation3 + $0xd8] sm:$0xf0]  ;;  %v4106_v25 = vor.u32 %v4331_v30, %v4105_v50  ;;  %v4198_v24 = vor.u32 %v4352_v37, %v4195_v0 }
 0x563   : > { %3340 = vst [vmem:[#allocation3 + $0x118] sm:$0xff] %v3336_v14  ;;  %3630 = vmatpush.bf16.msra.mxu2 %v4222_v32  ;;  %v4936_v5 = vpop.permute.xlu1 %4935  ;;  %v4202_v4 = vor.u32 %v4355_v22, %v4201_v54  ;;  %v4206_v16 = vor.u32 %v4354_v1, %v4203_v59  ;;  %v4099_v3 = vld [vmem:[#allocation3 + $0x8] sm:$0xf0]  ;;  %v4330_v2 = vld [vmem:[#allocation3 + $0x14] sm:$0xf]  ;;  %v4098_v32 = vor.u32 %v6327_v45, %v6325_v48  ;;  %v4958_v45 = vunpack.i.h.bf16 %v6342_v15 }
 0x564   : > { %v4931_v52 = vpop.permute.xlu0 %4930  ;;  %v4938_v51 = vunpack.i.h.bf16 %v4936_v5  ;;  %v4937_v56 = vunpack.i.l.bf16 %v4936_v5  ;;  %v4110_v26 = vor.u32 %v4330_v2, %v4107_v13  ;;  %v4193_v14 = vld [vmem:[#allocation3 + $0xc0] sm:$0xf]  ;;  %v4943_v5 = vunpack.i.h.bf16 %v6305_v57  ;;  %v4362_v15 = vld [vmem:[#allocation3 + $0x114] sm:$0xf]  ;;  %v4344_v37 = vld [vmem:[#allocation3 + $0x84] sm:$0xf] }
 0x565   : > { %v4933_v38 = vunpack.i.h.bf16 %v4931_v52  ;;  %v4932_v61 = vunpack.i.l.bf16 %v4931_v52  ;;  %3582 = vmatpush.bf16.msrb.mxu0 %v4122_v46  ;;  %3621 = vmatpush.bf16.msra.mxu1 %v4126_v33  ;;  %v4194_v11 = vor.u32 %v4353_v17, %v4193_v14  ;;  %v4171_v14 = vld [vmem:[#allocation3 + $0x98] sm:$0xf0] }
 0x566   : > { %v3310_v62 = vsel %vm396_vm1, %v4938_v51, %v4942_v10  ;;  %v3309_v20 = vsel %vm396_vm1, %v4937_v56, %v4938_v51  ;;  %3592 = vmatpush.bf16.msrb.mxu3 %v4210_v58  ;;  %v4102_v51 = vor.u32 %v4328_v35, %v4099_v3  ;;  %v3390_v56 = vpack.c.b16 %v3387_v23, %v3387_v23 }
 0x567   : > { %v3087_v7 = vsel %vm318_vm5, %v4928_v34, %v4932_v61  ;;  %v3088_v27 = vsel %vm318_vm5, %v4932_v61, %v4933_v38  ;;  %v3326_v19 = vsel %vm5071_vm7, %v3310_v62, 0.0  ;;  %v3325_v44 = vsel %vm5054_vm2, %v3309_v20, 0.0  ;;  %3631 = vmatpush.bf16.msra.mxu2 %v4214_v53  ;;  %v4233_v38 = vld [vmem:[#allocation3 + $0x110] sm:$0xf] }
 0x568   : > { %v3103_v6 = vsel %vm5054_vm2, %v3087_v7, 0.0  ;;  %v3104_v49 = vsel %vm5071_vm7, %v3088_v27, 0.0  ;;  %v3333_v47 = vpack.c.bf16 %v3326_v19, %v3325_v44 }
 0x569   : > { %v3108_v31 = vpack.c.bf16 %v3104_v49, %v3103_v6  ;;  %3583 = vmatpush.bf16.msrb.mxu0 %v4114_v28  ;;  %3622 = vmatpush.bf16.msra.mxu1 %v4118_v43  ;;  %v4185_v62 = vld [vmem:[#allocation3 + $0xb0] sm:$0xf]  ;;  %v4350_v20 = vld [vmem:[#allocation3 + $0xb4] sm:$0xf] }
 0x56a   : > { %3337 = vst [vmem:[#allocation3 + $0x100] sm:$0xff] %v3333_v47  ;;  %3593 = vmatpush.bf16.msrb.mxu3 %v4202_v4  ;;  %v4363_v42 = vld [vmem:[#allocation3 + $0x114] sm:$0xf0]  ;;  %v4235_v47 = vld [vmem:[#allocation3 + $0x118] sm:$0xf0] }
 0x56b   : > { %3112 = vst [vmem:[#allocation3 + $0xb8] sm:$0xff] %v3108_v31  ;;  %3632 = vmatpush.bf16.msra.mxu2 %v4206_v16  ;;  %v4951_v39 = vpop.permute.xlu1 %4950  ;;  %v4234_v21 = vor.u32 %v4363_v42, %v4233_v38  ;;  %v4238_v31 = vor.u32 %v4362_v15, %v4235_v47  ;;  %v3389_v16 = vunpack.c.l.b16 %v6318_v29  ;;  %v4169_v29 = vld [vmem:[#allocation3 + $0x90] sm:$0xf] }
 0x56c   : > { %v4946_v9 = vpop.permute.xlu0 %4945  ;;  %v4953_v8 = vunpack.i.h.bf16 %v4951_v39  ;;  %v4952_v12 = vunpack.i.l.bf16 %v4951_v39 }
 0x56d   : > { %v4948_v46 = vunpack.i.h.bf16 %v4946_v9  ;;  %v4947_v33 = vunpack.i.l.bf16 %v4946_v9  ;;  %3584 = vmatpush.bf16.msrb.mxu0 %v4106_v25  ;;  %3623 = vmatpush.bf16.msra.mxu1 %v4110_v26  ;;  %v3392_v40 = vpack.c.b16 %v3389_v16, %v3389_v16  ;;  %v4347_v26 = vld [vmem:[#allocation3 + $0x94] sm:$0xf0]  ;;  %v4345_v9 = vld [vmem:[#allocation3 + $0x84] sm:$0xf0] }
 0x56e   : > { %v3082_v10 = vsel %vm318_vm5, %v4953_v8, %v4957_v18  ;;  %v3081_v52 = vsel %vm318_vm5, %v4952_v12, %v4953_v8  ;;  %3594 = vmatpush.bf16.msrb.mxu3 %v4194_v11  ;;  %v4170_v35 = vor.u32 %v4347_v26, %v4169_v29  ;;  %v4163_v8 = vld [vmem:[#allocation3 + $0x88] sm:$0xf0]  ;;  %v3388_v12 = vunpack.c.h.b16 %v6336_v63  ;;  %v4161_v11 = vld [vmem:[#allocation3 + $0x80] sm:$0xf] }
 0x56f   : > { %v3311_v58 = vsel %vm396_vm1, %v4943_v5, %v4947_v33  ;;  %v3312_v60 = vsel %vm396_vm1, %v4947_v33, %v4948_v46  ;;  %v3098_v57 = vsel %vm5071_vm7, %v3082_v10, 0.0  ;;  %v3097_v34 = vsel %vm5054_vm2, %v3081_v52, 0.0  ;;  %3633 = vmatpush.bf16.msra.mxu2 %v4198_v24 }
 0x570   : > { %v3327_v61 = vsel %vm5054_vm2, %v3311_v58, 0.0  ;;  %v3328_v53 = vsel %vm5071_vm7, %v3312_v60, 0.0  ;;  %v3105_v41 = vpack.c.bf16 %v3098_v57, %v3097_v34  ;;  %v4162_v5 = vor.u32 %v4345_v9, %v4161_v11 }
 0x571   : > { %v3334_v22 = vpack.c.bf16 %v3328_v53, %v3327_v61  ;;  %3585 = vmatpush.bf16.msrb.mxu0 %v4098_v32  ;;  %3624 = vmatpush.bf16.msra.mxu1 %v4102_v51  ;;  %v4225_v4 = vld [vmem:[#allocation3 + $0x100] sm:$0xf]  ;;  %v4360_v0 = vld [vmem:[#allocation3 + $0x104] sm:$0xf]  ;;  %v4346_v32 = vld [vmem:[#allocation3 + $0x94] sm:$0xf]  ;;  %v4166_v46 = vor.u32 %v4344_v37, %v4163_v8  ;;  %v3391_v33 = vpack.c.b16 %v3388_v12, %v3388_v12 }
 0x572   : > { %3109 = vst [vmem:[#allocation3 + $0xa0] sm:$0xff] %v3105_v41  ;;  %v4351_v28 = vld [vmem:[#allocation3 + $0xb4] sm:$0xf0]  ;;  %v4187_v43 = vld [vmem:[#allocation3 + $0xb8] sm:$0xf0]  ;;  %v4174_v18 = vor.u32 %v4346_v32, %v4171_v14  ;;  %vm3664_vm1 = vcmp.lt.s32.totalorder %v163_v36, 256 }
 0x573   : > { %3338 = vst [vmem:[#allocation3 + $0x108] sm:$0xff] %v3334_v22  ;;  %v4186_v54 = vor.u32 %v4351_v28, %v4185_v62  ;;  %v4190_v59 = vor.u32 %v4350_v20, %v4187_v43 }
 0x574   : > { %v4961_v48 = vpop.permute.xlu0 %4960  ;;  %3586 = vmatmul.bf16.vlgmr.msrb.gmra.mxu0 %v3390_v56  ;;  %3625 = vmatmul.bf16.vlgmr.msra.gmra.mxu1 %v3390_v56 }
 0x575   : > { %3610 = vmatpush.bf16.msra.mxu0 %v4234_v21  ;;  %v4963_v7 = vunpack.i.h.bf16 %v4961_v48  ;;  %v4962_v27 = vunpack.i.l.bf16 %v4961_v48  ;;  %3595 = vmatpush.bf16.msrb.mxu3 %v4186_v54 }
 0x576   : > { %3634 = vmatpush.bf16.msra.mxu2 %v4190_v59 }
 0x577   : > { %v3083_v19 = vsel %vm318_vm5, %v4958_v45, %v4962_v27  ;;  %v3084_v44 = vsel %vm318_vm5, %v4962_v27, %v4963_v7 }
 0x578   : > { %v3099_v1 = vsel %vm5054_vm2, %v3083_v19, 0.0  ;;  %v3100_v6 = vsel %vm5071_vm7, %v3084_v44, 0.0 }
 0x579   : > { %v3106_v49 = vpack.c.bf16 %v3100_v6, %v3099_v1  ;;  %v4177_v50 = vld [vmem:[#allocation3 + $0xa0] sm:$0xf]  ;;  %v4348_v2 = vld [vmem:[#allocation3 + $0xa4] sm:$0xf] }
 0x57a   : > { %v4361_v30 = vld [vmem:[#allocation3 + $0x104] sm:$0xf0]  ;;  %v4227_v17 = vld [vmem:[#allocation3 + $0x108] sm:$0xf0] }
 0x57b   : > { %3110 = vst [vmem:[#allocation3 + $0xa8] sm:$0xff] %v3106_v49  ;;  %v4226_v13 = vor.u32 %v4361_v30, %v4225_v4  ;;  %v4230_v3 = vor.u32 %v4360_v0, %v4227_v17 }
 0x57d   : > { %3611 = vmatpush.bf16.msra.mxu0 %v4226_v13 }
 0x581   : > { %3649 = vmatpush.bf16.msrb.mxu0 %v4238_v31 }
 0x582   : > { %v4349_v55 = vld [vmem:[#allocation3 + $0xa4] sm:$0xf0]  ;;  %v4179_v23 = vld [vmem:[#allocation3 + $0xa8] sm:$0xf0] }
 0x583   : > { %v4178_v39 = vor.u32 %v4349_v55, %v4177_v50  ;;  %v4182_v25 = vor.u32 %v4348_v2, %v4179_v23 }
 0x584   : > { %4239 = vmatmul.msk.bf16.vlgmr.msra.gmra.mxu0 %vm1477_vm3, %v3392_v40 }
 0x585   : > { %3650 = vmatpush.bf16.msrb.mxu0 %v4230_v3  ;;  %3596 = vmatpush.bf16.msrb.mxu3 %v4178_v39 }
 0x586   : > { %3635 = vmatpush.bf16.msra.mxu2 %v4182_v25 }
 0x589   : > { %3597 = vmatpush.bf16.msrb.mxu3 %v4170_v35 }
 0x58a   : > { %3636 = vmatpush.bf16.msra.mxu2 %v4174_v18 }
 0x58d   : > { %3598 = vmatpush.bf16.msrb.mxu3 %v4162_v5 }
 0x58e   : > { %3637 = vmatpush.bf16.msra.mxu2 %v4166_v46 }
 0x590   : > { %3599 = vmatmul.bf16.vlgmr.msrb.gmra.mxu3 %v3391_v33 }
 0x591   : > { %3638 = vmatmul.bf16.vlgmr.msra.gmra.mxu2 %v3391_v33 }
 0x594   : > { %4240 = vmatmul.msk.bf16.vlgmr.msrb.gmra.mxu0 %vm1477_vm3, %v3392_v40 }
 0x5cc   : > { %v3383_v56 = vpop.permute.xlu1 %3382 }
 0x5f1   : > { %v3587_v24 = vpop.f32.mrf.mxu0  ;;  %v3626_v42 = vpop.f32.mrf.mxu1 }
 0x5f2   : > { %v3627_v58 = vadd.f32 %v3626_v42, %v3383_v56  ;;  %v3588_v57 = vadd.f32 %v3587_v24, %v3383_v56 }
 0x5f9   : > { %v3589_v10 = vpop.f32.mrf.mxu0  ;;  %v3628_v52 = vpop.f32.mrf.mxu1 }
 0x601   : > { %v3613_v51 = vpop.f32.mrf.mxu0 }
 0x609   : > { %v3615_v63 = vpop.f32.mrf.mxu0 }
 0x611   : > { %v3652_v60 = vpop.f32.mrf.mxu0 }
 0x613   : > { %v3600_v34 = vpop.f32.mrf.mxu3 }
 0x614   : > { %v3639_v38 = vpop.f32.mrf.mxu2  ;;  %v3601_v61 = vadd.f32 %v3600_v34, %v3588_v57 }
 0x615   : > { %v3640_v53 = vadd.f32 %v3639_v38, %v3627_v58 }
 0x616   : > { %v3614_v21 = vadd.f32 %v3613_v51, %v3601_v61 }
 0x617   : > { %v3653_v41 = vadd.f32 %v3652_v60, %v3640_v53 }
 0x619   : > { %v3658_v22 = vrot.slane %v3653_v41, 7  ;;  %v3654_v62 = vpop.f32.mrf.mxu0 }
 0x61b   : > { %v3660_v20 = vsel %vm3659_vm0, %v3614_v21, %v3658_v22  ;;  %v3602_v28 = vpop.f32.mrf.mxu3 }
 0x61c   : > { %3666 = vst.msk [vmem:[%s161_s4] sm:$0x3] %vm3664_vm1, %v3660_v20  ;;  %v3641_v43 = vpop.f32.mrf.mxu2 }
 0x61d PF: > { %s12_s9 = sadd.s32 1, %s4974_s9  }
 0x61e   : > { %p9_p4 = scmp.ge.s32.totalorder %s12_s9, 4  }
 0x620   :  { %11 = sbr.rel (!%p9_p4) target bundleno = 1 (0x1), region = 61 }

// kernel: hyper_discriminator_forward.2
= control target key start
LH: loop header
LB: loop body
LE: loop exit
PB: predicated region body
PF: predicated region fallthrough
CT: control target
= control target key end

     0   :  { %8 = vsyncpa [#allocation3], 0  ;;  %s11598_s0 = inlined_call_operand.vmem [shape: bf16[2,64], index: 0, kind: input, shape index: {}]   ;;  %s11599_s1 = inlined_call_operand.hbm [shape: bf16[64,21120], index: 1, kind: input, shape index: {}]   ;;  %s11600_s2 = inlined_call_operand.hbm [shape: f32[1,21120], index: 2, kind: input, shape index: {}]   ;;  %s11601_s3 = inlined_call_operand.vmem [shape: bf16[2,21120], index: 3, kind: output, shape index: {}]  }
   0x1   :  { %s16_s14 = sshll.u32 %s11599_s1, 4  ;;  %s17_s14 = int_to_ptr.hbm [resolvable:$true] %s16_s14 }
   0x2   :  { %9 = vsyncpa [#allocation5], 0  ;;  %s10742_s15 = smov [#allocation2]   ;;  %s30_s19 = sshll.u32 %s11600_s2, 4  ;;  %s31_s19 = int_to_ptr.hbm [resolvable:$true] %s30_s19 }
   0x3   :  { %s18_s16 = sshll.u32 %s10742_s15, 4  ;;  %s10743_s20 = smov 10560   ;;  %s19_s16 = int_to_ptr.vmem [resolvable:$true] %s18_s16 }
   0x4   :  { %s10744_s21 = smov 660   ;;  %s10745_s22 = smov [#allocation4]  }
   0x5   :  { %24 = dma.hbm_to_vmem [thread:$0]  %s17_s14, 84480, %s19_s16, [#allocation3], %s10743_s20, %s10743_s20, %s10744_s21  }
   0x6   :  { %s32_s23 = sshll.u32 %s10745_s22, 4  ;;  %s33_s23 = int_to_ptr.vmem [resolvable:$true] %s32_s23 }
   0x7   :  { %35 = dma.hbm_to_vmem [thread:$0]  %s31_s19, 2640, %s33_s23, [#allocation5]  }
   0x8   :  { %10738 = dma.done.wait [#allocation3], 84480  }
   0x9   :  { %10739 = vsyncadd [#allocation3], 4294882816 }
   0xa   :  { %10740 = dma.done.wait [#allocation5], 2640  }
   0xb   :  { %10741 = vsyncadd [#allocation5], 4294964656  ;;  %v9197_v0 = vld [vmem:[#allocation2 + $0xf78] sm:$0xf]  ;;  %v10597_v1 = vld [vmem:[#allocation2 + $0x1208] sm:$0xf0] }
   0xc   :  { %v10515_v2 = vld [vmem:[#allocation2 + $0xf7c] sm:$0xf]  ;;  %v9198_v3 = vor.u32 %v10597_v1, %v9197_v0  ;;  %v9199_v4 = vld [vmem:[#allocation2 + $0x120c] sm:$0xf0]  ;;  %v9205_v5 = vld [vmem:[#allocation2 + $0xf80] sm:$0xf] }
   0xd   :  { %v10598_v6 = vld [vmem:[#allocation2 + $0x1210] sm:$0xf0]  ;;  %v9202_v7 = vor.u32 %v10515_v2, %v9199_v4  ;;  %v10516_v9 = vld [vmem:[#allocation2 + $0xf84] sm:$0xf]  ;;  %v9207_v10 = vld [vmem:[#allocation2 + $0x1214] sm:$0xf0] }
   0xe   :  { %v9206_v8 = vor.u32 %v10598_v6, %v9205_v5  ;;  %v8537_v11 = vld [vmem:[#allocation2 + $0xa50] sm:$0xf]  ;;  %4394 = vmatpush.bf16.msra.mxu0 %v9198_v3  ;;  %v9210_v12 = vor.u32 %v10516_v9, %v9207_v10  ;;  %v10432_v13 = vld [vmem:[#allocation2 + $0xce0] sm:$0xf0]  ;;  %v10350_v14 = vld [vmem:[#allocation2 + $0xa54] sm:$0xf] }
   0xf   :  { %v8539_v15 = vld [vmem:[#allocation2 + $0xce4] sm:$0xf0]  ;;  %4407 = vmatpush.bf16.msra.mxu1 %v9202_v7  ;;  %v8538_v16 = vor.u32 %v10432_v13, %v8537_v11  ;;  %v8545_v18 = vld [vmem:[#allocation2 + $0xa58] sm:$0xf]  ;;  %v10433_v19 = vld [vmem:[#allocation2 + $0xce8] sm:$0xf0] }
  0x10   :  { %4420 = vmatpush.bf16.msra.mxu2 %v9206_v8  ;;  %v8542_v17 = vor.u32 %v10350_v14, %v8539_v15  ;;  %v10351_v20 = vld [vmem:[#allocation2 + $0xa5c] sm:$0xf]  ;;  %4433 = vmatpush.bf16.msra.mxu3 %v9210_v12  ;;  %v8546_v21 = vor.u32 %v10433_v19, %v8545_v18  ;;  %v8547_v22 = vld [vmem:[#allocation2 + $0xcec] sm:$0xf0]  ;;  %v7877_v23 = vld [vmem:[#allocation2 + $0x528] sm:$0xf] }
  0x11   :  { %v10267_v24 = vld [vmem:[#allocation2 + $0x7b8] sm:$0xf0]  ;;  %v8550_v25 = vor.u32 %v10351_v20, %v8547_v22  ;;  %v10185_v26 = vld [vmem:[#allocation2 + $0x52c] sm:$0xf]  ;;  %v7879_v27 = vld [vmem:[#allocation2 + $0x7bc] sm:$0xf0] }
  0x12   :  { %v7885_v28 = vld [vmem:[#allocation2 + $0x530] sm:$0xf]  ;;  %4395 = vmatpush.bf16.msra.mxu0 %v8538_v16  ;;  %v7878_v29 = vor.u32 %v10267_v24, %v7877_v23  ;;  %v10268_v30 = vld [vmem:[#allocation2 + $0x7c0] sm:$0xf0]  ;;  %v10186_v31 = vld [vmem:[#allocation2 + $0x534] sm:$0xf]  ;;  %v7882_v33 = vor.u32 %v10185_v26, %v7879_v27 }
  0x13   :  { %v7887_v32 = vld [vmem:[#allocation2 + $0x7c4] sm:$0xf0]  ;;  %4408 = vmatpush.bf16.msra.mxu1 %v8542_v17  ;;  %v7886_v34 = vor.u32 %v10268_v30, %v7885_v28  ;;  %v7217_v35 = vld [vmem:[#allocation2] sm:$0xf]  ;;  %v10102_v36 = vld [vmem:[#allocation2 + $0x290] sm:$0xf0] }
  0x14   :  { %4421 = vmatpush.bf16.msra.mxu2 %v8546_v21  ;;  %v10020_v37 = vld [vmem:[#allocation2 + $0x4] sm:$0xf]  ;;  %4434 = vmatpush.bf16.msra.mxu3 %v8550_v25  ;;  %v7890_v38 = vor.u32 %v10186_v31, %v7887_v32  ;;  %v7219_v39 = vld [vmem:[#allocation2 + $0x294] sm:$0xf0]  ;;  %v7225_v40 = vld [vmem:[#allocation2 + $0x8] sm:$0xf]  ;;  %v7218_v44 = vor.u32 %v10102_v36, %v7217_v35 }
  0x15   :  { %v10103_v41 = vld [vmem:[#allocation2 + $0x298] sm:$0xf0]  ;;  %v10021_v42 = vld [vmem:[#allocation2 + $0xc] sm:$0xf]  ;;  %v7227_v43 = vld [vmem:[#allocation2 + $0x29c] sm:$0xf0]  ;;  %v7222_v48 = vor.u32 %v10020_v37, %v7219_v39 }
  0x16   :  { %4396 = vmatpush.bf16.msra.mxu0 %v7878_v29  ;;  %v9213_v45 = vld [vmem:[#allocation2 + $0xf88] sm:$0xf]  ;;  %v10599_v46 = vld [vmem:[#allocation2 + $0x1218] sm:$0xf0]  ;;  %v10517_v47 = vld [vmem:[#allocation2 + $0xf8c] sm:$0xf]  ;;  %v7226_v49 = vor.u32 %v10103_v41, %v7225_v40  ;;  %v7230_v51 = vor.u32 %v10021_v42, %v7227_v43 }
  0x17   :  { %4409 = vmatpush.bf16.msra.mxu1 %v7882_v33  ;;  %vm4386_vm0 = vcmask 523264   ;;  %v9215_v50 = vld [vmem:[#allocation2 + $0x121c] sm:$0xf0]  ;;  %v9214_v52 = vor.u32 %v10599_v46, %v9213_v45  ;;  %v9221_v53 = vld [vmem:[#allocation2 + $0xf90] sm:$0xf]  ;;  %vm6850_vm1 = vcmask 1042434  }
  0x18   :  { %4422 = vmatpush.bf16.msra.mxu2 %v7886_v34  ;;  %4435 = vmatpush.bf16.msra.mxu3 %v7890_v38  ;;  %v10600_v54 = vld [vmem:[#allocation2 + $0x1220] sm:$0xf0]  ;;  %v10518_v55 = vld [vmem:[#allocation2 + $0xf94] sm:$0xf]  ;;  %v9218_v56 = vor.u32 %v10517_v47, %v9215_v50  ;;  %v9223_v57 = vld [vmem:[#allocation2 + $0x1224] sm:$0xf0] }
  0x19   :  { %v8553_v58 = vld [vmem:[#allocation2 + $0xa60] sm:$0xf]  ;;  %v10434_v59 = vld [vmem:[#allocation2 + $0xcf0] sm:$0xf0]  ;;  %v10352_v61 = vld [vmem:[#allocation2 + $0xa64] sm:$0xf]  ;;  %v9222_v63 = vor.u32 %v10600_v54, %v9221_v53  ;;  %v9226_v0 = vor.u32 %v10518_v55, %v9223_v57 }
  0x1a   :  { %4397 = vmatpush.bf16.msra.mxu0 %v7218_v44  ;;  %v10775_v60 = vld [vmem:[%s11598_s0] sm:$0x1]  ;;  %v8555_v62 = vld [vmem:[#allocation2 + $0xcf4] sm:$0xf0]  ;;  %v8554_v1 = vor.u32 %v10434_v59, %v8553_v58  ;;  %v8561_v2 = vld [vmem:[#allocation2 + $0xa68] sm:$0xf] }
  0x1b   :  { %4410 = vmatpush.bf16.msra.mxu1 %v7222_v48  ;;  %v10435_v3 = vld [vmem:[#allocation2 + $0xcf8] sm:$0xf0]  ;;  %v10353_v4 = vld [vmem:[#allocation2 + $0xa6c] sm:$0xf]  ;;  %v8558_v5 = vor.u32 %v10352_v61, %v8555_v62  ;;  %v8563_v6 = vld [vmem:[#allocation2 + $0xcfc] sm:$0xf0] }
  0x1c   :  { %4423 = vmatpush.bf16.msra.mxu2 %v7226_v49  ;;  %4436 = vmatpush.bf16.msra.mxu3 %v7230_v51  ;;  %v7893_v7 = vld [vmem:[#allocation2 + $0x538] sm:$0xf]  ;;  %v10269_v8 = vld [vmem:[#allocation2 + $0x7c8] sm:$0xf0]  ;;  %v10187_v9 = vld [vmem:[#allocation2 + $0x53c] sm:$0xf]  ;;  %v8562_v11 = vor.u32 %v10435_v3, %v8561_v2  ;;  %v8566_v13 = vor.u32 %v10353_v4, %v8563_v6 }
  0x1d   :  { %9855 = vmatmul.msk.bf16.vlgmr.msra.gmra.mxu0 %vm4386_vm0, %v10775_v60  ;;  %v7895_v10 = vld [vmem:[#allocation2 + $0x7cc] sm:$0xf0]  ;;  %v7901_v12 = vld [vmem:[#allocation2 + $0x540] sm:$0xf]  ;;  %v7894_v14 = vor.u32 %v10269_v8, %v7893_v7  ;;  %v10270_v15 = vld [vmem:[#allocation2 + $0x7d0] sm:$0xf0] }
  0x1e   :  { %4446 = vmatpush.bf16.msrb.mxu0 %v9214_v52  ;;  %9856 = vmatmul.msk.bf16.vlgmr.msra.gmra.mxu1 %vm4386_vm0, %v10775_v60  ;;  %v10188_v16 = vld [vmem:[#allocation2 + $0x544] sm:$0xf]  ;;  %v7903_v17 = vld [vmem:[#allocation2 + $0x7d4] sm:$0xf0]  ;;  %v7898_v18 = vor.u32 %v10187_v9, %v7895_v10  ;;  %v7233_v19 = vld [vmem:[#allocation2 + $0x10] sm:$0xf]  ;;  %v7902_v25 = vor.u32 %v10270_v15, %v7901_v12 }
  0x1f   :  { %4459 = vmatpush.bf16.msrb.mxu1 %v9218_v56  ;;  %9857 = vmatmul.msk.bf16.vlgmr.msra.gmra.mxu2 %vm4386_vm0, %v10775_v60  ;;  %v10104_v20 = vld [vmem:[#allocation2 + $0x2a0] sm:$0xf0]  ;;  %v10022_v21 = vld [vmem:[#allocation2 + $0x14] sm:$0xf]  ;;  %v7235_v22 = vld [vmem:[#allocation2 + $0x2a4] sm:$0xf0]  ;;  %v7906_v28 = vor.u32 %v10188_v16, %v7903_v17 }
  0x20   :  { %9858 = vmatmul.msk.bf16.vlgmr.msra.gmra.mxu3 %vm4386_vm0, %v10775_v60  ;;  %4472 = vmatpush.bf16.msrb.mxu2 %v9222_v63  ;;  %v9229_v23 = vld [vmem:[#allocation2 + $0xf98] sm:$0xf]  ;;  %v10601_v24 = vld [vmem:[#allocation2 + $0x1228] sm:$0xf0]  ;;  %v10519_v26 = vld [vmem:[#allocation2 + $0xf9c] sm:$0xf]  ;;  %v7234_v29 = vor.u32 %v10104_v20, %v7233_v19  ;;  %v7238_v33 = vor.u32 %v10022_v21, %v7235_v22 }
  0x21   :  { %4485 = vmatpush.bf16.msrb.mxu3 %v9226_v0  ;;  %v9231_v27 = vld [vmem:[#allocation2 + $0x122c] sm:$0xf0]  ;;  %v7241_v30 = vld [vmem:[#allocation2 + $0x18] sm:$0xf]  ;;  %v10105_v31 = vld [vmem:[#allocation2 + $0x2a8] sm:$0xf0]  ;;  %v9230_v35 = vor.u32 %v10601_v24, %v9229_v23 }
  0x22   :  { %4447 = vmatpush.bf16.msrb.mxu0 %v8554_v1  ;;  %v10023_v32 = vld [vmem:[#allocation2 + $0x1c] sm:$0xf]  ;;  %v7243_v34 = vld [vmem:[#allocation2 + $0x2ac] sm:$0xf0]  ;;  %v9237_v36 = vld [vmem:[#allocation2 + $0xfa0] sm:$0xf]  ;;  %v9234_v38 = vor.u32 %v10519_v26, %v9231_v27  ;;  %v7242_v41 = vor.u32 %v10105_v31, %v7241_v30 }
  0x23   :  { %4460 = vmatpush.bf16.msrb.mxu1 %v8558_v5  ;;  %v10602_v37 = vld [vmem:[#allocation2 + $0x1230] sm:$0xf0]  ;;  %v10520_v39 = vld [vmem:[#allocation2 + $0xfa4] sm:$0xf]  ;;  %v9239_v40 = vld [vmem:[#allocation2 + $0x1234] sm:$0xf0]  ;;  %v7246_v42 = vor.u32 %v10023_v32, %v7243_v34 }
  0x24   :  { %4473 = vmatpush.bf16.msrb.mxu2 %v8562_v11  ;;  %v9238_v43 = vor.u32 %v10602_v37, %v9237_v36  ;;  %v8569_v44 = vld [vmem:[#allocation2 + $0xa70] sm:$0xf]  ;;  %v10436_v45 = vld [vmem:[#allocation2 + $0xd00] sm:$0xf0]  ;;  %v10354_v46 = vld [vmem:[#allocation2 + $0xa74] sm:$0xf]  ;;  %v9242_v47 = vor.u32 %v10520_v39, %v9239_v40 }
  0x25   :  { %4486 = vmatpush.bf16.msrb.mxu3 %v8566_v13  ;;  %v8571_v48 = vld [vmem:[#allocation2 + $0xd04] sm:$0xf0]  ;;  %v8577_v49 = vld [vmem:[#allocation2 + $0xa78] sm:$0xf]  ;;  %v10437_v50 = vld [vmem:[#allocation2 + $0xd08] sm:$0xf0]  ;;  %v8570_v53 = vor.u32 %v10436_v45, %v8569_v44 }
  0x26   :  { %4448 = vmatpush.bf16.msrb.mxu0 %v7894_v14  ;;  %v10355_v51 = vld [vmem:[#allocation2 + $0xa7c] sm:$0xf]  ;;  %v8579_v52 = vld [vmem:[#allocation2 + $0xd0c] sm:$0xf0]  ;;  %v8574_v54 = vor.u32 %v10354_v46, %v8571_v48  ;;  %v8578_v55 = vor.u32 %v10437_v50, %v8577_v49  ;;  %v7909_v56 = vld [vmem:[#allocation2 + $0x548] sm:$0xf] }
  0x27   :  { %4461 = vmatpush.bf16.msrb.mxu1 %v7898_v18  ;;  %v10271_v57 = vld [vmem:[#allocation2 + $0x7d8] sm:$0xf0]  ;;  %v10189_v58 = vld [vmem:[#allocation2 + $0x54c] sm:$0xf]  ;;  %v8582_v59 = vor.u32 %v10355_v51, %v8579_v52  ;;  %v7911_v61 = vld [vmem:[#allocation2 + $0x7dc] sm:$0xf0] }
  0x28   :  { %4474 = vmatpush.bf16.msrb.mxu2 %v7902_v25  ;;  %v7917_v62 = vld [vmem:[#allocation2 + $0x550] sm:$0xf]  ;;  %v10272_v63 = vld [vmem:[#allocation2 + $0x7e0] sm:$0xf0]  ;;  %v10190_v0 = vld [vmem:[#allocation2 + $0x554] sm:$0xf]  ;;  %v7910_v2 = vor.u32 %v10271_v57, %v7909_v56  ;;  %v7914_v5 = vor.u32 %v10189_v58, %v7911_v61 }
  0x29   :  { %4487 = vmatpush.bf16.msrb.mxu3 %v7906_v28  ;;  %v7919_v1 = vld [vmem:[#allocation2 + $0x7e4] sm:$0xf0]  ;;  %v7249_v3 = vld [vmem:[#allocation2 + $0x20] sm:$0xf]  ;;  %v10106_v4 = vld [vmem:[#allocation2 + $0x2b0] sm:$0xf0]  ;;  %v7918_v6 = vor.u32 %v10272_v63, %v7917_v62 }
  0x2a   :  { %4449 = vmatpush.bf16.msrb.mxu0 %v7234_v29  ;;  %v10024_v7 = vld [vmem:[#allocation2 + $0x24] sm:$0xf]  ;;  %v7251_v8 = vld [vmem:[#allocation2 + $0x2b4] sm:$0xf0]  ;;  %v7257_v9 = vld [vmem:[#allocation2 + $0x28] sm:$0xf]  ;;  %v7922_v10 = vor.u32 %v10190_v0, %v7919_v1  ;;  %v7250_v17 = vor.u32 %v10106_v4, %v7249_v3 }
  0x2b   :  { %4462 = vmatpush.bf16.msrb.mxu1 %v7238_v33  ;;  %v10107_v11 = vld [vmem:[#allocation2 + $0x2b8] sm:$0xf0]  ;;  %v10025_v12 = vld [vmem:[#allocation2 + $0x2c] sm:$0xf]  ;;  %v7259_v13 = vld [vmem:[#allocation2 + $0x2bc] sm:$0xf0]  ;;  %v7254_v21 = vor.u32 %v10024_v7, %v7251_v8 }
  0x2c   :  { %4475 = vmatpush.bf16.msrb.mxu2 %v7242_v41  ;;  %v9245_v14 = vld [vmem:[#allocation2 + $0xfa8] sm:$0xf]  ;;  %v10603_v15 = vld [vmem:[#allocation2 + $0x1238] sm:$0xf0]  ;;  %v10521_v16 = vld [vmem:[#allocation2 + $0xfac] sm:$0xf]  ;;  %v7258_v22 = vor.u32 %v10107_v11, %v7257_v9  ;;  %v7262_v25 = vor.u32 %v10025_v12, %v7259_v13 }
  0x2d   :  { %4488 = vmatpush.bf16.msrb.mxu3 %v7246_v42  ;;  %9859 = vmatmul.msk.bf16.vlgmr.msrb.gmra.mxu0 %vm4386_vm0, %v10775_v60  ;;  %v9247_v18 = vld [vmem:[#allocation2 + $0x123c] sm:$0xf0]  ;;  %v9253_v19 = vld [vmem:[#allocation2 + $0xfb0] sm:$0xf]  ;;  %v10604_v20 = vld [vmem:[#allocation2 + $0x1240] sm:$0xf0]  ;;  %v9246_v26 = vor.u32 %v10603_v15, %v9245_v14 }
  0x2e   :  { %4498 = vmatpush.bf16.msra.mxu0 %v9230_v35  ;;  %9860 = vmatmul.msk.bf16.vlgmr.msrb.gmra.mxu1 %vm4386_vm0, %v10775_v60  ;;  %v10522_v23 = vld [vmem:[#allocation2 + $0xfb4] sm:$0xf]  ;;  %v9255_v24 = vld [vmem:[#allocation2 + $0x1244] sm:$0xf0]  ;;  %v9250_v27 = vor.u32 %v10521_v16, %v9247_v18  ;;  %v9254_v28 = vor.u32 %v10604_v20, %v9253_v19  ;;  %v8585_v30 = vld [vmem:[#allocation2 + $0xa80] sm:$0xf] }
  0x2f   :  { %4511 = vmatpush.bf16.msra.mxu1 %v9234_v38  ;;  %9861 = vmatmul.msk.bf16.vlgmr.msrb.gmra.mxu2 %vm4386_vm0, %v10775_v60  ;;  %v9258_v29 = vor.u32 %v10522_v23, %v9255_v24  ;;  %v10438_v31 = vld [vmem:[#allocation2 + $0xd10] sm:$0xf0]  ;;  %v10356_v32 = vld [vmem:[#allocation2 + $0xa84] sm:$0xf]  ;;  %v8587_v33 = vld [vmem:[#allocation2 + $0xd14] sm:$0xf0] }
  0x30   :  { %4524 = vmatpush.bf16.msra.mxu2 %v9238_v43  ;;  %9862 = vmatmul.msk.bf16.vlgmr.msrb.gmra.mxu3 %vm4386_vm0, %v10775_v60  ;;  %v8593_v34 = vld [vmem:[#allocation2 + $0xa88] sm:$0xf]  ;;  %v10439_v35 = vld [vmem:[#allocation2 + $0xd18] sm:$0xf0]  ;;  %v10357_v36 = vld [vmem:[#allocation2 + $0xa8c] sm:$0xf]  ;;  %v8586_v38 = vor.u32 %v10438_v31, %v8585_v30  ;;  %v8590_v39 = vor.u32 %v10356_v32, %v8587_v33 }
  0x31   :  { %4537 = vmatpush.bf16.msra.mxu3 %v9242_v47  ;;  %v8595_v37 = vld [vmem:[#allocation2 + $0xd1c] sm:$0xf0]  ;;  %v8594_v40 = vor.u32 %v10439_v35, %v8593_v34  ;;  %v7925_v41 = vld [vmem:[#allocation2 + $0x558] sm:$0xf]  ;;  %v10273_v42 = vld [vmem:[#allocation2 + $0x7e8] sm:$0xf0] }
  0x32   :  { %4499 = vmatpush.bf16.msra.mxu0 %v8570_v53  ;;  %v10191_v43 = vld [vmem:[#allocation2 + $0x55c] sm:$0xf]  ;;  %v8598_v44 = vor.u32 %v10357_v36, %v8595_v37  ;;  %v7927_v45 = vld [vmem:[#allocation2 + $0x7ec] sm:$0xf0]  ;;  %v7933_v46 = vld [vmem:[#allocation2 + $0x560] sm:$0xf]  ;;  %v7926_v50 = vor.u32 %v10273_v42, %v7925_v41 }
  0x33   :  { %4512 = vmatpush.bf16.msra.mxu1 %v8574_v54  ;;  %v10274_v47 = vld [vmem:[#allocation2 + $0x7f0] sm:$0xf0]  ;;  %v10192_v48 = vld [vmem:[#allocation2 + $0x564] sm:$0xf]  ;;  %v7935_v49 = vld [vmem:[#allocation2 + $0x7f4] sm:$0xf0]  ;;  %v7930_v53 = vor.u32 %v10191_v43, %v7927_v45 }
  0x34   :  { %4525 = vmatpush.bf16.msra.mxu2 %v8578_v55  ;;  %v7265_v51 = vld [vmem:[#allocation2 + $0x30] sm:$0xf]  ;;  %v10108_v52 = vld [vmem:[#allocation2 + $0x2c0] sm:$0xf0]  ;;  %v7934_v54 = vor.u32 %v10274_v47, %v7933_v46  ;;  %v10026_v55 = vld [vmem:[#allocation2 + $0x34] sm:$0xf]  ;;  %v7938_v58 = vor.u32 %v10192_v48, %v7935_v49 }
  0x35   :  { %4538 = vmatpush.bf16.msra.mxu3 %v8582_v59  ;;  %v7267_v56 = vld [vmem:[#allocation2 + $0x2c4] sm:$0xf0]  ;;  %v7273_v57 = vld [vmem:[#allocation2 + $0x38] sm:$0xf]  ;;  %v10109_v59 = vld [vmem:[#allocation2 + $0x2c8] sm:$0xf0] }
  0x36   :  { %4500 = vmatpush.bf16.msra.mxu0 %v7910_v2  ;;  %v10027_v61 = vld [vmem:[#allocation2 + $0x3c] sm:$0xf]  ;;  %v7275_v62 = vld [vmem:[#allocation2 + $0x2cc] sm:$0xf0]  ;;  %v9261_v63 = vld [vmem:[#allocation2 + $0xfb8] sm:$0xf]  ;;  %v7266_v2 = vor.u32 %v10108_v52, %v7265_v51  ;;  %v7274_v7 = vor.u32 %v10109_v59, %v7273_v57 }
  0x37   :  { %4513 = vmatpush.bf16.msra.mxu1 %v7914_v5  ;;  %v10605_v0 = vld [vmem:[#allocation2 + $0x1248] sm:$0xf0]  ;;  %v10523_v1 = vld [vmem:[#allocation2 + $0xfbc] sm:$0xf]  ;;  %v9263_v3 = vld [vmem:[#allocation2 + $0x124c] sm:$0xf0] }
  0x38   :  { %4526 = vmatpush.bf16.msra.mxu2 %v7918_v6  ;;  %v9269_v4 = vld [vmem:[#allocation2 + $0xfc0] sm:$0xf]  ;;  %v10606_v5 = vld [vmem:[#allocation2 + $0x1250] sm:$0xf0]  ;;  %v7270_v6 = vor.u32 %v10026_v55, %v7267_v56  ;;  %v10524_v8 = vld [vmem:[#allocation2 + $0xfc4] sm:$0xf]  ;;  %v9262_v11 = vor.u32 %v10605_v0, %v9261_v63  ;;  %v9266_v12 = vor.u32 %v10523_v1, %v9263_v3 }
  0x39   :  { %4539 = vmatpush.bf16.msra.mxu3 %v7922_v10  ;;  %v9271_v9 = vld [vmem:[#allocation2 + $0x1254] sm:$0xf0]  ;;  %v7278_v10 = vor.u32 %v10027_v61, %v7275_v62  ;;  %v9270_v13 = vor.u32 %v10606_v5, %v9269_v4  ;;  %v8601_v15 = vld [vmem:[#allocation2 + $0xa90] sm:$0xf]  ;;  %v10440_v16 = vld [vmem:[#allocation2 + $0xd20] sm:$0xf0] }
  0x3a   :  { %4501 = vmatpush.bf16.msra.mxu0 %v7250_v17  ;;  %v9274_v14 = vor.u32 %v10524_v8, %v9271_v9  ;;  %v10358_v17 = vld [vmem:[#allocation2 + $0xa94] sm:$0xf]  ;;  %v8603_v18 = vld [vmem:[#allocation2 + $0xd24] sm:$0xf0]  ;;  %v8609_v19 = vld [vmem:[#allocation2 + $0xa98] sm:$0xf]  ;;  %v8602_v23 = vor.u32 %v10440_v16, %v8601_v15 }
  0x3b   :  { %4514 = vmatpush.bf16.msra.mxu1 %v7254_v21  ;;  %v10441_v20 = vld [vmem:[#allocation2 + $0xd28] sm:$0xf0]  ;;  %v10359_v21 = vld [vmem:[#allocation2 + $0xa9c] sm:$0xf]  ;;  %v8606_v24 = vor.u32 %v10358_v17, %v8603_v18  ;;  %v7943_v30 = vld [vmem:[#allocation2 + $0x7fc] sm:$0xf0] }
  0x3c   :  { %4527 = vmatpush.bf16.msra.mxu2 %v7258_v22  ;;  %v8611_v22 = vld [vmem:[#allocation2 + $0xd2c] sm:$0xf0]  ;;  %v10276_v32 = vld [vmem:[#allocation2 + $0x800] sm:$0xf0]  ;;  %v10194_v33 = vld [vmem:[#allocation2 + $0x574] sm:$0xf] }
  0x3d   :  { %4540 = vmatpush.bf16.msra.mxu3 %v7262_v25  ;;  %9863 = vmatmul.msk.bf16.vlgmr.msra.gmra.mxu0 %vm4386_vm0, %v10775_v60  ;;  %v8610_v25 = vor.u32 %v10441_v20, %v8609_v19  ;;  %v7949_v31 = vld [vmem:[#allocation2 + $0x570] sm:$0xf]  ;;  %v7951_v34 = vld [vmem:[#allocation2 + $0x804] sm:$0xf0]  ;;  %v7281_v36 = vld [vmem:[#allocation2 + $0x40] sm:$0xf] }
  0x3e   :  { %4550 = vmatpush.bf16.msrb.mxu0 %v9246_v26  ;;  %9864 = vmatmul.msk.bf16.vlgmr.msra.gmra.mxu1 %vm4386_vm0, %v10775_v60  ;;  %v7941_v26 = vld [vmem:[#allocation2 + $0x568] sm:$0xf]  ;;  %v10110_v37 = vld [vmem:[#allocation2 + $0x2d0] sm:$0xf0]  ;;  %v7283_v41 = vld [vmem:[#allocation2 + $0x2d4] sm:$0xf0]  ;;  %v7954_v43 = vor.u32 %v10194_v33, %v7951_v34 }
  0x3f   :  { %4563 = vmatpush.bf16.msrb.mxu1 %v9250_v27  ;;  %9865 = vmatmul.msk.bf16.vlgmr.msra.gmra.mxu2 %vm4386_vm0, %v10775_v60  ;;  %v10275_v27 = vld [vmem:[#allocation2 + $0x7f8] sm:$0xf0]  ;;  %v7289_v42 = vld [vmem:[#allocation2 + $0x48] sm:$0xf]  ;;  %v10029_v45 = vld [vmem:[#allocation2 + $0x4c] sm:$0xf] }
  0x40   :  { %4576 = vmatpush.bf16.msrb.mxu2 %v9254_v28  ;;  %9866 = vmatmul.msk.bf16.vlgmr.msra.gmra.mxu3 %vm4386_vm0, %v10775_v60  ;;  %v10193_v28 = vld [vmem:[#allocation2 + $0x56c] sm:$0xf]  ;;  %v7942_v35 = vor.u32 %v10275_v27, %v7941_v26  ;;  %v7291_v46 = vld [vmem:[#allocation2 + $0x2dc] sm:$0xf0]  ;;  %v9277_v47 = vld [vmem:[#allocation2 + $0xfc8] sm:$0xf] }
  0x41   :  { %4589 = vmatpush.bf16.msrb.mxu3 %v9258_v29  ;;  %v8614_v29 = vor.u32 %v10359_v21, %v8611_v22  ;;  %v10607_v48 = vld [vmem:[#allocation2 + $0x1258] sm:$0xf0]  ;;  %v10525_v49 = vld [vmem:[#allocation2 + $0xfcc] sm:$0xf]  ;;  %v9279_v51 = vld [vmem:[#allocation2 + $0x125c] sm:$0xf0] }
  0x42   :  { %4551 = vmatpush.bf16.msrb.mxu0 %v8586_v38  ;;  %v7946_v38 = vor.u32 %v10193_v28, %v7943_v30  ;;  %v9285_v52 = vld [vmem:[#allocation2 + $0xfd0] sm:$0xf]  ;;  %v10526_v56 = vld [vmem:[#allocation2 + $0xfd4] sm:$0xf]  ;;  %v9287_v57 = vld [vmem:[#allocation2 + $0x1264] sm:$0xf0]  ;;  %v9278_v59 = vor.u32 %v10607_v48, %v9277_v47  ;;  %v9282_v61 = vor.u32 %v10525_v49, %v9279_v51 }
  0x43   :  { %4564 = vmatpush.bf16.msrb.mxu1 %v8590_v39  ;;  %v7950_v39 = vor.u32 %v10276_v32, %v7949_v31  ;;  %v9290_v63 = vor.u32 %v10526_v56, %v9287_v57  ;;  %v8617_v0 = vld [vmem:[#allocation2 + $0xaa0] sm:$0xf]  ;;  %v10442_v1 = vld [vmem:[#allocation2 + $0xd30] sm:$0xf0]  ;;  %v8619_v3 = vld [vmem:[#allocation2 + $0xd34] sm:$0xf0] }
  0x44   :  { %4577 = vmatpush.bf16.msrb.mxu2 %v8594_v40  ;;  %v10028_v40 = vld [vmem:[#allocation2 + $0x44] sm:$0xf]  ;;  %v8625_v4 = vld [vmem:[#allocation2 + $0xaa8] sm:$0xf]  ;;  %v10443_v5 = vld [vmem:[#allocation2 + $0xd38] sm:$0xf0]  ;;  %v8618_v8 = vor.u32 %v10442_v1, %v8617_v0 }
  0x45   :  { %4590 = vmatpush.bf16.msrb.mxu3 %v8598_v44  ;;  %v10111_v44 = vld [vmem:[#allocation2 + $0x2d8] sm:$0xf0]  ;;  %v7959_v15 = vld [vmem:[#allocation2 + $0x80c] sm:$0xf0]  ;;  %v7965_v16 = vld [vmem:[#allocation2 + $0x580] sm:$0xf] }
  0x46   :  { %4552 = vmatpush.bf16.msrb.mxu0 %v7926_v50  ;;  %v7282_v50 = vor.u32 %v10110_v37, %v7281_v36  ;;  %v7290_v55 = vor.u32 %v10111_v44, %v7289_v42  ;;  %v10278_v17 = vld [vmem:[#allocation2 + $0x810] sm:$0xf0]  ;;  %v10196_v18 = vld [vmem:[#allocation2 + $0x584] sm:$0xf]  ;;  %v7967_v19 = vld [vmem:[#allocation2 + $0x814] sm:$0xf0] }
  0x47   :  { %4565 = vmatpush.bf16.msrb.mxu1 %v7930_v53  ;;  %v10608_v53 = vld [vmem:[#allocation2 + $0x1260] sm:$0xf0]  ;;  %v7297_v21 = vld [vmem:[#allocation2 + $0x50] sm:$0xf]  ;;  %v7299_v26 = vld [vmem:[#allocation2 + $0x2e4] sm:$0xf0]  ;;  %v7970_v28 = vor.u32 %v10196_v18, %v7967_v19 }
  0x48   :  { %4578 = vmatpush.bf16.msrb.mxu2 %v7934_v54  ;;  %v7286_v54 = vor.u32 %v10028_v40, %v7283_v41  ;;  %v9286_v62 = vor.u32 %v10608_v53, %v9285_v52  ;;  %v10112_v22 = vld [vmem:[#allocation2 + $0x2e0] sm:$0xf0]  ;;  %v7305_v27 = vld [vmem:[#allocation2 + $0x58] sm:$0xf]  ;;  %v10031_v30 = vld [vmem:[#allocation2 + $0x5c] sm:$0xf] }
  0x49   :  { %4591 = vmatpush.bf16.msrb.mxu3 %v7938_v58  ;;  %v7294_v58 = vor.u32 %v10029_v45, %v7291_v46  ;;  %v7307_v31 = vld [vmem:[#allocation2 + $0x2ec] sm:$0xf0]  ;;  %v9293_v32 = vld [vmem:[#allocation2 + $0xfd8] sm:$0xf]  ;;  %v10609_v33 = vld [vmem:[#allocation2 + $0x1268] sm:$0xf0] }
  0x4a   :  { %4553 = vmatpush.bf16.msrb.mxu0 %v7266_v2  ;;  %v10360_v2 = vld [vmem:[#allocation2 + $0xaa4] sm:$0xf]  ;;  %v10527_v34 = vld [vmem:[#allocation2 + $0xfdc] sm:$0xf]  ;;  %v9295_v36 = vld [vmem:[#allocation2 + $0x126c] sm:$0xf0]  ;;  %v9294_v44 = vor.u32 %v10609_v33, %v9293_v32 }
  0x4b   :  { %4566 = vmatpush.bf16.msrb.mxu1 %v7270_v6  ;;  %v10361_v6 = vld [vmem:[#allocation2 + $0xaac] sm:$0xf]  ;;  %v8622_v9 = vor.u32 %v10360_v2, %v8619_v3  ;;  %v9301_v37 = vld [vmem:[#allocation2 + $0xfe0] sm:$0xf]  ;;  %v10528_v41 = vld [vmem:[#allocation2 + $0xfe4] sm:$0xf]  ;;  %v9298_v45 = vor.u32 %v10527_v34, %v9295_v36 }
  0x4c   :  { %4579 = vmatpush.bf16.msrb.mxu2 %v7274_v7  ;;  %v8627_v7 = vld [vmem:[#allocation2 + $0xd3c] sm:$0xf0]  ;;  %v9303_v42 = vld [vmem:[#allocation2 + $0x1274] sm:$0xf0]  ;;  %v8633_v48 = vld [vmem:[#allocation2 + $0xab0] sm:$0xf] }
  0x4d   :  { %4592 = vmatpush.bf16.msrb.mxu3 %v7278_v10  ;;  %9867 = vmatmul.msk.bf16.vlgmr.msrb.gmra.mxu0 %vm4386_vm0, %v10775_v60  ;;  %v8626_v10 = vor.u32 %v10443_v5, %v8625_v4  ;;  %v9306_v47 = vor.u32 %v10528_v41, %v9303_v42  ;;  %v10444_v49 = vld [vmem:[#allocation2 + $0xd40] sm:$0xf0]  ;;  %v8635_v51 = vld [vmem:[#allocation2 + $0xd44] sm:$0xf0]  ;;  %v8641_v52 = vld [vmem:[#allocation2 + $0xab8] sm:$0xf] }
  0x4e   :  { %4602 = vmatpush.bf16.msra.mxu0 %v9262_v11  ;;  %9868 = vmatmul.msk.bf16.vlgmr.msrb.gmra.mxu1 %vm4386_vm0, %v10775_v60  ;;  %v7957_v11 = vld [vmem:[#allocation2 + $0x578] sm:$0xf]  ;;  %v10445_v53 = vld [vmem:[#allocation2 + $0xd48] sm:$0xf0]  ;;  %v8634_v56 = vor.u32 %v10444_v49, %v8633_v48  ;;  %v7975_v0 = vld [vmem:[#allocation2 + $0x81c] sm:$0xf0] }
  0x4f   :  { %4615 = vmatpush.bf16.msra.mxu1 %v9266_v12  ;;  %9869 = vmatmul.msk.bf16.vlgmr.msrb.gmra.mxu2 %vm4386_vm0, %v10775_v60  ;;  %v10277_v12 = vld [vmem:[#allocation2 + $0x808] sm:$0xf0]  ;;  %v7981_v1 = vld [vmem:[#allocation2 + $0x590] sm:$0xf]  ;;  %v10280_v2 = vld [vmem:[#allocation2 + $0x820] sm:$0xf0] }
  0x50   :  { %4628 = vmatpush.bf16.msra.mxu2 %v9270_v13  ;;  %9870 = vmatmul.msk.bf16.vlgmr.msrb.gmra.mxu3 %vm4386_vm0, %v10775_v60  ;;  %v10195_v13 = vld [vmem:[#allocation2 + $0x57c] sm:$0xf]  ;;  %v7958_v20 = vor.u32 %v10277_v12, %v7957_v11  ;;  %v10198_v3 = vld [vmem:[#allocation2 + $0x594] sm:$0xf]  ;;  %v7983_v4 = vld [vmem:[#allocation2 + $0x824] sm:$0xf0] }
  0x51   :  { %4641 = vmatpush.bf16.msra.mxu3 %v9274_v14  ;;  %v8630_v14 = vor.u32 %v10361_v6, %v8627_v7  ;;  %v7313_v6 = vld [vmem:[#allocation2 + $0x60] sm:$0xf]  ;;  %v10114_v7 = vld [vmem:[#allocation2 + $0x2f0] sm:$0xf0]  ;;  %v7315_v11 = vld [vmem:[#allocation2 + $0x2f4] sm:$0xf0] }
  0x52   :  { %4603 = vmatpush.bf16.msra.mxu0 %v8602_v23  ;;  %v7962_v23 = vor.u32 %v10195_v13, %v7959_v15  ;;  %v7321_v12 = vld [vmem:[#allocation2 + $0x68] sm:$0xf]  ;;  %v7986_v13 = vor.u32 %v10198_v3, %v7983_v4  ;;  %v10033_v15 = vld [vmem:[#allocation2 + $0x6c] sm:$0xf]  ;;  %v10611_v18 = vld [vmem:[#allocation2 + $0x1278] sm:$0xf0] }
  0x53   :  { %4616 = vmatpush.bf16.msra.mxu1 %v8606_v24  ;;  %v7966_v24 = vor.u32 %v10278_v17, %v7965_v16  ;;  %v7323_v16 = vld [vmem:[#allocation2 + $0x2fc] sm:$0xf0]  ;;  %v9309_v17 = vld [vmem:[#allocation2 + $0xfe8] sm:$0xf]  ;;  %v10529_v19 = vld [vmem:[#allocation2 + $0xfec] sm:$0xf] }
  0x54   :  { %4629 = vmatpush.bf16.msra.mxu2 %v8610_v25  ;;  %v10030_v25 = vld [vmem:[#allocation2 + $0x54] sm:$0xf]  ;;  %v8649_v33 = vld [vmem:[#allocation2 + $0xac0] sm:$0xf]  ;;  %v8651_v36 = vld [vmem:[#allocation2 + $0xd54] sm:$0xf0] }
  0x55   :  { %4642 = vmatpush.bf16.msra.mxu3 %v8614_v29  ;;  %v10113_v29 = vld [vmem:[#allocation2 + $0x2e8] sm:$0xf0]  ;;  %v10446_v34 = vld [vmem:[#allocation2 + $0xd50] sm:$0xf0]  ;;  %v7991_v48 = vld [vmem:[#allocation2 + $0x82c] sm:$0xf0] }
  0x56   :  { %4604 = vmatpush.bf16.msra.mxu0 %v7942_v35  ;;  %v7298_v35 = vor.u32 %v10112_v22, %v7297_v21  ;;  %v7306_v40 = vor.u32 %v10113_v29, %v7305_v27  ;;  %v9311_v21 = vld [vmem:[#allocation2 + $0x127c] sm:$0xf0]  ;;  %v9317_v22 = vld [vmem:[#allocation2 + $0xff0] sm:$0xf]  ;;  %v9319_v27 = vld [vmem:[#allocation2 + $0x1284] sm:$0xf0]  ;;  %v9310_v29 = vor.u32 %v10611_v18, %v9309_v17  ;;  %v8650_v41 = vor.u32 %v10446_v34, %v8649_v33 }
  0x57   :  { %4617 = vmatpush.bf16.msra.mxu1 %v7946_v38  ;;  %v10610_v38 = vld [vmem:[#allocation2 + $0x1270] sm:$0xf0]  ;;  %v7997_v49 = vld [vmem:[#allocation2 + $0x5a0] sm:$0xf]  ;;  %v10613_v3 = vld [vmem:[#allocation2 + $0x1288] sm:$0xf0] }
  0x58   :  { %4630 = vmatpush.bf16.msra.mxu2 %v7950_v39  ;;  %v7302_v39 = vor.u32 %v10030_v25, %v7299_v26  ;;  %v9302_v46 = vor.u32 %v10610_v38, %v9301_v37  ;;  %v10530_v26 = vld [vmem:[#allocation2 + $0xff4] sm:$0xf]  ;;  %v8657_v37 = vld [vmem:[#allocation2 + $0xac8] sm:$0xf]  ;;  %v10447_v38 = vld [vmem:[#allocation2 + $0xd58] sm:$0xf0] }
  0x59   :  { %4643 = vmatpush.bf16.msra.mxu3 %v7954_v43  ;;  %v7310_v43 = vor.u32 %v10031_v30, %v7307_v31  ;;  %v9314_v30 = vor.u32 %v10529_v19, %v9311_v21  ;;  %v9322_v32 = vor.u32 %v10530_v26, %v9319_v27  ;;  %v10531_v4 = vld [vmem:[#allocation2 + $0xffc] sm:$0xf]  ;;  %v8665_v18 = vld [vmem:[#allocation2 + $0xad0] sm:$0xf]  ;;  %v10448_v19 = vld [vmem:[#allocation2 + $0xd60] sm:$0xf0] }
  0x5a   :  { %4605 = vmatpush.bf16.msra.mxu0 %v7282_v50  ;;  %v10362_v50 = vld [vmem:[#allocation2 + $0xab4] sm:$0xf]  ;;  %v8667_v21 = vld [vmem:[#allocation2 + $0xd64] sm:$0xf0]  ;;  %v8666_v26 = vor.u32 %v10448_v19, %v8665_v18  ;;  %v8007_v33 = vld [vmem:[#allocation2 + $0x83c] sm:$0xf0] }
  0x5b   :  { %4618 = vmatpush.bf16.msra.mxu1 %v7286_v54  ;;  %v10363_v54 = vld [vmem:[#allocation2 + $0xabc] sm:$0xf]  ;;  %v8638_v57 = vor.u32 %v10362_v50, %v8635_v51  ;;  %v10282_v50 = vld [vmem:[#allocation2 + $0x830] sm:$0xf0]  ;;  %v10200_v51 = vld [vmem:[#allocation2 + $0x5a4] sm:$0xf] }
  0x5c   :  { %4631 = vmatpush.bf16.msra.mxu2 %v7290_v55  ;;  %v8643_v55 = vld [vmem:[#allocation2 + $0xd4c] sm:$0xf0]  ;;  %v10848_v18 = vld [vmem:[%s11598_s0] sm:$0x1]  ;;  %vm6846_vm2 = vcmask 1040384   ;;  %vm6854_vm3 = vcmask 1041408  }
  0x5d   :  { %4644 = vmatpush.bf16.msra.mxu3 %v7294_v58  ;;  %9871 = vmatmul.msk.bf16.vlgmr.msra.gmra.mxu0 %vm4386_vm0, %v10775_v60  ;;  %v8642_v58 = vor.u32 %v10445_v53, %v8641_v52  ;;  %v7999_v52 = vld [vmem:[#allocation2 + $0x834] sm:$0xf0]  ;;  %v8013_v34 = vld [vmem:[#allocation2 + $0x5b0] sm:$0xf]  ;;  %vm6856_vm4 = vcmask 1044484   ;;  %vm6860_vm5 = vcmask 1046534  }
  0x5e   :  { %4654 = vmatpush.bf16.msrb.mxu0 %v9278_v59  ;;  %9872 = vmatmul.msk.bf16.vlgmr.msra.gmra.mxu1 %vm4386_vm0, %v10775_v60  ;;  %v7973_v59 = vld [vmem:[#allocation2 + $0x588] sm:$0xf]  ;;  %vm6864_vm6 = vcmask 1045508   ;;  %vm6866_vm7 = vcmask 1043456   ;;  %vm7158_vm8 = vcmask 1043459   ;;  %vm7162_vm9 = vcmask 1044483  }
  0x5f   :  { %4667 = vmatpush.bf16.msrb.mxu1 %v9282_v61  ;;  %9873 = vmatmul.msk.bf16.vlgmr.msra.gmra.mxu2 %vm4386_vm0, %v10775_v60  ;;  %v10279_v61 = vld [vmem:[#allocation2 + $0x818] sm:$0xf0]  ;;  %vm7165_vm10 = vcmask 1042432  }
  0x60   :  { %4680 = vmatpush.bf16.msrb.mxu2 %v9286_v62  ;;  %9874 = vmatmul.msk.bf16.vlgmr.msra.gmra.mxu3 %vm4386_vm0, %v10775_v60  ;;  %v10197_v62 = vld [vmem:[#allocation2 + $0x58c] sm:$0xf]  ;;  %v7974_v5 = vor.u32 %v10279_v61, %v7973_v59  ;;  %v7331_v59 = vld [vmem:[#allocation2 + $0x304] sm:$0xf0]  ;;  %v7337_v61 = vld [vmem:[#allocation2 + $0x78] sm:$0xf] }
  0x61   :  { %4693 = vmatpush.bf16.msrb.mxu3 %v9290_v63  ;;  %v8646_v63 = vor.u32 %v10363_v54, %v8643_v55  ;;  %v7329_v54 = vld [vmem:[#allocation2 + $0x70] sm:$0xf]  ;;  %v10116_v55 = vld [vmem:[#allocation2 + $0x300] sm:$0xf0] }
  0x62   :  { %4655 = vmatpush.bf16.msrb.mxu0 %v8618_v8  ;;  %v7978_v8 = vor.u32 %v10197_v62, %v7975_v0  ;;  %v8002_v62 = vor.u32 %v10200_v51, %v7999_v52  ;;  %v10035_v0 = vld [vmem:[#allocation2 + $0x7c] sm:$0xf]  ;;  %v10533_v52 = vld [vmem:[#allocation2 + $0x100c] sm:$0xf] }
  0x63   :  { %4668 = vmatpush.bf16.msrb.mxu1 %v8622_v9  ;;  %v7982_v9 = vor.u32 %v10280_v2, %v7981_v1  ;;  %v7339_v1 = vld [vmem:[#allocation2 + $0x30c] sm:$0xf0]  ;;  %v9325_v2 = vld [vmem:[#allocation2 + $0xff8] sm:$0xf]  ;;  %v10615_v51 = vld [vmem:[#allocation2 + $0x1298] sm:$0xf0] }
  0x64   :  { %4681 = vmatpush.bf16.msrb.mxu2 %v8626_v10  ;;  %v10032_v10 = vld [vmem:[#allocation2 + $0x64] sm:$0xf] }
  0x65   :  { %4694 = vmatpush.bf16.msrb.mxu3 %v8630_v14  ;;  %v10115_v14 = vld [vmem:[#allocation2 + $0x2f8] sm:$0xf0] }
  0x66   :  { %4656 = vmatpush.bf16.msrb.mxu0 %v7958_v20  ;;  %v7314_v20 = vor.u32 %v10114_v7, %v7313_v6  ;;  %v7322_v25 = vor.u32 %v10115_v14, %v7321_v12  ;;  %v9327_v6 = vld [vmem:[#allocation2 + $0x128c] sm:$0xf0]  ;;  %v9333_v7 = vld [vmem:[#allocation2 + $0x1000] sm:$0xf]  ;;  %v9335_v12 = vld [vmem:[#allocation2 + $0x1294] sm:$0xf0]  ;;  %v9326_v14 = vor.u32 %v10613_v3, %v9325_v2 }
  0x67   :  { %4669 = vmatpush.bf16.msrb.mxu1 %v7962_v23  ;;  %v10612_v23 = vld [vmem:[#allocation2 + $0x1280] sm:$0xf0]  ;;  %v8681_v2 = vld [vmem:[#allocation2 + $0xae0] sm:$0xf]  ;;  %v10450_v3 = vld [vmem:[#allocation2 + $0xd70] sm:$0xf0] }
  0x68   :  { %4682 = vmatpush.bf16.msrb.mxu2 %v7966_v24  ;;  %v7318_v24 = vor.u32 %v10032_v10, %v7315_v11  ;;  %v9318_v31 = vor.u32 %v10612_v23, %v9317_v22  ;;  %v10532_v11 = vld [vmem:[#allocation2 + $0x1004] sm:$0xf]  ;;  %v8673_v22 = vld [vmem:[#allocation2 + $0xad8] sm:$0xf]  ;;  %v10449_v23 = vld [vmem:[#allocation2 + $0xd68] sm:$0xf0] }
  0x69   :  { %4695 = vmatpush.bf16.msrb.mxu3 %v7970_v28  ;;  %v7326_v28 = vor.u32 %v10033_v15, %v7323_v16  ;;  %v9330_v15 = vor.u32 %v10531_v4, %v9327_v6  ;;  %v9338_v17 = vor.u32 %v10532_v11, %v9335_v12  ;;  %v10368_v4 = vld [vmem:[#allocation2 + $0xae4] sm:$0xf]  ;;  %v8689_v6 = vld [vmem:[#allocation2 + $0xae8] sm:$0xf]  ;;  %v8682_v12 = vor.u32 %v10450_v3, %v8681_v2  ;;  %v10370_v2 = vld [vmem:[#allocation2 + $0xaf4] sm:$0xf] }
  0x6a   :  { %4657 = vmatpush.bf16.msrb.mxu0 %v7298_v35  ;;  %v10364_v35 = vld [vmem:[#allocation2 + $0xac4] sm:$0xf]  ;;  %v8699_v3 = vld [vmem:[#allocation2 + $0xd84] sm:$0xf0] }
  0x6b   :  { %4670 = vmatpush.bf16.msrb.mxu1 %v7302_v39  ;;  %v10365_v39 = vld [vmem:[#allocation2 + $0xacc] sm:$0xf]  ;;  %v8654_v42 = vor.u32 %v10364_v35, %v8651_v36  ;;  %v10284_v35 = vld [vmem:[#allocation2 + $0x840] sm:$0xf0]  ;;  %v10202_v36 = vld [vmem:[#allocation2 + $0x5b4] sm:$0xf] }
  0x6c   :  { %4683 = vmatpush.bf16.msrb.mxu2 %v7306_v40  ;;  %v8659_v40 = vld [vmem:[#allocation2 + $0xd5c] sm:$0xf0] }
  0x6d   :  { %4696 = vmatpush.bf16.msrb.mxu3 %v7310_v43  ;;  %9875 = vmatmul.msk.bf16.vlgmr.msrb.gmra.mxu0 %vm4386_vm0, %v10775_v60  ;;  %v8658_v43 = vor.u32 %v10447_v38, %v8657_v37  ;;  %v8015_v37 = vld [vmem:[#allocation2 + $0x844] sm:$0xf0] }
  0x6e   :  { %4706 = vmatpush.bf16.msra.mxu0 %v9294_v44  ;;  %9876 = vmatmul.msk.bf16.vlgmr.msrb.gmra.mxu1 %vm4386_vm0, %v10775_v60  ;;  %v7989_v44 = vld [vmem:[#allocation2 + $0x598] sm:$0xf] }
  0x6f   :  { %4719 = vmatpush.bf16.msra.mxu1 %v9298_v45  ;;  %9877 = vmatmul.msk.bf16.vlgmr.msrb.gmra.mxu2 %vm4386_vm0, %v10775_v60  ;;  %v10281_v45 = vld [vmem:[#allocation2 + $0x828] sm:$0xf0] }
  0x70   :  { %4732 = vmatpush.bf16.msra.mxu2 %v9302_v46  ;;  %9878 = vmatmul.msk.bf16.vlgmr.msrb.gmra.mxu3 %vm4386_vm0, %v10775_v60  ;;  %v10199_v46 = vld [vmem:[#allocation2 + $0x59c] sm:$0xf]  ;;  %v7990_v53 = vor.u32 %v10281_v45, %v7989_v44  ;;  %v7347_v44 = vld [vmem:[#allocation2 + $0x314] sm:$0xf0]  ;;  %v7353_v45 = vld [vmem:[#allocation2 + $0x88] sm:$0xf] }
  0x71   :  { %4745 = vmatpush.bf16.msra.mxu3 %v9306_v47  ;;  %v8662_v47 = vor.u32 %v10365_v39, %v8659_v40  ;;  %v7345_v39 = vld [vmem:[#allocation2 + $0x80] sm:$0xf]  ;;  %v10118_v40 = vld [vmem:[#allocation2 + $0x310] sm:$0xf0] }
  0x72   :  { %4707 = vmatpush.bf16.msra.mxu0 %v8634_v56  ;;  %v7994_v56 = vor.u32 %v10199_v46, %v7991_v48  ;;  %v8018_v46 = vor.u32 %v10202_v36, %v8015_v37  ;;  %v10037_v48 = vld [vmem:[#allocation2 + $0x8c] sm:$0xf]  ;;  %v10039_v37 = vld [vmem:[#allocation2 + $0x9c] sm:$0xf] }
  0x73   :  { %4720 = vmatpush.bf16.msra.mxu1 %v8638_v57  ;;  %v7998_v57 = vor.u32 %v10282_v50, %v7997_v49  ;;  %v7355_v49 = vld [vmem:[#allocation2 + $0x31c] sm:$0xf0]  ;;  %v9341_v50 = vld [vmem:[#allocation2 + $0x1008] sm:$0xf]  ;;  %v10121_v36 = vld [vmem:[#allocation2 + $0x328] sm:$0xf0] }
  0x74   :  { %4733 = vmatpush.bf16.msra.mxu2 %v8642_v58  ;;  %v10034_v58 = vld [vmem:[#allocation2 + $0x74] sm:$0xf] }
  0x75   :  { %4746 = vmatpush.bf16.msra.mxu3 %v8646_v63  ;;  %v10117_v63 = vld [vmem:[#allocation2 + $0x308] sm:$0xf0] }
  0x76   :  { %4708 = vmatpush.bf16.msra.mxu0 %v7974_v5  ;;  %v7330_v5 = vor.u32 %v10116_v55, %v7329_v54  ;;  %v7338_v10 = vor.u32 %v10117_v63, %v7337_v61  ;;  %v9349_v54 = vld [vmem:[#allocation2 + $0x1010] sm:$0xf]  ;;  %v10616_v55 = vld [vmem:[#allocation2 + $0x12a0] sm:$0xf0]  ;;  %v7358_v61 = vor.u32 %v10037_v48, %v7355_v49  ;;  %v10618_v48 = vld [vmem:[#allocation2 + $0x12b0] sm:$0xf0] }
  0x77   :  { %4721 = vmatpush.bf16.msra.mxu1 %v7978_v8  ;;  %v10614_v8 = vld [vmem:[#allocation2 + $0x1290] sm:$0xf0] }
  0x78   :  { %4734 = vmatpush.bf16.msra.mxu2 %v7982_v9  ;;  %v7334_v9 = vor.u32 %v10034_v58, %v7331_v59  ;;  %v9334_v16 = vor.u32 %v10614_v8, %v9333_v7  ;;  %v10534_v58 = vld [vmem:[#allocation2 + $0x1014] sm:$0xf]  ;;  %v9351_v59 = vld [vmem:[#allocation2 + $0x12a4] sm:$0xf0]  ;;  %v10451_v7 = vld [vmem:[#allocation2 + $0xd78] sm:$0xf0] }
  0x79   :  { %4747 = vmatpush.bf16.msra.mxu3 %v7986_v13  ;;  %v7342_v13 = vor.u32 %v10035_v0, %v7339_v1  ;;  %v9350_v0 = vor.u32 %v10616_v55, %v9349_v54  ;;  %v9354_v1 = vor.u32 %v10534_v58, %v9351_v59 }
  0x7a   :  { %4709 = vmatpush.bf16.msra.mxu0 %v7314_v20  ;;  %v10366_v20 = vld [vmem:[#allocation2 + $0xad4] sm:$0xf] }
  0x7b   :  { %4722 = vmatpush.bf16.msra.mxu1 %v7318_v24  ;;  %v10367_v24 = vld [vmem:[#allocation2 + $0xadc] sm:$0xf]  ;;  %v8670_v27 = vor.u32 %v10366_v20, %v8667_v21  ;;  %v8023_v20 = vld [vmem:[#allocation2 + $0x84c] sm:$0xf0]  ;;  %v8029_v21 = vld [vmem:[#allocation2 + $0x5c0] sm:$0xf] }
  0x7c   :  { %4735 = vmatpush.bf16.msra.mxu2 %v7322_v25  ;;  %v8675_v25 = vld [vmem:[#allocation2 + $0xd6c] sm:$0xf0] }
  0x7d   :  { %4748 = vmatpush.bf16.msra.mxu3 %v7326_v28  ;;  %9879 = vmatmul.msk.bf16.vlgmr.msra.gmra.mxu0 %vm4386_vm0, %v10775_v60  ;;  %v8674_v28 = vor.u32 %v10449_v23, %v8673_v22  ;;  %v10286_v22 = vld [vmem:[#allocation2 + $0x850] sm:$0xf0]  ;;  %v10204_v23 = vld [vmem:[#allocation2 + $0x5c4] sm:$0xf] }
  0x7e   :  { %4758 = vmatpush.bf16.msrb.mxu0 %v9310_v29  ;;  %9880 = vmatmul.msk.bf16.vlgmr.msra.gmra.mxu1 %vm4386_vm0, %v10775_v60  ;;  %v8005_v29 = vld [vmem:[#allocation2 + $0x5a8] sm:$0xf] }
  0x7f   :  { %4771 = vmatpush.bf16.msrb.mxu1 %v9314_v30  ;;  %9881 = vmatmul.msk.bf16.vlgmr.msra.gmra.mxu2 %vm4386_vm0, %v10775_v60  ;;  %v10283_v30 = vld [vmem:[#allocation2 + $0x838] sm:$0xf0] }
  0x80   :  { %4784 = vmatpush.bf16.msrb.mxu2 %v9318_v31  ;;  %9882 = vmatmul.msk.bf16.vlgmr.msra.gmra.mxu3 %vm4386_vm0, %v10775_v60  ;;  %v10201_v31 = vld [vmem:[#allocation2 + $0x5ac] sm:$0xf]  ;;  %v8006_v38 = vor.u32 %v10283_v30, %v8005_v29  ;;  %v8030_v30 = vor.u32 %v10286_v22, %v8029_v21 }
  0x81   :  { %4797 = vmatpush.bf16.msrb.mxu3 %v9322_v32  ;;  %v8678_v32 = vor.u32 %v10367_v24, %v8675_v25  ;;  %v8031_v24 = vld [vmem:[#allocation2 + $0x854] sm:$0xf0] }
  0x82   :  { %4759 = vmatpush.bf16.msrb.mxu0 %v8650_v41  ;;  %v8010_v41 = vor.u32 %v10201_v31, %v8007_v33  ;;  %v10038_v31 = vld [vmem:[#allocation2 + $0x94] sm:$0xf]  ;;  %v7369_v33 = vld [vmem:[#allocation2 + $0x98] sm:$0xf] }
  0x83   :  { %4772 = vmatpush.bf16.msrb.mxu1 %v8654_v42  ;;  %v8014_v42 = vor.u32 %v10284_v35, %v8013_v34  ;;  %v8034_v35 = vor.u32 %v10204_v23, %v8031_v24  ;;  %v8037_v23 = vld [vmem:[#allocation2 + $0x5c8] sm:$0xf]  ;;  %v10287_v24 = vld [vmem:[#allocation2 + $0x858] sm:$0xf0] }
  0x84   :  { %4785 = vmatpush.bf16.msrb.mxu2 %v8658_v43  ;;  %v10036_v43 = vld [vmem:[#allocation2 + $0x84] sm:$0xf] }
  0x85   :  { %4798 = vmatpush.bf16.msrb.mxu3 %v8662_v47  ;;  %v10119_v47 = vld [vmem:[#allocation2 + $0x318] sm:$0xf0] }
  0x86   :  { %4760 = vmatpush.bf16.msrb.mxu0 %v7990_v53  ;;  %v9343_v53 = vld [vmem:[#allocation2 + $0x129c] sm:$0xf0] }
  0x87   :  { %4773 = vmatpush.bf16.msrb.mxu1 %v7994_v56  ;;  %v7350_v56 = vor.u32 %v10036_v43, %v7347_v44  ;;  %v9346_v63 = vor.u32 %v10533_v52, %v9343_v53  ;;  %v10535_v43 = vld [vmem:[#allocation2 + $0x101c] sm:$0xf]  ;;  %v9367_v52 = vld [vmem:[#allocation2 + $0x12b4] sm:$0xf0] }
  0x88   :  { %4786 = vmatpush.bf16.msrb.mxu2 %v7998_v57  ;;  %v7354_v57 = vor.u32 %v10119_v47, %v7353_v45  ;;  %v9365_v47 = vld [vmem:[#allocation2 + $0x1020] sm:$0xf] }
  0x89   :  { %4799 = vmatpush.bf16.msrb.mxu3 %v8002_v62  ;;  %v9342_v62 = vor.u32 %v10615_v51, %v9341_v50  ;;  %v7370_v50 = vor.u32 %v10121_v36, %v7369_v33  ;;  %v10536_v51 = vld [vmem:[#allocation2 + $0x1024] sm:$0xf]  ;;  %v9366_v59 = vor.u32 %v10618_v48, %v9365_v47  ;;  %v10206_v33 = vld [vmem:[#allocation2 + $0x5d4] sm:$0xf]  ;;  %v7387_v48 = vld [vmem:[#allocation2 + $0x33c] sm:$0xf0] }
  0x8a   :  { %4761 = vmatpush.bf16.msrb.mxu0 %v7330_v5  ;;  %v8683_v5 = vld [vmem:[#allocation2 + $0xd74] sm:$0xf0]  ;;  %v10122_v36 = vld [vmem:[#allocation2 + $0x330] sm:$0xf0] }
  0x8b   :  { %4774 = vmatpush.bf16.msrb.mxu1 %v7334_v9  ;;  %v10369_v9 = vld [vmem:[#allocation2 + $0xaec] sm:$0xf] }
  0x8c   :  { %4787 = vmatpush.bf16.msrb.mxu2 %v7338_v10  ;;  %v8691_v10 = vld [vmem:[#allocation2 + $0xd7c] sm:$0xf0] }
  0x8d   :  { %4800 = vmatpush.bf16.msrb.mxu3 %v7342_v13  ;;  %9883 = vmatmul.msk.bf16.vlgmr.msrb.gmra.mxu0 %vm4386_vm0, %v10775_v60  ;;  %v8686_v13 = vor.u32 %v10368_v4, %v8683_v5  ;;  %v8694_v19 = vor.u32 %v10369_v9, %v8691_v10  ;;  %v8705_v4 = vld [vmem:[#allocation2 + $0xaf8] sm:$0xf]  ;;  %v8707_v9 = vld [vmem:[#allocation2 + $0xd8c] sm:$0xf0] }
  0x8e   :  { %4810 = vmatpush.bf16.msra.mxu0 %v9326_v14  ;;  %9884 = vmatmul.msk.bf16.vlgmr.msrb.gmra.mxu1 %vm4386_vm0, %v10775_v60  ;;  %v8690_v14 = vor.u32 %v10451_v7, %v8689_v6  ;;  %v10453_v6 = vld [vmem:[#allocation2 + $0xd88] sm:$0xf0]  ;;  %v10371_v7 = vld [vmem:[#allocation2 + $0xafc] sm:$0xf] }
  0x8f   :  { %4823 = vmatpush.bf16.msra.mxu1 %v9330_v15  ;;  %9885 = vmatmul.msk.bf16.vlgmr.msrb.gmra.mxu2 %vm4386_vm0, %v10775_v60  ;;  %v8021_v15 = vld [vmem:[#allocation2 + $0x5b8] sm:$0xf]  ;;  %v8706_v21 = vor.u32 %v10453_v6, %v8705_v4  ;;  %v8710_v22 = vor.u32 %v10371_v7, %v8707_v9  ;;  %v9383_v4 = vld [vmem:[#allocation2 + $0x12c4] sm:$0xf0] }
  0x90   :  { %4836 = vmatpush.bf16.msra.mxu2 %v9334_v16  ;;  %9886 = vmatmul.msk.bf16.vlgmr.msrb.gmra.mxu3 %vm4386_vm0, %v10775_v60  ;;  %v7346_v60 = vor.u32 %v10118_v40, %v7345_v39  ;;  %v10285_v16 = vld [vmem:[#allocation2 + $0x848] sm:$0xf0] }
  0x91   :  { %4849 = vmatpush.bf16.msra.mxu3 %v9338_v17  ;;  %v10203_v17 = vld [vmem:[#allocation2 + $0x5bc] sm:$0xf]  ;;  %v8022_v25 = vor.u32 %v10285_v16, %v8021_v15 }
  0x92   :  { %4811 = vmatpush.bf16.msra.mxu0 %v8666_v26  ;;  %v7361_v26 = vld [vmem:[#allocation2 + $0x90] sm:$0xf]  ;;  %v8026_v29 = vor.u32 %v10203_v17, %v8023_v20  ;;  %v8702_v20 = vor.u32 %v10370_v2, %v8699_v3  ;;  %v10538_v3 = vld [vmem:[#allocation2 + $0x1034] sm:$0xf] }
  0x93   :  { %4824 = vmatpush.bf16.msra.mxu1 %v8670_v27  ;;  %v10120_v27 = vld [vmem:[#allocation2 + $0x320] sm:$0xf0] }
  0x94   :  { %4837 = vmatpush.bf16.msra.mxu2 %v8674_v28  ;;  %v10858_v28 = vld [vmem:[#allocation4] sm:$0xff]  ;;  %v7362_v45 = vor.u32 %v10120_v27, %v7361_v26 }
  0x95   :  { %4850 = vmatpush.bf16.msra.mxu3 %v8678_v32  ;;  %v7363_v32 = vld [vmem:[#allocation2 + $0x324] sm:$0xf0]  ;;  %v753_v53 = vperm.slane %v10858_v28, 1  ;;  %v759_v17 = vperm.slane %v10858_v28, 7 }
  0x96   :  { %4812 = vmatpush.bf16.msra.mxu0 %v8006_v38  ;;  %v7371_v38 = vld [vmem:[#allocation2 + $0x32c] sm:$0xf0]  ;;  %v7366_v49 = vor.u32 %v10038_v31, %v7363_v32  ;;  %v8039_v31 = vld [vmem:[#allocation2 + $0x85c] sm:$0xf0] }
  0x97   :  { %4825 = vmatpush.bf16.msra.mxu1 %v8010_v41  ;;  %v9357_v41 = vld [vmem:[#allocation2 + $0x1018] sm:$0xf]  ;;  %v7374_v54 = vor.u32 %v10039_v37, %v7371_v38  ;;  %v8045_v32 = vld [vmem:[#allocation2 + $0x5d0] sm:$0xf]  ;;  %v10040_v37 = vld [vmem:[#allocation2 + $0xa4] sm:$0xf] }
  0x98   :  { %4838 = vmatpush.bf16.msra.mxu2 %v8014_v42  ;;  %v10617_v42 = vld [vmem:[#allocation2 + $0x12a8] sm:$0xf0]  ;;  %v7379_v38 = vld [vmem:[#allocation2 + $0x334] sm:$0xf0] }
  0x99   :  { %4851 = vmatpush.bf16.msra.mxu3 %v8018_v46  ;;  %v9359_v46 = vld [vmem:[#allocation2 + $0x12ac] sm:$0xf0]  ;;  %v9358_v55 = vor.u32 %v10617_v42, %v9357_v41  ;;  %v7385_v41 = vld [vmem:[#allocation2 + $0xa8] sm:$0xf]  ;;  %v10123_v42 = vld [vmem:[#allocation2 + $0x338] sm:$0xf0] }
  0x9a   :  { %4813 = vmatpush.bf16.msra.mxu0 %v7346_v60  ;;  %v10841_v8 = vpop.f32.mrf.mxu0  ;;  %v752_v60 = vperm.slane %v10858_v28, 0  ;;  %v9362_v58 = vor.u32 %v10535_v43, %v9359_v46  ;;  %v10041_v43 = vld [vmem:[#allocation2 + $0xac] sm:$0xf] }
  0x9b   :  { %4826 = vmatpush.bf16.msra.mxu1 %v7350_v56  ;;  %v10843_v11 = vpop.f32.mrf.mxu1  ;;  %v754_v56 = vperm.slane %v10858_v28, 2 }
  0x9c   :  { %4839 = vmatpush.bf16.msra.mxu2 %v7354_v57  ;;  %v755_v57 = vperm.slane %v10858_v28, 3  ;;  %v4400_v26 = vadd.f32 %v10841_v8, %v752_v60  ;;  %v4413_v27 = vadd.f32 %v10843_v11, %v753_v53  ;;  %v7377_v8 = vld [vmem:[#allocation2 + $0xa0] sm:$0xf]  ;;  %v8038_v11 = vor.u32 %v10287_v24, %v8037_v23 }
  0x9d   :  { %4852 = vmatpush.bf16.msra.mxu3 %v7358_v61  ;;  %9887 = vmatmul.msk.bf16.vlgmr.msra.gmra.mxu0 %vm4386_vm0, %v10848_v18  ;;  %v756_v61 = vperm.slane %v10858_v28, 4  ;;  %v7378_v53 = vor.u32 %v10122_v36, %v7377_v8 }
  0x9e   :  { %4862 = vmatpush.bf16.msrb.mxu0 %v9342_v62  ;;  %9888 = vmatmul.msk.bf16.vlgmr.msra.gmra.mxu1 %vm4386_vm0, %v10848_v18  ;;  %v757_v62 = vperm.slane %v10858_v28, 5 }
  0x9f   :  { %4875 = vmatpush.bf16.msrb.mxu1 %v9346_v63  ;;  %9889 = vmatmul.msk.bf16.vlgmr.msra.gmra.mxu2 %vm4386_vm0, %v10848_v18  ;;  %v9370_v63 = vor.u32 %v10536_v51, %v9367_v52 }
  0xa0   :  { %4888 = vmatpush.bf16.msrb.mxu2 %v9350_v0  ;;  %9890 = vmatmul.msk.bf16.vlgmr.msra.gmra.mxu3 %vm4386_vm0, %v10848_v18  ;;  %v8697_v0 = vld [vmem:[#allocation2 + $0xaf0] sm:$0xf] }
  0xa1   :  { %4901 = vmatpush.bf16.msrb.mxu3 %v9354_v1  ;;  %v10452_v1 = vld [vmem:[#allocation2 + $0xd80] sm:$0xf0] }
  0xa2   :  { %4863 = vmatpush.bf16.msrb.mxu0 %v8682_v12  ;;  %v4425_v34 = vpop.f32.mrf.mxu2  ;;  %v4401_v40 = vpop.f32.mrf.mxu0 }
  0xa3   :  { %4876 = vmatpush.bf16.msrb.mxu1 %v8686_v13  ;;  %v4438_v39 = vpop.f32.mrf.mxu3  ;;  %v4414_v44 = vpop.f32.mrf.mxu1  ;;  %v758_v13 = vperm.slane %v10858_v28, 6  ;;  %v10288_v28 = vld [vmem:[#allocation2 + $0x860] sm:$0xf0] }
  0xa4   :  { %4889 = vmatpush.bf16.msrb.mxu2 %v8690_v14  ;;  %v4426_v14 = vadd.f32 %v4425_v34, %v754_v56  ;;  %v4439_v15 = vadd.f32 %v4438_v39, %v755_v57  ;;  %v8047_v34 = vld [vmem:[#allocation2 + $0x864] sm:$0xf0]  ;;  %v8046_v40 = vor.u32 %v10288_v28, %v8045_v32  ;;  %v6535_v44 = vpack.c.bf16 %v4413_v27, %v4400_v26  ;;  %v10455_v27 = vld [vmem:[#allocation2 + $0xd98] sm:$0xf0]  ;;  %v10373_v28 = vld [vmem:[#allocation2 + $0xb0c] sm:$0xf] }
  0xa5   :  { %4902 = vmatpush.bf16.msrb.mxu3 %v8694_v19  ;;  %v8698_v19 = vor.u32 %v10452_v1, %v8697_v0  ;;  %v8050_v47 = vor.u32 %v10206_v33, %v8047_v34  ;;  %v7386_v0 = vor.u32 %v10123_v42, %v7385_v41  ;;  %v7390_v1 = vor.u32 %v10041_v43, %v7387_v48  ;;  %v8721_v26 = vld [vmem:[#allocation2 + $0xb08] sm:$0xf]  ;;  %v8723_v33 = vld [vmem:[#allocation2 + $0xd9c] sm:$0xf0]  ;;  %v8055_v41 = vld [vmem:[#allocation2 + $0x86c] sm:$0xf0] }
  0xa6   :  { %4864 = vmatpush.bf16.msrb.mxu0 %v8022_v25  ;;  %v10205_v25 = vld [vmem:[#allocation2 + $0x5cc] sm:$0xf]  ;;  %v8722_v36 = vor.u32 %v10455_v27, %v8721_v26  ;;  %v8061_v42 = vld [vmem:[#allocation2 + $0x5e0] sm:$0xf]  ;;  %v10290_v43 = vld [vmem:[#allocation2 + $0x870] sm:$0xf0] }
  0xa7   :  { %4877 = vmatpush.bf16.msrb.mxu1 %v8026_v29  ;;  %v8042_v39 = vor.u32 %v10205_v25, %v8039_v31  ;;  %v8715_v25 = vld [vmem:[#allocation2 + $0xd94] sm:$0xf0]  ;;  %v10124_v48 = vld [vmem:[#allocation2 + $0x340] sm:$0xf0]  ;;  %v10374_v26 = vld [vmem:[#allocation2 + $0xb14] sm:$0xf] }
  0xa8   :  { %4890 = vmatpush.bf16.msrb.mxu2 %v8030_v30  ;;  %v8731_v27 = vld [vmem:[#allocation2 + $0xda4] sm:$0xf0] }
  0xa9   :  { %4903 = vmatpush.bf16.msrb.mxu3 %v8034_v35  ;;  %v6536_v35 = vpack.c.bf16 %v4439_v15, %v4426_v14 }
  0xaa   :  { %4865 = vmatpush.bf16.msrb.mxu0 %v7362_v45  ;;  %v4427_v5 = vpop.f32.mrf.mxu2  ;;  %v4451_v12 = vpop.f32.mrf.mxu0 }
  0xab   :  { %4878 = vmatpush.bf16.msrb.mxu1 %v7366_v49  ;;  %v4440_v10 = vpop.f32.mrf.mxu3  ;;  %v4464_v16 = vpop.f32.mrf.mxu1  ;;  %v4452_v29 = vadd.f32 %v4451_v12, %v756_v61  ;;  %v9373_v49 = vld [vmem:[#allocation2 + $0x1028] sm:$0xf]  ;;  %v6702_v56 = vrot.slane %v6536_v35, 6  ;;  %v6703_v57 = vrot.slane %v6536_v35, 1  ;;  %v7382_v61 = vor.u32 %v10040_v37, %v7379_v38  ;;  %v8053_v37 = vld [vmem:[#allocation2 + $0x5d8] sm:$0xf] }
  0xac   :  { %4891 = vmatpush.bf16.msrb.mxu2 %v7370_v50  ;;  %v4465_v30 = vadd.f32 %v4464_v16, %v757_v62  ;;  %v10619_v50 = vld [vmem:[#allocation2 + $0x12b8] sm:$0xf0]  ;;  %v9381_v62 = vld [vmem:[#allocation2 + $0x1030] sm:$0xf]  ;;  %v6701_v5 = vrot.slane %v6535_v44, 3  ;;  %v9386_v16 = vor.u32 %v10538_v3, %v9383_v4 }
  0xad   :  { %4904 = vmatpush.bf16.msrb.mxu3 %v7374_v54  ;;  %9891 = vmatmul.msk.bf16.vlgmr.msrb.gmra.mxu0 %vm4386_vm0, %v10848_v18  ;;  %v10537_v54 = vld [vmem:[#allocation2 + $0x102c] sm:$0xf]  ;;  %v9374_v2 = vor.u32 %v10619_v50, %v9373_v49  ;;  %v9391_v3 = vld [vmem:[#allocation2 + $0x12cc] sm:$0xf0]  ;;  %v9397_v4 = vld [vmem:[#allocation2 + $0x1040] sm:$0xf] }
  0xae   :  { %4914 = vmatpush.bf16.msra.mxu0 %v9358_v55  ;;  %9892 = vmatmul.msk.bf16.vlgmr.msrb.gmra.mxu1 %vm4386_vm0, %v10848_v18  ;;  %v6537_v45 = vpack.c.bf16 %v4465_v30, %v4452_v29  ;;  %v9375_v55 = vld [vmem:[#allocation2 + $0x12bc] sm:$0xf0]  ;;  %v10289_v38 = vld [vmem:[#allocation2 + $0x868] sm:$0xf0] }
  0xaf   :  { %4927 = vmatpush.bf16.msra.mxu1 %v9362_v58  ;;  %9893 = vmatmul.msk.bf16.vlgmr.msrb.gmra.mxu2 %vm4386_vm0, %v10848_v18  ;;  %v9378_v10 = vor.u32 %v10537_v54, %v9375_v55  ;;  %v10900_v49 = vld [vmem:[#allocation4 + $0x8] sm:$0xff] }
  0xb0   :  { %4940 = vmatpush.bf16.msra.mxu2 %v9366_v59  ;;  %9894 = vmatmul.msk.bf16.vlgmr.msrb.gmra.mxu3 %vm4386_vm0, %v10848_v18  ;;  %v6704_v6 = vrot.slane %v6537_v45, 4  ;;  %v6705_v7 = vrot.slane %v6537_v45, 7  ;;  %v8063_v45 = vld [vmem:[#allocation2 + $0x874] sm:$0xf0] }
  0xb1   :  { %4953 = vmatpush.bf16.msra.mxu3 %v9370_v63  ;;  %v10620_v63 = vld [vmem:[#allocation2 + $0x12c0] sm:$0xf0] }
  0xb2   :  { %4915 = vmatpush.bf16.msra.mxu0 %v8698_v19  ;;  %v4477_v46 = vpop.f32.mrf.mxu2  ;;  %v4453_v60 = vpop.f32.mrf.mxu0  ;;  %v9382_v12 = vor.u32 %v10620_v63, %v9381_v62  ;;  %v10454_v19 = vld [vmem:[#allocation2 + $0xd90] sm:$0xf0]  ;;  %v9389_v62 = vld [vmem:[#allocation2 + $0x1038] sm:$0xf]  ;;  %v10621_v63 = vld [vmem:[#allocation2 + $0x12c8] sm:$0xf0] }
  0xb3   :  { %4928 = vmatpush.bf16.msra.mxu1 %v8702_v20  ;;  %v4478_v51 = vadd.f32 %v4477_v46, %v758_v13  ;;  %v4490_v52 = vpop.f32.mrf.mxu3  ;;  %v4466_v59 = vpop.f32.mrf.mxu1  ;;  %v6853_v13 = vsel %vm6850_vm1, %v6702_v56, %v6703_v57  ;;  %v10372_v20 = vld [vmem:[#allocation2 + $0xb04] sm:$0xf]  ;;  %v8054_v46 = vor.u32 %v10289_v38, %v8053_v37  ;;  %v7395_v60 = vld [vmem:[#allocation2 + $0x344] sm:$0xf0]  ;;  %v10125_v56 = vld [vmem:[#allocation2 + $0x348] sm:$0xf0] }
  0xb4   :  { %4941 = vmatpush.bf16.msra.mxu2 %v8706_v21  ;;  %v4491_v58 = vadd.f32 %v4490_v52, %v759_v17  ;;  %v8713_v17 = vld [vmem:[#allocation2 + $0xb00] sm:$0xf]  ;;  %v6849_v21 = vsel %vm6846_vm2, %v6535_v44, %v6701_v5  ;;  %v10208_v44 = vld [vmem:[#allocation2 + $0x5e4] sm:$0xf]  ;;  %v10042_v52 = vld [vmem:[#allocation2 + $0xb4] sm:$0xf] }
  0xb5   :  { %4954 = vmatpush.bf16.msra.mxu3 %v8710_v22  ;;  %v6859_v22 = vsel %vm6856_vm4, %v6704_v6, %v6705_v7  ;;  %v6855_v29 = vsel %vm6854_vm3, %v6849_v21, %v6853_v13  ;;  %v8714_v35 = vor.u32 %v10454_v19, %v8713_v17  ;;  %v8066_v55 = vor.u32 %v10208_v44, %v8063_v45  ;;  %v10043_v57 = vld [vmem:[#allocation2 + $0xbc] sm:$0xf]  ;;  %v10622_v5 = vld [vmem:[#allocation2 + $0x12d0] sm:$0xf0]  ;;  %v8069_v44 = vld [vmem:[#allocation2 + $0x5e8] sm:$0xf] }
  0xb6   :  { %4916 = vmatpush.bf16.msra.mxu0 %v8038_v11  ;;  %v6538_v9 = vpack.c.bf16 %v4491_v58, %v4478_v51  ;;  %v8718_v11 = vor.u32 %v10372_v20, %v8715_v25  ;;  %v8062_v51 = vor.u32 %v10290_v43, %v8061_v42  ;;  %v7403_v58 = vld [vmem:[#allocation2 + $0x34c] sm:$0xf0]  ;;  %v7398_v6 = vor.u32 %v10042_v52, %v7395_v60  ;;  %v10456_v25 = vld [vmem:[#allocation2 + $0xda0] sm:$0xf0]  ;;  %v10291_v45 = vld [vmem:[#allocation2 + $0x878] sm:$0xf0] }
  0xb7   :  { %4929 = vmatpush.bf16.msra.mxu1 %v8042_v39  ;;  %v10207_v39 = vld [vmem:[#allocation2 + $0x5dc] sm:$0xf]  ;;  %v761_v13 = vperm.slane %v10900_v49, 1  ;;  %v763_v17 = vperm.slane %v10900_v49, 3  ;;  %v9398_v20 = vor.u32 %v10622_v5, %v9397_v4  ;;  %v764_v21 = vperm.slane %v10900_v49, 4 }
  0xb8   :  { %4942 = vmatpush.bf16.msra.mxu2 %v8046_v40  ;;  %v6706_v14 = vrot.slane %v6538_v9, 2  ;;  %v6707_v15 = vrot.slane %v6538_v9, 5  ;;  %v8726_v40 = vor.u32 %v10373_v28, %v8723_v33  ;;  %v8058_v50 = vor.u32 %v10207_v39, %v8055_v41  ;;  %v10540_v9 = vld [vmem:[#allocation2 + $0x1044] sm:$0xf]  ;;  %v10375_v28 = vld [vmem:[#allocation2 + $0xb1c] sm:$0xf] }
  0xb9   :  { %4955 = vmatpush.bf16.msra.mxu3 %v8050_v47  ;;  %v7393_v47 = vld [vmem:[#allocation2 + $0xb0] sm:$0xf]  ;;  %v767_v39 = vperm.slane %v10900_v49, 7  ;;  %v8734_v41 = vor.u32 %v10374_v26, %v8731_v27  ;;  %v8071_v52 = vld [vmem:[#allocation2 + $0x87c] sm:$0xf0] }
  0xba   :  { %4917 = vmatpush.bf16.msra.mxu0 %v7378_v53  ;;  %v6863_v23 = vsel %vm6860_vm5, %v6706_v14, %v6707_v15  ;;  %v4479_v24 = vpop.f32.mrf.mxu2  ;;  %v10884_v32 = vpop.f32.mrf.mxu0  ;;  %v7401_v53 = vld [vmem:[#allocation2 + $0xb8] sm:$0xf]  ;;  %v7406_v14 = vor.u32 %v10043_v57, %v7403_v58  ;;  %v9390_v15 = vor.u32 %v10621_v63, %v9389_v62  ;;  %v8739_v33 = vld [vmem:[#allocation2 + $0xdac] sm:$0xf0]  ;;  %v10044_v57 = vld [vmem:[#allocation2 + $0xc4] sm:$0xf] }
  0xbb   :  { %4930 = vmatpush.bf16.msra.mxu1 %v7382_v61  ;;  %v6865_v30 = vsel %vm6864_vm6, %v6859_v22, %v6863_v23  ;;  %v4492_v31 = vpop.f32.mrf.mxu3  ;;  %v10887_v8 = vpop.f32.mrf.mxu1  ;;  %v7402_v7 = vor.u32 %v10125_v56, %v7401_v53  ;;  %v765_v22 = vperm.slane %v10900_v49, 5  ;;  %v8729_v24 = vld [vmem:[#allocation2 + $0xb10] sm:$0xf]  ;;  %v8742_v43 = vor.u32 %v10375_v28, %v8739_v33  ;;  %v10292_v53 = vld [vmem:[#allocation2 + $0x880] sm:$0xf0] }
  0xbc   :  { %4943 = vmatpush.bf16.msra.mxu2 %v7386_v0  ;;  %v6867_v34 = vsel %vm6866_vm7, %v6855_v29, %v6865_v30  ;;  %v10539_v0 = vld [vmem:[#allocation2 + $0x103c] sm:$0xf]  ;;  %v8737_v29 = vld [vmem:[#allocation2 + $0xb18] sm:$0xf]  ;;  %v10457_v31 = vld [vmem:[#allocation2 + $0xda8] sm:$0xf0] }
  0xbd   :  { %4956 = vmatpush.bf16.msra.mxu3 %v7390_v1  ;;  %7188 = vst [vmem:[%s11601_s3] sm:$0xff] %v6867_v34  ;;  %9895 = vmatmul.msk.bf16.vlgmr.msra.gmra.mxu0 %vm4386_vm0, %v10848_v18  ;;  %v9394_v19 = vor.u32 %v10539_v0, %v9391_v3  ;;  %v8738_v42 = vor.u32 %v10457_v31, %v8737_v29  ;;  %v8077_v60 = vld [vmem:[#allocation2 + $0x5f0] sm:$0xf]  ;;  %v10126_v56 = vld [vmem:[#allocation2 + $0x350] sm:$0xf0]  ;;  %v7411_v58 = vld [vmem:[#allocation2 + $0x354] sm:$0xf0] }
  0xbe   :  { %4966 = vmatpush.bf16.msrb.mxu0 %v9374_v2  ;;  %9896 = vmatmul.msk.bf16.vlgmr.msra.gmra.mxu1 %vm4386_vm0, %v10848_v18  ;;  %v7394_v2 = vor.u32 %v10124_v48, %v7393_v47  ;;  %v4517_v48 = vadd.f32 %v10887_v8, %v761_v13  ;;  %v8070_v8 = vor.u32 %v10291_v45, %v8069_v44  ;;  %v7417_v62 = vld [vmem:[#allocation2 + $0xc8] sm:$0xf]  ;;  %v10127_v63 = vld [vmem:[#allocation2 + $0x358] sm:$0xf0]  ;;  %v10045_v0 = vld [vmem:[#allocation2 + $0xcc] sm:$0xf] }
  0xbf   :  { %4979 = vmatpush.bf16.msrb.mxu1 %v9378_v10  ;;  %9897 = vmatmul.msk.bf16.vlgmr.msra.gmra.mxu2 %vm4386_vm0, %v10848_v18  ;;  %v9399_v10 = vld [vmem:[#allocation2 + $0x12d4] sm:$0xf0]  ;;  %v7419_v5 = vld [vmem:[#allocation2 + $0x35c] sm:$0xf0]  ;;  %v10542_v27 = vld [vmem:[#allocation2 + $0x1054] sm:$0xf] }
  0xc0   :  { %4992 = vmatpush.bf16.msrb.mxu2 %v9382_v12  ;;  %9898 = vmatmul.msk.bf16.vlgmr.msra.gmra.mxu3 %vm4386_vm0, %v10848_v18  ;;  %v760_v12 = vperm.slane %v10900_v49, 0  ;;  %v9402_v23 = vor.u32 %v10540_v9, %v9399_v10  ;;  %v9415_v29 = vld [vmem:[#allocation2 + $0x12e4] sm:$0xf0] }
  0xc1   :  { %5005 = vmatpush.bf16.msrb.mxu3 %v9386_v16  ;;  %v762_v16 = vperm.slane %v10900_v49, 2 }
  0xc2   :  { %4967 = vmatpush.bf16.msrb.mxu0 %v8714_v35  ;;  %v4529_v54 = vpop.f32.mrf.mxu2  ;;  %v4505_v61 = vpop.f32.mrf.mxu0  ;;  %v4504_v47 = vadd.f32 %v10884_v32, %v760_v12 }
  0xc3   :  { %4980 = vmatpush.bf16.msrb.mxu1 %v8718_v11  ;;  %v4542_v59 = vpop.f32.mrf.mxu3  ;;  %v4518_v1 = vpop.f32.mrf.mxu1  ;;  %v766_v11 = vperm.slane %v10900_v49, 6  ;;  %v10210_v49 = vld [vmem:[#allocation2 + $0x5f4] sm:$0xf]  ;;  %v8078_v61 = vor.u32 %v10292_v53, %v8077_v60  ;;  %v10377_v53 = vld [vmem:[#allocation2 + $0xb2c] sm:$0xf] }
  0xc4   :  { %4993 = vmatpush.bf16.msrb.mxu2 %v8722_v36  ;;  %v4530_v36 = vadd.f32 %v4529_v54, %v762_v16  ;;  %v4543_v37 = vadd.f32 %v4542_v59, %v763_v17  ;;  %v8079_v54 = vld [vmem:[#allocation2 + $0x884] sm:$0xf0]  ;;  %v6539_v1 = vpack.c.bf16 %v4517_v48, %v4504_v47  ;;  %v10459_v48 = vld [vmem:[#allocation2 + $0xdb8] sm:$0xf0] }
  0xc5   :  { %5006 = vmatpush.bf16.msrb.mxu3 %v8726_v40  ;;  %v8730_v40 = vor.u32 %v10456_v25, %v8729_v24  ;;  %v8082_v4 = vor.u32 %v10210_v49, %v8079_v54  ;;  %v7418_v24 = vor.u32 %v10127_v63, %v7417_v62  ;;  %v7422_v25 = vor.u32 %v10045_v0, %v7419_v5  ;;  %v8753_v47 = vld [vmem:[#allocation2 + $0xb28] sm:$0xf]  ;;  %v8755_v49 = vld [vmem:[#allocation2 + $0xdbc] sm:$0xf0]  ;;  %v8087_v62 = vld [vmem:[#allocation2 + $0x88c] sm:$0xf0] }
  0xc6   :  { %4968 = vmatpush.bf16.msrb.mxu0 %v8054_v46  ;;  %v10209_v46 = vld [vmem:[#allocation2 + $0x5ec] sm:$0xf]  ;;  %v6540_v32 = vpack.c.bf16 %v4543_v37, %v4530_v36  ;;  %v8093_v63 = vld [vmem:[#allocation2 + $0x600] sm:$0xf]  ;;  %v10294_v0 = vld [vmem:[#allocation2 + $0x890] sm:$0xf0] }
  0xc7   :  { %4981 = vmatpush.bf16.msrb.mxu1 %v8058_v50  ;;  %v8074_v59 = vor.u32 %v10209_v46, %v8071_v52  ;;  %v8747_v46 = vld [vmem:[#allocation2 + $0xdb4] sm:$0xf0]  ;;  %v10128_v5 = vld [vmem:[#allocation2 + $0x360] sm:$0xf0] }
  0xc8   :  { %4994 = vmatpush.bf16.msrb.mxu2 %v8062_v51  ;;  %v6709_v16 = vrot.slane %v6540_v32, 6  ;;  %v6710_v17 = vrot.slane %v6540_v32, 1 }
  0xc9   :  { %5007 = vmatpush.bf16.msrb.mxu3 %v8066_v55  ;;  %v7409_v55 = vld [vmem:[#allocation2 + $0xc0] sm:$0xf] }
  0xca   :  { %4969 = vmatpush.bf16.msrb.mxu0 %v7394_v2  ;;  %v4531_v30 = vpop.f32.mrf.mxu2  ;;  %v4555_v35 = vpop.f32.mrf.mxu0  ;;  %v7410_v13 = vor.u32 %v10126_v56, %v7409_v55 }
  0xcb   :  { %4982 = vmatpush.bf16.msrb.mxu1 %v7398_v6  ;;  %v4544_v34 = vpop.f32.mrf.mxu3  ;;  %v4568_v38 = vpop.f32.mrf.mxu1  ;;  %v4556_v50 = vadd.f32 %v4555_v35, %v764_v21  ;;  %v9405_v6 = vld [vmem:[#allocation2 + $0x1048] sm:$0xf]  ;;  %v7414_v21 = vor.u32 %v10044_v57, %v7411_v58  ;;  %v6708_v30 = vrot.slane %v6539_v1, 3  ;;  %v8754_v57 = vor.u32 %v10459_v48, %v8753_v47  ;;  %v10293_v58 = vld [vmem:[#allocation2 + $0x888] sm:$0xf0] }
  0xcc   :  { %4995 = vmatpush.bf16.msrb.mxu2 %v7402_v7  ;;  %v4569_v51 = vadd.f32 %v4568_v38, %v765_v22  ;;  %v10623_v7 = vld [vmem:[#allocation2 + $0x12d8] sm:$0xf0]  ;;  %v9413_v22 = vld [vmem:[#allocation2 + $0x1050] sm:$0xf]  ;;  %v9418_v38 = vor.u32 %v10542_v27, %v9415_v29  ;;  %v9429_v29 = vld [vmem:[#allocation2 + $0x1060] sm:$0xf] }
  0xcd   :  { %5008 = vmatpush.bf16.msrb.mxu3 %v7406_v14  ;;  %9899 = vmatmul.msk.bf16.vlgmr.msrb.gmra.mxu0 %vm4386_vm0, %v10848_v18  ;;  %v10541_v14 = vld [vmem:[#allocation2 + $0x104c] sm:$0xf]  ;;  %v9406_v26 = vor.u32 %v10623_v7, %v9405_v6  ;;  %v10942_v6 = vld [vmem:[#allocation4 + $0x10] sm:$0xff]  ;;  %v8763_v48 = vld [vmem:[#allocation2 + $0xdc4] sm:$0xf0] }
  0xce   :  { %5018 = vmatpush.bf16.msra.mxu0 %v9390_v15  ;;  %9900 = vmatmul.msk.bf16.vlgmr.msrb.gmra.mxu1 %vm4386_vm0, %v10848_v18  ;;  %v6541_v2 = vpack.c.bf16 %v4569_v51, %v4556_v50  ;;  %v9407_v15 = vld [vmem:[#allocation2 + $0x12dc] sm:$0xf0]  ;;  %v9423_v27 = vld [vmem:[#allocation2 + $0x12ec] sm:$0xf0]  ;;  %v10378_v47 = vld [vmem:[#allocation2 + $0xb34] sm:$0xf] }
  0xcf   :  { %5031 = vmatpush.bf16.msra.mxu1 %v9394_v19  ;;  %9901 = vmatmul.msk.bf16.vlgmr.msrb.gmra.mxu2 %vm4386_vm0, %v10848_v18  ;;  %v9410_v34 = vor.u32 %v10541_v14, %v9407_v15 }
  0xd0   :  { %5044 = vmatpush.bf16.msra.mxu2 %v9398_v20  ;;  %9902 = vmatmul.msk.bf16.vlgmr.msrb.gmra.mxu3 %vm4386_vm0, %v10848_v18  ;;  %v6711_v31 = vrot.slane %v6541_v2, 4  ;;  %v6712_v28 = vrot.slane %v6541_v2, 7  ;;  %v8095_v2 = vld [vmem:[#allocation2 + $0x894] sm:$0xf0] }
  0xd1   :  { %5057 = vmatpush.bf16.msra.mxu3 %v9402_v23  ;;  %v10624_v23 = vld [vmem:[#allocation2 + $0x12e0] sm:$0xf0] }
  0xd2   :  { %5019 = vmatpush.bf16.msra.mxu0 %v8730_v40  ;;  %v4581_v3 = vpop.f32.mrf.mxu2  ;;  %v4557_v12 = vpop.f32.mrf.mxu0  ;;  %v9414_v35 = vor.u32 %v10624_v23, %v9413_v22  ;;  %v10458_v40 = vld [vmem:[#allocation2 + $0xdb0] sm:$0xf0]  ;;  %v9421_v22 = vld [vmem:[#allocation2 + $0x1058] sm:$0xf]  ;;  %v10625_v23 = vld [vmem:[#allocation2 + $0x12e8] sm:$0xf0] }
  0xd3   :  { %5032 = vmatpush.bf16.msra.mxu1 %v8734_v41  ;;  %v4582_v9 = vadd.f32 %v4581_v3, %v766_v11  ;;  %v4594_v10 = vpop.f32.mrf.mxu3  ;;  %v4570_v20 = vpop.f32.mrf.mxu1  ;;  %v6873_v11 = vsel %vm6850_vm1, %v6709_v16, %v6710_v17  ;;  %v10376_v41 = vld [vmem:[#allocation2 + $0xb24] sm:$0xf]  ;;  %v7427_v12 = vld [vmem:[#allocation2 + $0x364] sm:$0xf0]  ;;  %v10129_v16 = vld [vmem:[#allocation2 + $0x368] sm:$0xf0] }
  0xd4   :  { %5045 = vmatpush.bf16.msra.mxu2 %v8738_v42  ;;  %v4595_v19 = vadd.f32 %v4594_v10, %v767_v39  ;;  %v8745_v39 = vld [vmem:[#allocation2 + $0xb20] sm:$0xf]  ;;  %v6870_v42 = vsel %vm6846_vm2, %v6539_v1, %v6708_v30  ;;  %v8750_v56 = vor.u32 %v10376_v41, %v8747_v46  ;;  %v10212_v1 = vld [vmem:[#allocation2 + $0x604] sm:$0xf]  ;;  %v10046_v10 = vld [vmem:[#allocation2 + $0xd4] sm:$0xf] }
  0xd5   :  { %5058 = vmatpush.bf16.msra.mxu3 %v8742_v43  ;;  %v6877_v43 = vsel %vm6856_vm4, %v6711_v31, %v6712_v28  ;;  %v6874_v50 = vsel %vm6854_vm3, %v6870_v42, %v6873_v11  ;;  %v8746_v32 = vor.u32 %v10458_v40, %v8745_v39  ;;  %v8098_v15 = vor.u32 %v10212_v1, %v8095_v2  ;;  %v10047_v17 = vld [vmem:[#allocation2 + $0xdc] sm:$0xf]  ;;  %v10626_v30 = vld [vmem:[#allocation2 + $0x12f0] sm:$0xf0]  ;;  %v10460_v46 = vld [vmem:[#allocation2 + $0xdc0] sm:$0xf0] }
  0xd6   :  { %5020 = vmatpush.bf16.msra.mxu0 %v8070_v8  ;;  %v6542_v33 = vpack.c.bf16 %v4595_v19, %v4582_v9  ;;  %v8085_v8 = vld [vmem:[#allocation2 + $0x5f8] sm:$0xf]  ;;  %v8094_v9 = vor.u32 %v10294_v0, %v8093_v63  ;;  %v7435_v19 = vld [vmem:[#allocation2 + $0x36c] sm:$0xf0]  ;;  %v7430_v31 = vor.u32 %v10046_v10, %v7427_v12  ;;  %v769_v11 = vperm.slane %v10942_v6, 1 }
  0xd7   :  { %5033 = vmatpush.bf16.msra.mxu1 %v8074_v59  ;;  %v10211_v59 = vld [vmem:[#allocation2 + $0x5fc] sm:$0xf]  ;;  %v8086_v3 = vor.u32 %v10293_v58, %v8085_v8  ;;  %v771_v39 = vperm.slane %v10942_v6, 3  ;;  %v9430_v41 = vor.u32 %v10626_v30, %v9429_v29  ;;  %v772_v42 = vperm.slane %v10942_v6, 4  ;;  %v8101_v1 = vld [vmem:[#allocation2 + $0x608] sm:$0xf] }
  0xd8   :  { %5046 = vmatpush.bf16.msra.mxu2 %v8078_v61  ;;  %v6713_v36 = vrot.slane %v6542_v33, 2  ;;  %v6714_v37 = vrot.slane %v6542_v33, 5  ;;  %v8758_v61 = vor.u32 %v10377_v53, %v8755_v49  ;;  %v8090_v7 = vor.u32 %v10211_v59, %v8087_v62  ;;  %v10544_v33 = vld [vmem:[#allocation2 + $0x1064] sm:$0xf]  ;;  %v10379_v53 = vld [vmem:[#allocation2 + $0xb3c] sm:$0xf] }
  0xd9   :  { %5059 = vmatpush.bf16.msra.mxu3 %v8082_v4  ;;  %v7425_v4 = vld [vmem:[#allocation2 + $0xd0] sm:$0xf]  ;;  %v774_v8 = vperm.slane %v10942_v6, 6  ;;  %v775_v59 = vperm.slane %v10942_v6, 7  ;;  %v8766_v62 = vor.u32 %v10378_v47, %v8763_v48  ;;  %v10295_v2 = vld [vmem:[#allocation2 + $0x898] sm:$0xf0] }
  0xda   :  { %5021 = vmatpush.bf16.msra.mxu0 %v7410_v13  ;;  %v6880_v44 = vsel %vm6860_vm5, %v6713_v36, %v6714_v37  ;;  %v4583_v45 = vpop.f32.mrf.mxu2  ;;  %v10926_v60 = vpop.f32.mrf.mxu0  ;;  %v7433_v13 = vld [vmem:[#allocation2 + $0xd8] sm:$0xf]  ;;  %v7438_v36 = vor.u32 %v10047_v17, %v7435_v19  ;;  %v9422_v37 = vor.u32 %v10625_v23, %v9421_v22  ;;  %v8771_v49 = vld [vmem:[#allocation2 + $0xdcc] sm:$0xf0]  ;;  %v8103_v10 = vld [vmem:[#allocation2 + $0x89c] sm:$0xf0] }
  0xdb   :  { %5034 = vmatpush.bf16.msra.mxu1 %v7414_v21  ;;  %v6881_v51 = vsel %vm6864_vm6, %v6877_v43, %v6880_v44  ;;  %v4596_v52 = vpop.f32.mrf.mxu3  ;;  %v10929_v55 = vpop.f32.mrf.mxu1  ;;  %v7434_v28 = vor.u32 %v10129_v16, %v7433_v13  ;;  %v773_v43 = vperm.slane %v10942_v6, 5  ;;  %v8761_v45 = vld [vmem:[#allocation2 + $0xb30] sm:$0xf]  ;;  %v8774_v0 = vor.u32 %v10379_v53, %v8771_v49  ;;  %v10296_v13 = vld [vmem:[#allocation2 + $0x8a0] sm:$0xf0] }
  0xdc   :  { %5047 = vmatpush.bf16.msra.mxu2 %v7418_v24  ;;  %v6882_v54 = vsel %vm6866_vm7, %v6874_v50, %v6881_v51  ;;  %v10543_v24 = vld [vmem:[#allocation2 + $0x105c] sm:$0xf]  ;;  %v8769_v50 = vld [vmem:[#allocation2 + $0xb38] sm:$0xf]  ;;  %v10461_v52 = vld [vmem:[#allocation2 + $0xdc8] sm:$0xf0] }
  0xdd   :  { %5060 = vmatpush.bf16.msra.mxu3 %v7422_v25  ;;  %7189 = vst [vmem:[%s11601_s3 + $0x8] sm:$0xff] %v6882_v54  ;;  %9903 = vmatmul.msk.bf16.vlgmr.msra.gmra.mxu0 %vm4386_vm0, %v10848_v18  ;;  %v9426_v40 = vor.u32 %v10543_v24, %v9423_v27  ;;  %v8770_v63 = vor.u32 %v10461_v52, %v8769_v50  ;;  %v8109_v12 = vld [vmem:[#allocation2 + $0x610] sm:$0xf]  ;;  %v10130_v16 = vld [vmem:[#allocation2 + $0x370] sm:$0xf0] }
  0xde   :  { %5070 = vmatpush.bf16.msrb.mxu0 %v9406_v26  ;;  %9904 = vmatmul.msk.bf16.vlgmr.msra.gmra.mxu1 %vm4386_vm0, %v10848_v18  ;;  %v7426_v26 = vor.u32 %v10128_v5, %v7425_v4  ;;  %v4621_v5 = vadd.f32 %v10929_v55, %v769_v11  ;;  %v8102_v55 = vor.u32 %v10295_v2, %v8101_v1  ;;  %v10048_v17 = vld [vmem:[#allocation2 + $0xe4] sm:$0xf]  ;;  %v7443_v19 = vld [vmem:[#allocation2 + $0x374] sm:$0xf0]  ;;  %v7449_v22 = vld [vmem:[#allocation2 + $0xe8] sm:$0xf] }
  0xdf   :  { %5083 = vmatpush.bf16.msrb.mxu1 %v9410_v34  ;;  %9905 = vmatmul.msk.bf16.vlgmr.msra.gmra.mxu2 %vm4386_vm0, %v10848_v18  ;;  %v9431_v34 = vld [vmem:[#allocation2 + $0x12f4] sm:$0xf0]  ;;  %v10131_v23 = vld [vmem:[#allocation2 + $0x378] sm:$0xf0]  ;;  %v10049_v24 = vld [vmem:[#allocation2 + $0xec] sm:$0xf] }
  0xe0   :  { %5096 = vmatpush.bf16.msrb.mxu2 %v9414_v35  ;;  %9906 = vmatmul.msk.bf16.vlgmr.msra.gmra.mxu3 %vm4386_vm0, %v10848_v18  ;;  %v768_v35 = vperm.slane %v10942_v6, 0  ;;  %v9434_v44 = vor.u32 %v10544_v33, %v9431_v34  ;;  %v7451_v30 = vld [vmem:[#allocation2 + $0x37c] sm:$0xf0]  ;;  %v10545_v11 = vld [vmem:[#allocation2 + $0x106c] sm:$0xf] }
  0xe1   :  { %5109 = vmatpush.bf16.msrb.mxu3 %v9418_v38  ;;  %v770_v38 = vperm.slane %v10942_v6, 2  ;;  %v10214_v6 = vld [vmem:[#allocation2 + $0x614] sm:$0xf]  ;;  %v9447_v48 = vld [vmem:[#allocation2 + $0x1304] sm:$0xf0] }
  0xe2   :  { %5071 = vmatpush.bf16.msrb.mxu0 %v8746_v32  ;;  %v4633_v14 = vpop.f32.mrf.mxu2  ;;  %v4609_v21 = vpop.f32.mrf.mxu0  ;;  %v4608_v4 = vadd.f32 %v10926_v60, %v768_v35  ;;  %v10546_v47 = vld [vmem:[#allocation2 + $0x1074] sm:$0xf]  ;;  %v8779_v2 = vld [vmem:[#allocation2 + $0xdd4] sm:$0xf0] }
  0xe3   :  { %5084 = vmatpush.bf16.msrb.mxu1 %v8750_v56  ;;  %v4646_v20 = vpop.f32.mrf.mxu3  ;;  %v4622_v25 = vpop.f32.mrf.mxu1  ;;  %v4634_v56 = vadd.f32 %v4633_v14, %v770_v38  ;;  %v8111_v14 = vld [vmem:[#allocation2 + $0x8a4] sm:$0xf0]  ;;  %v8110_v21 = vor.u32 %v10296_v13, %v8109_v12  ;;  %v10381_v12 = vld [vmem:[#allocation2 + $0xb4c] sm:$0xf]  ;;  %v8787_v13 = vld [vmem:[#allocation2 + $0xddc] sm:$0xf0] }
  0xe4   :  { %5097 = vmatpush.bf16.msrb.mxu2 %v8754_v57  ;;  %v4647_v57 = vadd.f32 %v4646_v20, %v771_v39  ;;  %v6543_v25 = vpack.c.bf16 %v4621_v5, %v4608_v4  ;;  %v8114_v29 = vor.u32 %v10214_v6, %v8111_v14  ;;  %v10463_v4 = vld [vmem:[#allocation2 + $0xdd8] sm:$0xf0] }
  0xe5   :  { %5110 = vmatpush.bf16.msrb.mxu3 %v8758_v61  ;;  %v8762_v61 = vor.u32 %v10460_v46, %v8761_v45  ;;  %v7454_v45 = vor.u32 %v10049_v24, %v7451_v30  ;;  %v10298_v24 = vld [vmem:[#allocation2 + $0x8b0] sm:$0xf0]  ;;  %v10132_v30 = vld [vmem:[#allocation2 + $0x380] sm:$0xf0] }
  0xe6   :  { %5072 = vmatpush.bf16.msrb.mxu0 %v8086_v3  ;;  %v10213_v3 = vld [vmem:[#allocation2 + $0x60c] sm:$0xf]  ;;  %v6544_v60 = vpack.c.bf16 %v4647_v57, %v4634_v56  ;;  %v6715_v50 = vrot.slane %v6543_v25, 3  ;;  %v9450_v57 = vor.u32 %v10546_v47, %v9447_v48  ;;  %v9455_v47 = vld [vmem:[#allocation2 + $0x130c] sm:$0xf0] }
  0xe7   :  { %5085 = vmatpush.bf16.msrb.mxu1 %v8090_v7  ;;  %v8106_v20 = vor.u32 %v10213_v3, %v8103_v10  ;;  %v8785_v3 = vld [vmem:[#allocation2 + $0xb48] sm:$0xf]  ;;  %v9461_v48 = vld [vmem:[#allocation2 + $0x1080] sm:$0xf] }
  0xe8   :  { %5098 = vmatpush.bf16.msrb.mxu2 %v8094_v9  ;;  %v6717_v38 = vrot.slane %v6544_v60, 1 }
  0xe9   :  { %5111 = vmatpush.bf16.msrb.mxu3 %v8098_v15  ;;  %v7441_v15 = vld [vmem:[#allocation2 + $0xe0] sm:$0xf] }
  0xea   :  { %5073 = vmatpush.bf16.msrb.mxu0 %v7426_v26  ;;  %v4635_v51 = vpop.f32.mrf.mxu2  ;;  %v4659_v32 = vpop.f32.mrf.mxu0  ;;  %v7442_v35 = vor.u32 %v10130_v16, %v7441_v15  ;;  %v8786_v16 = vor.u32 %v10463_v4, %v8785_v3  ;;  %v10382_v3 = vld [vmem:[#allocation2 + $0xb54] sm:$0xf]  ;;  %v8795_v4 = vld [vmem:[#allocation2 + $0xde4] sm:$0xf0] }
  0xeb   :  { %5086 = vmatpush.bf16.msrb.mxu1 %v7430_v31  ;;  %v4648_v54 = vpop.f32.mrf.mxu3  ;;  %v4672_v58 = vpop.f32.mrf.mxu1  ;;  %v4660_v7 = vadd.f32 %v4659_v32, %v772_v42  ;;  %v9437_v31 = vld [vmem:[#allocation2 + $0x1068] sm:$0xf]  ;;  %v9445_v42 = vld [vmem:[#allocation2 + $0x1070] sm:$0xf] }
  0xec   :  { %5099 = vmatpush.bf16.msrb.mxu2 %v7434_v28  ;;  %v4673_v9 = vadd.f32 %v4672_v58, %v773_v43  ;;  %v10628_v43 = vld [vmem:[#allocation2 + $0x1300] sm:$0xf0]  ;;  %v8777_v58 = vld [vmem:[#allocation2 + $0xb40] sm:$0xf] }
  0xed   :  { %5112 = vmatpush.bf16.msrb.mxu3 %v7438_v36  ;;  %9907 = vmatmul.msk.bf16.vlgmr.msrb.gmra.mxu0 %vm4386_vm0, %v10848_v18  ;;  %v9439_v36 = vld [vmem:[#allocation2 + $0x12fc] sm:$0xf0]  ;;  %v9446_v54 = vor.u32 %v10628_v43, %v9445_v42  ;;  %v9453_v42 = vld [vmem:[#allocation2 + $0x1078] sm:$0xf]  ;;  %v10629_v43 = vld [vmem:[#allocation2 + $0x1308] sm:$0xf0] }
  0xee   :  { %5122 = vmatpush.bf16.msra.mxu0 %v9422_v37  ;;  %9908 = vmatmul.msk.bf16.vlgmr.msrb.gmra.mxu1 %vm4386_vm0, %v10848_v18  ;;  %v6545_v26 = vpack.c.bf16 %v4673_v9, %v4660_v7  ;;  %v6716_v37 = vrot.slane %v6544_v60, 6  ;;  %v9442_v49 = vor.u32 %v10545_v11, %v9439_v36  ;;  %v8117_v60 = vld [vmem:[#allocation2 + $0x618] sm:$0xf] }
  0xef   :  { %5135 = vmatpush.bf16.msra.mxu1 %v9426_v40  ;;  %9909 = vmatmul.msk.bf16.vlgmr.msrb.gmra.mxu2 %vm4386_vm0, %v10848_v18 }
  0xf0   :  { %5148 = vmatpush.bf16.msra.mxu2 %v9430_v41  ;;  %9910 = vmatmul.msk.bf16.vlgmr.msrb.gmra.mxu3 %vm4386_vm0, %v10848_v18  ;;  %v10627_v18 = vld [vmem:[#allocation2 + $0x12f8] sm:$0xf0]  ;;  %v7446_v41 = vor.u32 %v10048_v17, %v7443_v19  ;;  %v6718_v51 = vrot.slane %v6545_v26, 4  ;;  %v6719_v52 = vrot.slane %v6545_v26, 7  ;;  %v6888_v32 = vsel %vm6850_vm1, %v6716_v37, %v6717_v38  ;;  %v10297_v17 = vld [vmem:[#allocation2 + $0x8a8] sm:$0xf0] }
  0xf1   :  { %5161 = vmatpush.bf16.msra.mxu3 %v9434_v44  ;;  %v7450_v44 = vor.u32 %v10131_v23, %v7449_v22  ;;  %v9438_v46 = vor.u32 %v10627_v18, %v9437_v31  ;;  %v10215_v19 = vld [vmem:[#allocation2 + $0x61c] sm:$0xf]  ;;  %v8119_v22 = vld [vmem:[#allocation2 + $0x8ac] sm:$0xf0]  ;;  %v8125_v23 = vld [vmem:[#allocation2 + $0x620] sm:$0xf] }
  0xf2   :  { %5123 = vmatpush.bf16.msra.mxu0 %v8762_v61  ;;  %v4685_v27 = vpop.f32.mrf.mxu2  ;;  %v4661_v34 = vpop.f32.mrf.mxu0  ;;  %v10380_v61 = vld [vmem:[#allocation2 + $0xb44] sm:$0xf]  ;;  %v8127_v26 = vld [vmem:[#allocation2 + $0x8b4] sm:$0xf0]  ;;  %v8122_v18 = vor.u32 %v10215_v19, %v8119_v22  ;;  %v10133_v37 = vld [vmem:[#allocation2 + $0x388] sm:$0xf0]  ;;  %v8798_v22 = vor.u32 %v10382_v3, %v8795_v4 }
  0xf3   :  { %5136 = vmatpush.bf16.msra.mxu1 %v8766_v62  ;;  %v4686_v28 = vadd.f32 %v4685_v27, %v774_v8  ;;  %v4698_v33 = vpop.f32.mrf.mxu3  ;;  %v4674_v40 = vpop.f32.mrf.mxu1  ;;  %v6885_v62 = vsel %vm6846_vm2, %v6543_v25, %v6715_v50  ;;  %v10216_v25 = vld [vmem:[#allocation2 + $0x624] sm:$0xf]  ;;  %v8118_v27 = vor.u32 %v10297_v17, %v8117_v60  ;;  %v10989_v31 = vld [vmem:[#allocation4 + $0x18] sm:$0xff]  ;;  %v7459_v34 = vld [vmem:[#allocation2 + $0x384] sm:$0xf0] }
  0xf4   :  { %5149 = vmatpush.bf16.msra.mxu2 %v8770_v63  ;;  %v4699_v39 = vadd.f32 %v4698_v33, %v775_v59  ;;  %v10462_v59 = vld [vmem:[#allocation2 + $0xdd0] sm:$0xf0]  ;;  %v6892_v63 = vsel %vm6856_vm4, %v6718_v51, %v6719_v52  ;;  %v6889_v5 = vsel %vm6854_vm3, %v6885_v62, %v6888_v32  ;;  %v8130_v36 = vor.u32 %v10216_v25, %v8127_v26  ;;  %v10051_v38 = vld [vmem:[#allocation2 + $0xfc] sm:$0xf]  ;;  %v8133_v25 = vld [vmem:[#allocation2 + $0x628] sm:$0xf] }
  0xf5   :  { %5162 = vmatpush.bf16.msra.mxu3 %v8774_v0  ;;  %v8778_v15 = vor.u32 %v10462_v59, %v8777_v58  ;;  %v10050_v33 = vld [vmem:[#allocation2 + $0xf4] sm:$0xf]  ;;  %v777_v32 = vperm.slane %v10989_v31, 1  ;;  %v779_v58 = vperm.slane %v10989_v31, 3  ;;  %v780_v62 = vperm.slane %v10989_v31, 4 }
  0xf6   :  { %5124 = vmatpush.bf16.msra.mxu0 %v8102_v55  ;;  %v6546_v53 = vpack.c.bf16 %v4699_v39, %v4686_v28  ;;  %v8782_v55 = vor.u32 %v10380_v61, %v8779_v2  ;;  %v8126_v28 = vor.u32 %v10298_v24, %v8125_v23  ;;  %v7467_v39 = vld [vmem:[#allocation2 + $0x38c] sm:$0xf0]  ;;  %v10630_v50 = vld [vmem:[#allocation2 + $0x1310] sm:$0xf0]  ;;  %v7462_v51 = vor.u32 %v10050_v33, %v7459_v34  ;;  %v10464_v2 = vld [vmem:[#allocation2 + $0xde0] sm:$0xf0] }
  0xf7   :  { %5137 = vmatpush.bf16.msra.mxu1 %v8106_v20  ;;  %v10979_v20 = vld [vmem:[%s11598_s0] sm:$0x1]  ;;  %v9462_v61 = vor.u32 %v10630_v50, %v9461_v48  ;;  %v782_v60 = vperm.slane %v10989_v31, 6  ;;  %v783_v19 = vperm.slane %v10989_v31, 7  ;;  %v10299_v26 = vld [vmem:[#allocation2 + $0x8b8] sm:$0xf0] }
  0xf8   :  { %5150 = vmatpush.bf16.msra.mxu2 %v8110_v21  ;;  %v6720_v8 = vrot.slane %v6546_v53, 2  ;;  %v6721_v56 = vrot.slane %v6546_v53, 5  ;;  %v8790_v21 = vor.u32 %v10381_v12, %v8787_v13  ;;  %v10548_v53 = vld [vmem:[#allocation2 + $0x1084] sm:$0xf]  ;;  %v10383_v12 = vld [vmem:[#allocation2 + $0xb5c] sm:$0xf] }
  0xf9   :  { %5163 = vmatpush.bf16.msra.mxu3 %v8114_v29  ;;  %v7457_v29 = vld [vmem:[#allocation2 + $0xf0] sm:$0xf]  ;;  %v8135_v33 = vld [vmem:[#allocation2 + $0x8bc] sm:$0xf0]  ;;  %v10550_v4 = vld [vmem:[#allocation2 + $0x1094] sm:$0xf] }
  0xfa   :  { %5125 = vmatpush.bf16.msra.mxu0 %v7442_v35  ;;  %v6895_v0 = vsel %vm6860_vm5, %v6720_v8, %v6721_v56  ;;  %v4687_v1 = vpop.f32.mrf.mxu2  ;;  %v10968_v10 = vpop.f32.mrf.mxu0  ;;  %v7465_v35 = vld [vmem:[#allocation2 + $0xf8] sm:$0xf]  ;;  %v7470_v8 = vor.u32 %v10051_v38, %v7467_v39  ;;  %v9454_v56 = vor.u32 %v10629_v43, %v9453_v42  ;;  %v8803_v13 = vld [vmem:[#allocation2 + $0xdec] sm:$0xf0]  ;;  %v10052_v38 = vld [vmem:[#allocation2 + $0x104] sm:$0xf] }
  0xfb   :  { %5138 = vmatpush.bf16.msra.mxu1 %v7446_v41  ;;  %v6896_v7 = vsel %vm6864_vm6, %v6892_v63, %v6895_v0  ;;  %v4700_v9 = vpop.f32.mrf.mxu3  ;;  %v10971_v14 = vpop.f32.mrf.mxu1  ;;  %v7466_v52 = vor.u32 %v10133_v37, %v7465_v35  ;;  %v781_v63 = vperm.slane %v10989_v31, 5  ;;  %v8793_v1 = vld [vmem:[#allocation2 + $0xb50] sm:$0xf]  ;;  %v8806_v24 = vor.u32 %v10383_v12, %v8803_v13  ;;  %v10300_v35 = vld [vmem:[#allocation2 + $0x8c0] sm:$0xf0] }
  0xfc   :  { %5151 = vmatpush.bf16.msra.mxu2 %v7450_v44  ;;  %v6897_v6 = vsel %vm6866_vm7, %v6889_v5, %v6896_v7  ;;  %v10547_v44 = vld [vmem:[#allocation2 + $0x107c] sm:$0xf]  ;;  %v8801_v5 = vld [vmem:[#allocation2 + $0xb58] sm:$0xf]  ;;  %v10465_v9 = vld [vmem:[#allocation2 + $0xde8] sm:$0xf0] }
  0xfd   :  { %5164 = vmatpush.bf16.msra.mxu3 %v7454_v45  ;;  %7190 = vst [vmem:[%s11601_s3 + $0x10] sm:$0xff] %v6897_v6  ;;  %9911 = vmatmul.msk.bf16.vlgmr.msra.gmra.mxu0 %vm4386_vm0, %v10979_v20  ;;  %v9458_v59 = vor.u32 %v10547_v44, %v9455_v47  ;;  %v8802_v23 = vor.u32 %v10465_v9, %v8801_v5  ;;  %v8141_v34 = vld [vmem:[#allocation2 + $0x630] sm:$0xf]  ;;  %v10134_v37 = vld [vmem:[#allocation2 + $0x390] sm:$0xf0] }
  0xfe   :  { %5174 = vmatpush.bf16.msrb.mxu0 %v9438_v46  ;;  %9912 = vmatmul.msk.bf16.vlgmr.msra.gmra.mxu1 %vm4386_vm0, %v10979_v20  ;;  %v7458_v46 = vor.u32 %v10132_v30, %v7457_v29  ;;  %v4725_v30 = vadd.f32 %v10971_v14, %v777_v32  ;;  %v8134_v14 = vor.u32 %v10299_v26, %v8133_v25  ;;  %v7475_v39 = vld [vmem:[#allocation2 + $0x394] sm:$0xf0]  ;;  %v7481_v42 = vld [vmem:[#allocation2 + $0x108] sm:$0xf]  ;;  %v10135_v43 = vld [vmem:[#allocation2 + $0x398] sm:$0xf0] }
  0xff   :  { %5187 = vmatpush.bf16.msrb.mxu1 %v9442_v49  ;;  %9913 = vmatmul.msk.bf16.vlgmr.msra.gmra.mxu2 %vm4386_vm0, %v10979_v20  ;;  %v9463_v49 = vld [vmem:[#allocation2 + $0x1314] sm:$0xf0]  ;;  %v10053_v44 = vld [vmem:[#allocation2 + $0x10c] sm:$0xf]  ;;  %v7483_v50 = vld [vmem:[#allocation2 + $0x39c] sm:$0xf0] }
 0x100   :  { %5200 = vmatpush.bf16.msrb.mxu2 %v9446_v54  ;;  %9914 = vmatmul.msk.bf16.vlgmr.msra.gmra.mxu3 %vm4386_vm0, %v10979_v20  ;;  %v776_v54 = vperm.slane %v10989_v31, 0  ;;  %v9466_v0 = vor.u32 %v10548_v53, %v9463_v49  ;;  %v9479_v5 = vld [vmem:[#allocation2 + $0x1324] sm:$0xf0] }
 0x101   :  { %5213 = vmatpush.bf16.msrb.mxu3 %v9450_v57  ;;  %v778_v57 = vperm.slane %v10989_v31, 2  ;;  %v10218_v31 = vld [vmem:[#allocation2 + $0x634] sm:$0xf] }
 0x102   :  { %5175 = vmatpush.bf16.msrb.mxu0 %v8778_v15  ;;  %v4737_v11 = vpop.f32.mrf.mxu2  ;;  %v4713_v41 = vpop.f32.mrf.mxu0  ;;  %v4712_v29 = vadd.f32 %v10968_v10, %v776_v54 }
 0x103   :  { %5188 = vmatpush.bf16.msrb.mxu1 %v8782_v55  ;;  %v4750_v40 = vpop.f32.mrf.mxu3  ;;  %v4726_v45 = vpop.f32.mrf.mxu1  ;;  %v4738_v55 = vadd.f32 %v4737_v11, %v778_v57  ;;  %v8143_v11 = vld [vmem:[#allocation2 + $0x8c4] sm:$0xf0]  ;;  %v8142_v41 = vor.u32 %v10300_v35, %v8141_v34  ;;  %v10385_v35 = vld [vmem:[#allocation2 + $0xb6c] sm:$0xf] }
 0x104   :  { %5201 = vmatpush.bf16.msrb.mxu2 %v8786_v16  ;;  %v4751_v16 = vadd.f32 %v4750_v40, %v779_v58  ;;  %v6547_v45 = vpack.c.bf16 %v4725_v30, %v4712_v29  ;;  %v8146_v48 = vor.u32 %v10218_v31, %v8143_v11  ;;  %v8817_v29 = vld [vmem:[#allocation2 + $0xb68] sm:$0xf]  ;;  %v10467_v30 = vld [vmem:[#allocation2 + $0xdf8] sm:$0xf0]  ;;  %v8819_v31 = vld [vmem:[#allocation2 + $0xdfc] sm:$0xf0] }
 0x105   :  { %5214 = vmatpush.bf16.msrb.mxu3 %v8790_v21  ;;  %v8794_v21 = vor.u32 %v10464_v2, %v8793_v1  ;;  %v7482_v1 = vor.u32 %v10135_v43, %v7481_v42  ;;  %v7486_v2 = vor.u32 %v10053_v44, %v7483_v50  ;;  %v8151_v42 = vld [vmem:[#allocation2 + $0x8cc] sm:$0xf0]  ;;  %v8157_v43 = vld [vmem:[#allocation2 + $0x640] sm:$0xf]  ;;  %v10302_v44 = vld [vmem:[#allocation2 + $0x8d0] sm:$0xf0] }
 0x106   :  { %5176 = vmatpush.bf16.msrb.mxu0 %v8118_v27  ;;  %v10217_v27 = vld [vmem:[#allocation2 + $0x62c] sm:$0xf]  ;;  %v6548_v10 = vpack.c.bf16 %v4751_v16, %v4738_v55  ;;  %v10136_v50 = vld [vmem:[#allocation2 + $0x3a0] sm:$0xf0] }
 0x107   :  { %5189 = vmatpush.bf16.msrb.mxu1 %v8122_v18  ;;  %v8138_v40 = vor.u32 %v10217_v27, %v8135_v33  ;;  %v8811_v27 = vld [vmem:[#allocation2 + $0xdf4] sm:$0xf0] }
 0x108   :  { %5202 = vmatpush.bf16.msrb.mxu2 %v8126_v28  ;;  %v6723_v57 = vrot.slane %v6548_v10, 6  ;;  %v6724_v58 = vrot.slane %v6548_v10, 1 }
 0x109   :  { %5215 = vmatpush.bf16.msrb.mxu3 %v8130_v36  ;;  %v7473_v36 = vld [vmem:[#allocation2 + $0x100] sm:$0xf] }
 0x10a   :  { %5177 = vmatpush.bf16.msrb.mxu0 %v7458_v46  ;;  %v4739_v7 = vpop.f32.mrf.mxu2  ;;  %v4763_v15 = vpop.f32.mrf.mxu0  ;;  %v7474_v32 = vor.u32 %v10134_v37, %v7473_v36 }
 0x10b   :  { %5190 = vmatpush.bf16.msrb.mxu1 %v7462_v51  ;;  %v4752_v6 = vpop.f32.mrf.mxu3  ;;  %v4776_v17 = vpop.f32.mrf.mxu1  ;;  %v4764_v18 = vadd.f32 %v4763_v15, %v780_v62  ;;  %v9469_v51 = vld [vmem:[#allocation2 + $0x1088] sm:$0xf]  ;;  %v7478_v62 = vor.u32 %v10052_v38, %v7475_v39  ;;  %v6722_v7 = vrot.slane %v6547_v45, 3  ;;  %v8818_v38 = vor.u32 %v10467_v30, %v8817_v29  ;;  %v10301_v39 = vld [vmem:[#allocation2 + $0x8c8] sm:$0xf0] }
 0x10c   :  { %5203 = vmatpush.bf16.msrb.mxu2 %v7466_v52  ;;  %v4777_v28 = vadd.f32 %v4776_v17, %v781_v63  ;;  %v10631_v52 = vld [vmem:[#allocation2 + $0x1318] sm:$0xf0]  ;;  %v9477_v63 = vld [vmem:[#allocation2 + $0x1090] sm:$0xf]  ;;  %v9482_v17 = vor.u32 %v10550_v4, %v9479_v5  ;;  %v9493_v5 = vld [vmem:[#allocation2 + $0x10a0] sm:$0xf] }
 0x10d   :  { %5216 = vmatpush.bf16.msrb.mxu3 %v7470_v8  ;;  %9915 = vmatmul.msk.bf16.vlgmr.msrb.gmra.mxu0 %vm4386_vm0, %v10979_v20  ;;  %v10549_v8 = vld [vmem:[#allocation2 + $0x108c] sm:$0xf]  ;;  %v9470_v3 = vor.u32 %v10631_v52, %v9469_v51  ;;  %v11031_v51 = vld [vmem:[#allocation4 + $0x20] sm:$0xff]  ;;  %v9487_v4 = vld [vmem:[#allocation2 + $0x132c] sm:$0xf0] }
 0x10e   :  { %5226 = vmatpush.bf16.msra.mxu0 %v9454_v56  ;;  %9916 = vmatmul.msk.bf16.vlgmr.msrb.gmra.mxu1 %vm4386_vm0, %v10979_v20  ;;  %v6549_v46 = vpack.c.bf16 %v4777_v28, %v4764_v18  ;;  %v9471_v56 = vld [vmem:[#allocation2 + $0x131c] sm:$0xf0]  ;;  %v10386_v29 = vld [vmem:[#allocation2 + $0xb74] sm:$0xf]  ;;  %v8827_v30 = vld [vmem:[#allocation2 + $0xe04] sm:$0xf0] }
 0x10f   :  { %5239 = vmatpush.bf16.msra.mxu1 %v9458_v59  ;;  %9917 = vmatmul.msk.bf16.vlgmr.msrb.gmra.mxu2 %vm4386_vm0, %v10979_v20  ;;  %v9474_v6 = vor.u32 %v10549_v8, %v9471_v56 }
 0x110   :  { %5252 = vmatpush.bf16.msra.mxu2 %v9462_v61  ;;  %9918 = vmatmul.msk.bf16.vlgmr.msrb.gmra.mxu3 %vm4386_vm0, %v10979_v20  ;;  %v6725_v9 = vrot.slane %v6549_v46, 4  ;;  %v6726_v12 = vrot.slane %v6549_v46, 7  ;;  %v8159_v46 = vld [vmem:[#allocation2 + $0x8d4] sm:$0xf0] }
 0x111   :  { %5265 = vmatpush.bf16.msra.mxu3 %v9466_v0  ;;  %v10632_v0 = vld [vmem:[#allocation2 + $0x1320] sm:$0xf0] }
 0x112   :  { %5227 = vmatpush.bf16.msra.mxu0 %v8794_v21  ;;  %v4789_v47 = vpop.f32.mrf.mxu2  ;;  %v4765_v54 = vpop.f32.mrf.mxu0  ;;  %v9478_v15 = vor.u32 %v10632_v0, %v9477_v63  ;;  %v10466_v21 = vld [vmem:[#allocation2 + $0xdf0] sm:$0xf0]  ;;  %v9485_v63 = vld [vmem:[#allocation2 + $0x1098] sm:$0xf]  ;;  %v10633_v0 = vld [vmem:[#allocation2 + $0x1328] sm:$0xf0] }
 0x113   :  { %5240 = vmatpush.bf16.msra.mxu1 %v8798_v22  ;;  %v4790_v53 = vadd.f32 %v4789_v47, %v782_v60  ;;  %v4802_v49 = vpop.f32.mrf.mxu3  ;;  %v4778_v61 = vpop.f32.mrf.mxu1  ;;  %v6903_v60 = vsel %vm6850_vm1, %v6723_v57, %v6724_v58  ;;  %v10384_v22 = vld [vmem:[#allocation2 + $0xb64] sm:$0xf]  ;;  %v7491_v54 = vld [vmem:[#allocation2 + $0x3a4] sm:$0xf0]  ;;  %v10137_v57 = vld [vmem:[#allocation2 + $0x3a8] sm:$0xf0] }
 0x114   :  { %5253 = vmatpush.bf16.msra.mxu2 %v8802_v23  ;;  %v4803_v59 = vadd.f32 %v4802_v49, %v783_v19  ;;  %v8809_v19 = vld [vmem:[#allocation2 + $0xb60] sm:$0xf]  ;;  %v6900_v23 = vsel %vm6846_vm2, %v6547_v45, %v6722_v7  ;;  %v8814_v37 = vor.u32 %v10384_v22, %v8811_v27  ;;  %v10220_v45 = vld [vmem:[#allocation2 + $0x644] sm:$0xf]  ;;  %v10054_v49 = vld [vmem:[#allocation2 + $0x114] sm:$0xf] }
 0x115   :  { %5266 = vmatpush.bf16.msra.mxu3 %v8806_v24  ;;  %v6907_v24 = vsel %vm6856_vm4, %v6725_v9, %v6726_v12  ;;  %v6904_v18 = vsel %vm6854_vm3, %v6900_v23, %v6903_v60  ;;  %v8810_v10 = vor.u32 %v10466_v21, %v8809_v19  ;;  %v8162_v56 = vor.u32 %v10220_v45, %v8159_v46  ;;  %v10055_v58 = vld [vmem:[#allocation2 + $0x11c] sm:$0xf]  ;;  %v10634_v7 = vld [vmem:[#allocation2 + $0x1330] sm:$0xf0]  ;;  %v10468_v27 = vld [vmem:[#allocation2 + $0xe00] sm:$0xf0] }
 0x116   :  { %5228 = vmatpush.bf16.msra.mxu0 %v8134_v14  ;;  %v6550_v13 = vpack.c.bf16 %v4803_v59, %v4790_v53  ;;  %v8149_v14 = vld [vmem:[#allocation2 + $0x638] sm:$0xf]  ;;  %v8158_v53 = vor.u32 %v10302_v44, %v8157_v43  ;;  %v7499_v59 = vld [vmem:[#allocation2 + $0x3ac] sm:$0xf0]  ;;  %v7494_v9 = vor.u32 %v10054_v49, %v7491_v54  ;;  %v785_v60 = vperm.slane %v11031_v51, 1 }
 0x117   :  { %5241 = vmatpush.bf16.msra.mxu1 %v8138_v40  ;;  %v10219_v40 = vld [vmem:[#allocation2 + $0x63c] sm:$0xf]  ;;  %v8150_v47 = vor.u32 %v10301_v39, %v8149_v14  ;;  %v787_v19 = vperm.slane %v11031_v51, 3  ;;  %v9494_v22 = vor.u32 %v10634_v7, %v9493_v5  ;;  %v788_v23 = vperm.slane %v11031_v51, 4  ;;  %v8165_v45 = vld [vmem:[#allocation2 + $0x648] sm:$0xf] }
 0x118   :  { %5254 = vmatpush.bf16.msra.mxu2 %v8142_v41  ;;  %v6727_v55 = vrot.slane %v6550_v13, 2  ;;  %v6728_v16 = vrot.slane %v6550_v13, 5  ;;  %v8822_v41 = vor.u32 %v10385_v35, %v8819_v31  ;;  %v8154_v52 = vor.u32 %v10219_v40, %v8151_v42  ;;  %v10552_v13 = vld [vmem:[#allocation2 + $0x10a4] sm:$0xf]  ;;  %v10387_v35 = vld [vmem:[#allocation2 + $0xb7c] sm:$0xf] }
 0x119   :  { %5267 = vmatpush.bf16.msra.mxu3 %v8146_v48  ;;  %v7489_v48 = vld [vmem:[#allocation2 + $0x110] sm:$0xf]  ;;  %v790_v14 = vperm.slane %v11031_v51, 6  ;;  %v791_v40 = vperm.slane %v11031_v51, 7  ;;  %v8830_v42 = vor.u32 %v10386_v29, %v8827_v30  ;;  %v10303_v46 = vld [vmem:[#allocation2 + $0x8d8] sm:$0xf0] }
 0x11a   :  { %5229 = vmatpush.bf16.msra.mxu0 %v7474_v32  ;;  %v6910_v25 = vsel %vm6860_vm5, %v6727_v55, %v6728_v16  ;;  %v4791_v26 = vpop.f32.mrf.mxu2  ;;  %v11015_v34 = vpop.f32.mrf.mxu0  ;;  %v7497_v32 = vld [vmem:[#allocation2 + $0x118] sm:$0xf]  ;;  %v7502_v55 = vor.u32 %v10055_v58, %v7499_v59  ;;  %v9486_v16 = vor.u32 %v10633_v0, %v9485_v63  ;;  %v8835_v31 = vld [vmem:[#allocation2 + $0xe0c] sm:$0xf0]  ;;  %v8167_v49 = vld [vmem:[#allocation2 + $0x8dc] sm:$0xf0] }
 0x11b   :  { %5242 = vmatpush.bf16.msra.mxu1 %v7478_v62  ;;  %v6911_v28 = vsel %vm6864_vm6, %v6907_v24, %v6910_v25  ;;  %v4804_v33 = vpop.f32.mrf.mxu3  ;;  %v11018_v36 = vpop.f32.mrf.mxu1  ;;  %v7498_v12 = vor.u32 %v10137_v57, %v7497_v32  ;;  %v789_v24 = vperm.slane %v11031_v51, 5  ;;  %v8825_v26 = vld [vmem:[#allocation2 + $0xb70] sm:$0xf]  ;;  %v8838_v44 = vor.u32 %v10387_v35, %v8835_v31  ;;  %v10304_v32 = vld [vmem:[#allocation2 + $0x8e0] sm:$0xf0] }
 0x11c   :  { %5255 = vmatpush.bf16.msra.mxu2 %v7482_v1  ;;  %v6912_v11 = vsel %vm6866_vm7, %v6904_v18, %v6911_v28  ;;  %v10551_v1 = vld [vmem:[#allocation2 + $0x109c] sm:$0xf]  ;;  %v8833_v18 = vld [vmem:[#allocation2 + $0xb78] sm:$0xf]  ;;  %v10469_v33 = vld [vmem:[#allocation2 + $0xe08] sm:$0xf0] }
 0x11d   :  { %5268 = vmatpush.bf16.msra.mxu3 %v7486_v2  ;;  %7191 = vst [vmem:[%s11601_s3 + $0x18] sm:$0xff] %v6912_v11  ;;  %9919 = vmatmul.msk.bf16.vlgmr.msra.gmra.mxu0 %vm4386_vm0, %v10979_v20  ;;  %v9490_v21 = vor.u32 %v10551_v1, %v9487_v4  ;;  %v8834_v43 = vor.u32 %v10469_v33, %v8833_v18  ;;  %v8173_v54 = vld [vmem:[#allocation2 + $0x650] sm:$0xf]  ;;  %v10138_v57 = vld [vmem:[#allocation2 + $0x3b0] sm:$0xf0] }
 0x11e   :  { %5278 = vmatpush.bf16.msrb.mxu0 %v9470_v3  ;;  %9920 = vmatmul.msk.bf16.vlgmr.msra.gmra.mxu1 %vm4386_vm0, %v10979_v20  ;;  %v7490_v3 = vor.u32 %v10136_v50, %v7489_v48  ;;  %v4829_v50 = vadd.f32 %v11018_v36, %v785_v60  ;;  %v8166_v36 = vor.u32 %v10303_v46, %v8165_v45  ;;  %v10056_v58 = vld [vmem:[#allocation2 + $0x124] sm:$0xf]  ;;  %v7507_v59 = vld [vmem:[#allocation2 + $0x3b4] sm:$0xf0]  ;;  %v7513_v63 = vld [vmem:[#allocation2 + $0x128] sm:$0xf] }
 0x11f   :  { %5291 = vmatpush.bf16.msrb.mxu1 %v9474_v6  ;;  %9921 = vmatmul.msk.bf16.vlgmr.msra.gmra.mxu2 %vm4386_vm0, %v10979_v20  ;;  %v9495_v6 = vld [vmem:[#allocation2 + $0x1334] sm:$0xf0]  ;;  %v10139_v0 = vld [vmem:[#allocation2 + $0x3b8] sm:$0xf0]  ;;  %v10057_v1 = vld [vmem:[#allocation2 + $0x12c] sm:$0xf] }
 0x120   :  { %5304 = vmatpush.bf16.msrb.mxu2 %v9478_v15  ;;  %9922 = vmatmul.msk.bf16.vlgmr.msra.gmra.mxu3 %vm4386_vm0, %v10979_v20  ;;  %v784_v15 = vperm.slane %v11031_v51, 0  ;;  %v9498_v25 = vor.u32 %v10552_v13, %v9495_v6  ;;  %v7515_v7 = vld [vmem:[#allocation2 + $0x3bc] sm:$0xf0]  ;;  %v10554_v30 = vld [vmem:[#allocation2 + $0x10b4] sm:$0xf] }
 0x121   :  { %5317 = vmatpush.bf16.msrb.mxu3 %v9482_v17  ;;  %v786_v17 = vperm.slane %v11031_v51, 2  ;;  %v10222_v51 = vld [vmem:[#allocation2 + $0x654] sm:$0xf]  ;;  %v9511_v18 = vld [vmem:[#allocation2 + $0x1344] sm:$0xf0] }
 0x122   :  { %5279 = vmatpush.bf16.msrb.mxu0 %v8810_v10  ;;  %v4841_v8 = vpop.f32.mrf.mxu2  ;;  %v4817_v62 = vpop.f32.mrf.mxu0  ;;  %v4816_v48 = vadd.f32 %v11015_v34, %v784_v15 }
 0x123   :  { %5292 = vmatpush.bf16.msrb.mxu1 %v8814_v37  ;;  %v4854_v61 = vpop.f32.mrf.mxu3  ;;  %v4830_v2 = vpop.f32.mrf.mxu1  ;;  %v4842_v37 = vadd.f32 %v4841_v8, %v786_v17  ;;  %v8175_v8 = vld [vmem:[#allocation2 + $0x8e4] sm:$0xf0]  ;;  %v8174_v62 = vor.u32 %v10304_v32, %v8173_v54  ;;  %v10389_v32 = vld [vmem:[#allocation2 + $0xb8c] sm:$0xf] }
 0x124   :  { %5305 = vmatpush.bf16.msrb.mxu2 %v8818_v38  ;;  %v4855_v38 = vadd.f32 %v4854_v61, %v787_v19  ;;  %v6551_v2 = vpack.c.bf16 %v4829_v50, %v4816_v48  ;;  %v8178_v5 = vor.u32 %v10222_v51, %v8175_v8  ;;  %v8849_v48 = vld [vmem:[#allocation2 + $0xb88] sm:$0xf]  ;;  %v10471_v50 = vld [vmem:[#allocation2 + $0xe18] sm:$0xf0]  ;;  %v8851_v51 = vld [vmem:[#allocation2 + $0xe1c] sm:$0xf0] }
 0x125   :  { %5318 = vmatpush.bf16.msrb.mxu3 %v8822_v41  ;;  %v8826_v41 = vor.u32 %v10468_v27, %v8825_v26  ;;  %v7514_v26 = vor.u32 %v10139_v0, %v7513_v63  ;;  %v7518_v27 = vor.u32 %v10057_v1, %v7515_v7  ;;  %v8183_v63 = vld [vmem:[#allocation2 + $0x8ec] sm:$0xf0]  ;;  %v8189_v0 = vld [vmem:[#allocation2 + $0x660] sm:$0xf]  ;;  %v10306_v1 = vld [vmem:[#allocation2 + $0x8f0] sm:$0xf0] }
 0x126   :  { %5280 = vmatpush.bf16.msrb.mxu0 %v8150_v47  ;;  %v10221_v47 = vld [vmem:[#allocation2 + $0x64c] sm:$0xf]  ;;  %v6552_v34 = vpack.c.bf16 %v4855_v38, %v4842_v37  ;;  %v10140_v7 = vld [vmem:[#allocation2 + $0x3c0] sm:$0xf0] }
 0x127   :  { %5293 = vmatpush.bf16.msrb.mxu1 %v8154_v52  ;;  %v8170_v61 = vor.u32 %v10221_v47, %v8167_v49  ;;  %v8843_v47 = vld [vmem:[#allocation2 + $0xe14] sm:$0xf0] }
 0x128   :  { %5306 = vmatpush.bf16.msrb.mxu2 %v8158_v53  ;;  %v6730_v17 = vrot.slane %v6552_v34, 6  ;;  %v6731_v19 = vrot.slane %v6552_v34, 1 }
 0x129   :  { %5319 = vmatpush.bf16.msrb.mxu3 %v8162_v56  ;;  %v7505_v56 = vld [vmem:[#allocation2 + $0x120] sm:$0xf] }
 0x12a   :  { %5281 = vmatpush.bf16.msrb.mxu0 %v7490_v3  ;;  %v4843_v28 = vpop.f32.mrf.mxu2  ;;  %v4867_v10 = vpop.f32.mrf.mxu0  ;;  %v7506_v60 = vor.u32 %v10138_v57, %v7505_v56 }
 0x12b   :  { %5294 = vmatpush.bf16.msrb.mxu1 %v7494_v9  ;;  %v4856_v11 = vpop.f32.mrf.mxu3  ;;  %v4880_v39 = vpop.f32.mrf.mxu1  ;;  %v4868_v52 = vadd.f32 %v4867_v10, %v788_v23  ;;  %v9501_v9 = vld [vmem:[#allocation2 + $0x10a8] sm:$0xf]  ;;  %v7510_v23 = vor.u32 %v10056_v58, %v7507_v59  ;;  %v6729_v28 = vrot.slane %v6551_v2, 3  ;;  %v8850_v58 = vor.u32 %v10471_v50, %v8849_v48  ;;  %v10305_v59 = vld [vmem:[#allocation2 + $0x8e8] sm:$0xf0] }
 0x12c   :  { %5307 = vmatpush.bf16.msrb.mxu2 %v7498_v12  ;;  %v4881_v53 = vadd.f32 %v4880_v39, %v789_v24  ;;  %v10635_v12 = vld [vmem:[#allocation2 + $0x1338] sm:$0xf0]  ;;  %v9509_v24 = vld [vmem:[#allocation2 + $0x10b0] sm:$0xf]  ;;  %v9514_v39 = vor.u32 %v10554_v30, %v9511_v18  ;;  %v9525_v18 = vld [vmem:[#allocation2 + $0x10c0] sm:$0xf] }
 0x12d   :  { %5320 = vmatpush.bf16.msrb.mxu3 %v7502_v55  ;;  %9923 = vmatmul.msk.bf16.vlgmr.msrb.gmra.mxu0 %vm4386_vm0, %v10979_v20  ;;  %v10553_v55 = vld [vmem:[#allocation2 + $0x10ac] sm:$0xf]  ;;  %v9502_v29 = vor.u32 %v10635_v12, %v9501_v9  ;;  %v9519_v30 = vld [vmem:[#allocation2 + $0x134c] sm:$0xf0]  ;;  %v10390_v48 = vld [vmem:[#allocation2 + $0xb94] sm:$0xf] }
 0x12e   :  { %5330 = vmatpush.bf16.msra.mxu0 %v9486_v16  ;;  %9924 = vmatmul.msk.bf16.vlgmr.msrb.gmra.mxu1 %vm4386_vm0, %v10979_v20  ;;  %v6553_v3 = vpack.c.bf16 %v4881_v53, %v4868_v52  ;;  %v9503_v16 = vld [vmem:[#allocation2 + $0x133c] sm:$0xf0]  ;;  %v11073_v9 = vld [vmem:[#allocation4 + $0x28] sm:$0xff] }
 0x12f   :  { %5343 = vmatpush.bf16.msra.mxu1 %v9490_v21  ;;  %9925 = vmatmul.msk.bf16.vlgmr.msrb.gmra.mxu2 %vm4386_vm0, %v10979_v20  ;;  %v9506_v11 = vor.u32 %v10553_v55, %v9503_v16  ;;  %v8859_v50 = vld [vmem:[#allocation2 + $0xe24] sm:$0xf0] }
 0x130   :  { %5356 = vmatpush.bf16.msra.mxu2 %v9494_v22  ;;  %9926 = vmatmul.msk.bf16.vlgmr.msrb.gmra.mxu3 %vm4386_vm0, %v10979_v20  ;;  %v6732_v33 = vrot.slane %v6553_v3, 4  ;;  %v6733_v35 = vrot.slane %v6553_v3, 7  ;;  %v8191_v3 = vld [vmem:[#allocation2 + $0x8f4] sm:$0xf0] }
 0x131   :  { %5369 = vmatpush.bf16.msra.mxu3 %v9498_v25  ;;  %v10636_v25 = vld [vmem:[#allocation2 + $0x1340] sm:$0xf0] }
 0x132   :  { %5331 = vmatpush.bf16.msra.mxu0 %v8826_v41  ;;  %v4893_v4 = vpop.f32.mrf.mxu2  ;;  %v4869_v15 = vpop.f32.mrf.mxu0  ;;  %v9510_v10 = vor.u32 %v10636_v25, %v9509_v24  ;;  %v10470_v41 = vld [vmem:[#allocation2 + $0xe10] sm:$0xf0]  ;;  %v9517_v24 = vld [vmem:[#allocation2 + $0x10b8] sm:$0xf]  ;;  %v10637_v25 = vld [vmem:[#allocation2 + $0x1348] sm:$0xf0] }
 0x133   :  { %5344 = vmatpush.bf16.msra.mxu1 %v8830_v42  ;;  %v4894_v13 = vadd.f32 %v4893_v4, %v790_v14  ;;  %v4906_v6 = vpop.f32.mrf.mxu3  ;;  %v4882_v22 = vpop.f32.mrf.mxu1  ;;  %v6918_v14 = vsel %vm6850_vm1, %v6730_v17, %v6731_v19  ;;  %v10388_v42 = vld [vmem:[#allocation2 + $0xb84] sm:$0xf]  ;;  %v7523_v15 = vld [vmem:[#allocation2 + $0x3c4] sm:$0xf0]  ;;  %v10141_v17 = vld [vmem:[#allocation2 + $0x3c8] sm:$0xf0] }
 0x134   :  { %5357 = vmatpush.bf16.msra.mxu2 %v8834_v43  ;;  %v4907_v21 = vadd.f32 %v4906_v6, %v791_v40  ;;  %v8841_v40 = vld [vmem:[#allocation2 + $0xb80] sm:$0xf]  ;;  %v6915_v43 = vsel %vm6846_vm2, %v6551_v2, %v6729_v28  ;;  %v8846_v57 = vor.u32 %v10388_v42, %v8843_v47  ;;  %v10224_v2 = vld [vmem:[#allocation2 + $0x664] sm:$0xf]  ;;  %v10058_v6 = vld [vmem:[#allocation2 + $0x134] sm:$0xf] }
 0x135   :  { %5370 = vmatpush.bf16.msra.mxu3 %v8838_v44  ;;  %v6922_v44 = vsel %vm6856_vm4, %v6732_v33, %v6733_v35  ;;  %v6919_v52 = vsel %vm6854_vm3, %v6915_v43, %v6918_v14  ;;  %v8842_v34 = vor.u32 %v10470_v41, %v8841_v40  ;;  %v8194_v16 = vor.u32 %v10224_v2, %v8191_v3  ;;  %v10059_v19 = vld [vmem:[#allocation2 + $0x13c] sm:$0xf]  ;;  %v10638_v28 = vld [vmem:[#allocation2 + $0x1350] sm:$0xf0]  ;;  %v10472_v47 = vld [vmem:[#allocation2 + $0xe20] sm:$0xf0] }
 0x136   :  { %5332 = vmatpush.bf16.msra.mxu0 %v8166_v36  ;;  %v6554_v31 = vpack.c.bf16 %v4907_v21, %v4894_v13  ;;  %v8181_v36 = vld [vmem:[#allocation2 + $0x658] sm:$0xf]  ;;  %v8190_v13 = vor.u32 %v10306_v1, %v8189_v0  ;;  %v7531_v21 = vld [vmem:[#allocation2 + $0x3cc] sm:$0xf0]  ;;  %v7526_v33 = vor.u32 %v10058_v6, %v7523_v15  ;;  %v793_v14 = vperm.slane %v11073_v9, 1 }
 0x137   :  { %5345 = vmatpush.bf16.msra.mxu1 %v8170_v61  ;;  %v10223_v61 = vld [vmem:[#allocation2 + $0x65c] sm:$0xf]  ;;  %v8182_v4 = vor.u32 %v10305_v59, %v8181_v36  ;;  %v795_v40 = vperm.slane %v11073_v9, 3  ;;  %v9526_v42 = vor.u32 %v10638_v28, %v9525_v18  ;;  %v796_v43 = vperm.slane %v11073_v9, 4  ;;  %v8197_v2 = vld [vmem:[#allocation2 + $0x668] sm:$0xf] }
 0x138   :  { %5358 = vmatpush.bf16.msra.mxu2 %v8174_v62  ;;  %v6734_v37 = vrot.slane %v6554_v31, 2  ;;  %v6735_v38 = vrot.slane %v6554_v31, 5  ;;  %v8854_v62 = vor.u32 %v10389_v32, %v8851_v51  ;;  %v8186_v12 = vor.u32 %v10223_v61, %v8183_v63  ;;  %v10556_v31 = vld [vmem:[#allocation2 + $0x10c4] sm:$0xf]  ;;  %v10391_v32 = vld [vmem:[#allocation2 + $0xb9c] sm:$0xf] }
 0x139   :  { %5371 = vmatpush.bf16.msra.mxu3 %v8178_v5  ;;  %v7521_v5 = vld [vmem:[#allocation2 + $0x130] sm:$0xf]  ;;  %v798_v36 = vperm.slane %v11073_v9, 6  ;;  %v799_v61 = vperm.slane %v11073_v9, 7  ;;  %v8862_v63 = vor.u32 %v10390_v48, %v8859_v50  ;;  %v10307_v3 = vld [vmem:[#allocation2 + $0x8f8] sm:$0xf0] }
 0x13a   :  { %5333 = vmatpush.bf16.msra.mxu0 %v7506_v60  ;;  %v6925_v45 = vsel %vm6860_vm5, %v6734_v37, %v6735_v38  ;;  %v4895_v46 = vpop.f32.mrf.mxu2  ;;  %v11057_v54 = vpop.f32.mrf.mxu0  ;;  %v7529_v60 = vld [vmem:[#allocation2 + $0x138] sm:$0xf]  ;;  %v7534_v37 = vor.u32 %v10059_v19, %v7531_v21  ;;  %v9518_v38 = vor.u32 %v10637_v25, %v9517_v24  ;;  %v8867_v51 = vld [vmem:[#allocation2 + $0xe2c] sm:$0xf0]  ;;  %v8199_v6 = vld [vmem:[#allocation2 + $0x8fc] sm:$0xf0] }
 0x13b   :  { %5346 = vmatpush.bf16.msra.mxu1 %v7510_v23  ;;  %v6926_v53 = vsel %vm6864_vm6, %v6922_v44, %v6925_v45  ;;  %v4908_v49 = vpop.f32.mrf.mxu3  ;;  %v11060_v56 = vpop.f32.mrf.mxu1  ;;  %v7530_v35 = vor.u32 %v10141_v17, %v7529_v60  ;;  %v797_v44 = vperm.slane %v11073_v9, 5  ;;  %v8857_v46 = vld [vmem:[#allocation2 + $0xb90] sm:$0xf]  ;;  %v8870_v1 = vor.u32 %v10391_v32, %v8867_v51  ;;  %v10308_v60 = vld [vmem:[#allocation2 + $0x900] sm:$0xf0] }
 0x13c   :  { %5359 = vmatpush.bf16.msra.mxu2 %v7514_v26  ;;  %v6927_v8 = vsel %vm6866_vm7, %v6919_v52, %v6926_v53  ;;  %v10555_v26 = vld [vmem:[#allocation2 + $0x10bc] sm:$0xf]  ;;  %v8865_v52 = vld [vmem:[#allocation2 + $0xb98] sm:$0xf]  ;;  %v10473_v49 = vld [vmem:[#allocation2 + $0xe28] sm:$0xf0] }
 0x13d   :  { %5372 = vmatpush.bf16.msra.mxu3 %v7518_v27  ;;  %7192 = vst [vmem:[%s11601_s3 + $0x20] sm:$0xff] %v6927_v8  ;;  %9927 = vmatmul.msk.bf16.vlgmr.msra.gmra.mxu0 %vm4386_vm0, %v10979_v20  ;;  %v9522_v41 = vor.u32 %v10555_v26, %v9519_v30  ;;  %v8866_v0 = vor.u32 %v10473_v49, %v8865_v52  ;;  %v8205_v15 = vld [vmem:[#allocation2 + $0x670] sm:$0xf]  ;;  %v10142_v17 = vld [vmem:[#allocation2 + $0x3d0] sm:$0xf0] }
 0x13e   :  { %5382 = vmatpush.bf16.msrb.mxu0 %v9502_v29  ;;  %9928 = vmatmul.msk.bf16.vlgmr.msra.gmra.mxu1 %vm4386_vm0, %v10979_v20  ;;  %v7522_v29 = vor.u32 %v10140_v7, %v7521_v5  ;;  %v4933_v7 = vadd.f32 %v11060_v56, %v793_v14  ;;  %v8198_v56 = vor.u32 %v10307_v3, %v8197_v2  ;;  %v10060_v19 = vld [vmem:[#allocation2 + $0x144] sm:$0xf]  ;;  %v7539_v21 = vld [vmem:[#allocation2 + $0x3d4] sm:$0xf0]  ;;  %v7545_v24 = vld [vmem:[#allocation2 + $0x148] sm:$0xf] }
 0x13f   :  { %5395 = vmatpush.bf16.msrb.mxu1 %v9506_v11  ;;  %9929 = vmatmul.msk.bf16.vlgmr.msra.gmra.mxu2 %vm4386_vm0, %v10979_v20  ;;  %v9527_v11 = vld [vmem:[#allocation2 + $0x1354] sm:$0xf0]  ;;  %v10143_v25 = vld [vmem:[#allocation2 + $0x3d8] sm:$0xf0]  ;;  %v10061_v26 = vld [vmem:[#allocation2 + $0x14c] sm:$0xf] }
 0x140   :  { %5408 = vmatpush.bf16.msrb.mxu2 %v9510_v10  ;;  %9930 = vmatmul.msk.bf16.vlgmr.msra.gmra.mxu3 %vm4386_vm0, %v10979_v20  ;;  %v792_v10 = vperm.slane %v11073_v9, 0  ;;  %v9530_v45 = vor.u32 %v10556_v31, %v9527_v11  ;;  %v7547_v28 = vld [vmem:[#allocation2 + $0x3dc] sm:$0xf0]  ;;  %v10557_v14 = vld [vmem:[#allocation2 + $0x10cc] sm:$0xf] }
 0x141   :  { %5421 = vmatpush.bf16.msrb.mxu3 %v9514_v39  ;;  %v794_v39 = vperm.slane %v11073_v9, 2  ;;  %v10226_v9 = vld [vmem:[#allocation2 + $0x674] sm:$0xf]  ;;  %v9543_v50 = vld [vmem:[#allocation2 + $0x1364] sm:$0xf0] }
 0x142   :  { %5383 = vmatpush.bf16.msrb.mxu0 %v8842_v34  ;;  %v4945_v55 = vpop.f32.mrf.mxu2  ;;  %v4921_v23 = vpop.f32.mrf.mxu0  ;;  %v4920_v5 = vadd.f32 %v11057_v54, %v792_v10  ;;  %v10558_v48 = vld [vmem:[#allocation2 + $0x10d4] sm:$0xf]  ;;  %v8875_v3 = vld [vmem:[#allocation2 + $0xe34] sm:$0xf0] }
 0x143   :  { %5396 = vmatpush.bf16.msrb.mxu1 %v8846_v57  ;;  %v4958_v22 = vpop.f32.mrf.mxu3  ;;  %v4934_v27 = vpop.f32.mrf.mxu1  ;;  %v4946_v57 = vadd.f32 %v4945_v55, %v794_v39  ;;  %v8207_v55 = vld [vmem:[#allocation2 + $0x904] sm:$0xf0]  ;;  %v8206_v23 = vor.u32 %v10308_v60, %v8205_v15  ;;  %v10393_v15 = vld [vmem:[#allocation2 + $0xbac] sm:$0xf]  ;;  %v8883_v60 = vld [vmem:[#allocation2 + $0xe3c] sm:$0xf0] }
 0x144   :  { %5409 = vmatpush.bf16.msrb.mxu2 %v8850_v58  ;;  %v4959_v58 = vadd.f32 %v4958_v22, %v795_v40  ;;  %v6555_v27 = vpack.c.bf16 %v4933_v7, %v4920_v5  ;;  %v8210_v18 = vor.u32 %v10226_v9, %v8207_v55  ;;  %v10475_v5 = vld [vmem:[#allocation2 + $0xe38] sm:$0xf0] }
 0x145   :  { %5422 = vmatpush.bf16.msrb.mxu3 %v8854_v62  ;;  %v8858_v62 = vor.u32 %v10472_v47, %v8857_v46  ;;  %v7550_v46 = vor.u32 %v10061_v26, %v7547_v28  ;;  %v10310_v26 = vld [vmem:[#allocation2 + $0x910] sm:$0xf0]  ;;  %v10144_v28 = vld [vmem:[#allocation2 + $0x3e0] sm:$0xf0] }
 0x146   :  { %5384 = vmatpush.bf16.msrb.mxu0 %v8182_v4  ;;  %v10225_v4 = vld [vmem:[#allocation2 + $0x66c] sm:$0xf]  ;;  %v6556_v54 = vpack.c.bf16 %v4959_v58, %v4946_v57  ;;  %v6736_v52 = vrot.slane %v6555_v27, 3  ;;  %v9546_v58 = vor.u32 %v10558_v48, %v9543_v50  ;;  %v9551_v48 = vld [vmem:[#allocation2 + $0x136c] sm:$0xf0] }
 0x147   :  { %5397 = vmatpush.bf16.msrb.mxu1 %v8186_v12  ;;  %v8202_v22 = vor.u32 %v10225_v4, %v8199_v6  ;;  %v8881_v4 = vld [vmem:[#allocation2 + $0xba8] sm:$0xf]  ;;  %v9557_v50 = vld [vmem:[#allocation2 + $0x10e0] sm:$0xf] }
 0x148   :  { %5410 = vmatpush.bf16.msrb.mxu2 %v8190_v13  ;;  %v6738_v39 = vrot.slane %v6556_v54, 1 }
 0x149   :  { %5423 = vmatpush.bf16.msrb.mxu3 %v8194_v16  ;;  %v7537_v16 = vld [vmem:[#allocation2 + $0x140] sm:$0xf] }
 0x14a   :  { %5385 = vmatpush.bf16.msrb.mxu0 %v7522_v29  ;;  %v4947_v53 = vpop.f32.mrf.mxu2  ;;  %v4971_v34 = vpop.f32.mrf.mxu0  ;;  %v7538_v10 = vor.u32 %v10142_v17, %v7537_v16  ;;  %v8882_v17 = vor.u32 %v10475_v5, %v8881_v4  ;;  %v10394_v4 = vld [vmem:[#allocation2 + $0xbb4] sm:$0xf]  ;;  %v8891_v5 = vld [vmem:[#allocation2 + $0xe44] sm:$0xf0] }
 0x14b   :  { %5398 = vmatpush.bf16.msrb.mxu1 %v7526_v33  ;;  %v4960_v8 = vpop.f32.mrf.mxu3  ;;  %v4984_v59 = vpop.f32.mrf.mxu1  ;;  %v4972_v12 = vadd.f32 %v4971_v34, %v796_v43  ;;  %v9533_v33 = vld [vmem:[#allocation2 + $0x10c8] sm:$0xf]  ;;  %v9541_v43 = vld [vmem:[#allocation2 + $0x10d0] sm:$0xf] }
 0x14c   :  { %5411 = vmatpush.bf16.msrb.mxu2 %v7530_v35  ;;  %v4985_v13 = vadd.f32 %v4984_v59, %v797_v44  ;;  %v10640_v44 = vld [vmem:[#allocation2 + $0x1360] sm:$0xf0]  ;;  %v8873_v59 = vld [vmem:[#allocation2 + $0xba0] sm:$0xf] }
 0x14d   :  { %5424 = vmatpush.bf16.msrb.mxu3 %v7534_v37  ;;  %9931 = vmatmul.msk.bf16.vlgmr.msrb.gmra.mxu0 %vm4386_vm0, %v10979_v20  ;;  %v9535_v37 = vld [vmem:[#allocation2 + $0x135c] sm:$0xf0]  ;;  %v9542_v8 = vor.u32 %v10640_v44, %v9541_v43  ;;  %v9549_v43 = vld [vmem:[#allocation2 + $0x10d8] sm:$0xf]  ;;  %v10641_v44 = vld [vmem:[#allocation2 + $0x1368] sm:$0xf0] }
 0x14e   :  { %5434 = vmatpush.bf16.msra.mxu0 %v9518_v38  ;;  %9932 = vmatmul.msk.bf16.vlgmr.msrb.gmra.mxu1 %vm4386_vm0, %v10979_v20  ;;  %v6557_v29 = vpack.c.bf16 %v4985_v13, %v4972_v12  ;;  %v6737_v38 = vrot.slane %v6556_v54, 6  ;;  %v9538_v51 = vor.u32 %v10557_v14, %v9535_v37  ;;  %v8213_v54 = vld [vmem:[#allocation2 + $0x678] sm:$0xf] }
 0x14f   :  { %5447 = vmatpush.bf16.msra.mxu1 %v9522_v41  ;;  %9933 = vmatmul.msk.bf16.vlgmr.msrb.gmra.mxu2 %vm4386_vm0, %v10979_v20 }
 0x150   :  { %5460 = vmatpush.bf16.msra.mxu2 %v9526_v42  ;;  %9934 = vmatmul.msk.bf16.vlgmr.msrb.gmra.mxu3 %vm4386_vm0, %v10979_v20  ;;  %v10639_v20 = vld [vmem:[#allocation2 + $0x1358] sm:$0xf0]  ;;  %v7542_v42 = vor.u32 %v10060_v19, %v7539_v21  ;;  %v6739_v53 = vrot.slane %v6557_v29, 4  ;;  %v6740_v49 = vrot.slane %v6557_v29, 7  ;;  %v6933_v34 = vsel %vm6850_vm1, %v6737_v38, %v6738_v39  ;;  %v10309_v19 = vld [vmem:[#allocation2 + $0x908] sm:$0xf0] }
 0x151   :  { %5473 = vmatpush.bf16.msra.mxu3 %v9530_v45  ;;  %v7546_v45 = vor.u32 %v10143_v25, %v7545_v24  ;;  %v9534_v47 = vor.u32 %v10639_v20, %v9533_v33  ;;  %v10227_v21 = vld [vmem:[#allocation2 + $0x67c] sm:$0xf]  ;;  %v8215_v24 = vld [vmem:[#allocation2 + $0x90c] sm:$0xf0]  ;;  %v8221_v25 = vld [vmem:[#allocation2 + $0x680] sm:$0xf] }
 0x152   :  { %5435 = vmatpush.bf16.msra.mxu0 %v8858_v62  ;;  %v4997_v30 = vpop.f32.mrf.mxu2  ;;  %v4973_v11 = vpop.f32.mrf.mxu0  ;;  %v10392_v62 = vld [vmem:[#allocation2 + $0xba4] sm:$0xf]  ;;  %v8223_v29 = vld [vmem:[#allocation2 + $0x914] sm:$0xf0]  ;;  %v11120_v33 = vld [vmem:[#allocation4 + $0x30] sm:$0xff]  ;;  %v8218_v20 = vor.u32 %v10227_v21, %v8215_v24  ;;  %v8894_v24 = vor.u32 %v10394_v4, %v8891_v5 }
 0x153   :  { %5448 = vmatpush.bf16.msra.mxu1 %v8862_v63  ;;  %v4998_v35 = vadd.f32 %v4997_v30, %v798_v36  ;;  %v5010_v31 = vpop.f32.mrf.mxu3  ;;  %v4986_v41 = vpop.f32.mrf.mxu1  ;;  %v6930_v63 = vsel %vm6846_vm2, %v6555_v27, %v6736_v52  ;;  %v10228_v27 = vld [vmem:[#allocation2 + $0x684] sm:$0xf]  ;;  %v8214_v30 = vor.u32 %v10309_v19, %v8213_v54  ;;  %v7555_v11 = vld [vmem:[#allocation2 + $0x3e4] sm:$0xf0]  ;;  %v10145_v38 = vld [vmem:[#allocation2 + $0x3e8] sm:$0xf0] }
 0x154   :  { %5461 = vmatpush.bf16.msra.mxu2 %v8866_v0  ;;  %v5011_v40 = vadd.f32 %v5010_v31, %v799_v61  ;;  %v10474_v61 = vld [vmem:[#allocation2 + $0xe30] sm:$0xf0]  ;;  %v6937_v0 = vsel %vm6856_vm4, %v6739_v53, %v6740_v49  ;;  %v6934_v7 = vsel %vm6854_vm3, %v6930_v63, %v6933_v34  ;;  %v8226_v37 = vor.u32 %v10228_v27, %v8223_v29  ;;  %v10063_v39 = vld [vmem:[#allocation2 + $0x15c] sm:$0xf]  ;;  %v8229_v27 = vld [vmem:[#allocation2 + $0x688] sm:$0xf] }
 0x155   :  { %5474 = vmatpush.bf16.msra.mxu3 %v8870_v1  ;;  %v8874_v16 = vor.u32 %v10474_v61, %v8873_v59  ;;  %v10062_v31 = vld [vmem:[#allocation2 + $0x154] sm:$0xf]  ;;  %v801_v34 = vperm.slane %v11120_v33, 1  ;;  %v803_v59 = vperm.slane %v11120_v33, 3  ;;  %v804_v63 = vperm.slane %v11120_v33, 4 }
 0x156   :  { %5436 = vmatpush.bf16.msra.mxu0 %v8198_v56  ;;  %v6558_v32 = vpack.c.bf16 %v5011_v40, %v4998_v35  ;;  %v8878_v56 = vor.u32 %v10392_v62, %v8875_v3  ;;  %v8222_v35 = vor.u32 %v10310_v26, %v8221_v25  ;;  %v7563_v40 = vld [vmem:[#allocation2 + $0x3ec] sm:$0xf0]  ;;  %v10642_v52 = vld [vmem:[#allocation2 + $0x1370] sm:$0xf0]  ;;  %v7558_v53 = vor.u32 %v10062_v31, %v7555_v11  ;;  %v10476_v3 = vld [vmem:[#allocation2 + $0xe40] sm:$0xf0] }
 0x157   :  { %5449 = vmatpush.bf16.msra.mxu1 %v8202_v22  ;;  %v11110_v22 = vld [vmem:[%s11598_s0] sm:$0x1]  ;;  %v9558_v62 = vor.u32 %v10642_v52, %v9557_v50  ;;  %v806_v54 = vperm.slane %v11120_v33, 6  ;;  %v807_v21 = vperm.slane %v11120_v33, 7  ;;  %v10311_v29 = vld [vmem:[#allocation2 + $0x918] sm:$0xf0] }
 0x158   :  { %5462 = vmatpush.bf16.msra.mxu2 %v8206_v23  ;;  %v6741_v36 = vrot.slane %v6558_v32, 2  ;;  %v6742_v57 = vrot.slane %v6558_v32, 5  ;;  %v8886_v23 = vor.u32 %v10393_v15, %v8883_v60  ;;  %v10560_v32 = vld [vmem:[#allocation2 + $0x10e4] sm:$0xf]  ;;  %v10395_v15 = vld [vmem:[#allocation2 + $0xbbc] sm:$0xf] }
 0x159   :  { %5475 = vmatpush.bf16.msra.mxu3 %v8210_v18  ;;  %v7553_v18 = vld [vmem:[#allocation2 + $0x150] sm:$0xf]  ;;  %v8231_v31 = vld [vmem:[#allocation2 + $0x91c] sm:$0xf0]  ;;  %v10562_v5 = vld [vmem:[#allocation2 + $0x10f4] sm:$0xf] }
 0x15a   :  { %5437 = vmatpush.bf16.msra.mxu0 %v7538_v10  ;;  %v6940_v1 = vsel %vm6860_vm5, %v6741_v36, %v6742_v57  ;;  %v4999_v2 = vpop.f32.mrf.mxu2  ;;  %v11099_v6 = vpop.f32.mrf.mxu0  ;;  %v7561_v10 = vld [vmem:[#allocation2 + $0x158] sm:$0xf]  ;;  %v7566_v36 = vor.u32 %v10063_v39, %v7563_v40  ;;  %v9550_v57 = vor.u32 %v10641_v44, %v9549_v43  ;;  %v8899_v60 = vld [vmem:[#allocation2 + $0xe4c] sm:$0xf0]  ;;  %v10064_v39 = vld [vmem:[#allocation2 + $0x164] sm:$0xf] }
 0x15b   :  { %5450 = vmatpush.bf16.msra.mxu1 %v7542_v42  ;;  %v6941_v12 = vsel %vm6864_vm6, %v6937_v0, %v6940_v1  ;;  %v5012_v13 = vpop.f32.mrf.mxu3  ;;  %v11102_v55 = vpop.f32.mrf.mxu1  ;;  %v7562_v49 = vor.u32 %v10145_v38, %v7561_v10  ;;  %v805_v0 = vperm.slane %v11120_v33, 5  ;;  %v8889_v2 = vld [vmem:[#allocation2 + $0xbb0] sm:$0xf]  ;;  %v8902_v26 = vor.u32 %v10395_v15, %v8899_v60  ;;  %v10312_v10 = vld [vmem:[#allocation2 + $0x920] sm:$0xf0] }
 0x15c   :  { %5463 = vmatpush.bf16.msra.mxu2 %v7546_v45  ;;  %v6942_v9 = vsel %vm6866_vm7, %v6934_v7, %v6941_v12  ;;  %v10559_v45 = vld [vmem:[#allocation2 + $0x10dc] sm:$0xf]  ;;  %v8897_v7 = vld [vmem:[#allocation2 + $0xbb8] sm:$0xf]  ;;  %v10477_v13 = vld [vmem:[#allocation2 + $0xe48] sm:$0xf0] }
 0x15d   :  { %5476 = vmatpush.bf16.msra.mxu3 %v7550_v46  ;;  %7193 = vst [vmem:[%s11601_s3 + $0x28] sm:$0xff] %v6942_v9  ;;  %9935 = vmatmul.msk.bf16.vlgmr.msra.gmra.mxu0 %vm4386_vm0, %v11110_v22  ;;  %v9554_v61 = vor.u32 %v10559_v45, %v9551_v48  ;;  %v8898_v25 = vor.u32 %v10477_v13, %v8897_v7  ;;  %v8237_v11 = vld [vmem:[#allocation2 + $0x690] sm:$0xf]  ;;  %v10146_v38 = vld [vmem:[#allocation2 + $0x3f0] sm:$0xf0] }
 0x15e   :  { %5486 = vmatpush.bf16.msrb.mxu0 %v9534_v47  ;;  %9936 = vmatmul.msk.bf16.vlgmr.msra.gmra.mxu1 %vm4386_vm0, %v11110_v22  ;;  %v7554_v47 = vor.u32 %v10144_v28, %v7553_v18  ;;  %v5037_v28 = vadd.f32 %v11102_v55, %v801_v34  ;;  %v8230_v55 = vor.u32 %v10311_v29, %v8229_v27  ;;  %v7571_v40 = vld [vmem:[#allocation2 + $0x3f4] sm:$0xf0]  ;;  %v7577_v43 = vld [vmem:[#allocation2 + $0x168] sm:$0xf]  ;;  %v10147_v44 = vld [vmem:[#allocation2 + $0x3f8] sm:$0xf0] }
 0x15f   :  { %5499 = vmatpush.bf16.msrb.mxu1 %v9538_v51  ;;  %9937 = vmatmul.msk.bf16.vlgmr.msra.gmra.mxu2 %vm4386_vm0, %v11110_v22  ;;  %v9559_v51 = vld [vmem:[#allocation2 + $0x1374] sm:$0xf0]  ;;  %v10065_v45 = vld [vmem:[#allocation2 + $0x16c] sm:$0xf]  ;;  %v7579_v52 = vld [vmem:[#allocation2 + $0x3fc] sm:$0xf0] }
 0x160   :  { %5512 = vmatpush.bf16.msrb.mxu2 %v9542_v8  ;;  %9938 = vmatmul.msk.bf16.vlgmr.msra.gmra.mxu3 %vm4386_vm0, %v11110_v22  ;;  %v800_v8 = vperm.slane %v11120_v33, 0  ;;  %v9562_v1 = vor.u32 %v10560_v32, %v9559_v51  ;;  %v9575_v7 = vld [vmem:[#allocation2 + $0x1384] sm:$0xf0] }
 0x161   :  { %5525 = vmatpush.bf16.msrb.mxu3 %v9546_v58  ;;  %v802_v58 = vperm.slane %v11120_v33, 2  ;;  %v10230_v33 = vld [vmem:[#allocation2 + $0x694] sm:$0xf] }
 0x162   :  { %5487 = vmatpush.bf16.msrb.mxu0 %v8874_v16  ;;  %v5049_v14 = vpop.f32.mrf.mxu2  ;;  %v5025_v42 = vpop.f32.mrf.mxu0  ;;  %v5024_v18 = vadd.f32 %v11099_v6, %v800_v8 }
 0x163   :  { %5500 = vmatpush.bf16.msrb.mxu1 %v8878_v56  ;;  %v5062_v41 = vpop.f32.mrf.mxu3  ;;  %v5038_v46 = vpop.f32.mrf.mxu1  ;;  %v5050_v56 = vadd.f32 %v5049_v14, %v802_v58  ;;  %v8239_v14 = vld [vmem:[#allocation2 + $0x924] sm:$0xf0]  ;;  %v8238_v42 = vor.u32 %v10312_v10, %v8237_v11  ;;  %v10397_v10 = vld [vmem:[#allocation2 + $0xbcc] sm:$0xf] }
 0x164   :  { %5513 = vmatpush.bf16.msrb.mxu2 %v8882_v17  ;;  %v5063_v17 = vadd.f32 %v5062_v41, %v803_v59  ;;  %v6559_v46 = vpack.c.bf16 %v5037_v28, %v5024_v18  ;;  %v8242_v50 = vor.u32 %v10230_v33, %v8239_v14  ;;  %v8913_v18 = vld [vmem:[#allocation2 + $0xbc8] sm:$0xf]  ;;  %v10479_v28 = vld [vmem:[#allocation2 + $0xe58] sm:$0xf0]  ;;  %v8915_v33 = vld [vmem:[#allocation2 + $0xe5c] sm:$0xf0] }
 0x165   :  { %5526 = vmatpush.bf16.msrb.mxu3 %v8886_v23  ;;  %v8890_v23 = vor.u32 %v10476_v3, %v8889_v2  ;;  %v7578_v2 = vor.u32 %v10147_v44, %v7577_v43  ;;  %v7582_v3 = vor.u32 %v10065_v45, %v7579_v52  ;;  %v8247_v43 = vld [vmem:[#allocation2 + $0x92c] sm:$0xf0]  ;;  %v8253_v44 = vld [vmem:[#allocation2 + $0x6a0] sm:$0xf]  ;;  %v10314_v45 = vld [vmem:[#allocation2 + $0x930] sm:$0xf0] }
 0x166   :  { %5488 = vmatpush.bf16.msrb.mxu0 %v8214_v30  ;;  %v10229_v30 = vld [vmem:[#allocation2 + $0x68c] sm:$0xf]  ;;  %v6560_v6 = vpack.c.bf16 %v5063_v17, %v5050_v56  ;;  %v10148_v52 = vld [vmem:[#allocation2 + $0x400] sm:$0xf0] }
 0x167   :  { %5501 = vmatpush.bf16.msrb.mxu1 %v8218_v20  ;;  %v8234_v41 = vor.u32 %v10229_v30, %v8231_v31  ;;  %v8907_v30 = vld [vmem:[#allocation2 + $0xe54] sm:$0xf0] }
 0x168   :  { %5514 = vmatpush.bf16.msrb.mxu2 %v8222_v35  ;;  %v6744_v58 = vrot.slane %v6560_v6, 6  ;;  %v6745_v59 = vrot.slane %v6560_v6, 1 }
 0x169   :  { %5527 = vmatpush.bf16.msrb.mxu3 %v8226_v37  ;;  %v7569_v37 = vld [vmem:[#allocation2 + $0x160] sm:$0xf] }
 0x16a   :  { %5489 = vmatpush.bf16.msrb.mxu0 %v7554_v47  ;;  %v5051_v12 = vpop.f32.mrf.mxu2  ;;  %v5075_v16 = vpop.f32.mrf.mxu0  ;;  %v7570_v34 = vor.u32 %v10146_v38, %v7569_v37 }
 0x16b   :  { %5502 = vmatpush.bf16.msrb.mxu1 %v7558_v53  ;;  %v5064_v9 = vpop.f32.mrf.mxu3  ;;  %v5088_v19 = vpop.f32.mrf.mxu1  ;;  %v5076_v20 = vadd.f32 %v5075_v16, %v804_v63  ;;  %v9565_v53 = vld [vmem:[#allocation2 + $0x10e8] sm:$0xf]  ;;  %v7574_v63 = vor.u32 %v10064_v39, %v7571_v40  ;;  %v6743_v12 = vrot.slane %v6559_v46, 3  ;;  %v8914_v39 = vor.u32 %v10479_v28, %v8913_v18  ;;  %v10313_v40 = vld [vmem:[#allocation2 + $0x928] sm:$0xf0] }
 0x16c   :  { %5515 = vmatpush.bf16.msrb.mxu2 %v7562_v49  ;;  %v5089_v35 = vadd.f32 %v5088_v19, %v805_v0  ;;  %v10643_v49 = vld [vmem:[#allocation2 + $0x1378] sm:$0xf0]  ;;  %v9573_v0 = vld [vmem:[#allocation2 + $0x10f0] sm:$0xf]  ;;  %v9578_v19 = vor.u32 %v10562_v5, %v9575_v7  ;;  %v9589_v7 = vld [vmem:[#allocation2 + $0x1100] sm:$0xf] }
 0x16d   :  { %5528 = vmatpush.bf16.msrb.mxu3 %v7566_v36  ;;  %9939 = vmatmul.msk.bf16.vlgmr.msrb.gmra.mxu0 %vm4386_vm0, %v11110_v22  ;;  %v10561_v36 = vld [vmem:[#allocation2 + $0x10ec] sm:$0xf]  ;;  %v9566_v4 = vor.u32 %v10643_v49, %v9565_v53  ;;  %v11162_v53 = vld [vmem:[#allocation4 + $0x38] sm:$0xff]  ;;  %v9583_v5 = vld [vmem:[#allocation2 + $0x138c] sm:$0xf0] }
 0x16e   :  { %5538 = vmatpush.bf16.msra.mxu0 %v9550_v57  ;;  %9940 = vmatmul.msk.bf16.vlgmr.msrb.gmra.mxu1 %vm4386_vm0, %v11110_v22  ;;  %v6561_v47 = vpack.c.bf16 %v5089_v35, %v5076_v20  ;;  %v9567_v57 = vld [vmem:[#allocation2 + $0x137c] sm:$0xf0]  ;;  %v10398_v18 = vld [vmem:[#allocation2 + $0xbd4] sm:$0xf]  ;;  %v8923_v28 = vld [vmem:[#allocation2 + $0xe64] sm:$0xf0] }
 0x16f   :  { %5551 = vmatpush.bf16.msra.mxu1 %v9554_v61  ;;  %9941 = vmatmul.msk.bf16.vlgmr.msrb.gmra.mxu2 %vm4386_vm0, %v11110_v22  ;;  %v9570_v9 = vor.u32 %v10561_v36, %v9567_v57 }
 0x170   :  { %5564 = vmatpush.bf16.msra.mxu2 %v9558_v62  ;;  %9942 = vmatmul.msk.bf16.vlgmr.msrb.gmra.mxu3 %vm4386_vm0, %v11110_v22  ;;  %v6746_v13 = vrot.slane %v6561_v47, 4  ;;  %v6747_v15 = vrot.slane %v6561_v47, 7  ;;  %v8255_v47 = vld [vmem:[#allocation2 + $0x934] sm:$0xf0] }
 0x171   :  { %5577 = vmatpush.bf16.msra.mxu3 %v9562_v1  ;;  %v10644_v1 = vld [vmem:[#allocation2 + $0x1380] sm:$0xf0] }
 0x172   :  { %5539 = vmatpush.bf16.msra.mxu0 %v8890_v23  ;;  %v5101_v48 = vpop.f32.mrf.mxu2  ;;  %v5077_v8 = vpop.f32.mrf.mxu0  ;;  %v9574_v16 = vor.u32 %v10644_v1, %v9573_v0  ;;  %v10478_v23 = vld [vmem:[#allocation2 + $0xe50] sm:$0xf0]  ;;  %v9581_v0 = vld [vmem:[#allocation2 + $0x10f8] sm:$0xf]  ;;  %v10645_v1 = vld [vmem:[#allocation2 + $0x1388] sm:$0xf0] }
 0x173   :  { %5552 = vmatpush.bf16.msra.mxu1 %v8894_v24  ;;  %v5102_v32 = vadd.f32 %v5101_v48, %v806_v54  ;;  %v5114_v51 = vpop.f32.mrf.mxu3  ;;  %v5090_v62 = vpop.f32.mrf.mxu1  ;;  %v6948_v54 = vsel %vm6850_vm1, %v6744_v58, %v6745_v59  ;;  %v10396_v24 = vld [vmem:[#allocation2 + $0xbc4] sm:$0xf]  ;;  %v7587_v8 = vld [vmem:[#allocation2 + $0x404] sm:$0xf0]  ;;  %v10149_v58 = vld [vmem:[#allocation2 + $0x408] sm:$0xf0] }
 0x174   :  { %5565 = vmatpush.bf16.msra.mxu2 %v8898_v25  ;;  %v5115_v61 = vadd.f32 %v5114_v51, %v807_v21  ;;  %v8905_v21 = vld [vmem:[#allocation2 + $0xbc0] sm:$0xf]  ;;  %v6945_v25 = vsel %vm6846_vm2, %v6559_v46, %v6743_v12  ;;  %v8910_v38 = vor.u32 %v10396_v24, %v8907_v30  ;;  %v10232_v46 = vld [vmem:[#allocation2 + $0x6a4] sm:$0xf]  ;;  %v10066_v51 = vld [vmem:[#allocation2 + $0x174] sm:$0xf] }
 0x175   :  { %5578 = vmatpush.bf16.msra.mxu3 %v8902_v26  ;;  %v6952_v26 = vsel %vm6856_vm4, %v6746_v13, %v6747_v15  ;;  %v6949_v20 = vsel %vm6854_vm3, %v6945_v25, %v6948_v54  ;;  %v8906_v6 = vor.u32 %v10478_v23, %v8905_v21  ;;  %v8258_v57 = vor.u32 %v10232_v46, %v8255_v47  ;;  %v10067_v59 = vld [vmem:[#allocation2 + $0x17c] sm:$0xf]  ;;  %v10646_v12 = vld [vmem:[#allocation2 + $0x1390] sm:$0xf0]  ;;  %v10480_v30 = vld [vmem:[#allocation2 + $0xe60] sm:$0xf0] }
 0x176   :  { %5540 = vmatpush.bf16.msra.mxu0 %v8230_v55  ;;  %v6562_v60 = vpack.c.bf16 %v5115_v61, %v5102_v32  ;;  %v8245_v55 = vld [vmem:[#allocation2 + $0x698] sm:$0xf]  ;;  %v8254_v32 = vor.u32 %v10314_v45, %v8253_v44  ;;  %v7595_v61 = vld [vmem:[#allocation2 + $0x40c] sm:$0xf0]  ;;  %v7590_v13 = vor.u32 %v10066_v51, %v7587_v8  ;;  %v809_v54 = vperm.slane %v11162_v53, 1 }
 0x177   :  { %5553 = vmatpush.bf16.msra.mxu1 %v8234_v41  ;;  %v10231_v41 = vld [vmem:[#allocation2 + $0x69c] sm:$0xf]  ;;  %v8246_v48 = vor.u32 %v10313_v40, %v8245_v55  ;;  %v811_v21 = vperm.slane %v11162_v53, 3  ;;  %v9590_v24 = vor.u32 %v10646_v12, %v9589_v7  ;;  %v812_v25 = vperm.slane %v11162_v53, 4  ;;  %v8261_v46 = vld [vmem:[#allocation2 + $0x6a8] sm:$0xf] }
 0x178   :  { %5566 = vmatpush.bf16.msra.mxu2 %v8238_v42  ;;  %v6748_v56 = vrot.slane %v6562_v60, 2  ;;  %v6749_v17 = vrot.slane %v6562_v60, 5  ;;  %v8918_v42 = vor.u32 %v10397_v10, %v8915_v33  ;;  %v8250_v49 = vor.u32 %v10231_v41, %v8247_v43  ;;  %v10564_v60 = vld [vmem:[#allocation2 + $0x1104] sm:$0xf]  ;;  %v10399_v10 = vld [vmem:[#allocation2 + $0xbdc] sm:$0xf] }
 0x179   :  { %5579 = vmatpush.bf16.msra.mxu3 %v8242_v50  ;;  %v7585_v50 = vld [vmem:[#allocation2 + $0x170] sm:$0xf]  ;;  %v814_v55 = vperm.slane %v11162_v53, 6  ;;  %v815_v41 = vperm.slane %v11162_v53, 7  ;;  %v8926_v43 = vor.u32 %v10398_v18, %v8923_v28  ;;  %v10315_v47 = vld [vmem:[#allocation2 + $0x938] sm:$0xf0] }
 0x17a   :  { %5541 = vmatpush.bf16.msra.mxu0 %v7570_v34  ;;  %v6955_v27 = vsel %vm6860_vm5, %v6748_v56, %v6749_v17  ;;  %v5103_v29 = vpop.f32.mrf.mxu2  ;;  %v11146_v11 = vpop.f32.mrf.mxu0  ;;  %v7593_v34 = vld [vmem:[#allocation2 + $0x178] sm:$0xf]  ;;  %v7598_v56 = vor.u32 %v10067_v59, %v7595_v61  ;;  %v9582_v17 = vor.u32 %v10645_v1, %v9581_v0  ;;  %v8931_v33 = vld [vmem:[#allocation2 + $0xe6c] sm:$0xf0]  ;;  %v8263_v51 = vld [vmem:[#allocation2 + $0x93c] sm:$0xf0] }
 0x17b   :  { %5554 = vmatpush.bf16.msra.mxu1 %v7574_v63  ;;  %v6956_v35 = vsel %vm6864_vm6, %v6952_v26, %v6955_v27  ;;  %v5116_v31 = vpop.f32.mrf.mxu3  ;;  %v11149_v37 = vpop.f32.mrf.mxu1  ;;  %v7594_v15 = vor.u32 %v10149_v58, %v7593_v34  ;;  %v813_v26 = vperm.slane %v11162_v53, 5  ;;  %v8921_v29 = vld [vmem:[#allocation2 + $0xbd0] sm:$0xf]  ;;  %v8934_v45 = vor.u32 %v10399_v10, %v8931_v33  ;;  %v10316_v34 = vld [vmem:[#allocation2 + $0x940] sm:$0xf0] }
 0x17c   :  { %5567 = vmatpush.bf16.msra.mxu2 %v7578_v2  ;;  %v6957_v14 = vsel %vm6866_vm7, %v6949_v20, %v6956_v35  ;;  %v10563_v2 = vld [vmem:[#allocation2 + $0x10fc] sm:$0xf]  ;;  %v8929_v20 = vld [vmem:[#allocation2 + $0xbd8] sm:$0xf]  ;;  %v10481_v31 = vld [vmem:[#allocation2 + $0xe68] sm:$0xf0] }
 0x17d   :  { %5580 = vmatpush.bf16.msra.mxu3 %v7582_v3  ;;  %7194 = vst [vmem:[%s11601_s3 + $0x30] sm:$0xff] %v6957_v14  ;;  %9943 = vmatmul.msk.bf16.vlgmr.msra.gmra.mxu0 %vm4386_vm0, %v11110_v22  ;;  %v9586_v23 = vor.u32 %v10563_v2, %v9583_v5  ;;  %v8930_v44 = vor.u32 %v10481_v31, %v8929_v20  ;;  %v8269_v8 = vld [vmem:[#allocation2 + $0x6b0] sm:$0xf]  ;;  %v10150_v58 = vld [vmem:[#allocation2 + $0x410] sm:$0xf0] }
 0x17e   :  { %5590 = vmatpush.bf16.msrb.mxu0 %v9566_v4  ;;  %9944 = vmatmul.msk.bf16.vlgmr.msra.gmra.mxu1 %vm4386_vm0, %v11110_v22  ;;  %v7586_v4 = vor.u32 %v10148_v52, %v7585_v50  ;;  %v5141_v52 = vadd.f32 %v11149_v37, %v809_v54  ;;  %v8262_v37 = vor.u32 %v10315_v47, %v8261_v46  ;;  %v10068_v59 = vld [vmem:[#allocation2 + $0x184] sm:$0xf]  ;;  %v7603_v61 = vld [vmem:[#allocation2 + $0x414] sm:$0xf0]  ;;  %v7609_v0 = vld [vmem:[#allocation2 + $0x188] sm:$0xf] }
 0x17f   :  { %5603 = vmatpush.bf16.msrb.mxu1 %v9570_v9  ;;  %9945 = vmatmul.msk.bf16.vlgmr.msra.gmra.mxu2 %vm4386_vm0, %v11110_v22  ;;  %v9591_v9 = vld [vmem:[#allocation2 + $0x1394] sm:$0xf0]  ;;  %v10151_v1 = vld [vmem:[#allocation2 + $0x418] sm:$0xf0]  ;;  %v10069_v2 = vld [vmem:[#allocation2 + $0x18c] sm:$0xf] }
 0x180   :  { %5616 = vmatpush.bf16.msrb.mxu2 %v9574_v16  ;;  %9946 = vmatmul.msk.bf16.vlgmr.msra.gmra.mxu3 %vm4386_vm0, %v11110_v22  ;;  %v808_v16 = vperm.slane %v11162_v53, 0  ;;  %v9594_v27 = vor.u32 %v10564_v60, %v9591_v9  ;;  %v7611_v12 = vld [vmem:[#allocation2 + $0x41c] sm:$0xf0]  ;;  %v10566_v28 = vld [vmem:[#allocation2 + $0x1114] sm:$0xf] }
 0x181   :  { %5629 = vmatpush.bf16.msrb.mxu3 %v9578_v19  ;;  %v810_v19 = vperm.slane %v11162_v53, 2  ;;  %v10234_v53 = vld [vmem:[#allocation2 + $0x6b4] sm:$0xf]  ;;  %v9607_v20 = vld [vmem:[#allocation2 + $0x13a4] sm:$0xf0] }
 0x182   :  { %5591 = vmatpush.bf16.msrb.mxu0 %v8906_v6  ;;  %v5153_v36 = vpop.f32.mrf.mxu2  ;;  %v5129_v63 = vpop.f32.mrf.mxu0  ;;  %v5128_v50 = vadd.f32 %v11146_v11, %v808_v16 }
 0x183   :  { %5604 = vmatpush.bf16.msrb.mxu1 %v8910_v38  ;;  %v5166_v62 = vpop.f32.mrf.mxu3  ;;  %v5142_v3 = vpop.f32.mrf.mxu1  ;;  %v5154_v38 = vadd.f32 %v5153_v36, %v810_v19  ;;  %v8271_v36 = vld [vmem:[#allocation2 + $0x944] sm:$0xf0]  ;;  %v8270_v63 = vor.u32 %v10316_v34, %v8269_v8  ;;  %v10401_v34 = vld [vmem:[#allocation2 + $0xbec] sm:$0xf] }
 0x184   :  { %5617 = vmatpush.bf16.msrb.mxu2 %v8914_v39  ;;  %v5167_v39 = vadd.f32 %v5166_v62, %v811_v21  ;;  %v6563_v3 = vpack.c.bf16 %v5141_v52, %v5128_v50  ;;  %v8274_v7 = vor.u32 %v10234_v53, %v8271_v36  ;;  %v8945_v50 = vld [vmem:[#allocation2 + $0xbe8] sm:$0xf]  ;;  %v10483_v52 = vld [vmem:[#allocation2 + $0xe78] sm:$0xf0]  ;;  %v8947_v53 = vld [vmem:[#allocation2 + $0xe7c] sm:$0xf0] }
 0x185   :  { %5630 = vmatpush.bf16.msrb.mxu3 %v8918_v42  ;;  %v8922_v42 = vor.u32 %v10480_v30, %v8921_v29  ;;  %v7610_v29 = vor.u32 %v10151_v1, %v7609_v0  ;;  %v7614_v30 = vor.u32 %v10069_v2, %v7611_v12  ;;  %v8279_v0 = vld [vmem:[#allocation2 + $0x94c] sm:$0xf0]  ;;  %v8285_v1 = vld [vmem:[#allocation2 + $0x6c0] sm:$0xf]  ;;  %v10318_v2 = vld [vmem:[#allocation2 + $0x950] sm:$0xf0] }
 0x186   :  { %5592 = vmatpush.bf16.msrb.mxu0 %v8246_v48  ;;  %v10233_v48 = vld [vmem:[#allocation2 + $0x6ac] sm:$0xf]  ;;  %v6564_v11 = vpack.c.bf16 %v5167_v39, %v5154_v38  ;;  %v10152_v12 = vld [vmem:[#allocation2 + $0x420] sm:$0xf0] }
 0x187   :  { %5605 = vmatpush.bf16.msrb.mxu1 %v8250_v49  ;;  %v8266_v62 = vor.u32 %v10233_v48, %v8263_v51  ;;  %v8939_v48 = vld [vmem:[#allocation2 + $0xe74] sm:$0xf0] }
 0x188   :  { %5618 = vmatpush.bf16.msrb.mxu2 %v8254_v32  ;;  %v6751_v19 = vrot.slane %v6564_v11, 6  ;;  %v6752_v21 = vrot.slane %v6564_v11, 1 }
 0x189   :  { %5631 = vmatpush.bf16.msrb.mxu3 %v8258_v57  ;;  %v7601_v57 = vld [vmem:[#allocation2 + $0x180] sm:$0xf] }
 0x18a   :  { %5593 = vmatpush.bf16.msrb.mxu0 %v7586_v4  ;;  %v5155_v35 = vpop.f32.mrf.mxu2  ;;  %v5179_v6 = vpop.f32.mrf.mxu0  ;;  %v7602_v54 = vor.u32 %v10150_v58, %v7601_v57 }
 0x18b   :  { %5606 = vmatpush.bf16.msrb.mxu1 %v7590_v13  ;;  %v5168_v14 = vpop.f32.mrf.mxu3  ;;  %v5192_v40 = vpop.f32.mrf.mxu1  ;;  %v5180_v49 = vadd.f32 %v5179_v6, %v812_v25  ;;  %v9597_v13 = vld [vmem:[#allocation2 + $0x1108] sm:$0xf]  ;;  %v7606_v25 = vor.u32 %v10068_v59, %v7603_v61  ;;  %v6750_v35 = vrot.slane %v6563_v3, 3  ;;  %v8946_v59 = vor.u32 %v10483_v52, %v8945_v50  ;;  %v10317_v61 = vld [vmem:[#allocation2 + $0x948] sm:$0xf0] }
 0x18c   :  { %5619 = vmatpush.bf16.msrb.mxu2 %v7594_v15  ;;  %v5193_v32 = vadd.f32 %v5192_v40, %v813_v26  ;;  %v10647_v15 = vld [vmem:[#allocation2 + $0x1398] sm:$0xf0]  ;;  %v9605_v26 = vld [vmem:[#allocation2 + $0x1110] sm:$0xf]  ;;  %v9610_v40 = vor.u32 %v10566_v28, %v9607_v20  ;;  %v9621_v20 = vld [vmem:[#allocation2 + $0x1120] sm:$0xf] }
 0x18d   :  { %5632 = vmatpush.bf16.msrb.mxu3 %v7598_v56  ;;  %9947 = vmatmul.msk.bf16.vlgmr.msrb.gmra.mxu0 %vm4386_vm0, %v11110_v22  ;;  %v10565_v56 = vld [vmem:[#allocation2 + $0x110c] sm:$0xf]  ;;  %v9598_v18 = vor.u32 %v10647_v15, %v9597_v13  ;;  %v11204_v13 = vld [vmem:[#allocation4 + $0x40] sm:$0xff]  ;;  %v9615_v28 = vld [vmem:[#allocation2 + $0x13ac] sm:$0xf0] }
 0x18e   :  { %5642 = vmatpush.bf16.msra.mxu0 %v9582_v17  ;;  %9948 = vmatmul.msk.bf16.vlgmr.msrb.gmra.mxu1 %vm4386_vm0, %v11110_v22  ;;  %v6565_v4 = vpack.c.bf16 %v5193_v32, %v5180_v49  ;;  %v9599_v17 = vld [vmem:[#allocation2 + $0x139c] sm:$0xf0]  ;;  %v10402_v50 = vld [vmem:[#allocation2 + $0xbf4] sm:$0xf]  ;;  %v8955_v52 = vld [vmem:[#allocation2 + $0xe84] sm:$0xf0] }
 0x18f   :  { %5655 = vmatpush.bf16.msra.mxu1 %v9586_v23  ;;  %9949 = vmatmul.msk.bf16.vlgmr.msrb.gmra.mxu2 %vm4386_vm0, %v11110_v22  ;;  %v9602_v14 = vor.u32 %v10565_v56, %v9599_v17 }
 0x190   :  { %5668 = vmatpush.bf16.msra.mxu2 %v9590_v24  ;;  %9950 = vmatmul.msk.bf16.vlgmr.msrb.gmra.mxu3 %vm4386_vm0, %v11110_v22  ;;  %v6753_v31 = vrot.slane %v6565_v4, 4  ;;  %v6754_v10 = vrot.slane %v6565_v4, 7  ;;  %v8287_v4 = vld [vmem:[#allocation2 + $0x954] sm:$0xf0] }
 0x191   :  { %5681 = vmatpush.bf16.msra.mxu3 %v9594_v27  ;;  %v10648_v27 = vld [vmem:[#allocation2 + $0x13a0] sm:$0xf0] }
 0x192   :  { %5643 = vmatpush.bf16.msra.mxu0 %v8922_v42  ;;  %v5205_v5 = vpop.f32.mrf.mxu2  ;;  %v5181_v16 = vpop.f32.mrf.mxu0  ;;  %v9606_v6 = vor.u32 %v10648_v27, %v9605_v26  ;;  %v10482_v42 = vld [vmem:[#allocation2 + $0xe70] sm:$0xf0]  ;;  %v9613_v26 = vld [vmem:[#allocation2 + $0x1118] sm:$0xf]  ;;  %v10649_v27 = vld [vmem:[#allocation2 + $0x13a8] sm:$0xf0] }
 0x193   :  { %5656 = vmatpush.bf16.msra.mxu1 %v8926_v43  ;;  %v5206_v60 = vadd.f32 %v5205_v5, %v814_v55  ;;  %v5218_v9 = vpop.f32.mrf.mxu3  ;;  %v5194_v24 = vpop.f32.mrf.mxu1  ;;  %v6963_v55 = vsel %vm6850_vm1, %v6751_v19, %v6752_v21  ;;  %v10400_v43 = vld [vmem:[#allocation2 + $0xbe4] sm:$0xf]  ;;  %v7619_v16 = vld [vmem:[#allocation2 + $0x424] sm:$0xf0]  ;;  %v10153_v19 = vld [vmem:[#allocation2 + $0x428] sm:$0xf0] }
 0x194   :  { %5669 = vmatpush.bf16.msra.mxu2 %v8930_v44  ;;  %v5219_v23 = vadd.f32 %v5218_v9, %v815_v41  ;;  %v8937_v41 = vld [vmem:[#allocation2 + $0xbe0] sm:$0xf]  ;;  %v6960_v44 = vsel %vm6846_vm2, %v6563_v3, %v6750_v35  ;;  %v8942_v58 = vor.u32 %v10400_v43, %v8939_v48  ;;  %v10236_v3 = vld [vmem:[#allocation2 + $0x6c4] sm:$0xf]  ;;  %v10070_v9 = vld [vmem:[#allocation2 + $0x194] sm:$0xf] }
 0x195   :  { %5682 = vmatpush.bf16.msra.mxu3 %v8934_v45  ;;  %v6967_v45 = vsel %vm6856_vm4, %v6753_v31, %v6754_v10  ;;  %v6964_v49 = vsel %vm6854_vm3, %v6960_v44, %v6963_v55  ;;  %v8938_v11 = vor.u32 %v10482_v42, %v8937_v41  ;;  %v8290_v17 = vor.u32 %v10236_v3, %v8287_v4  ;;  %v10071_v21 = vld [vmem:[#allocation2 + $0x19c] sm:$0xf]  ;;  %v10650_v35 = vld [vmem:[#allocation2 + $0x13b0] sm:$0xf0]  ;;  %v10484_v48 = vld [vmem:[#allocation2 + $0xe80] sm:$0xf0] }
 0x196   :  { %5644 = vmatpush.bf16.msra.mxu0 %v8262_v37  ;;  %v6566_v33 = vpack.c.bf16 %v5219_v23, %v5206_v60  ;;  %v8277_v37 = vld [vmem:[#allocation2 + $0x6b8] sm:$0xf]  ;;  %v8286_v60 = vor.u32 %v10318_v2, %v8285_v1  ;;  %v7627_v23 = vld [vmem:[#allocation2 + $0x42c] sm:$0xf0]  ;;  %v7622_v31 = vor.u32 %v10070_v9, %v7619_v16  ;;  %v817_v55 = vperm.slane %v11204_v13, 1 }
 0x197   :  { %5657 = vmatpush.bf16.msra.mxu1 %v8266_v62  ;;  %v10235_v62 = vld [vmem:[#allocation2 + $0x6bc] sm:$0xf]  ;;  %v8278_v5 = vor.u32 %v10317_v61, %v8277_v37  ;;  %v819_v41 = vperm.slane %v11204_v13, 3  ;;  %v9622_v43 = vor.u32 %v10650_v35, %v9621_v20  ;;  %v820_v44 = vperm.slane %v11204_v13, 4  ;;  %v8293_v3 = vld [vmem:[#allocation2 + $0x6c8] sm:$0xf] }
 0x198   :  { %5670 = vmatpush.bf16.msra.mxu2 %v8270_v63  ;;  %v6755_v38 = vrot.slane %v6566_v33, 2  ;;  %v6756_v39 = vrot.slane %v6566_v33, 5  ;;  %v8950_v63 = vor.u32 %v10401_v34, %v8947_v53  ;;  %v8282_v15 = vor.u32 %v10235_v62, %v8279_v0  ;;  %v10568_v33 = vld [vmem:[#allocation2 + $0x1124] sm:$0xf]  ;;  %v10403_v34 = vld [vmem:[#allocation2 + $0xbfc] sm:$0xf] }
 0x199   :  { %5683 = vmatpush.bf16.msra.mxu3 %v8274_v7  ;;  %v7617_v7 = vld [vmem:[#allocation2 + $0x190] sm:$0xf]  ;;  %v822_v37 = vperm.slane %v11204_v13, 6  ;;  %v823_v62 = vperm.slane %v11204_v13, 7  ;;  %v8958_v0 = vor.u32 %v10402_v50, %v8955_v52  ;;  %v10319_v4 = vld [vmem:[#allocation2 + $0x958] sm:$0xf0] }
 0x19a   :  { %5645 = vmatpush.bf16.msra.mxu0 %v7602_v54  ;;  %v6970_v46 = vsel %vm6860_vm5, %v6755_v38, %v6756_v39  ;;  %v5207_v47 = vpop.f32.mrf.mxu2  ;;  %v11188_v8 = vpop.f32.mrf.mxu0  ;;  %v7625_v54 = vld [vmem:[#allocation2 + $0x198] sm:$0xf]  ;;  %v7630_v38 = vor.u32 %v10071_v21, %v7627_v23  ;;  %v9614_v39 = vor.u32 %v10649_v27, %v9613_v26  ;;  %v8963_v53 = vld [vmem:[#allocation2 + $0xe8c] sm:$0xf0]  ;;  %v8295_v9 = vld [vmem:[#allocation2 + $0x95c] sm:$0xf0] }
 0x19b   :  { %5658 = vmatpush.bf16.msra.mxu1 %v7606_v25  ;;  %v6971_v32 = vsel %vm6864_vm6, %v6967_v45, %v6970_v46  ;;  %v5220_v51 = vpop.f32.mrf.mxu3  ;;  %v11191_v57 = vpop.f32.mrf.mxu1  ;;  %v7626_v10 = vor.u32 %v10153_v19, %v7625_v54  ;;  %v821_v45 = vperm.slane %v11204_v13, 5  ;;  %v8953_v47 = vld [vmem:[#allocation2 + $0xbf0] sm:$0xf]  ;;  %v8966_v2 = vor.u32 %v10403_v34, %v8963_v53  ;;  %v10320_v54 = vld [vmem:[#allocation2 + $0x960] sm:$0xf0] }
 0x19c   :  { %5671 = vmatpush.bf16.msra.mxu2 %v7610_v29  ;;  %v6972_v36 = vsel %vm6866_vm7, %v6964_v49, %v6971_v32  ;;  %v10567_v29 = vld [vmem:[#allocation2 + $0x111c] sm:$0xf]  ;;  %v8961_v49 = vld [vmem:[#allocation2 + $0xbf8] sm:$0xf]  ;;  %v10485_v51 = vld [vmem:[#allocation2 + $0xe88] sm:$0xf0] }
 0x19d   :  { %5684 = vmatpush.bf16.msra.mxu3 %v7614_v30  ;;  %7195 = vst [vmem:[%s11601_s3 + $0x38] sm:$0xff] %v6972_v36  ;;  %9951 = vmatmul.msk.bf16.vlgmr.msra.gmra.mxu0 %vm4386_vm0, %v11110_v22  ;;  %v9618_v42 = vor.u32 %v10567_v29, %v9615_v28  ;;  %v8962_v1 = vor.u32 %v10485_v51, %v8961_v49  ;;  %v8301_v16 = vld [vmem:[#allocation2 + $0x6d0] sm:$0xf]  ;;  %v10154_v19 = vld [vmem:[#allocation2 + $0x430] sm:$0xf0] }
 0x19e   :  { %5694 = vmatpush.bf16.msrb.mxu0 %v9598_v18  ;;  %9952 = vmatmul.msk.bf16.vlgmr.msra.gmra.mxu1 %vm4386_vm0, %v11110_v22  ;;  %v7618_v18 = vor.u32 %v10152_v12, %v7617_v7  ;;  %v5245_v12 = vadd.f32 %v11191_v57, %v817_v55  ;;  %v8294_v57 = vor.u32 %v10319_v4, %v8293_v3  ;;  %v10072_v21 = vld [vmem:[#allocation2 + $0x1a4] sm:$0xf]  ;;  %v7635_v23 = vld [vmem:[#allocation2 + $0x434] sm:$0xf0]  ;;  %v7641_v26 = vld [vmem:[#allocation2 + $0x1a8] sm:$0xf] }
 0x19f   :  { %5707 = vmatpush.bf16.msrb.mxu1 %v9602_v14  ;;  %9953 = vmatmul.msk.bf16.vlgmr.msra.gmra.mxu2 %vm4386_vm0, %v11110_v22  ;;  %v9623_v14 = vld [vmem:[#allocation2 + $0x13b4] sm:$0xf0]  ;;  %v10155_v27 = vld [vmem:[#allocation2 + $0x438] sm:$0xf0]  ;;  %v10073_v29 = vld [vmem:[#allocation2 + $0x1ac] sm:$0xf] }
 0x1a0   :  { %5720 = vmatpush.bf16.msrb.mxu2 %v9606_v6  ;;  %9954 = vmatmul.msk.bf16.vlgmr.msra.gmra.mxu3 %vm4386_vm0, %v11110_v22  ;;  %v816_v6 = vperm.slane %v11204_v13, 0  ;;  %v9626_v46 = vor.u32 %v10568_v33, %v9623_v14  ;;  %v7643_v35 = vld [vmem:[#allocation2 + $0x43c] sm:$0xf0]  ;;  %v10569_v55 = vld [vmem:[#allocation2 + $0x112c] sm:$0xf] }
 0x1a1   :  { %5733 = vmatpush.bf16.msrb.mxu3 %v9610_v40  ;;  %v818_v40 = vperm.slane %v11204_v13, 2  ;;  %v10238_v13 = vld [vmem:[#allocation2 + $0x6d4] sm:$0xf]  ;;  %v9639_v52 = vld [vmem:[#allocation2 + $0x13c4] sm:$0xf0] }
 0x1a2   :  { %5695 = vmatpush.bf16.msrb.mxu0 %v8938_v11  ;;  %v5257_v56 = vpop.f32.mrf.mxu2  ;;  %v5233_v25 = vpop.f32.mrf.mxu0  ;;  %v5232_v7 = vadd.f32 %v11188_v8, %v816_v6  ;;  %v10570_v50 = vld [vmem:[#allocation2 + $0x1134] sm:$0xf]  ;;  %v8971_v4 = vld [vmem:[#allocation2 + $0xe94] sm:$0xf0] }
 0x1a3   :  { %5708 = vmatpush.bf16.msrb.mxu1 %v8942_v58  ;;  %v5270_v24 = vpop.f32.mrf.mxu3  ;;  %v5246_v30 = vpop.f32.mrf.mxu1  ;;  %v5258_v58 = vadd.f32 %v5257_v56, %v818_v40  ;;  %v8303_v56 = vld [vmem:[#allocation2 + $0x964] sm:$0xf0]  ;;  %v8302_v25 = vor.u32 %v10320_v54, %v8301_v16  ;;  %v10405_v16 = vld [vmem:[#allocation2 + $0xc0c] sm:$0xf]  ;;  %v8979_v54 = vld [vmem:[#allocation2 + $0xe9c] sm:$0xf0] }
 0x1a4   :  { %5721 = vmatpush.bf16.msrb.mxu2 %v8946_v59  ;;  %v5271_v59 = vadd.f32 %v5270_v24, %v819_v41  ;;  %v6567_v30 = vpack.c.bf16 %v5245_v12, %v5232_v7  ;;  %v8306_v20 = vor.u32 %v10238_v13, %v8303_v56  ;;  %v10487_v7 = vld [vmem:[#allocation2 + $0xe98] sm:$0xf0] }
 0x1a5   :  { %5734 = vmatpush.bf16.msrb.mxu3 %v8950_v63  ;;  %v8954_v63 = vor.u32 %v10484_v48, %v8953_v47  ;;  %v7646_v47 = vor.u32 %v10073_v29, %v7643_v35  ;;  %v10322_v29 = vld [vmem:[#allocation2 + $0x970] sm:$0xf0]  ;;  %v10156_v35 = vld [vmem:[#allocation2 + $0x440] sm:$0xf0] }
 0x1a6   :  { %5696 = vmatpush.bf16.msrb.mxu0 %v8278_v5  ;;  %v10237_v5 = vld [vmem:[#allocation2 + $0x6cc] sm:$0xf]  ;;  %v6568_v8 = vpack.c.bf16 %v5271_v59, %v5258_v58  ;;  %v6757_v49 = vrot.slane %v6567_v30, 3  ;;  %v9642_v59 = vor.u32 %v10570_v50, %v9639_v52  ;;  %v9647_v50 = vld [vmem:[#allocation2 + $0x13cc] sm:$0xf0] }
 0x1a7   :  { %5709 = vmatpush.bf16.msrb.mxu1 %v8282_v15  ;;  %v8298_v24 = vor.u32 %v10237_v5, %v8295_v9  ;;  %v8977_v5 = vld [vmem:[#allocation2 + $0xc08] sm:$0xf]  ;;  %v9653_v52 = vld [vmem:[#allocation2 + $0x1140] sm:$0xf] }
 0x1a8   :  { %5722 = vmatpush.bf16.msrb.mxu2 %v8286_v60  ;;  %v6759_v40 = vrot.slane %v6568_v8, 1 }
 0x1a9   :  { %5735 = vmatpush.bf16.msrb.mxu3 %v8290_v17  ;;  %v7633_v17 = vld [vmem:[#allocation2 + $0x1a0] sm:$0xf] }
 0x1aa   :  { %5697 = vmatpush.bf16.msrb.mxu0 %v7618_v18  ;;  %v5259_v32 = vpop.f32.mrf.mxu2  ;;  %v5283_v11 = vpop.f32.mrf.mxu0  ;;  %v7634_v6 = vor.u32 %v10154_v19, %v7633_v17  ;;  %v8978_v19 = vor.u32 %v10487_v7, %v8977_v5  ;;  %v10406_v5 = vld [vmem:[#allocation2 + $0xc14] sm:$0xf]  ;;  %v8987_v7 = vld [vmem:[#allocation2 + $0xea4] sm:$0xf0] }
 0x1ab   :  { %5710 = vmatpush.bf16.msrb.mxu1 %v7622_v31  ;;  %v5272_v36 = vpop.f32.mrf.mxu3  ;;  %v5296_v61 = vpop.f32.mrf.mxu1  ;;  %v5284_v15 = vadd.f32 %v5283_v11, %v820_v44  ;;  %v9629_v31 = vld [vmem:[#allocation2 + $0x1128] sm:$0xf]  ;;  %v9637_v44 = vld [vmem:[#allocation2 + $0x1130] sm:$0xf] }
 0x1ac   :  { %5723 = vmatpush.bf16.msrb.mxu2 %v7626_v10  ;;  %v5297_v60 = vadd.f32 %v5296_v61, %v821_v45  ;;  %v10652_v45 = vld [vmem:[#allocation2 + $0x13c0] sm:$0xf0]  ;;  %v8969_v61 = vld [vmem:[#allocation2 + $0xc00] sm:$0xf] }
 0x1ad   :  { %5736 = vmatpush.bf16.msrb.mxu3 %v7630_v38  ;;  %9955 = vmatmul.msk.bf16.vlgmr.msrb.gmra.mxu0 %vm4386_vm0, %v11110_v22  ;;  %v9631_v38 = vld [vmem:[#allocation2 + $0x13bc] sm:$0xf0]  ;;  %v9638_v36 = vor.u32 %v10652_v45, %v9637_v44  ;;  %v9645_v44 = vld [vmem:[#allocation2 + $0x1138] sm:$0xf]  ;;  %v10653_v45 = vld [vmem:[#allocation2 + $0x13c8] sm:$0xf0] }
 0x1ae   :  { %5746 = vmatpush.bf16.msra.mxu0 %v9614_v39  ;;  %9956 = vmatmul.msk.bf16.vlgmr.msrb.gmra.mxu1 %vm4386_vm0, %v11110_v22  ;;  %v6569_v18 = vpack.c.bf16 %v5297_v60, %v5284_v15  ;;  %v6758_v39 = vrot.slane %v6568_v8, 6  ;;  %v9634_v53 = vor.u32 %v10569_v55, %v9631_v38  ;;  %v8309_v8 = vld [vmem:[#allocation2 + $0x6d8] sm:$0xf] }
 0x1af   :  { %5759 = vmatpush.bf16.msra.mxu1 %v9618_v42  ;;  %9957 = vmatmul.msk.bf16.vlgmr.msrb.gmra.mxu2 %vm4386_vm0, %v11110_v22 }
 0x1b0   :  { %5772 = vmatpush.bf16.msra.mxu2 %v9622_v43  ;;  %9958 = vmatmul.msk.bf16.vlgmr.msrb.gmra.mxu3 %vm4386_vm0, %v11110_v22  ;;  %v10651_v22 = vld [vmem:[#allocation2 + $0x13b8] sm:$0xf0]  ;;  %v7638_v43 = vor.u32 %v10072_v21, %v7635_v23  ;;  %v6760_v32 = vrot.slane %v6569_v18, 4  ;;  %v6761_v51 = vrot.slane %v6569_v18, 7  ;;  %v6978_v11 = vsel %vm6850_vm1, %v6758_v39, %v6759_v40  ;;  %v10321_v21 = vld [vmem:[#allocation2 + $0x968] sm:$0xf0] }
 0x1b1   :  { %5785 = vmatpush.bf16.msra.mxu3 %v9626_v46  ;;  %v7642_v46 = vor.u32 %v10155_v27, %v7641_v26  ;;  %v9630_v48 = vor.u32 %v10651_v22, %v9629_v31  ;;  %v10239_v23 = vld [vmem:[#allocation2 + $0x6dc] sm:$0xf]  ;;  %v8311_v26 = vld [vmem:[#allocation2 + $0x96c] sm:$0xf0]  ;;  %v8317_v27 = vld [vmem:[#allocation2 + $0x6e0] sm:$0xf] }
 0x1b2   :  { %5747 = vmatpush.bf16.msra.mxu0 %v8954_v63  ;;  %v5309_v28 = vpop.f32.mrf.mxu2  ;;  %v5285_v14 = vpop.f32.mrf.mxu0  ;;  %v10404_v63 = vld [vmem:[#allocation2 + $0xc04] sm:$0xf]  ;;  %v8319_v18 = vld [vmem:[#allocation2 + $0x974] sm:$0xf0]  ;;  %v11251_v31 = vld [vmem:[#allocation4 + $0x48] sm:$0xff]  ;;  %v8314_v22 = vor.u32 %v10239_v23, %v8311_v26  ;;  %v8990_v26 = vor.u32 %v10406_v5, %v8987_v7 }
 0x1b3   :  { %5760 = vmatpush.bf16.msra.mxu1 %v8958_v0  ;;  %v5310_v10 = vadd.f32 %v5309_v28, %v822_v37  ;;  %v5322_v33 = vpop.f32.mrf.mxu3  ;;  %v5298_v42 = vpop.f32.mrf.mxu1  ;;  %v6975_v0 = vsel %vm6846_vm2, %v6567_v30, %v6757_v49  ;;  %v10240_v30 = vld [vmem:[#allocation2 + $0x6e4] sm:$0xf]  ;;  %v8310_v28 = vor.u32 %v10321_v21, %v8309_v8  ;;  %v7651_v14 = vld [vmem:[#allocation2 + $0x444] sm:$0xf0]  ;;  %v10157_v39 = vld [vmem:[#allocation2 + $0x448] sm:$0xf0] }
 0x1b4   :  { %5773 = vmatpush.bf16.msra.mxu2 %v8962_v1  ;;  %v5323_v41 = vadd.f32 %v5322_v33, %v823_v62  ;;  %v10486_v62 = vld [vmem:[#allocation2 + $0xe90] sm:$0xf0]  ;;  %v6982_v1 = vsel %vm6856_vm4, %v6760_v32, %v6761_v51  ;;  %v6979_v12 = vsel %vm6854_vm3, %v6975_v0, %v6978_v11  ;;  %v8322_v38 = vor.u32 %v10240_v30, %v8319_v18  ;;  %v10075_v40 = vld [vmem:[#allocation2 + $0x1bc] sm:$0xf]  ;;  %v8325_v30 = vld [vmem:[#allocation2 + $0x6e8] sm:$0xf] }
 0x1b5   :  { %5786 = vmatpush.bf16.msra.mxu3 %v8966_v2  ;;  %v8970_v17 = vor.u32 %v10486_v62, %v8969_v61  ;;  %v10074_v33 = vld [vmem:[#allocation2 + $0x1b4] sm:$0xf]  ;;  %v825_v11 = vperm.slane %v11251_v31, 1  ;;  %v827_v61 = vperm.slane %v11251_v31, 3  ;;  %v828_v0 = vperm.slane %v11251_v31, 4 }
 0x1b6   :  { %5748 = vmatpush.bf16.msra.mxu0 %v8294_v57  ;;  %v6570_v34 = vpack.c.bf16 %v5323_v41, %v5310_v10  ;;  %v8974_v57 = vor.u32 %v10404_v63, %v8971_v4  ;;  %v8318_v10 = vor.u32 %v10322_v29, %v8317_v27  ;;  %v7659_v41 = vld [vmem:[#allocation2 + $0x44c] sm:$0xf0]  ;;  %v10654_v49 = vld [vmem:[#allocation2 + $0x13d0] sm:$0xf0]  ;;  %v7654_v32 = vor.u32 %v10074_v33, %v7651_v14  ;;  %v10488_v4 = vld [vmem:[#allocation2 + $0xea0] sm:$0xf0] }
 0x1b7   :  { %5761 = vmatpush.bf16.msra.mxu1 %v8298_v24  ;;  %v11241_v24 = vld [vmem:[%s11598_s0] sm:$0x1]  ;;  %v9654_v63 = vor.u32 %v10654_v49, %v9653_v52  ;;  %v830_v8 = vperm.slane %v11251_v31, 6  ;;  %v831_v23 = vperm.slane %v11251_v31, 7  ;;  %v10323_v18 = vld [vmem:[#allocation2 + $0x978] sm:$0xf0] }
 0x1b8   :  { %5774 = vmatpush.bf16.msra.mxu2 %v8302_v25  ;;  %v6762_v37 = vrot.slane %v6570_v34, 2  ;;  %v6763_v58 = vrot.slane %v6570_v34, 5  ;;  %v8982_v25 = vor.u32 %v10405_v16, %v8979_v54  ;;  %v10572_v34 = vld [vmem:[#allocation2 + $0x1144] sm:$0xf]  ;;  %v10407_v16 = vld [vmem:[#allocation2 + $0xc1c] sm:$0xf] }
 0x1b9   :  { %5787 = vmatpush.bf16.msra.mxu3 %v8306_v20  ;;  %v7649_v20 = vld [vmem:[#allocation2 + $0x1b0] sm:$0xf]  ;;  %v8327_v33 = vld [vmem:[#allocation2 + $0x97c] sm:$0xf0]  ;;  %v10574_v7 = vld [vmem:[#allocation2 + $0x1154] sm:$0xf] }
 0x1ba   :  { %5749 = vmatpush.bf16.msra.mxu0 %v7634_v6  ;;  %v6985_v2 = vsel %vm6860_vm5, %v6762_v37, %v6763_v58  ;;  %v5311_v3 = vpop.f32.mrf.mxu2  ;;  %v11230_v9 = vpop.f32.mrf.mxu0  ;;  %v7657_v6 = vld [vmem:[#allocation2 + $0x1b8] sm:$0xf]  ;;  %v7662_v37 = vor.u32 %v10075_v40, %v7659_v41  ;;  %v9646_v58 = vor.u32 %v10653_v45, %v9645_v44  ;;  %v8995_v54 = vld [vmem:[#allocation2 + $0xeac] sm:$0xf0]  ;;  %v10076_v40 = vld [vmem:[#allocation2 + $0x1c4] sm:$0xf] }
 0x1bb   :  { %5762 = vmatpush.bf16.msra.mxu1 %v7638_v43  ;;  %v6986_v15 = vsel %vm6864_vm6, %v6982_v1, %v6985_v2  ;;  %v5324_v60 = vpop.f32.mrf.mxu3  ;;  %v11233_v56 = vpop.f32.mrf.mxu1  ;;  %v7658_v51 = vor.u32 %v10157_v39, %v7657_v6  ;;  %v829_v1 = vperm.slane %v11251_v31, 5  ;;  %v8985_v3 = vld [vmem:[#allocation2 + $0xc10] sm:$0xf]  ;;  %v8998_v29 = vor.u32 %v10407_v16, %v8995_v54  ;;  %v10324_v6 = vld [vmem:[#allocation2 + $0x980] sm:$0xf0] }
 0x1bc   :  { %5775 = vmatpush.bf16.msra.mxu2 %v7642_v46  ;;  %v6987_v13 = vsel %vm6866_vm7, %v6979_v12, %v6986_v15  ;;  %v10571_v46 = vld [vmem:[#allocation2 + $0x113c] sm:$0xf]  ;;  %v8993_v12 = vld [vmem:[#allocation2 + $0xc18] sm:$0xf]  ;;  %v10489_v60 = vld [vmem:[#allocation2 + $0xea8] sm:$0xf0] }
 0x1bd   :  { %5788 = vmatpush.bf16.msra.mxu3 %v7646_v47  ;;  %7196 = vst [vmem:[%s11601_s3 + $0x40] sm:$0xff] %v6987_v13  ;;  %9959 = vmatmul.msk.bf16.vlgmr.msra.gmra.mxu0 %vm4386_vm0, %v11241_v24  ;;  %v9650_v62 = vor.u32 %v10571_v46, %v9647_v50  ;;  %v8994_v27 = vor.u32 %v10489_v60, %v8993_v12  ;;  %v8333_v14 = vld [vmem:[#allocation2 + $0x6f0] sm:$0xf]  ;;  %v10158_v39 = vld [vmem:[#allocation2 + $0x450] sm:$0xf0] }
 0x1be   :  { %5798 = vmatpush.bf16.msrb.mxu0 %v9630_v48  ;;  %9960 = vmatmul.msk.bf16.vlgmr.msra.gmra.mxu1 %vm4386_vm0, %v11241_v24  ;;  %v7650_v48 = vor.u32 %v10156_v35, %v7649_v20  ;;  %v5349_v35 = vadd.f32 %v11233_v56, %v825_v11  ;;  %v8326_v56 = vor.u32 %v10323_v18, %v8325_v30  ;;  %v7667_v41 = vld [vmem:[#allocation2 + $0x454] sm:$0xf0]  ;;  %v7673_v44 = vld [vmem:[#allocation2 + $0x1c8] sm:$0xf]  ;;  %v10159_v45 = vld [vmem:[#allocation2 + $0x458] sm:$0xf0] }
 0x1bf   :  { %5811 = vmatpush.bf16.msrb.mxu1 %v9634_v53  ;;  %9961 = vmatmul.msk.bf16.vlgmr.msra.gmra.mxu2 %vm4386_vm0, %v11241_v24  ;;  %v9655_v53 = vld [vmem:[#allocation2 + $0x13d4] sm:$0xf0]  ;;  %v10077_v46 = vld [vmem:[#allocation2 + $0x1cc] sm:$0xf]  ;;  %v7675_v49 = vld [vmem:[#allocation2 + $0x45c] sm:$0xf0] }
 0x1c0   :  { %5824 = vmatpush.bf16.msrb.mxu2 %v9638_v36  ;;  %9962 = vmatmul.msk.bf16.vlgmr.msra.gmra.mxu3 %vm4386_vm0, %v11241_v24  ;;  %v824_v36 = vperm.slane %v11251_v31, 0  ;;  %v9658_v2 = vor.u32 %v10572_v34, %v9655_v53  ;;  %v9671_v12 = vld [vmem:[#allocation2 + $0x13e4] sm:$0xf0] }
 0x1c1   :  { %5837 = vmatpush.bf16.msrb.mxu3 %v9642_v59  ;;  %v826_v59 = vperm.slane %v11251_v31, 2  ;;  %v10242_v31 = vld [vmem:[#allocation2 + $0x6f4] sm:$0xf] }
 0x1c2   :  { %5799 = vmatpush.bf16.msrb.mxu0 %v8970_v17  ;;  %v5361_v55 = vpop.f32.mrf.mxu2  ;;  %v5337_v43 = vpop.f32.mrf.mxu0  ;;  %v5336_v20 = vadd.f32 %v11230_v9, %v824_v36 }
 0x1c3   :  { %5812 = vmatpush.bf16.msrb.mxu1 %v8974_v57  ;;  %v5374_v42 = vpop.f32.mrf.mxu3  ;;  %v5350_v47 = vpop.f32.mrf.mxu1  ;;  %v5362_v57 = vadd.f32 %v5361_v55, %v826_v59  ;;  %v8335_v55 = vld [vmem:[#allocation2 + $0x984] sm:$0xf0]  ;;  %v8334_v43 = vor.u32 %v10324_v6, %v8333_v14  ;;  %v10409_v6 = vld [vmem:[#allocation2 + $0xc2c] sm:$0xf] }
 0x1c4   :  { %5825 = vmatpush.bf16.msrb.mxu2 %v8978_v19  ;;  %v5375_v19 = vadd.f32 %v5374_v42, %v827_v61  ;;  %v6571_v47 = vpack.c.bf16 %v5349_v35, %v5336_v20  ;;  %v8338_v52 = vor.u32 %v10242_v31, %v8335_v55  ;;  %v9009_v20 = vld [vmem:[#allocation2 + $0xc28] sm:$0xf]  ;;  %v10491_v35 = vld [vmem:[#allocation2 + $0xeb8] sm:$0xf0]  ;;  %v9011_v31 = vld [vmem:[#allocation2 + $0xebc] sm:$0xf0] }
 0x1c5   :  { %5838 = vmatpush.bf16.msrb.mxu3 %v8982_v25  ;;  %v8986_v25 = vor.u32 %v10488_v4, %v8985_v3  ;;  %v7674_v3 = vor.u32 %v10159_v45, %v7673_v44  ;;  %v7678_v4 = vor.u32 %v10077_v46, %v7675_v49  ;;  %v8343_v44 = vld [vmem:[#allocation2 + $0x98c] sm:$0xf0]  ;;  %v8349_v45 = vld [vmem:[#allocation2 + $0x700] sm:$0xf]  ;;  %v10326_v46 = vld [vmem:[#allocation2 + $0x990] sm:$0xf0] }
 0x1c6   :  { %5800 = vmatpush.bf16.msrb.mxu0 %v8310_v28  ;;  %v10241_v28 = vld [vmem:[#allocation2 + $0x6ec] sm:$0xf]  ;;  %v6572_v9 = vpack.c.bf16 %v5375_v19, %v5362_v57  ;;  %v10160_v49 = vld [vmem:[#allocation2 + $0x460] sm:$0xf0] }
 0x1c7   :  { %5813 = vmatpush.bf16.msrb.mxu1 %v8314_v22  ;;  %v8330_v42 = vor.u32 %v10241_v28, %v8327_v33  ;;  %v9003_v28 = vld [vmem:[#allocation2 + $0xeb4] sm:$0xf0] }
 0x1c8   :  { %5826 = vmatpush.bf16.msrb.mxu2 %v8318_v10  ;;  %v6765_v59 = vrot.slane %v6572_v9, 6  ;;  %v6766_v61 = vrot.slane %v6572_v9, 1 }
 0x1c9   :  { %5839 = vmatpush.bf16.msrb.mxu3 %v8322_v38  ;;  %v7665_v38 = vld [vmem:[#allocation2 + $0x1c0] sm:$0xf] }
 0x1ca   :  { %5801 = vmatpush.bf16.msrb.mxu0 %v7650_v48  ;;  %v5363_v15 = vpop.f32.mrf.mxu2  ;;  %v5387_v17 = vpop.f32.mrf.mxu0  ;;  %v7666_v11 = vor.u32 %v10158_v39, %v7665_v38 }
 0x1cb   :  { %5814 = vmatpush.bf16.msrb.mxu1 %v7654_v32  ;;  %v5376_v13 = vpop.f32.mrf.mxu3  ;;  %v5400_v21 = vpop.f32.mrf.mxu1  ;;  %v5388_v22 = vadd.f32 %v5387_v17, %v828_v0  ;;  %v9661_v32 = vld [vmem:[#allocation2 + $0x1148] sm:$0xf]  ;;  %v7670_v0 = vor.u32 %v10076_v40, %v7667_v41  ;;  %v6764_v15 = vrot.slane %v6571_v47, 3  ;;  %v9010_v40 = vor.u32 %v10491_v35, %v9009_v20  ;;  %v10325_v41 = vld [vmem:[#allocation2 + $0x988] sm:$0xf0] }
 0x1cc   :  { %5827 = vmatpush.bf16.msrb.mxu2 %v7658_v51  ;;  %v5401_v10 = vadd.f32 %v5400_v21, %v829_v1  ;;  %v10655_v51 = vld [vmem:[#allocation2 + $0x13d8] sm:$0xf0]  ;;  %v9669_v1 = vld [vmem:[#allocation2 + $0x1150] sm:$0xf]  ;;  %v9674_v21 = vor.u32 %v10574_v7, %v9671_v12  ;;  %v9685_v12 = vld [vmem:[#allocation2 + $0x1160] sm:$0xf] }
 0x1cd   :  { %5840 = vmatpush.bf16.msrb.mxu3 %v7662_v37  ;;  %9963 = vmatmul.msk.bf16.vlgmr.msrb.gmra.mxu0 %vm4386_vm0, %v11241_v24  ;;  %v10573_v37 = vld [vmem:[#allocation2 + $0x114c] sm:$0xf]  ;;  %v9662_v5 = vor.u32 %v10655_v51, %v9661_v32  ;;  %v11293_v32 = vld [vmem:[#allocation4 + $0x50] sm:$0xff]  ;;  %v9019_v35 = vld [vmem:[#allocation2 + $0xec4] sm:$0xf0] }
 0x1ce   :  { %5850 = vmatpush.bf16.msra.mxu0 %v9646_v58  ;;  %9964 = vmatmul.msk.bf16.vlgmr.msrb.gmra.mxu1 %vm4386_vm0, %v11241_v24  ;;  %v6573_v48 = vpack.c.bf16 %v5401_v10, %v5388_v22  ;;  %v9663_v58 = vld [vmem:[#allocation2 + $0x13dc] sm:$0xf0]  ;;  %v9679_v7 = vld [vmem:[#allocation2 + $0x13ec] sm:$0xf0]  ;;  %v10410_v20 = vld [vmem:[#allocation2 + $0xc34] sm:$0xf] }
 0x1cf   :  { %5863 = vmatpush.bf16.msra.mxu1 %v9650_v62  ;;  %9965 = vmatmul.msk.bf16.vlgmr.msrb.gmra.mxu2 %vm4386_vm0, %v11241_v24  ;;  %v9666_v13 = vor.u32 %v10573_v37, %v9663_v58 }
 0x1d0   :  { %5876 = vmatpush.bf16.msra.mxu2 %v9654_v63  ;;  %9966 = vmatmul.msk.bf16.vlgmr.msrb.gmra.mxu3 %vm4386_vm0, %v11241_v24  ;;  %v6767_v60 = vrot.slane %v6573_v48, 4  ;;  %v6768_v16 = vrot.slane %v6573_v48, 7  ;;  %v8351_v48 = vld [vmem:[#allocation2 + $0x994] sm:$0xf0] }
 0x1d1   :  { %5889 = vmatpush.bf16.msra.mxu3 %v9658_v2  ;;  %v10656_v2 = vld [vmem:[#allocation2 + $0x13e0] sm:$0xf0] }
 0x1d2   :  { %5851 = vmatpush.bf16.msra.mxu0 %v8986_v25  ;;  %v5413_v50 = vpop.f32.mrf.mxu2  ;;  %v5389_v36 = vpop.f32.mrf.mxu0  ;;  %v9670_v17 = vor.u32 %v10656_v2, %v9669_v1  ;;  %v10490_v25 = vld [vmem:[#allocation2 + $0xeb0] sm:$0xf0]  ;;  %v9677_v1 = vld [vmem:[#allocation2 + $0x1158] sm:$0xf]  ;;  %v10657_v2 = vld [vmem:[#allocation2 + $0x13e8] sm:$0xf0] }
 0x1d3   :  { %5864 = vmatpush.bf16.msra.mxu1 %v8990_v26  ;;  %v5414_v34 = vadd.f32 %v5413_v50, %v830_v8  ;;  %v5426_v53 = vpop.f32.mrf.mxu3  ;;  %v5402_v63 = vpop.f32.mrf.mxu1  ;;  %v6993_v8 = vsel %vm6850_vm1, %v6765_v59, %v6766_v61  ;;  %v10408_v26 = vld [vmem:[#allocation2 + $0xc24] sm:$0xf]  ;;  %v7683_v36 = vld [vmem:[#allocation2 + $0x464] sm:$0xf0]  ;;  %v10161_v59 = vld [vmem:[#allocation2 + $0x468] sm:$0xf0] }
 0x1d4   :  { %5877 = vmatpush.bf16.msra.mxu2 %v8994_v27  ;;  %v5427_v62 = vadd.f32 %v5426_v53, %v831_v23  ;;  %v9001_v23 = vld [vmem:[#allocation2 + $0xc20] sm:$0xf]  ;;  %v6990_v27 = vsel %vm6846_vm2, %v6571_v47, %v6764_v15  ;;  %v9006_v39 = vor.u32 %v10408_v26, %v9003_v28  ;;  %v10244_v47 = vld [vmem:[#allocation2 + $0x704] sm:$0xf]  ;;  %v10078_v53 = vld [vmem:[#allocation2 + $0x1d4] sm:$0xf] }
 0x1d5   :  { %5890 = vmatpush.bf16.msra.mxu3 %v8998_v29  ;;  %v6997_v29 = vsel %vm6856_vm4, %v6767_v60, %v6768_v16  ;;  %v6994_v22 = vsel %vm6854_vm3, %v6990_v27, %v6993_v8  ;;  %v9002_v9 = vor.u32 %v10490_v25, %v9001_v23  ;;  %v8354_v58 = vor.u32 %v10244_v47, %v8351_v48  ;;  %v10079_v61 = vld [vmem:[#allocation2 + $0x1dc] sm:$0xf]  ;;  %v10658_v15 = vld [vmem:[#allocation2 + $0x13f0] sm:$0xf0]  ;;  %v10492_v28 = vld [vmem:[#allocation2 + $0xec0] sm:$0xf0] }
 0x1d6   :  { %5852 = vmatpush.bf16.msra.mxu0 %v8326_v56  ;;  %v6574_v54 = vpack.c.bf16 %v5427_v62, %v5414_v34  ;;  %v8341_v56 = vld [vmem:[#allocation2 + $0x6f8] sm:$0xf]  ;;  %v8350_v34 = vor.u32 %v10326_v46, %v8349_v45  ;;  %v7691_v62 = vld [vmem:[#allocation2 + $0x46c] sm:$0xf0]  ;;  %v7686_v60 = vor.u32 %v10078_v53, %v7683_v36  ;;  %v833_v8 = vperm.slane %v11293_v32, 1 }
 0x1d7   :  { %5865 = vmatpush.bf16.msra.mxu1 %v8330_v42  ;;  %v10243_v42 = vld [vmem:[#allocation2 + $0x6fc] sm:$0xf]  ;;  %v8342_v50 = vor.u32 %v10325_v41, %v8341_v56  ;;  %v835_v23 = vperm.slane %v11293_v32, 3  ;;  %v9686_v26 = vor.u32 %v10658_v15, %v9685_v12  ;;  %v836_v27 = vperm.slane %v11293_v32, 4  ;;  %v8357_v47 = vld [vmem:[#allocation2 + $0x708] sm:$0xf] }
 0x1d8   :  { %5878 = vmatpush.bf16.msra.mxu2 %v8334_v43  ;;  %v6769_v57 = vrot.slane %v6574_v54, 2  ;;  %v6770_v19 = vrot.slane %v6574_v54, 5  ;;  %v9014_v43 = vor.u32 %v10409_v6, %v9011_v31  ;;  %v8346_v51 = vor.u32 %v10243_v42, %v8343_v44  ;;  %v10576_v54 = vld [vmem:[#allocation2 + $0x1164] sm:$0xf]  ;;  %v10411_v6 = vld [vmem:[#allocation2 + $0xc3c] sm:$0xf] }
 0x1d9   :  { %5891 = vmatpush.bf16.msra.mxu3 %v8338_v52  ;;  %v7681_v52 = vld [vmem:[#allocation2 + $0x1d0] sm:$0xf]  ;;  %v838_v56 = vperm.slane %v11293_v32, 6  ;;  %v839_v42 = vperm.slane %v11293_v32, 7  ;;  %v9022_v44 = vor.u32 %v10410_v20, %v9019_v35  ;;  %v10327_v48 = vld [vmem:[#allocation2 + $0x998] sm:$0xf0] }
 0x1da   :  { %5853 = vmatpush.bf16.msra.mxu0 %v7666_v11  ;;  %v7000_v30 = vsel %vm6860_vm5, %v6769_v57, %v6770_v19  ;;  %v5415_v18 = vpop.f32.mrf.mxu2  ;;  %v11277_v14 = vpop.f32.mrf.mxu0  ;;  %v7689_v11 = vld [vmem:[#allocation2 + $0x1d8] sm:$0xf]  ;;  %v7694_v57 = vor.u32 %v10079_v61, %v7691_v62  ;;  %v9678_v19 = vor.u32 %v10657_v2, %v9677_v1  ;;  %v9027_v31 = vld [vmem:[#allocation2 + $0xecc] sm:$0xf0]  ;;  %v8359_v53 = vld [vmem:[#allocation2 + $0x99c] sm:$0xf0] }
 0x1db   :  { %5866 = vmatpush.bf16.msra.mxu1 %v7670_v0  ;;  %v7001_v10 = vsel %vm6864_vm6, %v6997_v29, %v7000_v30  ;;  %v5428_v33 = vpop.f32.mrf.mxu3  ;;  %v11280_v38 = vpop.f32.mrf.mxu1  ;;  %v7690_v16 = vor.u32 %v10161_v59, %v7689_v11  ;;  %v837_v29 = vperm.slane %v11293_v32, 5  ;;  %v9017_v18 = vld [vmem:[#allocation2 + $0xc30] sm:$0xf]  ;;  %v9030_v46 = vor.u32 %v10411_v6, %v9027_v31  ;;  %v10328_v11 = vld [vmem:[#allocation2 + $0x9a0] sm:$0xf0] }
 0x1dc   :  { %5879 = vmatpush.bf16.msra.mxu2 %v7674_v3  ;;  %v7002_v55 = vsel %vm6866_vm7, %v6994_v22, %v7001_v10  ;;  %v10575_v3 = vld [vmem:[#allocation2 + $0x115c] sm:$0xf]  ;;  %v9025_v22 = vld [vmem:[#allocation2 + $0xc38] sm:$0xf]  ;;  %v10493_v33 = vld [vmem:[#allocation2 + $0xec8] sm:$0xf0] }
 0x1dd   :  { %5892 = vmatpush.bf16.msra.mxu3 %v7678_v4  ;;  %7197 = vst [vmem:[%s11601_s3 + $0x48] sm:$0xff] %v7002_v55  ;;  %9967 = vmatmul.msk.bf16.vlgmr.msra.gmra.mxu0 %vm4386_vm0, %v11241_v24  ;;  %v9682_v25 = vor.u32 %v10575_v3, %v9679_v7  ;;  %v9026_v45 = vor.u32 %v10493_v33, %v9025_v22  ;;  %v8365_v36 = vld [vmem:[#allocation2 + $0x710] sm:$0xf]  ;;  %v10162_v59 = vld [vmem:[#allocation2 + $0x470] sm:$0xf0] }
 0x1de   :  { %5902 = vmatpush.bf16.msrb.mxu0 %v9662_v5  ;;  %9968 = vmatmul.msk.bf16.vlgmr.msra.gmra.mxu1 %vm4386_vm0, %v11241_v24  ;;  %v7682_v5 = vor.u32 %v10160_v49, %v7681_v52  ;;  %v5453_v49 = vadd.f32 %v11280_v38, %v833_v8  ;;  %v8358_v38 = vor.u32 %v10327_v48, %v8357_v47  ;;  %v10080_v61 = vld [vmem:[#allocation2 + $0x1e4] sm:$0xf]  ;;  %v7699_v62 = vld [vmem:[#allocation2 + $0x474] sm:$0xf0]  ;;  %v7705_v1 = vld [vmem:[#allocation2 + $0x1e8] sm:$0xf] }
 0x1df   :  { %5915 = vmatpush.bf16.msrb.mxu1 %v9666_v13  ;;  %9969 = vmatmul.msk.bf16.vlgmr.msra.gmra.mxu2 %vm4386_vm0, %v11241_v24  ;;  %v9687_v13 = vld [vmem:[#allocation2 + $0x13f4] sm:$0xf0]  ;;  %v10163_v2 = vld [vmem:[#allocation2 + $0x478] sm:$0xf0]  ;;  %v10081_v3 = vld [vmem:[#allocation2 + $0x1ec] sm:$0xf] }
 0x1e0   :  { %5928 = vmatpush.bf16.msrb.mxu2 %v9670_v17  ;;  %9970 = vmatmul.msk.bf16.vlgmr.msra.gmra.mxu3 %vm4386_vm0, %v11241_v24  ;;  %v832_v17 = vperm.slane %v11293_v32, 0  ;;  %v9690_v30 = vor.u32 %v10576_v54, %v9687_v13  ;;  %v7707_v15 = vld [vmem:[#allocation2 + $0x47c] sm:$0xf0]  ;;  %v10578_v35 = vld [vmem:[#allocation2 + $0x1174] sm:$0xf] }
 0x1e1   :  { %5941 = vmatpush.bf16.msrb.mxu3 %v9674_v21  ;;  %v834_v21 = vperm.slane %v11293_v32, 2  ;;  %v10246_v32 = vld [vmem:[#allocation2 + $0x714] sm:$0xf]  ;;  %v9703_v22 = vld [vmem:[#allocation2 + $0x1404] sm:$0xf0] }
 0x1e2   :  { %5903 = vmatpush.bf16.msrb.mxu0 %v9002_v9  ;;  %v5465_v37 = vpop.f32.mrf.mxu2  ;;  %v5441_v0 = vpop.f32.mrf.mxu0  ;;  %v5440_v52 = vadd.f32 %v11277_v14, %v832_v17 }
 0x1e3   :  { %5916 = vmatpush.bf16.msrb.mxu1 %v9006_v39  ;;  %v5478_v63 = vpop.f32.mrf.mxu3  ;;  %v5454_v4 = vpop.f32.mrf.mxu1  ;;  %v5466_v39 = vadd.f32 %v5465_v37, %v834_v21  ;;  %v8367_v37 = vld [vmem:[#allocation2 + $0x9a4] sm:$0xf0]  ;;  %v8366_v0 = vor.u32 %v10328_v11, %v8365_v36  ;;  %v10413_v11 = vld [vmem:[#allocation2 + $0xc4c] sm:$0xf] }
 0x1e4   :  { %5929 = vmatpush.bf16.msrb.mxu2 %v9010_v40  ;;  %v5479_v40 = vadd.f32 %v5478_v63, %v835_v23  ;;  %v6575_v4 = vpack.c.bf16 %v5453_v49, %v5440_v52  ;;  %v8370_v12 = vor.u32 %v10246_v32, %v8367_v37  ;;  %v9041_v52 = vld [vmem:[#allocation2 + $0xc48] sm:$0xf]  ;;  %v10495_v49 = vld [vmem:[#allocation2 + $0xed8] sm:$0xf0]  ;;  %v9043_v32 = vld [vmem:[#allocation2 + $0xedc] sm:$0xf0] }
 0x1e5   :  { %5942 = vmatpush.bf16.msrb.mxu3 %v9014_v43  ;;  %v9018_v43 = vor.u32 %v10492_v28, %v9017_v18  ;;  %v7706_v18 = vor.u32 %v10163_v2, %v7705_v1  ;;  %v7710_v28 = vor.u32 %v10081_v3, %v7707_v15  ;;  %v8375_v1 = vld [vmem:[#allocation2 + $0x9ac] sm:$0xf0]  ;;  %v8381_v2 = vld [vmem:[#allocation2 + $0x720] sm:$0xf]  ;;  %v10330_v3 = vld [vmem:[#allocation2 + $0x9b0] sm:$0xf0] }
 0x1e6   :  { %5904 = vmatpush.bf16.msrb.mxu0 %v8342_v50  ;;  %v10245_v50 = vld [vmem:[#allocation2 + $0x70c] sm:$0xf]  ;;  %v6576_v14 = vpack.c.bf16 %v5479_v40, %v5466_v39  ;;  %v10164_v15 = vld [vmem:[#allocation2 + $0x480] sm:$0xf0] }
 0x1e7   :  { %5917 = vmatpush.bf16.msrb.mxu1 %v8346_v51  ;;  %v8362_v63 = vor.u32 %v10245_v50, %v8359_v53  ;;  %v9035_v50 = vld [vmem:[#allocation2 + $0xed4] sm:$0xf0] }
 0x1e8   :  { %5930 = vmatpush.bf16.msrb.mxu2 %v8350_v34  ;;  %v6772_v21 = vrot.slane %v6576_v14, 6  ;;  %v6773_v23 = vrot.slane %v6576_v14, 1 }
 0x1e9   :  { %5943 = vmatpush.bf16.msrb.mxu3 %v8354_v58  ;;  %v7697_v58 = vld [vmem:[#allocation2 + $0x1e0] sm:$0xf] }
 0x1ea   :  { %5905 = vmatpush.bf16.msrb.mxu0 %v7682_v5  ;;  %v5467_v10 = vpop.f32.mrf.mxu2  ;;  %v5491_v9 = vpop.f32.mrf.mxu0  ;;  %v7698_v8 = vor.u32 %v10162_v59, %v7697_v58 }
 0x1eb   :  { %5918 = vmatpush.bf16.msrb.mxu1 %v7686_v60  ;;  %v5480_v55 = vpop.f32.mrf.mxu3  ;;  %v5504_v41 = vpop.f32.mrf.mxu1  ;;  %v5492_v51 = vadd.f32 %v5491_v9, %v836_v27  ;;  %v9693_v60 = vld [vmem:[#allocation2 + $0x1168] sm:$0xf]  ;;  %v7702_v27 = vor.u32 %v10080_v61, %v7699_v62  ;;  %v6771_v10 = vrot.slane %v6575_v4, 3  ;;  %v9042_v61 = vor.u32 %v10495_v49, %v9041_v52  ;;  %v10329_v62 = vld [vmem:[#allocation2 + $0x9a8] sm:$0xf0] }
 0x1ec   :  { %5931 = vmatpush.bf16.msrb.mxu2 %v7690_v16  ;;  %v5505_v34 = vadd.f32 %v5504_v41, %v837_v29  ;;  %v10659_v16 = vld [vmem:[#allocation2 + $0x13f8] sm:$0xf0]  ;;  %v9701_v29 = vld [vmem:[#allocation2 + $0x1170] sm:$0xf]  ;;  %v9706_v41 = vor.u32 %v10578_v35, %v9703_v22  ;;  %v9717_v22 = vld [vmem:[#allocation2 + $0x1180] sm:$0xf] }
 0x1ed   :  { %5944 = vmatpush.bf16.msrb.mxu3 %v7694_v57  ;;  %9971 = vmatmul.msk.bf16.vlgmr.msrb.gmra.mxu0 %vm4386_vm0, %v11241_v24  ;;  %v10577_v57 = vld [vmem:[#allocation2 + $0x116c] sm:$0xf]  ;;  %v9694_v20 = vor.u32 %v10659_v16, %v9693_v60  ;;  %v11335_v60 = vld [vmem:[#allocation4 + $0x58] sm:$0xff]  ;;  %v9711_v35 = vld [vmem:[#allocation2 + $0x140c] sm:$0xf0] }
 0x1ee   :  { %5954 = vmatpush.bf16.msra.mxu0 %v9678_v19  ;;  %9972 = vmatmul.msk.bf16.vlgmr.msrb.gmra.mxu1 %vm4386_vm0, %v11241_v24  ;;  %v6577_v5 = vpack.c.bf16 %v5505_v34, %v5492_v51  ;;  %v9695_v19 = vld [vmem:[#allocation2 + $0x13fc] sm:$0xf0]  ;;  %v10414_v52 = vld [vmem:[#allocation2 + $0xc54] sm:$0xf]  ;;  %v9051_v49 = vld [vmem:[#allocation2 + $0xee4] sm:$0xf0] }
 0x1ef   :  { %5967 = vmatpush.bf16.msra.mxu1 %v9682_v25  ;;  %9973 = vmatmul.msk.bf16.vlgmr.msrb.gmra.mxu2 %vm4386_vm0, %v11241_v24  ;;  %v9698_v55 = vor.u32 %v10577_v57, %v9695_v19 }
 0x1f0   :  { %5980 = vmatpush.bf16.msra.mxu2 %v9686_v26  ;;  %9974 = vmatmul.msk.bf16.vlgmr.msrb.gmra.mxu3 %vm4386_vm0, %v11241_v24  ;;  %v6774_v33 = vrot.slane %v6577_v5, 4  ;;  %v6775_v6 = vrot.slane %v6577_v5, 7  ;;  %v8383_v5 = vld [vmem:[#allocation2 + $0x9b4] sm:$0xf0] }
 0x1f1   :  { %5993 = vmatpush.bf16.msra.mxu3 %v9690_v30  ;;  %v10660_v30 = vld [vmem:[#allocation2 + $0x1400] sm:$0xf0] }
 0x1f2   :  { %5955 = vmatpush.bf16.msra.mxu0 %v9018_v43  ;;  %v5517_v7 = vpop.f32.mrf.mxu2  ;;  %v5493_v17 = vpop.f32.mrf.mxu0  ;;  %v9702_v9 = vor.u32 %v10660_v30, %v9701_v29  ;;  %v10494_v43 = vld [vmem:[#allocation2 + $0xed0] sm:$0xf0]  ;;  %v9709_v29 = vld [vmem:[#allocation2 + $0x1178] sm:$0xf]  ;;  %v10661_v30 = vld [vmem:[#allocation2 + $0x1408] sm:$0xf0] }
 0x1f3   :  { %5968 = vmatpush.bf16.msra.mxu1 %v9022_v44  ;;  %v5518_v54 = vadd.f32 %v5517_v7, %v838_v56  ;;  %v5530_v13 = vpop.f32.mrf.mxu3  ;;  %v5506_v26 = vpop.f32.mrf.mxu1  ;;  %v7008_v56 = vsel %vm6850_vm1, %v6772_v21, %v6773_v23  ;;  %v10412_v44 = vld [vmem:[#allocation2 + $0xc44] sm:$0xf]  ;;  %v7715_v17 = vld [vmem:[#allocation2 + $0x484] sm:$0xf0]  ;;  %v10165_v21 = vld [vmem:[#allocation2 + $0x488] sm:$0xf0] }
 0x1f4   :  { %5981 = vmatpush.bf16.msra.mxu2 %v9026_v45  ;;  %v5531_v25 = vadd.f32 %v5530_v13, %v839_v42  ;;  %v9033_v42 = vld [vmem:[#allocation2 + $0xc40] sm:$0xf]  ;;  %v7005_v45 = vsel %vm6846_vm2, %v6575_v4, %v6771_v10  ;;  %v9038_v59 = vor.u32 %v10412_v44, %v9035_v50  ;;  %v10248_v4 = vld [vmem:[#allocation2 + $0x724] sm:$0xf]  ;;  %v10082_v13 = vld [vmem:[#allocation2 + $0x1f4] sm:$0xf] }
 0x1f5   :  { %5994 = vmatpush.bf16.msra.mxu3 %v9030_v46  ;;  %v7012_v46 = vsel %vm6856_vm4, %v6774_v33, %v6775_v6  ;;  %v7009_v51 = vsel %vm6854_vm3, %v7005_v45, %v7008_v56  ;;  %v9034_v14 = vor.u32 %v10494_v43, %v9033_v42  ;;  %v8386_v19 = vor.u32 %v10248_v4, %v8383_v5  ;;  %v10083_v23 = vld [vmem:[#allocation2 + $0x1fc] sm:$0xf]  ;;  %v10662_v10 = vld [vmem:[#allocation2 + $0x1410] sm:$0xf0]  ;;  %v10496_v50 = vld [vmem:[#allocation2 + $0xee0] sm:$0xf0] }
 0x1f6   :  { %5956 = vmatpush.bf16.msra.mxu0 %v8358_v38  ;;  %v6578_v31 = vpack.c.bf16 %v5531_v25, %v5518_v54  ;;  %v8373_v38 = vld [vmem:[#allocation2 + $0x718] sm:$0xf]  ;;  %v8382_v54 = vor.u32 %v10330_v3, %v8381_v2  ;;  %v7723_v25 = vld [vmem:[#allocation2 + $0x48c] sm:$0xf0]  ;;  %v7718_v33 = vor.u32 %v10082_v13, %v7715_v17  ;;  %v841_v56 = vperm.slane %v11335_v60, 1 }
 0x1f7   :  { %5969 = vmatpush.bf16.msra.mxu1 %v8362_v63  ;;  %v10247_v63 = vld [vmem:[#allocation2 + $0x71c] sm:$0xf]  ;;  %v8374_v7 = vor.u32 %v10329_v62, %v8373_v38  ;;  %v843_v42 = vperm.slane %v11335_v60, 3  ;;  %v9718_v44 = vor.u32 %v10662_v10, %v9717_v22  ;;  %v844_v45 = vperm.slane %v11335_v60, 4  ;;  %v8389_v4 = vld [vmem:[#allocation2 + $0x728] sm:$0xf] }
 0x1f8   :  { %5982 = vmatpush.bf16.msra.mxu2 %v8366_v0  ;;  %v6776_v39 = vrot.slane %v6578_v31, 2  ;;  %v6777_v40 = vrot.slane %v6578_v31, 5  ;;  %v9046_v0 = vor.u32 %v10413_v11, %v9043_v32  ;;  %v8378_v16 = vor.u32 %v10247_v63, %v8375_v1  ;;  %v10580_v31 = vld [vmem:[#allocation2 + $0x1184] sm:$0xf]  ;;  %v10415_v11 = vld [vmem:[#allocation2 + $0xc5c] sm:$0xf] }
 0x1f9   :  { %5995 = vmatpush.bf16.msra.mxu3 %v8370_v12  ;;  %v7713_v12 = vld [vmem:[#allocation2 + $0x1f0] sm:$0xf]  ;;  %v846_v38 = vperm.slane %v11335_v60, 6  ;;  %v847_v63 = vperm.slane %v11335_v60, 7  ;;  %v9054_v1 = vor.u32 %v10414_v52, %v9051_v49  ;;  %v10331_v5 = vld [vmem:[#allocation2 + $0x9b8] sm:$0xf0] }
 0x1fa   :  { %5957 = vmatpush.bf16.msra.mxu0 %v7698_v8  ;;  %v7015_v47 = vsel %vm6860_vm5, %v6776_v39, %v6777_v40  ;;  %v5519_v48 = vpop.f32.mrf.mxu2  ;;  %v11319_v36 = vpop.f32.mrf.mxu0  ;;  %v7721_v8 = vld [vmem:[#allocation2 + $0x1f8] sm:$0xf]  ;;  %v7726_v39 = vor.u32 %v10083_v23, %v7723_v25  ;;  %v9710_v40 = vor.u32 %v10661_v30, %v9709_v29  ;;  %v9059_v32 = vld [vmem:[#allocation2 + $0xeec] sm:$0xf0]  ;;  %v8391_v13 = vld [vmem:[#allocation2 + $0x9bc] sm:$0xf0] }
 0x1fb   :  { %5970 = vmatpush.bf16.msra.mxu1 %v7702_v27  ;;  %v7016_v34 = vsel %vm6864_vm6, %v7012_v46, %v7015_v47  ;;  %v5532_v53 = vpop.f32.mrf.mxu3  ;;  %v11322_v58 = vpop.f32.mrf.mxu1  ;;  %v7722_v6 = vor.u32 %v10165_v21, %v7721_v8  ;;  %v845_v46 = vperm.slane %v11335_v60, 5  ;;  %v9049_v48 = vld [vmem:[#allocation2 + $0xc50] sm:$0xf]  ;;  %v9062_v3 = vor.u32 %v10415_v11, %v9059_v32  ;;  %v10332_v8 = vld [vmem:[#allocation2 + $0x9c0] sm:$0xf0] }
 0x1fc   :  { %5983 = vmatpush.bf16.msra.mxu2 %v7706_v18  ;;  %v7017_v37 = vsel %vm6866_vm7, %v7009_v51, %v7016_v34  ;;  %v10579_v18 = vld [vmem:[#allocation2 + $0x117c] sm:$0xf]  ;;  %v9057_v51 = vld [vmem:[#allocation2 + $0xc58] sm:$0xf]  ;;  %v10497_v53 = vld [vmem:[#allocation2 + $0xee8] sm:$0xf0] }
 0x1fd   :  { %5996 = vmatpush.bf16.msra.mxu3 %v7710_v28  ;;  %7198 = vst [vmem:[%s11601_s3 + $0x50] sm:$0xff] %v7017_v37  ;;  %9975 = vmatmul.msk.bf16.vlgmr.msra.gmra.mxu0 %vm4386_vm0, %v11241_v24  ;;  %v9714_v43 = vor.u32 %v10579_v18, %v9711_v35  ;;  %v9058_v2 = vor.u32 %v10497_v53, %v9057_v51  ;;  %v8397_v17 = vld [vmem:[#allocation2 + $0x730] sm:$0xf]  ;;  %v10166_v21 = vld [vmem:[#allocation2 + $0x490] sm:$0xf0] }
 0x1fe   :  { %6006 = vmatpush.bf16.msrb.mxu0 %v9694_v20  ;;  %9976 = vmatmul.msk.bf16.vlgmr.msra.gmra.mxu1 %vm4386_vm0, %v11241_v24  ;;  %v7714_v20 = vor.u32 %v10164_v15, %v7713_v12  ;;  %v5557_v15 = vadd.f32 %v11322_v58, %v841_v56  ;;  %v8390_v58 = vor.u32 %v10331_v5, %v8389_v4  ;;  %v10084_v23 = vld [vmem:[#allocation2 + $0x204] sm:$0xf]  ;;  %v7731_v25 = vld [vmem:[#allocation2 + $0x494] sm:$0xf0]  ;;  %v7737_v29 = vld [vmem:[#allocation2 + $0x208] sm:$0xf] }
 0x1ff   :  { %6019 = vmatpush.bf16.msrb.mxu1 %v9698_v55  ;;  %9977 = vmatmul.msk.bf16.vlgmr.msra.gmra.mxu2 %vm4386_vm0, %v11241_v24  ;;  %v9719_v55 = vld [vmem:[#allocation2 + $0x1414] sm:$0xf0]  ;;  %v10167_v30 = vld [vmem:[#allocation2 + $0x498] sm:$0xf0]  ;;  %v10085_v18 = vld [vmem:[#allocation2 + $0x20c] sm:$0xf] }
 0x200   :  { %6032 = vmatpush.bf16.msrb.mxu2 %v9702_v9  ;;  %9978 = vmatmul.msk.bf16.vlgmr.msra.gmra.mxu3 %vm4386_vm0, %v11241_v24  ;;  %v840_v9 = vperm.slane %v11335_v60, 0  ;;  %v9722_v47 = vor.u32 %v10580_v31, %v9719_v55  ;;  %v7739_v10 = vld [vmem:[#allocation2 + $0x49c] sm:$0xf0]  ;;  %v10581_v56 = vld [vmem:[#allocation2 + $0x118c] sm:$0xf] }
 0x201   :  { %6045 = vmatpush.bf16.msrb.mxu3 %v9706_v41  ;;  %v842_v41 = vperm.slane %v11335_v60, 2  ;;  %v10250_v60 = vld [vmem:[#allocation2 + $0x734] sm:$0xf]  ;;  %v9735_v49 = vld [vmem:[#allocation2 + $0x1424] sm:$0xf0] }
 0x202   :  { %6007 = vmatpush.bf16.msrb.mxu0 %v9034_v14  ;;  %v5569_v57 = vpop.f32.mrf.mxu2  ;;  %v5545_v27 = vpop.f32.mrf.mxu0  ;;  %v5544_v12 = vadd.f32 %v11319_v36, %v840_v9  ;;  %v10582_v52 = vld [vmem:[#allocation2 + $0x1194] sm:$0xf]  ;;  %v9067_v5 = vld [vmem:[#allocation2 + $0xef4] sm:$0xf0] }
 0x203   :  { %6020 = vmatpush.bf16.msrb.mxu1 %v9038_v59  ;;  %v5582_v26 = vpop.f32.mrf.mxu3  ;;  %v5558_v28 = vpop.f32.mrf.mxu1  ;;  %v5570_v59 = vadd.f32 %v5569_v57, %v842_v41  ;;  %v8399_v57 = vld [vmem:[#allocation2 + $0x9c4] sm:$0xf0]  ;;  %v8398_v27 = vor.u32 %v10332_v8, %v8397_v17  ;;  %v10417_v17 = vld [vmem:[#allocation2 + $0xc6c] sm:$0xf]  ;;  %v9075_v8 = vld [vmem:[#allocation2 + $0xefc] sm:$0xf0] }
 0x204   :  { %6033 = vmatpush.bf16.msrb.mxu2 %v9042_v61  ;;  %v5583_v61 = vadd.f32 %v5582_v26, %v843_v42  ;;  %v6579_v28 = vpack.c.bf16 %v5557_v15, %v5544_v12  ;;  %v8402_v22 = vor.u32 %v10250_v60, %v8399_v57  ;;  %v10499_v12 = vld [vmem:[#allocation2 + $0xef8] sm:$0xf0] }
 0x205   :  { %6046 = vmatpush.bf16.msrb.mxu3 %v9046_v0  ;;  %v9050_v0 = vor.u32 %v10496_v50, %v9049_v48  ;;  %v7742_v48 = vor.u32 %v10085_v18, %v7739_v10  ;;  %v10334_v18 = vld [vmem:[#allocation2 + $0x9d0] sm:$0xf0]  ;;  %v10168_v10 = vld [vmem:[#allocation2 + $0x4a0] sm:$0xf0] }
 0x206   :  { %6008 = vmatpush.bf16.msrb.mxu0 %v8374_v7  ;;  %v10249_v7 = vld [vmem:[#allocation2 + $0x72c] sm:$0xf]  ;;  %v6580_v36 = vpack.c.bf16 %v5583_v61, %v5570_v59  ;;  %v6778_v51 = vrot.slane %v6579_v28, 3  ;;  %v9738_v61 = vor.u32 %v10582_v52, %v9735_v49  ;;  %v9743_v52 = vld [vmem:[#allocation2 + $0x142c] sm:$0xf0] }
 0x207   :  { %6021 = vmatpush.bf16.msrb.mxu1 %v8378_v16  ;;  %v8394_v26 = vor.u32 %v10249_v7, %v8391_v13  ;;  %v9073_v7 = vld [vmem:[#allocation2 + $0xc68] sm:$0xf]  ;;  %v9749_v49 = vld [vmem:[#allocation2 + $0x11a0] sm:$0xf] }
 0x208   :  { %6034 = vmatpush.bf16.msrb.mxu2 %v8382_v54  ;;  %v6780_v41 = vrot.slane %v6580_v36, 1 }
 0x209   :  { %6047 = vmatpush.bf16.msrb.mxu3 %v8386_v19  ;;  %v7729_v19 = vld [vmem:[#allocation2 + $0x200] sm:$0xf] }
 0x20a   :  { %6009 = vmatpush.bf16.msrb.mxu0 %v7714_v20  ;;  %v5571_v34 = vpop.f32.mrf.mxu2  ;;  %v5595_v14 = vpop.f32.mrf.mxu0  ;;  %v7730_v9 = vor.u32 %v10166_v21, %v7729_v19  ;;  %v9074_v21 = vor.u32 %v10499_v12, %v9073_v7  ;;  %v10418_v7 = vld [vmem:[#allocation2 + $0xc74] sm:$0xf]  ;;  %v9083_v12 = vld [vmem:[#allocation2 + $0xf04] sm:$0xf0] }
 0x20b   :  { %6022 = vmatpush.bf16.msrb.mxu1 %v7718_v33  ;;  %v5584_v37 = vpop.f32.mrf.mxu3  ;;  %v5608_v62 = vpop.f32.mrf.mxu1  ;;  %v5596_v16 = vadd.f32 %v5595_v14, %v844_v45  ;;  %v9725_v33 = vld [vmem:[#allocation2 + $0x1188] sm:$0xf]  ;;  %v9733_v45 = vld [vmem:[#allocation2 + $0x1190] sm:$0xf] }
 0x20c   :  { %6035 = vmatpush.bf16.msrb.mxu2 %v7722_v6  ;;  %v5609_v54 = vadd.f32 %v5608_v62, %v845_v46  ;;  %v10664_v46 = vld [vmem:[#allocation2 + $0x1420] sm:$0xf0]  ;;  %v9065_v62 = vld [vmem:[#allocation2 + $0xc60] sm:$0xf] }
 0x20d   :  { %6048 = vmatpush.bf16.msrb.mxu3 %v7726_v39  ;;  %9979 = vmatmul.msk.bf16.vlgmr.msrb.gmra.mxu0 %vm4386_vm0, %v11241_v24  ;;  %v9727_v39 = vld [vmem:[#allocation2 + $0x141c] sm:$0xf0]  ;;  %v9734_v37 = vor.u32 %v10664_v46, %v9733_v45  ;;  %v9741_v45 = vld [vmem:[#allocation2 + $0x1198] sm:$0xf]  ;;  %v10665_v46 = vld [vmem:[#allocation2 + $0x1428] sm:$0xf0] }
 0x20e   :  { %6058 = vmatpush.bf16.msra.mxu0 %v9710_v40  ;;  %9980 = vmatmul.msk.bf16.vlgmr.msrb.gmra.mxu1 %vm4386_vm0, %v11241_v24  ;;  %v6581_v20 = vpack.c.bf16 %v5609_v54, %v5596_v16  ;;  %v6779_v40 = vrot.slane %v6580_v36, 6  ;;  %v9730_v32 = vor.u32 %v10581_v56, %v9727_v39  ;;  %v8405_v36 = vld [vmem:[#allocation2 + $0x738] sm:$0xf] }
 0x20f   :  { %6071 = vmatpush.bf16.msra.mxu1 %v9714_v43  ;;  %9981 = vmatmul.msk.bf16.vlgmr.msrb.gmra.mxu2 %vm4386_vm0, %v11241_v24 }
 0x210   :  { %6084 = vmatpush.bf16.msra.mxu2 %v9718_v44  ;;  %9982 = vmatmul.msk.bf16.vlgmr.msrb.gmra.mxu3 %vm4386_vm0, %v11241_v24  ;;  %v10663_v24 = vld [vmem:[#allocation2 + $0x1418] sm:$0xf0]  ;;  %v7734_v44 = vor.u32 %v10084_v23, %v7731_v25  ;;  %v6781_v34 = vrot.slane %v6581_v20, 4  ;;  %v6782_v53 = vrot.slane %v6581_v20, 7  ;;  %v7023_v14 = vsel %vm6850_vm1, %v6779_v40, %v6780_v41  ;;  %v10333_v23 = vld [vmem:[#allocation2 + $0x9c8] sm:$0xf0] }
 0x211   :  { %6097 = vmatpush.bf16.msra.mxu3 %v9722_v47  ;;  %v7738_v47 = vor.u32 %v10167_v30, %v7737_v29  ;;  %v9726_v50 = vor.u32 %v10663_v24, %v9725_v33  ;;  %v10251_v25 = vld [vmem:[#allocation2 + $0x73c] sm:$0xf]  ;;  %v8407_v29 = vld [vmem:[#allocation2 + $0x9cc] sm:$0xf0]  ;;  %v8413_v30 = vld [vmem:[#allocation2 + $0x740] sm:$0xf] }
 0x212   :  { %6059 = vmatpush.bf16.msra.mxu0 %v9050_v0  ;;  %v5621_v35 = vpop.f32.mrf.mxu2  ;;  %v5597_v55 = vpop.f32.mrf.mxu0  ;;  %v10416_v0 = vld [vmem:[#allocation2 + $0xc64] sm:$0xf]  ;;  %v8415_v20 = vld [vmem:[#allocation2 + $0x9d4] sm:$0xf0]  ;;  %v8410_v24 = vor.u32 %v10251_v25, %v8407_v29  ;;  %v10169_v40 = vld [vmem:[#allocation2 + $0x4a8] sm:$0xf0]  ;;  %v9086_v29 = vor.u32 %v10418_v7, %v9083_v12 }
 0x213   :  { %6072 = vmatpush.bf16.msra.mxu1 %v9054_v1  ;;  %v5622_v6 = vadd.f32 %v5621_v35, %v846_v38  ;;  %v5634_v31 = vpop.f32.mrf.mxu3  ;;  %v5610_v43 = vpop.f32.mrf.mxu1  ;;  %v7020_v1 = vsel %vm6846_vm2, %v6579_v28, %v6778_v51  ;;  %v10252_v28 = vld [vmem:[#allocation2 + $0x744] sm:$0xf]  ;;  %v8406_v35 = vor.u32 %v10333_v23, %v8405_v36  ;;  %v7747_v55 = vld [vmem:[#allocation2 + $0x4a4] sm:$0xf0]  ;;  %v10087_v41 = vld [vmem:[#allocation2 + $0x21c] sm:$0xf] }
 0x214   :  { %6085 = vmatpush.bf16.msra.mxu2 %v9058_v2  ;;  %v5635_v42 = vadd.f32 %v5634_v31, %v847_v63  ;;  %v10498_v63 = vld [vmem:[#allocation2 + $0xef0] sm:$0xf0]  ;;  %v7027_v2 = vsel %vm6856_vm4, %v6781_v34, %v6782_v53  ;;  %v7024_v15 = vsel %vm6854_vm3, %v7020_v1, %v7023_v14  ;;  %v11382_v33 = vld [vmem:[#allocation4 + $0x60] sm:$0xff]  ;;  %v8418_v39 = vor.u32 %v10252_v28, %v8415_v20  ;;  %v8421_v28 = vld [vmem:[#allocation2 + $0x748] sm:$0xf] }
 0x215   :  { %6098 = vmatpush.bf16.msra.mxu3 %v9062_v3  ;;  %v9066_v19 = vor.u32 %v10498_v63, %v9065_v62  ;;  %v10086_v31 = vld [vmem:[#allocation2 + $0x214] sm:$0xf]  ;;  %v849_v14 = vperm.slane %v11382_v33, 1  ;;  %v851_v62 = vperm.slane %v11382_v33, 3  ;;  %v852_v1 = vperm.slane %v11382_v33, 4 }
 0x216   :  { %6060 = vmatpush.bf16.msra.mxu0 %v8390_v58  ;;  %v6582_v11 = vpack.c.bf16 %v5635_v42, %v5622_v6  ;;  %v9070_v58 = vor.u32 %v10416_v0, %v9067_v5  ;;  %v8414_v6 = vor.u32 %v10334_v18, %v8413_v30  ;;  %v7755_v42 = vld [vmem:[#allocation2 + $0x4ac] sm:$0xf0]  ;;  %v10666_v51 = vld [vmem:[#allocation2 + $0x1430] sm:$0xf0]  ;;  %v7750_v34 = vor.u32 %v10086_v31, %v7747_v55  ;;  %v10500_v5 = vld [vmem:[#allocation2 + $0xf00] sm:$0xf0] }
 0x217   :  { %6073 = vmatpush.bf16.msra.mxu1 %v8394_v26  ;;  %v11372_v26 = vld [vmem:[%s11598_s0] sm:$0x1]  ;;  %v9750_v0 = vor.u32 %v10666_v51, %v9749_v49  ;;  %v854_v36 = vperm.slane %v11382_v33, 6  ;;  %v855_v25 = vperm.slane %v11382_v33, 7  ;;  %v10335_v20 = vld [vmem:[#allocation2 + $0x9d8] sm:$0xf0] }
 0x218   :  { %6086 = vmatpush.bf16.msra.mxu2 %v8398_v27  ;;  %v6783_v38 = vrot.slane %v6582_v11, 2  ;;  %v6784_v59 = vrot.slane %v6582_v11, 5  ;;  %v9078_v27 = vor.u32 %v10417_v17, %v9075_v8  ;;  %v10584_v11 = vld [vmem:[#allocation2 + $0x11a4] sm:$0xf]  ;;  %v10419_v17 = vld [vmem:[#allocation2 + $0xc7c] sm:$0xf] }
 0x219   :  { %6099 = vmatpush.bf16.msra.mxu3 %v8402_v22  ;;  %v7745_v22 = vld [vmem:[#allocation2 + $0x210] sm:$0xf]  ;;  %v8423_v31 = vld [vmem:[#allocation2 + $0x9dc] sm:$0xf0]  ;;  %v10586_v12 = vld [vmem:[#allocation2 + $0x11b4] sm:$0xf] }
 0x21a   :  { %6061 = vmatpush.bf16.msra.mxu0 %v7730_v9  ;;  %v7030_v3 = vsel %vm6860_vm5, %v6783_v38, %v6784_v59  ;;  %v5623_v4 = vpop.f32.mrf.mxu2  ;;  %v11361_v13 = vpop.f32.mrf.mxu0  ;;  %v7753_v9 = vld [vmem:[#allocation2 + $0x218] sm:$0xf]  ;;  %v7758_v38 = vor.u32 %v10087_v41, %v7755_v42  ;;  %v9742_v59 = vor.u32 %v10665_v46, %v9741_v45  ;;  %v9091_v8 = vld [vmem:[#allocation2 + $0xf0c] sm:$0xf0]  ;;  %v10088_v41 = vld [vmem:[#allocation2 + $0x224] sm:$0xf] }
 0x21b   :  { %6074 = vmatpush.bf16.msra.mxu1 %v7734_v44  ;;  %v7031_v16 = vsel %vm6864_vm6, %v7027_v2, %v7030_v3  ;;  %v5636_v54 = vpop.f32.mrf.mxu3  ;;  %v11364_v57 = vpop.f32.mrf.mxu1  ;;  %v7754_v53 = vor.u32 %v10169_v40, %v7753_v9  ;;  %v853_v2 = vperm.slane %v11382_v33, 5  ;;  %v9081_v4 = vld [vmem:[#allocation2 + $0xc70] sm:$0xf]  ;;  %v9094_v18 = vor.u32 %v10419_v17, %v9091_v8  ;;  %v10336_v9 = vld [vmem:[#allocation2 + $0x9e0] sm:$0xf0] }
 0x21c   :  { %6087 = vmatpush.bf16.msra.mxu2 %v7738_v47  ;;  %v7032_v60 = vsel %vm6866_vm7, %v7024_v15, %v7031_v16  ;;  %v10583_v47 = vld [vmem:[#allocation2 + $0x119c] sm:$0xf]  ;;  %v9089_v15 = vld [vmem:[#allocation2 + $0xc78] sm:$0xf]  ;;  %v10501_v54 = vld [vmem:[#allocation2 + $0xf08] sm:$0xf0] }
 0x21d   :  { %6100 = vmatpush.bf16.msra.mxu3 %v7742_v48  ;;  %7199 = vst [vmem:[%s11601_s3 + $0x58] sm:$0xff] %v7032_v60  ;;  %9983 = vmatmul.msk.bf16.vlgmr.msra.gmra.mxu0 %vm4386_vm0, %v11372_v26  ;;  %v9746_v63 = vor.u32 %v10583_v47, %v9743_v52  ;;  %v9090_v30 = vor.u32 %v10501_v54, %v9089_v15  ;;  %v8429_v55 = vld [vmem:[#allocation2 + $0x750] sm:$0xf]  ;;  %v10170_v40 = vld [vmem:[#allocation2 + $0x4b0] sm:$0xf0] }
 0x21e   :  { %6110 = vmatpush.bf16.msrb.mxu0 %v9726_v50  ;;  %9984 = vmatmul.msk.bf16.vlgmr.msra.gmra.mxu1 %vm4386_vm0, %v11372_v26  ;;  %v7746_v50 = vor.u32 %v10168_v10, %v7745_v22  ;;  %v5661_v10 = vadd.f32 %v11364_v57, %v849_v14  ;;  %v8422_v57 = vor.u32 %v10335_v20, %v8421_v28  ;;  %v7763_v42 = vld [vmem:[#allocation2 + $0x4b4] sm:$0xf0]  ;;  %v7769_v45 = vld [vmem:[#allocation2 + $0x228] sm:$0xf]  ;;  %v10171_v46 = vld [vmem:[#allocation2 + $0x4b8] sm:$0xf0] }
 0x21f   :  { %6123 = vmatpush.bf16.msrb.mxu1 %v9730_v32  ;;  %9985 = vmatmul.msk.bf16.vlgmr.msra.gmra.mxu2 %vm4386_vm0, %v11372_v26  ;;  %v9751_v32 = vld [vmem:[#allocation2 + $0x1434] sm:$0xf0]  ;;  %v10089_v47 = vld [vmem:[#allocation2 + $0x22c] sm:$0xf]  ;;  %v7771_v51 = vld [vmem:[#allocation2 + $0x4bc] sm:$0xf0] }
 0x220   :  { %6136 = vmatpush.bf16.msrb.mxu2 %v9734_v37  ;;  %9986 = vmatmul.msk.bf16.vlgmr.msra.gmra.mxu3 %vm4386_vm0, %v11372_v26  ;;  %v848_v37 = vperm.slane %v11382_v33, 0  ;;  %v9754_v3 = vor.u32 %v10584_v11, %v9751_v32  ;;  %v9767_v15 = vld [vmem:[#allocation2 + $0x1444] sm:$0xf0] }
 0x221   :  { %6149 = vmatpush.bf16.msrb.mxu3 %v9738_v61  ;;  %v850_v61 = vperm.slane %v11382_v33, 2  ;;  %v10254_v33 = vld [vmem:[#allocation2 + $0x754] sm:$0xf] }
 0x222   :  { %6111 = vmatpush.bf16.msrb.mxu0 %v9066_v19  ;;  %v5673_v56 = vpop.f32.mrf.mxu2  ;;  %v5649_v44 = vpop.f32.mrf.mxu0  ;;  %v5648_v22 = vadd.f32 %v11361_v13, %v848_v37 }
 0x223   :  { %6124 = vmatpush.bf16.msrb.mxu1 %v9070_v58  ;;  %v5686_v43 = vpop.f32.mrf.mxu3  ;;  %v5662_v48 = vpop.f32.mrf.mxu1  ;;  %v5674_v58 = vadd.f32 %v5673_v56, %v850_v61  ;;  %v8431_v56 = vld [vmem:[#allocation2 + $0x9e4] sm:$0xf0]  ;;  %v8430_v44 = vor.u32 %v10336_v9, %v8429_v55  ;;  %v10421_v9 = vld [vmem:[#allocation2 + $0xc8c] sm:$0xf] }
 0x224   :  { %6137 = vmatpush.bf16.msrb.mxu2 %v9074_v21  ;;  %v5687_v21 = vadd.f32 %v5686_v43, %v851_v62  ;;  %v6583_v48 = vpack.c.bf16 %v5661_v10, %v5648_v22  ;;  %v8434_v49 = vor.u32 %v10254_v33, %v8431_v56  ;;  %v9105_v22 = vld [vmem:[#allocation2 + $0xc88] sm:$0xf]  ;;  %v10503_v10 = vld [vmem:[#allocation2 + $0xf18] sm:$0xf0]  ;;  %v9107_v33 = vld [vmem:[#allocation2 + $0xf1c] sm:$0xf0] }
 0x225   :  { %6150 = vmatpush.bf16.msrb.mxu3 %v9078_v27  ;;  %v9082_v27 = vor.u32 %v10500_v5, %v9081_v4  ;;  %v7770_v4 = vor.u32 %v10171_v46, %v7769_v45  ;;  %v7774_v5 = vor.u32 %v10089_v47, %v7771_v51  ;;  %v8439_v45 = vld [vmem:[#allocation2 + $0x9ec] sm:$0xf0]  ;;  %v8445_v46 = vld [vmem:[#allocation2 + $0x760] sm:$0xf]  ;;  %v10338_v47 = vld [vmem:[#allocation2 + $0x9f0] sm:$0xf0] }
 0x226   :  { %6112 = vmatpush.bf16.msrb.mxu0 %v8406_v35  ;;  %v10253_v35 = vld [vmem:[#allocation2 + $0x74c] sm:$0xf]  ;;  %v6584_v13 = vpack.c.bf16 %v5687_v21, %v5674_v58  ;;  %v10172_v51 = vld [vmem:[#allocation2 + $0x4c0] sm:$0xf0] }
 0x227   :  { %6125 = vmatpush.bf16.msrb.mxu1 %v8410_v24  ;;  %v8426_v43 = vor.u32 %v10253_v35, %v8423_v31  ;;  %v9099_v35 = vld [vmem:[#allocation2 + $0xf14] sm:$0xf0] }
 0x228   :  { %6138 = vmatpush.bf16.msrb.mxu2 %v8414_v6  ;;  %v6786_v61 = vrot.slane %v6584_v13, 6  ;;  %v6787_v62 = vrot.slane %v6584_v13, 1 }
 0x229   :  { %6151 = vmatpush.bf16.msrb.mxu3 %v8418_v39  ;;  %v7761_v39 = vld [vmem:[#allocation2 + $0x220] sm:$0xf] }
 0x22a   :  { %6113 = vmatpush.bf16.msrb.mxu0 %v7746_v50  ;;  %v5675_v16 = vpop.f32.mrf.mxu2  ;;  %v5699_v19 = vpop.f32.mrf.mxu0  ;;  %v7762_v14 = vor.u32 %v10170_v40, %v7761_v39 }
 0x22b   :  { %6126 = vmatpush.bf16.msrb.mxu1 %v7750_v34  ;;  %v5688_v60 = vpop.f32.mrf.mxu3  ;;  %v5712_v23 = vpop.f32.mrf.mxu1  ;;  %v5700_v24 = vadd.f32 %v5699_v19, %v852_v1  ;;  %v9757_v34 = vld [vmem:[#allocation2 + $0x11a8] sm:$0xf]  ;;  %v7766_v1 = vor.u32 %v10088_v41, %v7763_v42  ;;  %v6785_v16 = vrot.slane %v6583_v48, 3  ;;  %v9106_v41 = vor.u32 %v10503_v10, %v9105_v22  ;;  %v10337_v42 = vld [vmem:[#allocation2 + $0x9e8] sm:$0xf0] }
 0x22c   :  { %6139 = vmatpush.bf16.msrb.mxu2 %v7754_v53  ;;  %v5713_v6 = vadd.f32 %v5712_v23, %v853_v2  ;;  %v10667_v53 = vld [vmem:[#allocation2 + $0x1438] sm:$0xf0]  ;;  %v9765_v2 = vld [vmem:[#allocation2 + $0x11b0] sm:$0xf]  ;;  %v9770_v23 = vor.u32 %v10586_v12, %v9767_v15  ;;  %v9781_v15 = vld [vmem:[#allocation2 + $0x11c0] sm:$0xf] }
 0x22d   :  { %6152 = vmatpush.bf16.msrb.mxu3 %v7758_v38  ;;  %9987 = vmatmul.msk.bf16.vlgmr.msrb.gmra.mxu0 %vm4386_vm0, %v11372_v26  ;;  %v10585_v38 = vld [vmem:[#allocation2 + $0x11ac] sm:$0xf]  ;;  %v9758_v7 = vor.u32 %v10667_v53, %v9757_v34  ;;  %v9775_v12 = vld [vmem:[#allocation2 + $0x144c] sm:$0xf0]  ;;  %v10422_v22 = vld [vmem:[#allocation2 + $0xc94] sm:$0xf] }
 0x22e   :  { %6162 = vmatpush.bf16.msra.mxu0 %v9742_v59  ;;  %9988 = vmatmul.msk.bf16.vlgmr.msrb.gmra.mxu1 %vm4386_vm0, %v11372_v26  ;;  %v6585_v50 = vpack.c.bf16 %v5713_v6, %v5700_v24  ;;  %v9759_v59 = vld [vmem:[#allocation2 + $0x143c] sm:$0xf0]  ;;  %v11424_v34 = vld [vmem:[#allocation4 + $0x68] sm:$0xff] }
 0x22f   :  { %6175 = vmatpush.bf16.msra.mxu1 %v9746_v63  ;;  %9989 = vmatmul.msk.bf16.vlgmr.msrb.gmra.mxu2 %vm4386_vm0, %v11372_v26  ;;  %v9762_v60 = vor.u32 %v10585_v38, %v9759_v59  ;;  %v9115_v10 = vld [vmem:[#allocation2 + $0xf24] sm:$0xf0] }
 0x230   :  { %6188 = vmatpush.bf16.msra.mxu2 %v9750_v0  ;;  %9990 = vmatmul.msk.bf16.vlgmr.msrb.gmra.mxu3 %vm4386_vm0, %v11372_v26  ;;  %v6788_v54 = vrot.slane %v6585_v50, 4  ;;  %v6789_v17 = vrot.slane %v6585_v50, 7  ;;  %v8447_v50 = vld [vmem:[#allocation2 + $0x9f4] sm:$0xf0] }
 0x231   :  { %6201 = vmatpush.bf16.msra.mxu3 %v9754_v3  ;;  %v10668_v3 = vld [vmem:[#allocation2 + $0x1440] sm:$0xf0] }
 0x232   :  { %6163 = vmatpush.bf16.msra.mxu0 %v9082_v27  ;;  %v5725_v52 = vpop.f32.mrf.mxu2  ;;  %v5701_v37 = vpop.f32.mrf.mxu0  ;;  %v9766_v19 = vor.u32 %v10668_v3, %v9765_v2  ;;  %v10502_v27 = vld [vmem:[#allocation2 + $0xf10] sm:$0xf0]  ;;  %v9773_v2 = vld [vmem:[#allocation2 + $0x11b8] sm:$0xf]  ;;  %v10669_v3 = vld [vmem:[#allocation2 + $0x1448] sm:$0xf0] }
 0x233   :  { %6176 = vmatpush.bf16.msra.mxu1 %v9086_v29  ;;  %v5726_v11 = vadd.f32 %v5725_v52, %v854_v36  ;;  %v5738_v32 = vpop.f32.mrf.mxu3  ;;  %v5714_v0 = vpop.f32.mrf.mxu1  ;;  %v7038_v36 = vsel %vm6850_vm1, %v6786_v61, %v6787_v62  ;;  %v10420_v29 = vld [vmem:[#allocation2 + $0xc84] sm:$0xf]  ;;  %v7779_v37 = vld [vmem:[#allocation2 + $0x4c4] sm:$0xf0]  ;;  %v10173_v61 = vld [vmem:[#allocation2 + $0x4c8] sm:$0xf0] }
 0x234   :  { %6189 = vmatpush.bf16.msra.mxu2 %v9090_v30  ;;  %v5739_v63 = vadd.f32 %v5738_v32, %v855_v25  ;;  %v9097_v25 = vld [vmem:[#allocation2 + $0xc80] sm:$0xf]  ;;  %v7035_v30 = vsel %vm6846_vm2, %v6583_v48, %v6785_v16  ;;  %v9102_v40 = vor.u32 %v10420_v29, %v9099_v35  ;;  %v10256_v48 = vld [vmem:[#allocation2 + $0x764] sm:$0xf]  ;;  %v10090_v32 = vld [vmem:[#allocation2 + $0x234] sm:$0xf] }
 0x235   :  { %6202 = vmatpush.bf16.msra.mxu3 %v9094_v18  ;;  %v7042_v18 = vsel %vm6856_vm4, %v6788_v54, %v6789_v17  ;;  %v7039_v24 = vsel %vm6854_vm3, %v7035_v30, %v7038_v36  ;;  %v9098_v13 = vor.u32 %v10502_v27, %v9097_v25  ;;  %v8450_v59 = vor.u32 %v10256_v48, %v8447_v50  ;;  %v10091_v62 = vld [vmem:[#allocation2 + $0x23c] sm:$0xf]  ;;  %v10670_v16 = vld [vmem:[#allocation2 + $0x1450] sm:$0xf0]  ;;  %v10504_v35 = vld [vmem:[#allocation2 + $0xf20] sm:$0xf0] }
 0x236   :  { %6164 = vmatpush.bf16.msra.mxu0 %v8422_v57  ;;  %v6586_v8 = vpack.c.bf16 %v5739_v63, %v5726_v11  ;;  %v8437_v57 = vld [vmem:[#allocation2 + $0x758] sm:$0xf]  ;;  %v8446_v11 = vor.u32 %v10338_v47, %v8445_v46  ;;  %v7787_v63 = vld [vmem:[#allocation2 + $0x4cc] sm:$0xf0]  ;;  %v7782_v54 = vor.u32 %v10090_v32, %v7779_v37  ;;  %v857_v36 = vperm.slane %v11424_v34, 1 }
 0x237   :  { %6177 = vmatpush.bf16.msra.mxu1 %v8426_v43  ;;  %v10255_v43 = vld [vmem:[#allocation2 + $0x75c] sm:$0xf]  ;;  %v8438_v52 = vor.u32 %v10337_v42, %v8437_v57  ;;  %v859_v25 = vperm.slane %v11424_v34, 3  ;;  %v9782_v29 = vor.u32 %v10670_v16, %v9781_v15  ;;  %v860_v30 = vperm.slane %v11424_v34, 4  ;;  %v8453_v48 = vld [vmem:[#allocation2 + $0x768] sm:$0xf] }
 0x238   :  { %6190 = vmatpush.bf16.msra.mxu2 %v8430_v44  ;;  %v6790_v58 = vrot.slane %v6586_v8, 2  ;;  %v6791_v21 = vrot.slane %v6586_v8, 5  ;;  %v9110_v44 = vor.u32 %v10421_v9, %v9107_v33  ;;  %v8442_v53 = vor.u32 %v10255_v43, %v8439_v45  ;;  %v10588_v8 = vld [vmem:[#allocation2 + $0x11c4] sm:$0xf]  ;;  %v10423_v9 = vld [vmem:[#allocation2 + $0xc9c] sm:$0xf] }
 0x239   :  { %6203 = vmatpush.bf16.msra.mxu3 %v8434_v49  ;;  %v7777_v49 = vld [vmem:[#allocation2 + $0x230] sm:$0xf]  ;;  %v862_v57 = vperm.slane %v11424_v34, 6  ;;  %v863_v43 = vperm.slane %v11424_v34, 7  ;;  %v9118_v45 = vor.u32 %v10422_v22, %v9115_v10  ;;  %v10339_v50 = vld [vmem:[#allocation2 + $0x9f8] sm:$0xf0] }
 0x23a   :  { %6165 = vmatpush.bf16.msra.mxu0 %v7762_v14  ;;  %v7045_v28 = vsel %vm6860_vm5, %v6790_v58, %v6791_v21  ;;  %v5727_v20 = vpop.f32.mrf.mxu2  ;;  %v11408_v55 = vpop.f32.mrf.mxu0  ;;  %v7785_v14 = vld [vmem:[#allocation2 + $0x238] sm:$0xf]  ;;  %v7790_v58 = vor.u32 %v10091_v62, %v7787_v63  ;;  %v9774_v21 = vor.u32 %v10669_v3, %v9773_v2  ;;  %v9123_v33 = vld [vmem:[#allocation2 + $0xf2c] sm:$0xf0]  ;;  %v8455_v32 = vld [vmem:[#allocation2 + $0x9fc] sm:$0xf0] }
 0x23b   :  { %6178 = vmatpush.bf16.msra.mxu1 %v7766_v1  ;;  %v7046_v6 = vsel %vm6864_vm6, %v7042_v18, %v7045_v28  ;;  %v5740_v31 = vpop.f32.mrf.mxu3  ;;  %v11411_v39 = vpop.f32.mrf.mxu1  ;;  %v7786_v17 = vor.u32 %v10173_v61, %v7785_v14  ;;  %v861_v18 = vperm.slane %v11424_v34, 5  ;;  %v9113_v20 = vld [vmem:[#allocation2 + $0xc90] sm:$0xf]  ;;  %v9126_v47 = vor.u32 %v10423_v9, %v9123_v33  ;;  %v10340_v14 = vld [vmem:[#allocation2 + $0xa00] sm:$0xf0] }
 0x23c   :  { %6191 = vmatpush.bf16.msra.mxu2 %v7770_v4  ;;  %v7047_v56 = vsel %vm6866_vm7, %v7039_v24, %v7046_v6  ;;  %v10587_v4 = vld [vmem:[#allocation2 + $0x11bc] sm:$0xf]  ;;  %v9121_v24 = vld [vmem:[#allocation2 + $0xc98] sm:$0xf]  ;;  %v10505_v31 = vld [vmem:[#allocation2 + $0xf28] sm:$0xf0] }
 0x23d   :  { %6204 = vmatpush.bf16.msra.mxu3 %v7774_v5  ;;  %7200 = vst [vmem:[%s11601_s3 + $0x60] sm:$0xff] %v7047_v56  ;;  %9991 = vmatmul.msk.bf16.vlgmr.msra.gmra.mxu0 %vm4386_vm0, %v11372_v26  ;;  %v9778_v27 = vor.u32 %v10587_v4, %v9775_v12  ;;  %v9122_v46 = vor.u32 %v10505_v31, %v9121_v24  ;;  %v8461_v37 = vld [vmem:[#allocation2 + $0x770] sm:$0xf]  ;;  %v10174_v61 = vld [vmem:[#allocation2 + $0x4d0] sm:$0xf0] }
 0x23e   :  { %6214 = vmatpush.bf16.msrb.mxu0 %v9758_v7  ;;  %9992 = vmatmul.msk.bf16.vlgmr.msra.gmra.mxu1 %vm4386_vm0, %v11372_v26  ;;  %v7778_v7 = vor.u32 %v10172_v51, %v7777_v49  ;;  %v5765_v51 = vadd.f32 %v11411_v39, %v857_v36  ;;  %v8454_v39 = vor.u32 %v10339_v50, %v8453_v48  ;;  %v10092_v62 = vld [vmem:[#allocation2 + $0x244] sm:$0xf]  ;;  %v7795_v63 = vld [vmem:[#allocation2 + $0x4d4] sm:$0xf0]  ;;  %v7801_v2 = vld [vmem:[#allocation2 + $0x248] sm:$0xf] }
 0x23f   :  { %6227 = vmatpush.bf16.msrb.mxu1 %v9762_v60  ;;  %9993 = vmatmul.msk.bf16.vlgmr.msra.gmra.mxu2 %vm4386_vm0, %v11372_v26  ;;  %v9783_v60 = vld [vmem:[#allocation2 + $0x1454] sm:$0xf0]  ;;  %v10175_v3 = vld [vmem:[#allocation2 + $0x4d8] sm:$0xf0]  ;;  %v10093_v4 = vld [vmem:[#allocation2 + $0x24c] sm:$0xf] }
 0x240   :  { %6240 = vmatpush.bf16.msrb.mxu2 %v9766_v19  ;;  %9994 = vmatmul.msk.bf16.vlgmr.msra.gmra.mxu3 %vm4386_vm0, %v11372_v26  ;;  %v856_v19 = vperm.slane %v11424_v34, 0  ;;  %v9786_v28 = vor.u32 %v10588_v8, %v9783_v60  ;;  %v7803_v16 = vld [vmem:[#allocation2 + $0x4dc] sm:$0xf0]  ;;  %v10590_v10 = vld [vmem:[#allocation2 + $0x11d4] sm:$0xf] }
 0x241   :  { %6253 = vmatpush.bf16.msrb.mxu3 %v9770_v23  ;;  %v858_v23 = vperm.slane %v11424_v34, 2  ;;  %v10258_v34 = vld [vmem:[#allocation2 + $0x774] sm:$0xf]  ;;  %v9799_v24 = vld [vmem:[#allocation2 + $0x1464] sm:$0xf0] }
 0x242   :  { %6215 = vmatpush.bf16.msrb.mxu0 %v9098_v13  ;;  %v5777_v38 = vpop.f32.mrf.mxu2  ;;  %v5753_v1 = vpop.f32.mrf.mxu0  ;;  %v5752_v49 = vadd.f32 %v11408_v55, %v856_v19 }
 0x243   :  { %6228 = vmatpush.bf16.msrb.mxu1 %v9102_v40  ;;  %v5790_v0 = vpop.f32.mrf.mxu3  ;;  %v5766_v5 = vpop.f32.mrf.mxu1  ;;  %v5778_v40 = vadd.f32 %v5777_v38, %v858_v23  ;;  %v8463_v38 = vld [vmem:[#allocation2 + $0xa04] sm:$0xf0]  ;;  %v8462_v1 = vor.u32 %v10340_v14, %v8461_v37  ;;  %v10425_v14 = vld [vmem:[#allocation2 + $0xcac] sm:$0xf] }
 0x244   :  { %6241 = vmatpush.bf16.msrb.mxu2 %v9106_v41  ;;  %v5791_v41 = vadd.f32 %v5790_v0, %v859_v25  ;;  %v6587_v5 = vpack.c.bf16 %v5765_v51, %v5752_v49  ;;  %v8466_v15 = vor.u32 %v10258_v34, %v8463_v38  ;;  %v9137_v49 = vld [vmem:[#allocation2 + $0xca8] sm:$0xf]  ;;  %v10507_v51 = vld [vmem:[#allocation2 + $0xf38] sm:$0xf0]  ;;  %v9139_v34 = vld [vmem:[#allocation2 + $0xf3c] sm:$0xf0] }
 0x245   :  { %6254 = vmatpush.bf16.msrb.mxu3 %v9110_v44  ;;  %v9114_v44 = vor.u32 %v10504_v35, %v9113_v20  ;;  %v7802_v20 = vor.u32 %v10175_v3, %v7801_v2  ;;  %v7806_v35 = vor.u32 %v10093_v4, %v7803_v16  ;;  %v8471_v2 = vld [vmem:[#allocation2 + $0xa0c] sm:$0xf0]  ;;  %v8477_v3 = vld [vmem:[#allocation2 + $0x780] sm:$0xf]  ;;  %v10342_v4 = vld [vmem:[#allocation2 + $0xa10] sm:$0xf0] }
 0x246   :  { %6216 = vmatpush.bf16.msrb.mxu0 %v8438_v52  ;;  %v10257_v52 = vld [vmem:[#allocation2 + $0x76c] sm:$0xf]  ;;  %v6588_v55 = vpack.c.bf16 %v5791_v41, %v5778_v40  ;;  %v10176_v16 = vld [vmem:[#allocation2 + $0x4e0] sm:$0xf0] }
 0x247   :  { %6229 = vmatpush.bf16.msrb.mxu1 %v8442_v53  ;;  %v8458_v0 = vor.u32 %v10257_v52, %v8455_v32  ;;  %v9131_v52 = vld [vmem:[#allocation2 + $0xf34] sm:$0xf0] }
 0x248   :  { %6242 = vmatpush.bf16.msrb.mxu2 %v8446_v11  ;;  %v6793_v23 = vrot.slane %v6588_v55, 6  ;;  %v6794_v25 = vrot.slane %v6588_v55, 1 }
 0x249   :  { %6255 = vmatpush.bf16.msrb.mxu3 %v8450_v59  ;;  %v7793_v59 = vld [vmem:[#allocation2 + $0x240] sm:$0xf] }
 0x24a   :  { %6217 = vmatpush.bf16.msrb.mxu0 %v7778_v7  ;;  %v5779_v6 = vpop.f32.mrf.mxu2  ;;  %v5803_v13 = vpop.f32.mrf.mxu0  ;;  %v7794_v36 = vor.u32 %v10174_v61, %v7793_v59 }
 0x24b   :  { %6230 = vmatpush.bf16.msrb.mxu1 %v7782_v54  ;;  %v5792_v56 = vpop.f32.mrf.mxu3  ;;  %v5816_v42 = vpop.f32.mrf.mxu1  ;;  %v5804_v53 = vadd.f32 %v5803_v13, %v860_v30  ;;  %v9789_v54 = vld [vmem:[#allocation2 + $0x11c8] sm:$0xf]  ;;  %v7798_v30 = vor.u32 %v10092_v62, %v7795_v63  ;;  %v6792_v6 = vrot.slane %v6587_v5, 3  ;;  %v9138_v62 = vor.u32 %v10507_v51, %v9137_v49  ;;  %v10341_v63 = vld [vmem:[#allocation2 + $0xa08] sm:$0xf0] }
 0x24c   :  { %6243 = vmatpush.bf16.msrb.mxu2 %v7786_v17  ;;  %v5817_v11 = vadd.f32 %v5816_v42, %v861_v18  ;;  %v10671_v17 = vld [vmem:[#allocation2 + $0x1458] sm:$0xf0]  ;;  %v9797_v18 = vld [vmem:[#allocation2 + $0x11d0] sm:$0xf]  ;;  %v9802_v42 = vor.u32 %v10590_v10, %v9799_v24  ;;  %v9813_v24 = vld [vmem:[#allocation2 + $0x11e0] sm:$0xf] }
 0x24d   :  { %6256 = vmatpush.bf16.msrb.mxu3 %v7790_v58  ;;  %9995 = vmatmul.msk.bf16.vlgmr.msrb.gmra.mxu0 %vm4386_vm0, %v11372_v26  ;;  %v10589_v58 = vld [vmem:[#allocation2 + $0x11cc] sm:$0xf]  ;;  %v9790_v22 = vor.u32 %v10671_v17, %v9789_v54  ;;  %v11466_v54 = vld [vmem:[#allocation4 + $0x70] sm:$0xff]  ;;  %v9147_v51 = vld [vmem:[#allocation2 + $0xf44] sm:$0xf0] }
 0x24e   :  { %6266 = vmatpush.bf16.msra.mxu0 %v9774_v21  ;;  %9996 = vmatmul.msk.bf16.vlgmr.msrb.gmra.mxu1 %vm4386_vm0, %v11372_v26  ;;  %v6589_v7 = vpack.c.bf16 %v5817_v11, %v5804_v53  ;;  %v9791_v21 = vld [vmem:[#allocation2 + $0x145c] sm:$0xf0]  ;;  %v9807_v10 = vld [vmem:[#allocation2 + $0x146c] sm:$0xf0]  ;;  %v10426_v49 = vld [vmem:[#allocation2 + $0xcb4] sm:$0xf] }
 0x24f   :  { %6279 = vmatpush.bf16.msra.mxu1 %v9778_v27  ;;  %9997 = vmatmul.msk.bf16.vlgmr.msrb.gmra.mxu2 %vm4386_vm0, %v11372_v26  ;;  %v9794_v56 = vor.u32 %v10589_v58, %v9791_v21 }
 0x250   :  { %6292 = vmatpush.bf16.msra.mxu2 %v9782_v29  ;;  %9998 = vmatmul.msk.bf16.vlgmr.msrb.gmra.mxu3 %vm4386_vm0, %v11372_v26  ;;  %v6795_v31 = vrot.slane %v6589_v7, 4  ;;  %v6796_v9 = vrot.slane %v6589_v7, 7  ;;  %v8479_v7 = vld [vmem:[#allocation2 + $0xa14] sm:$0xf0] }
 0x251   :  { %6305 = vmatpush.bf16.msra.mxu3 %v9786_v28  ;;  %v10672_v28 = vld [vmem:[#allocation2 + $0x1460] sm:$0xf0] }
 0x252   :  { %6267 = vmatpush.bf16.msra.mxu0 %v9114_v44  ;;  %v5829_v12 = vpop.f32.mrf.mxu2  ;;  %v5805_v19 = vpop.f32.mrf.mxu0  ;;  %v9798_v13 = vor.u32 %v10672_v28, %v9797_v18  ;;  %v10506_v44 = vld [vmem:[#allocation2 + $0xf30] sm:$0xf0]  ;;  %v9805_v18 = vld [vmem:[#allocation2 + $0x11d8] sm:$0xf]  ;;  %v10673_v28 = vld [vmem:[#allocation2 + $0x1468] sm:$0xf0] }
 0x253   :  { %6280 = vmatpush.bf16.msra.mxu1 %v9118_v45  ;;  %v5830_v8 = vadd.f32 %v5829_v12, %v862_v57  ;;  %v5842_v60 = vpop.f32.mrf.mxu3  ;;  %v5818_v29 = vpop.f32.mrf.mxu1  ;;  %v7053_v57 = vsel %vm6850_vm1, %v6793_v23, %v6794_v25  ;;  %v10424_v45 = vld [vmem:[#allocation2 + $0xca4] sm:$0xf]  ;;  %v7811_v19 = vld [vmem:[#allocation2 + $0x4e4] sm:$0xf0]  ;;  %v10177_v23 = vld [vmem:[#allocation2 + $0x4e8] sm:$0xf0] }
 0x254   :  { %6293 = vmatpush.bf16.msra.mxu2 %v9122_v46  ;;  %v5843_v27 = vadd.f32 %v5842_v60, %v863_v43  ;;  %v9129_v43 = vld [vmem:[#allocation2 + $0xca0] sm:$0xf]  ;;  %v7050_v46 = vsel %vm6846_vm2, %v6587_v5, %v6792_v6  ;;  %v9134_v61 = vor.u32 %v10424_v45, %v9131_v52  ;;  %v10260_v5 = vld [vmem:[#allocation2 + $0x784] sm:$0xf]  ;;  %v10094_v60 = vld [vmem:[#allocation2 + $0x254] sm:$0xf] }
 0x255   :  { %6306 = vmatpush.bf16.msra.mxu3 %v9126_v47  ;;  %v7057_v47 = vsel %vm6856_vm4, %v6795_v31, %v6796_v9  ;;  %v7054_v53 = vsel %vm6854_vm3, %v7050_v46, %v7053_v57  ;;  %v9130_v55 = vor.u32 %v10506_v44, %v9129_v43  ;;  %v8482_v21 = vor.u32 %v10260_v5, %v8479_v7  ;;  %v10095_v25 = vld [vmem:[#allocation2 + $0x25c] sm:$0xf]  ;;  %v10674_v6 = vld [vmem:[#allocation2 + $0x1470] sm:$0xf0]  ;;  %v10508_v52 = vld [vmem:[#allocation2 + $0xf40] sm:$0xf0] }
 0x256   :  { %6268 = vmatpush.bf16.msra.mxu0 %v8454_v39  ;;  %v6590_v33 = vpack.c.bf16 %v5843_v27, %v5830_v8  ;;  %v8469_v39 = vld [vmem:[#allocation2 + $0x778] sm:$0xf]  ;;  %v8478_v8 = vor.u32 %v10342_v4, %v8477_v3  ;;  %v7819_v27 = vld [vmem:[#allocation2 + $0x4ec] sm:$0xf0]  ;;  %v7814_v31 = vor.u32 %v10094_v60, %v7811_v19  ;;  %v865_v57 = vperm.slane %v11466_v54, 1 }
 0x257   :  { %6281 = vmatpush.bf16.msra.mxu1 %v8458_v0  ;;  %v10259_v0 = vld [vmem:[#allocation2 + $0x77c] sm:$0xf]  ;;  %v8470_v12 = vor.u32 %v10341_v63, %v8469_v39  ;;  %v867_v43 = vperm.slane %v11466_v54, 3  ;;  %v9814_v45 = vor.u32 %v10674_v6, %v9813_v24  ;;  %v868_v46 = vperm.slane %v11466_v54, 4  ;;  %v8485_v5 = vld [vmem:[#allocation2 + $0x788] sm:$0xf] }
 0x258   :  { %6294 = vmatpush.bf16.msra.mxu2 %v8462_v1  ;;  %v6797_v40 = vrot.slane %v6590_v33, 2  ;;  %v6798_v41 = vrot.slane %v6590_v33, 5  ;;  %v9142_v1 = vor.u32 %v10425_v14, %v9139_v34  ;;  %v8474_v17 = vor.u32 %v10259_v0, %v8471_v2  ;;  %v10592_v33 = vld [vmem:[#allocation2 + $0x11e4] sm:$0xf]  ;;  %v10427_v14 = vld [vmem:[#allocation2 + $0xcbc] sm:$0xf] }
 0x259   :  { %6307 = vmatpush.bf16.msra.mxu3 %v8466_v15  ;;  %v7809_v15 = vld [vmem:[#allocation2 + $0x250] sm:$0xf]  ;;  %v870_v39 = vperm.slane %v11466_v54, 6  ;;  %v871_v0 = vperm.slane %v11466_v54, 7  ;;  %v9150_v2 = vor.u32 %v10426_v49, %v9147_v51  ;;  %v10343_v7 = vld [vmem:[#allocation2 + $0xa18] sm:$0xf0] }
 0x25a   :  { %6269 = vmatpush.bf16.msra.mxu0 %v7794_v36  ;;  %v7060_v48 = vsel %vm6860_vm5, %v6797_v40, %v6798_v41  ;;  %v5831_v50 = vpop.f32.mrf.mxu2  ;;  %v11450_v37 = vpop.f32.mrf.mxu0  ;;  %v7817_v36 = vld [vmem:[#allocation2 + $0x258] sm:$0xf]  ;;  %v7822_v40 = vor.u32 %v10095_v25, %v7819_v27  ;;  %v9806_v41 = vor.u32 %v10673_v28, %v9805_v18  ;;  %v9155_v34 = vld [vmem:[#allocation2 + $0xf4c] sm:$0xf0]  ;;  %v8487_v60 = vld [vmem:[#allocation2 + $0xa1c] sm:$0xf0] }
 0x25b   :  { %6282 = vmatpush.bf16.msra.mxu1 %v7798_v30  ;;  %v7061_v11 = vsel %vm6864_vm6, %v7057_v47, %v7060_v48  ;;  %v5844_v32 = vpop.f32.mrf.mxu3  ;;  %v11453_v59 = vpop.f32.mrf.mxu1  ;;  %v7818_v9 = vor.u32 %v10177_v23, %v7817_v36  ;;  %v869_v47 = vperm.slane %v11466_v54, 5  ;;  %v9145_v50 = vld [vmem:[#allocation2 + $0xcb0] sm:$0xf]  ;;  %v9158_v4 = vor.u32 %v10427_v14, %v9155_v34  ;;  %v10344_v36 = vld [vmem:[#allocation2 + $0xa20] sm:$0xf0] }
 0x25c   :  { %6295 = vmatpush.bf16.msra.mxu2 %v7802_v20  ;;  %v7062_v38 = vsel %vm6866_vm7, %v7054_v53, %v7061_v11  ;;  %v10591_v20 = vld [vmem:[#allocation2 + $0x11dc] sm:$0xf]  ;;  %v9153_v53 = vld [vmem:[#allocation2 + $0xcb8] sm:$0xf]  ;;  %v10509_v32 = vld [vmem:[#allocation2 + $0xf48] sm:$0xf0] }
 0x25d   :  { %6308 = vmatpush.bf16.msra.mxu3 %v7806_v35  ;;  %7201 = vst [vmem:[%s11601_s3 + $0x68] sm:$0xff] %v7062_v38  ;;  %9999 = vmatmul.msk.bf16.vlgmr.msra.gmra.mxu0 %vm4386_vm0, %v11372_v26  ;;  %v9810_v44 = vor.u32 %v10591_v20, %v9807_v10  ;;  %v9154_v3 = vor.u32 %v10509_v32, %v9153_v53  ;;  %v8493_v19 = vld [vmem:[#allocation2 + $0x790] sm:$0xf]  ;;  %v10178_v23 = vld [vmem:[#allocation2 + $0x4f0] sm:$0xf0] }
 0x25e   :  { %6318 = vmatpush.bf16.msrb.mxu0 %v9790_v22  ;;  %10000 = vmatmul.msk.bf16.vlgmr.msra.gmra.mxu1 %vm4386_vm0, %v11372_v26  ;;  %v7810_v22 = vor.u32 %v10176_v16, %v7809_v15  ;;  %v5869_v16 = vadd.f32 %v11453_v59, %v865_v57  ;;  %v8486_v59 = vor.u32 %v10343_v7, %v8485_v5  ;;  %v10096_v25 = vld [vmem:[#allocation2 + $0x264] sm:$0xf]  ;;  %v7827_v27 = vld [vmem:[#allocation2 + $0x4f4] sm:$0xf0]  ;;  %v7833_v18 = vld [vmem:[#allocation2 + $0x268] sm:$0xf] }
 0x25f   :  { %6331 = vmatpush.bf16.msrb.mxu1 %v9794_v56  ;;  %10001 = vmatmul.msk.bf16.vlgmr.msra.gmra.mxu2 %vm4386_vm0, %v11372_v26  ;;  %v9815_v56 = vld [vmem:[#allocation2 + $0x1474] sm:$0xf0]  ;;  %v10179_v28 = vld [vmem:[#allocation2 + $0x4f8] sm:$0xf0]  ;;  %v10097_v20 = vld [vmem:[#allocation2 + $0x26c] sm:$0xf] }
 0x260   :  { %6344 = vmatpush.bf16.msrb.mxu2 %v9798_v13  ;;  %10002 = vmatmul.msk.bf16.vlgmr.msra.gmra.mxu3 %vm4386_vm0, %v11372_v26  ;;  %v864_v13 = vperm.slane %v11466_v54, 0  ;;  %v9818_v48 = vor.u32 %v10592_v33, %v9815_v56  ;;  %v7835_v6 = vld [vmem:[#allocation2 + $0x4fc] sm:$0xf0]  ;;  %v10593_v57 = vld [vmem:[#allocation2 + $0x11ec] sm:$0xf] }
 0x261   :  { %6357 = vmatpush.bf16.msrb.mxu3 %v9802_v42  ;;  %v866_v42 = vperm.slane %v11466_v54, 2  ;;  %v10262_v54 = vld [vmem:[#allocation2 + $0x794] sm:$0xf]  ;;  %v9831_v51 = vld [vmem:[#allocation2 + $0x1484] sm:$0xf0] }
 0x262   :  { %6319 = vmatpush.bf16.msrb.mxu0 %v9130_v55  ;;  %v5881_v58 = vpop.f32.mrf.mxu2  ;;  %v5857_v30 = vpop.f32.mrf.mxu0  ;;  %v5856_v15 = vadd.f32 %v11450_v37, %v864_v13  ;;  %v10594_v49 = vld [vmem:[#allocation2 + $0x11f4] sm:$0xf]  ;;  %v9163_v7 = vld [vmem:[#allocation2 + $0xf54] sm:$0xf0] }
 0x263   :  { %6332 = vmatpush.bf16.msrb.mxu1 %v9134_v61  ;;  %v5894_v29 = vpop.f32.mrf.mxu3  ;;  %v5870_v35 = vpop.f32.mrf.mxu1  ;;  %v5882_v61 = vadd.f32 %v5881_v58, %v866_v42  ;;  %v8495_v58 = vld [vmem:[#allocation2 + $0xa24] sm:$0xf0]  ;;  %v8494_v30 = vor.u32 %v10344_v36, %v8493_v19  ;;  %v10429_v19 = vld [vmem:[#allocation2 + $0xccc] sm:$0xf]  ;;  %v9171_v36 = vld [vmem:[#allocation2 + $0xf5c] sm:$0xf0] }
 0x264   :  { %6345 = vmatpush.bf16.msrb.mxu2 %v9138_v62  ;;  %v5895_v62 = vadd.f32 %v5894_v29, %v867_v43  ;;  %v6591_v35 = vpack.c.bf16 %v5869_v16, %v5856_v15  ;;  %v8498_v24 = vor.u32 %v10262_v54, %v8495_v58  ;;  %v10511_v15 = vld [vmem:[#allocation2 + $0xf58] sm:$0xf0] }
 0x265   :  { %6358 = vmatpush.bf16.msrb.mxu3 %v9142_v1  ;;  %v9146_v1 = vor.u32 %v10508_v52, %v9145_v50  ;;  %v7838_v50 = vor.u32 %v10097_v20, %v7835_v6  ;;  %v10346_v20 = vld [vmem:[#allocation2 + $0xa30] sm:$0xf0]  ;;  %v10180_v6 = vld [vmem:[#allocation2 + $0x500] sm:$0xf0] }
 0x266   :  { %6320 = vmatpush.bf16.msrb.mxu0 %v8470_v12  ;;  %v10261_v12 = vld [vmem:[#allocation2 + $0x78c] sm:$0xf]  ;;  %v6592_v37 = vpack.c.bf16 %v5895_v62, %v5882_v61  ;;  %v6799_v53 = vrot.slane %v6591_v35, 3  ;;  %v9834_v62 = vor.u32 %v10594_v49, %v9831_v51  ;;  %v9839_v49 = vld [vmem:[#allocation2 + $0x148c] sm:$0xf0] }
 0x267   :  { %6333 = vmatpush.bf16.msrb.mxu1 %v8474_v17  ;;  %v8490_v29 = vor.u32 %v10261_v12, %v8487_v60  ;;  %v9169_v12 = vld [vmem:[#allocation2 + $0xcc8] sm:$0xf]  ;;  %v9845_v51 = vld [vmem:[#allocation2 + $0x1200] sm:$0xf] }
 0x268   :  { %6346 = vmatpush.bf16.msrb.mxu2 %v8478_v8  ;;  %v6801_v42 = vrot.slane %v6592_v37, 1 }
 0x269   :  { %6359 = vmatpush.bf16.msrb.mxu3 %v8482_v21  ;;  %v7825_v21 = vld [vmem:[#allocation2 + $0x260] sm:$0xf] }
 0x26a   :  { %6321 = vmatpush.bf16.msrb.mxu0 %v7810_v22  ;;  %v5883_v11 = vpop.f32.mrf.mxu2  ;;  %v5907_v55 = vpop.f32.mrf.mxu0  ;;  %v7826_v13 = vor.u32 %v10178_v23, %v7825_v21  ;;  %v9170_v23 = vor.u32 %v10511_v15, %v9169_v12  ;;  %v10430_v12 = vld [vmem:[#allocation2 + $0xcd4] sm:$0xf]  ;;  %v9179_v15 = vld [vmem:[#allocation2 + $0xf64] sm:$0xf0] }
 0x26b   :  { %6334 = vmatpush.bf16.msrb.mxu1 %v7814_v31  ;;  %v5896_v38 = vpop.f32.mrf.mxu3  ;;  %v5920_v63 = vpop.f32.mrf.mxu1  ;;  %v5908_v17 = vadd.f32 %v5907_v55, %v868_v46  ;;  %v9821_v31 = vld [vmem:[#allocation2 + $0x11e8] sm:$0xf]  ;;  %v9829_v46 = vld [vmem:[#allocation2 + $0x11f0] sm:$0xf] }
 0x26c   :  { %6347 = vmatpush.bf16.msrb.mxu2 %v7818_v9  ;;  %v5921_v8 = vadd.f32 %v5920_v63, %v869_v47  ;;  %v10676_v47 = vld [vmem:[#allocation2 + $0x1480] sm:$0xf0]  ;;  %v9161_v63 = vld [vmem:[#allocation2 + $0xcc0] sm:$0xf] }
 0x26d   :  { %6360 = vmatpush.bf16.msrb.mxu3 %v7822_v40  ;;  %10003 = vmatmul.msk.bf16.vlgmr.msrb.gmra.mxu0 %vm4386_vm0, %v11372_v26  ;;  %v9823_v40 = vld [vmem:[#allocation2 + $0x147c] sm:$0xf0]  ;;  %v9830_v38 = vor.u32 %v10676_v47, %v9829_v46  ;;  %v9837_v46 = vld [vmem:[#allocation2 + $0x11f8] sm:$0xf]  ;;  %v10677_v47 = vld [vmem:[#allocation2 + $0x1488] sm:$0xf0] }
 0x26e   :  { %6370 = vmatpush.bf16.msra.mxu0 %v9806_v41  ;;  %10004 = vmatmul.msk.bf16.vlgmr.msrb.gmra.mxu1 %vm4386_vm0, %v11372_v26  ;;  %v6593_v22 = vpack.c.bf16 %v5921_v8, %v5908_v17  ;;  %v6800_v41 = vrot.slane %v6592_v37, 6  ;;  %v9826_v34 = vor.u32 %v10593_v57, %v9823_v40  ;;  %v8501_v37 = vld [vmem:[#allocation2 + $0x798] sm:$0xf] }
 0x26f   :  { %6383 = vmatpush.bf16.msra.mxu1 %v9810_v44  ;;  %10005 = vmatmul.msk.bf16.vlgmr.msrb.gmra.mxu2 %vm4386_vm0, %v11372_v26 }
 0x270   :  { %6396 = vmatpush.bf16.msra.mxu2 %v9814_v45  ;;  %10006 = vmatmul.msk.bf16.vlgmr.msrb.gmra.mxu3 %vm4386_vm0, %v11372_v26  ;;  %v10675_v26 = vld [vmem:[#allocation2 + $0x1478] sm:$0xf0]  ;;  %v7830_v45 = vor.u32 %v10096_v25, %v7827_v27  ;;  %v6802_v11 = vrot.slane %v6593_v22, 4  ;;  %v6803_v32 = vrot.slane %v6593_v22, 7  ;;  %v7068_v55 = vsel %vm6850_vm1, %v6800_v41, %v6801_v42  ;;  %v10345_v25 = vld [vmem:[#allocation2 + $0xa28] sm:$0xf0] }
 0x271   :  { %6409 = vmatpush.bf16.msra.mxu3 %v9818_v48  ;;  %v7834_v48 = vor.u32 %v10179_v28, %v7833_v18  ;;  %v9822_v52 = vor.u32 %v10675_v26, %v9821_v31  ;;  %v10263_v27 = vld [vmem:[#allocation2 + $0x79c] sm:$0xf]  ;;  %v8503_v18 = vld [vmem:[#allocation2 + $0xa2c] sm:$0xf0]  ;;  %v8509_v28 = vld [vmem:[#allocation2 + $0x7a0] sm:$0xf] }
 0x272   :  { %6371 = vmatpush.bf16.msra.mxu0 %v9146_v1  ;;  %v5933_v10 = vpop.f32.mrf.mxu2  ;;  %v5909_v56 = vpop.f32.mrf.mxu0  ;;  %v10428_v1 = vld [vmem:[#allocation2 + $0xcc4] sm:$0xf]  ;;  %v8511_v22 = vld [vmem:[#allocation2 + $0xa34] sm:$0xf0]  ;;  %v8506_v26 = vor.u32 %v10263_v27, %v8503_v18  ;;  %v10181_v41 = vld [vmem:[#allocation2 + $0x508] sm:$0xf0]  ;;  %v9182_v18 = vor.u32 %v10430_v12, %v9179_v15 }
 0x273   :  { %6384 = vmatpush.bf16.msra.mxu1 %v9150_v2  ;;  %v5934_v9 = vadd.f32 %v5933_v10, %v870_v39  ;;  %v5946_v33 = vpop.f32.mrf.mxu3  ;;  %v5922_v44 = vpop.f32.mrf.mxu1  ;;  %v7065_v2 = vsel %vm6846_vm2, %v6591_v35, %v6799_v53  ;;  %v10264_v35 = vld [vmem:[#allocation2 + $0x7a4] sm:$0xf]  ;;  %v8502_v10 = vor.u32 %v10345_v25, %v8501_v37  ;;  %v11513_v31 = vld [vmem:[#allocation4 + $0x78] sm:$0xff]  ;;  %v7843_v56 = vld [vmem:[#allocation2 + $0x504] sm:$0xf0] }
 0x274   :  { %6397 = vmatpush.bf16.msra.mxu2 %v9154_v3  ;;  %v5947_v43 = vadd.f32 %v5946_v33, %v871_v0  ;;  %v10510_v0 = vld [vmem:[#allocation2 + $0xf50] sm:$0xf0]  ;;  %v7072_v3 = vsel %vm6856_vm4, %v6802_v11, %v6803_v32  ;;  %v7069_v16 = vsel %vm6854_vm3, %v7065_v2, %v7068_v55  ;;  %v8514_v40 = vor.u32 %v10264_v35, %v8511_v22  ;;  %v10099_v42 = vld [vmem:[#allocation2 + $0x27c] sm:$0xf]  ;;  %v8517_v35 = vld [vmem:[#allocation2 + $0x7a8] sm:$0xf] }
 0x275   :  { %6410 = vmatpush.bf16.msra.mxu3 %v9158_v4  ;;  %v9162_v21 = vor.u32 %v10510_v0, %v9161_v63  ;;  %v10098_v33 = vld [vmem:[#allocation2 + $0x274] sm:$0xf]  ;;  %v873_v55 = vperm.slane %v11513_v31, 1  ;;  %v875_v63 = vperm.slane %v11513_v31, 3  ;;  %v876_v2 = vperm.slane %v11513_v31, 4 }
 0x276   :  { %6372 = vmatpush.bf16.msra.mxu0 %v8486_v59  ;;  %v6594_v14 = vpack.c.bf16 %v5947_v43, %v5934_v9  ;;  %v9166_v59 = vor.u32 %v10428_v1, %v9163_v7  ;;  %v8510_v9 = vor.u32 %v10346_v20, %v8509_v28  ;;  %v7851_v43 = vld [vmem:[#allocation2 + $0x50c] sm:$0xf0]  ;;  %v10678_v53 = vld [vmem:[#allocation2 + $0x1490] sm:$0xf0]  ;;  %v7846_v11 = vor.u32 %v10098_v33, %v7843_v56  ;;  %v10512_v7 = vld [vmem:[#allocation2 + $0xf60] sm:$0xf0] }
 0x277   :  { %6385 = vmatpush.bf16.msra.mxu1 %v8490_v29  ;;  %v11503_v29 = vld [vmem:[%s11598_s0] sm:$0x1]  ;;  %v9846_v1 = vor.u32 %v10678_v53, %v9845_v51  ;;  %v878_v37 = vperm.slane %v11513_v31, 6  ;;  %v879_v27 = vperm.slane %v11513_v31, 7  ;;  %v10347_v22 = vld [vmem:[#allocation2 + $0xa38] sm:$0xf0] }
 0x278   :  { %6398 = vmatpush.bf16.msra.mxu2 %v8494_v30  ;;  %v6804_v39 = vrot.slane %v6594_v14, 2  ;;  %v6805_v61 = vrot.slane %v6594_v14, 5  ;;  %v9174_v30 = vor.u32 %v10429_v19, %v9171_v36  ;;  %v10596_v14 = vld [vmem:[#allocation2 + $0x1204] sm:$0xf]  ;;  %v10431_v19 = vld [vmem:[#allocation2 + $0xcdc] sm:$0xf] }
 0x279   :  { %6411 = vmatpush.bf16.msra.mxu3 %v8498_v24  ;;  %v7841_v24 = vld [vmem:[#allocation2 + $0x270] sm:$0xf]  ;;  %v8519_v33 = vld [vmem:[#allocation2 + $0xa3c] sm:$0xf0] }
 0x27a   :  { %6373 = vmatpush.bf16.msra.mxu0 %v7826_v13  ;;  %v7075_v4 = vsel %vm6860_vm5, %v6804_v39, %v6805_v61  ;;  %v5935_v5 = vpop.f32.mrf.mxu2  ;;  %v11492_v60 = vpop.f32.mrf.mxu0  ;;  %v7849_v13 = vld [vmem:[#allocation2 + $0x278] sm:$0xf]  ;;  %v7854_v39 = vor.u32 %v10099_v42, %v7851_v43  ;;  %v9838_v61 = vor.u32 %v10677_v47, %v9837_v46  ;;  %v9187_v36 = vld [vmem:[#allocation2 + $0xf6c] sm:$0xf0]  ;;  %v10100_v42 = vld [vmem:[#allocation2 + $0x284] sm:$0xf] }
 0x27b   :  { %6386 = vmatpush.bf16.msra.mxu1 %v7830_v45  ;;  %v7076_v17 = vsel %vm6864_vm6, %v7072_v3, %v7075_v4  ;;  %v5948_v8 = vpop.f32.mrf.mxu3  ;;  %v11495_v58 = vpop.f32.mrf.mxu1  ;;  %v7850_v32 = vor.u32 %v10181_v41, %v7849_v13  ;;  %v877_v3 = vperm.slane %v11513_v31, 5  ;;  %v9177_v5 = vld [vmem:[#allocation2 + $0xcd0] sm:$0xf]  ;;  %v9190_v20 = vor.u32 %v10431_v19, %v9187_v36  ;;  %v10348_v13 = vld [vmem:[#allocation2 + $0xa40] sm:$0xf0] }
 0x27c   :  { %6399 = vmatpush.bf16.msra.mxu2 %v7834_v48  ;;  %v7077_v54 = vsel %vm6866_vm7, %v7069_v16, %v7076_v17  ;;  %v10595_v48 = vld [vmem:[#allocation2 + $0x11fc] sm:$0xf]  ;;  %v9185_v16 = vld [vmem:[#allocation2 + $0xcd8] sm:$0xf]  ;;  %v10513_v8 = vld [vmem:[#allocation2 + $0xf68] sm:$0xf0] }
 0x27d   :  { %6412 = vmatpush.bf16.msra.mxu3 %v7838_v50  ;;  %7202 = vst [vmem:[%s11601_s3 + $0x70] sm:$0xff] %v7077_v54  ;;  %10007 = vmatmul.msk.bf16.vlgmr.msra.gmra.mxu0 %vm4386_vm0, %v11503_v29  ;;  %v9842_v0 = vor.u32 %v10595_v48, %v9839_v49  ;;  %v9186_v28 = vor.u32 %v10513_v8, %v9185_v16  ;;  %v8525_v56 = vld [vmem:[#allocation2 + $0x7b0] sm:$0xf]  ;;  %v10182_v41 = vld [vmem:[#allocation2 + $0x510] sm:$0xf0] }
 0x27e   :  { %6422 = vmatpush.bf16.msrb.mxu0 %v9822_v52  ;;  %10008 = vmatmul.msk.bf16.vlgmr.msra.gmra.mxu1 %vm4386_vm0, %v11503_v29  ;;  %v7842_v52 = vor.u32 %v10180_v6, %v7841_v24  ;;  %v5973_v6 = vadd.f32 %v11495_v58, %v873_v55  ;;  %v8518_v58 = vor.u32 %v10347_v22, %v8517_v35  ;;  %v7859_v43 = vld [vmem:[#allocation2 + $0x514] sm:$0xf0]  ;;  %v7865_v46 = vld [vmem:[#allocation2 + $0x288] sm:$0xf]  ;;  %v10183_v47 = vld [vmem:[#allocation2 + $0x518] sm:$0xf0] }
 0x27f   :  { %6435 = vmatpush.bf16.msrb.mxu1 %v9826_v34  ;;  %10009 = vmatmul.msk.bf16.vlgmr.msra.gmra.mxu2 %vm4386_vm0, %v11503_v29  ;;  %v9847_v34 = vld [vmem:[#allocation2 + $0x1494] sm:$0xf0]  ;;  %v10101_v48 = vld [vmem:[#allocation2 + $0x28c] sm:$0xf]  ;;  %v7867_v53 = vld [vmem:[#allocation2 + $0x51c] sm:$0xf0] }
 0x280   :  { %6448 = vmatpush.bf16.msrb.mxu2 %v9830_v38  ;;  %10010 = vmatmul.msk.bf16.vlgmr.msra.gmra.mxu3 %vm4386_vm0, %v11503_v29  ;;  %v872_v38 = vperm.slane %v11513_v31, 0  ;;  %v9850_v4 = vor.u32 %v10596_v14, %v9847_v34  ;;  %v9193_v8 = vld [vmem:[#allocation2 + $0xce0] sm:$0xf]  ;;  %v10514_v19 = vld [vmem:[#allocation2 + $0xf70] sm:$0xf0] }
 0x281   :  { %6461 = vmatpush.bf16.msrb.mxu3 %v9834_v62  ;;  %v874_v62 = vperm.slane %v11513_v31, 2  ;;  %v10266_v31 = vld [vmem:[#allocation2 + $0x7b4] sm:$0xf]  ;;  %v10349_v35 = vld [vmem:[#allocation2 + $0xa48] sm:$0xf0] }
 0x282   :  { %6423 = vmatpush.bf16.msrb.mxu0 %v9162_v21  ;;  %v5985_v57 = vpop.f32.mrf.mxu2  ;;  %v5961_v45 = vpop.f32.mrf.mxu0  ;;  %v5960_v24 = vadd.f32 %v11492_v60, %v872_v38 }
 0x283   :  { %6436 = vmatpush.bf16.msrb.mxu1 %v9166_v59  ;;  %v5998_v44 = vpop.f32.mrf.mxu3  ;;  %v5974_v50 = vpop.f32.mrf.mxu1  ;;  %v5986_v59 = vadd.f32 %v5985_v57, %v874_v62  ;;  %v8527_v57 = vld [vmem:[#allocation2 + $0xa44] sm:$0xf0]  ;;  %v8526_v45 = vor.u32 %v10348_v13, %v8525_v56  ;;  %v726_v13 = vld [vmem:[#allocation4 + $0x80] sm:$0xff] }
 0x284   :  { %6449 = vmatpush.bf16.msrb.mxu2 %v9170_v23  ;;  %v5999_v23 = vadd.f32 %v5998_v44, %v875_v63  ;;  %v6595_v50 = vpack.c.bf16 %v5973_v6, %v5960_v24  ;;  %v8530_v51 = vor.u32 %v10266_v31, %v8527_v57  ;;  %v10184_v24 = vld [vmem:[#allocation2 + $0x520] sm:$0xf0]  ;;  %v882_v31 = vperm.slane %v726_v13, 2 }
 0x285   :  { %6462 = vmatpush.bf16.msrb.mxu3 %v9174_v30  ;;  %v9178_v30 = vor.u32 %v10512_v7, %v9177_v5  ;;  %v883_v57 = vperm.slane %v726_v13, 3 }
 0x286   :  { %6424 = vmatpush.bf16.msrb.mxu0 %v8502_v10  ;;  %v10265_v10 = vld [vmem:[#allocation2 + $0x7ac] sm:$0xf]  ;;  %v6596_v60 = vpack.c.bf16 %v5999_v23, %v5986_v59 }
 0x287   :  { %6437 = vmatpush.bf16.msrb.mxu1 %v8506_v26  ;;  %v8522_v44 = vor.u32 %v10265_v10, %v8519_v33  ;;  %v7873_v10 = vld [vmem:[#allocation2 + $0x290] sm:$0xf] }
 0x288   :  { %6450 = vmatpush.bf16.msrb.mxu2 %v8510_v9  ;;  %v7874_v56 = vor.u32 %v10184_v24, %v7873_v10 }
 0x289   :  { %6463 = vmatpush.bf16.msrb.mxu3 %v8514_v40  ;;  %v7857_v40 = vld [vmem:[#allocation2 + $0x280] sm:$0xf] }
 0x28a   :  { %6425 = vmatpush.bf16.msrb.mxu0 %v7842_v52  ;;  %v5987_v17 = vpop.f32.mrf.mxu2  ;;  %v6011_v21 = vpop.f32.mrf.mxu0  ;;  %v7858_v55 = vor.u32 %v10182_v41, %v7857_v40  ;;  %v880_v40 = vperm.slane %v726_v13, 0  ;;  %v884_v41 = vperm.slane %v726_v13, 4 }
 0x28b   :  { %6438 = vmatpush.bf16.msrb.mxu1 %v7846_v11  ;;  %v6000_v54 = vpop.f32.mrf.mxu3  ;;  %v6024_v25 = vpop.f32.mrf.mxu1  ;;  %v6012_v26 = vadd.f32 %v6011_v21, %v876_v2  ;;  %v9853_v11 = vld [vmem:[#allocation2 + $0x1208] sm:$0xf]  ;;  %v7870_v2 = vor.u32 %v10101_v48, %v7867_v53 }
 0x28c   :  { %6451 = vmatpush.bf16.msrb.mxu2 %v7850_v32  ;;  %v6025_v9 = vadd.f32 %v6024_v25, %v877_v3  ;;  %v10679_v32 = vld [vmem:[#allocation2 + $0x1498] sm:$0xf0] }
 0x28d   :  { %6464 = vmatpush.bf16.msrb.mxu3 %v7854_v39  ;;  %10011 = vmatmul.msk.bf16.vlgmr.msrb.gmra.mxu0 %vm4386_vm0, %v11503_v29  ;;  %v6807_v39 = vrot.slane %v6596_v60, 6  ;;  %v9854_v3 = vor.u32 %v10679_v32, %v9853_v11  ;;  %v887_v11 = vperm.slane %v726_v13, 7 }
 0x28e   :  { %6474 = vmatpush.bf16.msra.mxu0 %v9838_v61  ;;  %10012 = vmatmul.msk.bf16.vlgmr.msrb.gmra.mxu1 %vm4386_vm0, %v11503_v29  ;;  %v6597_v52 = vpack.c.bf16 %v6025_v9, %v6012_v26  ;;  %v6808_v61 = vrot.slane %v6596_v60, 1  ;;  %v881_v60 = vperm.slane %v726_v13, 1 }
 0x28f   :  { %6487 = vmatpush.bf16.msra.mxu1 %v9842_v0  ;;  %10013 = vmatmul.msk.bf16.vlgmr.msrb.gmra.mxu2 %vm4386_vm0, %v11503_v29  ;;  %v7862_v0 = vor.u32 %v10100_v42, %v7859_v43  ;;  %v885_v42 = vperm.slane %v726_v13, 5 }
 0x290   :  { %6500 = vmatpush.bf16.msra.mxu2 %v9846_v1  ;;  %10014 = vmatmul.msk.bf16.vlgmr.msrb.gmra.mxu3 %vm4386_vm0, %v11503_v29  ;;  %v7866_v1 = vor.u32 %v10183_v47, %v7865_v46  ;;  %v6809_v5 = vrot.slane %v6597_v52, 4  ;;  %v6810_v7 = vrot.slane %v6597_v52, 7  ;;  %v7083_v15 = vsel %vm6850_vm1, %v6807_v39, %v6808_v61 }
 0x291   :  { %6513 = vmatpush.bf16.msra.mxu3 %v9850_v4  ;;  %v6806_v4 = vrot.slane %v6595_v50, 3 }
 0x292   :  { %6475 = vmatpush.bf16.msra.mxu0 %v9178_v30  ;;  %v6037_v49 = vpop.f32.mrf.mxu2  ;;  %v6013_v38 = vpop.f32.mrf.mxu0  ;;  %v7087_v54 = vsel %vm6856_vm4, %v6809_v5, %v6810_v7 }
 0x293   :  { %6488 = vmatpush.bf16.msra.mxu1 %v9182_v18  ;;  %v6038_v14 = vadd.f32 %v6037_v49, %v878_v37  ;;  %v6050_v34 = vpop.f32.mrf.mxu3  ;;  %v6026_v63 = vpop.f32.mrf.mxu1  ;;  %v7080_v36 = vsel %vm6846_vm2, %v6595_v50, %v6806_v4 }
 0x294   :  { %6501 = vmatpush.bf16.msra.mxu2 %v9186_v28  ;;  %v6051_v62 = vadd.f32 %v6050_v34, %v879_v27  ;;  %v7084_v59 = vsel %vm6854_vm3, %v7080_v36, %v7083_v15  ;;  %v9194_v28 = vor.u32 %v10514_v19, %v9193_v8 }
 0x295   :  { %6514 = vmatpush.bf16.msra.mxu3 %v9190_v20  ;;  %v8533_v20 = vld [vmem:[#allocation2 + $0x7b8] sm:$0xf] }
 0x296   :  { %6476 = vmatpush.bf16.msra.mxu0 %v8518_v58  ;;  %v6598_v12 = vpack.c.bf16 %v6051_v62, %v6038_v14  ;;  %v8534_v22 = vor.u32 %v10349_v35, %v8533_v20 }
 0x297   :  { %6489 = vmatpush.bf16.msra.mxu1 %v8522_v44 }
 0x298   :  { %6502 = vmatpush.bf16.msra.mxu2 %v8526_v45  ;;  %v6811_v16 = vrot.slane %v6598_v12, 2  ;;  %v6812_v17 = vrot.slane %v6598_v12, 5 }
 0x299   :  { %6515 = vmatpush.bf16.msra.mxu3 %v8530_v51  ;;  %v886_v51 = vperm.slane %v726_v13, 6 }
 0x29a   :  { %6477 = vmatpush.bf16.msra.mxu0 %v7858_v55  ;;  %v7090_v21 = vsel %vm6860_vm5, %v6811_v16, %v6812_v17  ;;  %v6039_v37 = vpop.f32.mrf.mxu2  ;;  %v6063_v27 = vpop.f32.mrf.mxu0 }
 0x29b   :  { %6490 = vmatpush.bf16.msra.mxu1 %v7862_v0  ;;  %v7091_v23 = vsel %vm6864_vm6, %v7087_v54, %v7090_v21  ;;  %v6052_v25 = vpop.f32.mrf.mxu3  ;;  %v6076_v18 = vpop.f32.mrf.mxu1  ;;  %v6064_v48 = vadd.f32 %v6063_v27, %v880_v40 }
 0x29c   :  { %6503 = vmatpush.bf16.msra.mxu2 %v7866_v1  ;;  %v7092_v30 = vsel %vm6866_vm7, %v7084_v59, %v7091_v23  ;;  %v6077_v50 = vadd.f32 %v6076_v18, %v881_v60 }
 0x29d   :  { %6516 = vmatpush.bf16.msra.mxu3 %v7870_v2  ;;  %7203 = vst [vmem:[%s11601_s3 + $0x78] sm:$0xff] %v7092_v30  ;;  %10015 = vmatmul.msk.bf16.vlgmr.msra.gmra.mxu0 %vm4386_vm0, %v11503_v29  ;;  %v727_v30 = vld [vmem:[#allocation4 + $0x88] sm:$0xff] }
 0x29e   :  { %6526 = vmatpush.bf16.msrb.mxu0 %v9854_v3  ;;  %10016 = vmatmul.msk.bf16.vlgmr.msra.gmra.mxu1 %vm4386_vm0, %v11503_v29  ;;  %v6599_v32 = vpack.c.bf16 %v6077_v50, %v6064_v48  ;;  %v890_v18 = vperm.slane %v727_v30, 2  ;;  %v888_v20 = vperm.slane %v727_v30, 0  ;;  %v889_v35 = vperm.slane %v727_v30, 1 }
 0x29f   :  { %10017 = vmatmul.msk.bf16.vlgmr.msra.gmra.mxu2 %vm4386_vm0, %v11503_v29  ;;  %v892_v10 = vperm.slane %v727_v30, 4  ;;  %v893_v24 = vperm.slane %v727_v30, 5  ;;  %v894_v60 = vperm.slane %v727_v30, 6 }
 0x2a0   :  { %10018 = vmatmul.msk.bf16.vlgmr.msra.gmra.mxu3 %vm4386_vm0, %v11503_v29  ;;  %v6813_v1 = vrot.slane %v6599_v32, 3 }
 0x2a2   :  { %6527 = vmatpush.bf16.msrb.mxu0 %v9194_v28  ;;  %v6089_v6 = vpop.f32.mrf.mxu2  ;;  %v6065_v9 = vpop.f32.mrf.mxu0  ;;  %v7095_v12 = vsel %vm6846_vm2, %v6599_v32, %v6813_v1  ;;  %v891_v28 = vperm.slane %v727_v30, 3 }
 0x2a3   :  { %v6102_v26 = vpop.f32.mrf.mxu3  ;;  %v6078_v33 = vpop.f32.mrf.mxu1  ;;  %v6090_v45 = vadd.f32 %v6089_v6, %v882_v31 }
 0x2a4   :  { %v6103_v46 = vadd.f32 %v6102_v26, %v883_v57 }
 0x2a6   :  { %6528 = vmatpush.bf16.msrb.mxu0 %v8534_v22  ;;  %v6600_v53 = vpack.c.bf16 %v6103_v46, %v6090_v45 }
 0x2a8   :  { %v6814_v61 = vrot.slane %v6600_v53, 6  ;;  %v6815_v62 = vrot.slane %v6600_v53, 1 }
 0x2aa   :  { %6529 = vmatpush.bf16.msrb.mxu0 %v7874_v56  ;;  %v6091_v58 = vpop.f32.mrf.mxu2  ;;  %v6115_v44 = vpop.f32.mrf.mxu0  ;;  %v7098_v5 = vsel %vm6850_vm1, %v6814_v61, %v6815_v62 }
 0x2ab   :  { %v6104_v43 = vpop.f32.mrf.mxu3  ;;  %v6128_v47 = vpop.f32.mrf.mxu1  ;;  %v6116_v52 = vadd.f32 %v6115_v44, %v884_v41  ;;  %v7099_v8 = vsel %vm6854_vm3, %v7095_v12, %v7098_v5  ;;  %v895_v41 = vperm.slane %v727_v30, 7 }
 0x2ac   :  { %v6129_v49 = vadd.f32 %v6128_v47, %v885_v42 }
 0x2ad   :  { %10019 = vmatmul.msk.bf16.vlgmr.msrb.gmra.mxu0 %vm4386_vm0, %v11503_v29 }
 0x2ae   :  { %v6601_v14 = vpack.c.bf16 %v6129_v49, %v6116_v52 }
 0x2b0   :  { %v6816_v2 = vrot.slane %v6601_v14, 4  ;;  %v6817_v3 = vrot.slane %v6601_v14, 7 }
 0x2b2   :  { %v6141_v34 = vpop.f32.mrf.mxu2  ;;  %v6117_v39 = vpop.f32.mrf.mxu0  ;;  %v7102_v15 = vsel %vm6856_vm4, %v6816_v2, %v6817_v3 }
 0x2b3   :  { %v6142_v38 = vadd.f32 %v6141_v34, %v886_v51  ;;  %v6154_v55 = vpop.f32.mrf.mxu3  ;;  %v6130_v0 = vpop.f32.mrf.mxu1 }
 0x2b4   :  { %v6155_v63 = vadd.f32 %v6154_v55, %v887_v11 }
 0x2b6   :  { %v6602_v4 = vpack.c.bf16 %v6155_v63, %v6142_v38 }
 0x2b8   :  { %v6818_v29 = vrot.slane %v6602_v4, 2  ;;  %v6819_v7 = vrot.slane %v6602_v4, 5 }
 0x2ba   :  { %v7105_v16 = vsel %vm6860_vm5, %v6818_v29, %v6819_v7  ;;  %v6143_v17 = vpop.f32.mrf.mxu2  ;;  %v6167_v54 = vpop.f32.mrf.mxu0 }
 0x2bb   :  { %v7106_v19 = vsel %vm6864_vm6, %v7102_v15, %v7105_v16  ;;  %v6156_v36 = vpop.f32.mrf.mxu3  ;;  %v6180_v37 = vpop.f32.mrf.mxu1  ;;  %v6168_v13 = vadd.f32 %v6167_v54, %v888_v20  ;;  %v728_v15 = vld [vmem:[#allocation4 + $0x90] sm:$0xff] }
 0x2bc   :  { %v7107_v21 = vsel %vm6866_vm7, %v7099_v8, %v7106_v19  ;;  %v6181_v31 = vadd.f32 %v6180_v37, %v889_v35  ;;  %v898_v16 = vperm.slane %v728_v15, 2  ;;  %v899_v17 = vperm.slane %v728_v15, 3 }
 0x2bd   :  { %7204 = vst [vmem:[%s11601_s3 + $0x80] sm:$0xff] %v7107_v21  ;;  %v896_v8 = vperm.slane %v728_v15, 0  ;;  %v897_v19 = vperm.slane %v728_v15, 1  ;;  %v900_v54 = vperm.slane %v728_v15, 4  ;;  %v901_v21 = vperm.slane %v728_v15, 5 }
 0x2be   :  { %v6603_v42 = vpack.c.bf16 %v6181_v31, %v6168_v13  ;;  %v902_v35 = vperm.slane %v728_v15, 6 }
 0x2c0   :  { %v6820_v51 = vrot.slane %v6603_v42, 3 }
 0x2c2   :  { %v6193_v59 = vpop.f32.mrf.mxu2  ;;  %v6169_v25 = vpop.f32.mrf.mxu0  ;;  %v7110_v55 = vsel %vm6846_vm2, %v6603_v42, %v6820_v51 }
 0x2c3   :  { %v6206_v23 = vpop.f32.mrf.mxu3  ;;  %v6182_v27 = vpop.f32.mrf.mxu1  ;;  %v6194_v9 = vadd.f32 %v6193_v59, %v890_v18 }
 0x2c4   :  { %v6207_v33 = vadd.f32 %v6206_v23, %v891_v28 }
 0x2c6   :  { %v6604_v58 = vpack.c.bf16 %v6207_v33, %v6194_v9 }
 0x2c8   :  { %v6821_v48 = vrot.slane %v6604_v58, 6  ;;  %v6822_v50 = vrot.slane %v6604_v58, 1 }
 0x2ca   :  { %v6195_v22 = vpop.f32.mrf.mxu2  ;;  %v6219_v26 = vpop.f32.mrf.mxu0  ;;  %v7113_v14 = vsel %vm6850_vm1, %v6821_v48, %v6822_v50 }
 0x2cb   :  { %v6208_v6 = vpop.f32.mrf.mxu3  ;;  %v6232_v56 = vpop.f32.mrf.mxu1  ;;  %v6220_v57 = vadd.f32 %v6219_v26, %v892_v10  ;;  %v7114_v63 = vsel %vm6854_vm3, %v7110_v55, %v7113_v14  ;;  %v903_v10 = vperm.slane %v728_v15, 7 }
 0x2cc   :  { %v6233_v40 = vadd.f32 %v6232_v56, %v893_v24 }
 0x2ce   :  { %v6605_v43 = vpack.c.bf16 %v6233_v40, %v6220_v57 }
 0x2d0   :  { %v6823_v53 = vrot.slane %v6605_v43, 4  ;;  %v6824_v11 = vrot.slane %v6605_v43, 7 }
 0x2d2   :  { %v6245_v44 = vpop.f32.mrf.mxu2  ;;  %v6221_v47 = vpop.f32.mrf.mxu0  ;;  %v7117_v39 = vsel %vm6856_vm4, %v6823_v53, %v6824_v11 }
 0x2d3   :  { %v6246_v45 = vadd.f32 %v6245_v44, %v894_v60  ;;  %v6258_v46 = vpop.f32.mrf.mxu3  ;;  %v6234_v49 = vpop.f32.mrf.mxu1 }
 0x2d4   :  { %v6259_v52 = vadd.f32 %v6258_v46, %v895_v41 }
 0x2d6   :  { %v6606_v32 = vpack.c.bf16 %v6259_v52, %v6246_v45 }
 0x2d8   :  { %v6825_v34 = vrot.slane %v6606_v32, 2  ;;  %v6826_v38 = vrot.slane %v6606_v32, 5 }
 0x2da   :  { %v7120_v61 = vsel %vm6860_vm5, %v6825_v34, %v6826_v38  ;;  %v6247_v62 = vpop.f32.mrf.mxu2  ;;  %v6271_v2 = vpop.f32.mrf.mxu0 }
 0x2db   :  { %v7121_v0 = vsel %vm6864_vm6, %v7117_v39, %v7120_v61  ;;  %v6260_v1 = vpop.f32.mrf.mxu3  ;;  %v6284_v4 = vpop.f32.mrf.mxu1  ;;  %v6272_v30 = vadd.f32 %v6271_v2, %v896_v8  ;;  %v729_v39 = vld [vmem:[#allocation4 + $0x98] sm:$0xff] }
 0x2dc   :  { %v7122_v3 = vsel %vm6866_vm7, %v7114_v63, %v7121_v0  ;;  %v6285_v18 = vadd.f32 %v6284_v4, %v897_v19  ;;  %v906_v61 = vperm.slane %v729_v39, 2  ;;  %v907_v62 = vperm.slane %v729_v39, 3 }
 0x2dd   :  { %7205 = vst [vmem:[%s11601_s3 + $0x88] sm:$0xff] %v7122_v3  ;;  %v904_v63 = vperm.slane %v729_v39, 0  ;;  %v905_v0 = vperm.slane %v729_v39, 1  ;;  %v908_v2 = vperm.slane %v729_v39, 4  ;;  %v909_v3 = vperm.slane %v729_v39, 5 }
 0x2de   :  { %v6607_v24 = vpack.c.bf16 %v6285_v18, %v6272_v30  ;;  %v910_v19 = vperm.slane %v729_v39, 6 }
 0x2e0   :  { %v6827_v60 = vrot.slane %v6607_v24, 3 }
 0x2e2   :  { %v6297_v5 = vpop.f32.mrf.mxu2  ;;  %v6273_v7 = vpop.f32.mrf.mxu0  ;;  %v7125_v46 = vsel %vm6846_vm2, %v6607_v24, %v6827_v60 }
 0x2e3   :  { %v6310_v29 = vpop.f32.mrf.mxu3  ;;  %v6286_v12 = vpop.f32.mrf.mxu1  ;;  %v6298_v23 = vadd.f32 %v6297_v5, %v898_v16 }
 0x2e4   :  { %v6311_v25 = vadd.f32 %v6310_v29, %v899_v17 }
 0x2e6   :  { %v6608_v22 = vpack.c.bf16 %v6311_v25, %v6298_v23 }
 0x2e8   :  { %v6828_v13 = vrot.slane %v6608_v22, 6  ;;  %v6829_v31 = vrot.slane %v6608_v22, 1 }
 0x2ea   :  { %v6299_v36 = vpop.f32.mrf.mxu2  ;;  %v6323_v59 = vpop.f32.mrf.mxu0  ;;  %v7128_v43 = vsel %vm6850_vm1, %v6828_v13, %v6829_v31 }
 0x2eb   :  { %v6312_v37 = vpop.f32.mrf.mxu3  ;;  %v6336_v27 = vpop.f32.mrf.mxu1  ;;  %v6324_v28 = vadd.f32 %v6323_v59, %v900_v54  ;;  %v7129_v52 = vsel %vm6854_vm3, %v7125_v46, %v7128_v43  ;;  %v911_v54 = vperm.slane %v729_v39, 7  ;;  %v730_v43 = vld [vmem:[#allocation4 + $0xa0] sm:$0x1f] }
 0x2ec   :  { %v6337_v20 = vadd.f32 %v6336_v27, %v901_v21 }
 0x2ee   :  { %v6609_v6 = vpack.c.bf16 %v6337_v20, %v6324_v28 }
 0x2f0   :  { %v6830_v58 = vrot.slane %v6609_v6, 4  ;;  %v6831_v41 = vrot.slane %v6609_v6, 7 }
 0x2f2   :  { %v6349_v26 = vpop.f32.mrf.mxu2  ;;  %v6325_v56 = vpop.f32.mrf.mxu0  ;;  %v7132_v47 = vsel %vm6856_vm4, %v6830_v58, %v6831_v41 }
 0x2f3   :  { %v6350_v9 = vadd.f32 %v6349_v26, %v902_v35  ;;  %v6362_v33 = vpop.f32.mrf.mxu3  ;;  %v6338_v40 = vpop.f32.mrf.mxu1 }
 0x2f4   :  { %v6363_v57 = vadd.f32 %v6362_v33, %v903_v10 }
 0x2f6   :  { %v6610_v42 = vpack.c.bf16 %v6363_v57, %v6350_v9 }
 0x2f8   :  { %v6832_v44 = vrot.slane %v6610_v42, 2  ;;  %v6833_v45 = vrot.slane %v6610_v42, 5 }
 0x2fa   :  { %v7135_v48 = vsel %vm6860_vm5, %v6832_v44, %v6833_v45  ;;  %v6351_v50 = vpop.f32.mrf.mxu2  ;;  %v6375_v53 = vpop.f32.mrf.mxu0  ;;  %v912_v44 = vperm.slane %v730_v43, 0  ;;  %v913_v45 = vperm.slane %v730_v43, 1 }
 0x2fb   :  { %v7136_v49 = vsel %vm6864_vm6, %v7132_v47, %v7135_v48  ;;  %v6364_v51 = vpop.f32.mrf.mxu3  ;;  %v6388_v32 = vpop.f32.mrf.mxu1  ;;  %v6376_v15 = vadd.f32 %v6375_v53, %v904_v63  ;;  %v914_v47 = vperm.slane %v730_v43, 2  ;;  %v915_v48 = vperm.slane %v730_v43, 3 }
 0x2fc   :  { %v7137_v11 = vsel %vm6866_vm7, %v7129_v52, %v7136_v49  ;;  %v6389_v16 = vadd.f32 %v6388_v32, %v905_v0 }
 0x2fd   :  { %7206 = vst [vmem:[%s11601_s3 + $0x90] sm:$0xff] %v7137_v11 }
 0x2fe   :  { %v6611_v21 = vpack.c.bf16 %v6389_v16, %v6376_v15 }
 0x300   :  { %v6834_v35 = vrot.slane %v6611_v21, 3 }
 0x302   :  { %v6401_v14 = vpop.f32.mrf.mxu2  ;;  %v6377_v38 = vpop.f32.mrf.mxu0  ;;  %v7140_v33 = vsel %vm6846_vm2, %v6611_v21, %v6834_v35 }
 0x303   :  { %v6414_v34 = vpop.f32.mrf.mxu3  ;;  %v6390_v55 = vpop.f32.mrf.mxu1  ;;  %v6402_v29 = vadd.f32 %v6401_v14, %v906_v61  ;;  %v916_v14 = vperm.slane %v730_v43, 4 }
 0x304   :  { %v6415_v7 = vadd.f32 %v6414_v34, %v907_v62 }
 0x306   :  { %v6612_v36 = vpack.c.bf16 %v6415_v7, %v6402_v29 }
 0x308   :  { %v6835_v30 = vrot.slane %v6612_v36, 6  ;;  %v6836_v18 = vrot.slane %v6612_v36, 1 }
 0x30a   :  { %v6403_v1 = vpop.f32.mrf.mxu2  ;;  %v6427_v5 = vpop.f32.mrf.mxu0  ;;  %v7143_v6 = vsel %vm6850_vm1, %v6835_v30, %v6836_v18 }
 0x30b   :  { %v6416_v4 = vpop.f32.mrf.mxu3  ;;  %v6440_v12 = vpop.f32.mrf.mxu1  ;;  %v6428_v17 = vadd.f32 %v6427_v5, %v908_v2  ;;  %v7144_v57 = vsel %vm6854_vm3, %v7140_v33, %v7143_v6 }
 0x30c   :  { %v6441_v8 = vadd.f32 %v6440_v12, %v909_v3 }
 0x30e   :  { %v6613_v37 = vpack.c.bf16 %v6441_v8, %v6428_v17 }
 0x310   :  { %v6837_v22 = vrot.slane %v6613_v37, 4  ;;  %v6838_v10 = vrot.slane %v6613_v37, 7 }
 0x312   :  { %v6453_v59 = vpop.f32.mrf.mxu2  ;;  %v6429_v27 = vpop.f32.mrf.mxu0  ;;  %v7147_v56 = vsel %vm6856_vm4, %v6837_v22, %v6838_v10 }
 0x313   :  { %v6454_v23 = vadd.f32 %v6453_v59, %v910_v19  ;;  %v6466_v25 = vpop.f32.mrf.mxu3  ;;  %v6442_v20 = vpop.f32.mrf.mxu1 }
 0x314   :  { %v6467_v28 = vadd.f32 %v6466_v25, %v911_v54 }
 0x316   :  { %v6614_v24 = vpack.c.bf16 %v6467_v28, %v6454_v23 }
 0x318   :  { %v6839_v26 = vrot.slane %v6614_v24, 2  ;;  %v6840_v9 = vrot.slane %v6614_v24, 5 }
 0x31a   :  { %v7150_v13 = vsel %vm6860_vm5, %v6839_v26, %v6840_v9  ;;  %v6455_v31 = vpop.f32.mrf.mxu2  ;;  %v6479_v58 = vpop.f32.mrf.mxu0 }
 0x31b   :  { %v7151_v40 = vsel %vm6864_vm6, %v7147_v56, %v7150_v13  ;;  %v6468_v60 = vpop.f32.mrf.mxu3  ;;  %v6492_v42 = vpop.f32.mrf.mxu1  ;;  %v6480_v51 = vadd.f32 %v6479_v58, %v912_v44 }
 0x31c   :  { %v7152_v41 = vsel %vm6866_vm7, %v7144_v57, %v7151_v40  ;;  %v6493_v53 = vadd.f32 %v6492_v42, %v913_v45 }
 0x31d   :  { %7207 = vst [vmem:[%s11601_s3 + $0x98] sm:$0xff] %v7152_v41 }
 0x31e   :  { %v6615_v34 = vpack.c.bf16 %v6493_v53, %v6480_v51 }
 0x320   :  { %v6841_v63 = vrot.slane %v6615_v34, 3 }
 0x322   :  { %v6505_v46 = vpop.f32.mrf.mxu2  ;;  %v6481_v52 = vpop.f32.mrf.mxu0  ;;  %v7155_v5 = vsel %vm6846_vm2, %v6615_v34, %v6841_v63 }
 0x323   :  { %v6518_v50 = vpop.f32.mrf.mxu3  ;;  %v6494_v49 = vpop.f32.mrf.mxu1  ;;  %v6506_v11 = vadd.f32 %v6505_v46, %v914_v47 }
 0x324   :  { %v6519_v32 = vadd.f32 %v6518_v50, %v915_v48 }
 0x326   :  { %v6616_v55 = vpack.c.bf16 %v6519_v32, %v6506_v11 }
 0x328   :  { %v6843_v0 = vrot.slane %v6616_v55, 1  ;;  %v6842_v2 = vrot.slane %v6616_v55, 6 }
 0x32a   :  { %v6507_v38 = vpop.f32.mrf.mxu2  ;;  %v6531_v61 = vpop.f32.mrf.mxu0  ;;  %v7157_v7 = vsel %vm6854_vm3, %v7155_v5, %v6842_v2 }
 0x32b   :  { %v6520_v39 = vpop.f32.mrf.mxu3  ;;  %v6532_v62 = vadd.f32 %v6531_v61, %v916_v14 }
 0x32d   :  { %v6617_v1 = vpack.c.bf16 %v6532_v62, %v6532_v62 }
 0x32f   :  { %v6844_v3 = vrot.slane %v6617_v1, 4  ;;  %v6845_v4 = vrot.slane %v6617_v1, 7 }
 0x331   :  { %v7161_v29 = vsel %vm7158_vm8, %v6843_v0, %v6844_v3 }
 0x332   :  { %v7164_v12 = vsel %vm7162_vm9, %v7161_v29, %v6845_v4  ;;  %v6533_v15 = vpop.f32.mrf.mxu0 }
 0x333   :  { %v7166_v16 = vsel %vm7165_vm10, %v7157_v7, %v7164_v12 }
 0x334   :  { %7208 = vst [vmem:[%s11601_s3 + $0xa0] sm:$0x1f] %v7166_v16 }
 0x335   :  { %7213 = vsyncpa [#allocation3], 1 }
 0x336   :  { %7214 = vsyncpa [#allocation5], 1 }

</bundles_post_ra>
